<compile_context>
chip_gen: v7x
topology: tpu7x:2x2x1
jax: 0.10.0
libtpu: 0.0.40
codegen_flags: <defaults>
</compile_context>

<pallas_src>
import jax
import jax.numpy as jnp
from jax.experimental import pallas as pl
from jax.experimental.pallas import tpu as pltpu

IN_DIM = 3 * 32 * 32   # 3072
H1, H2, H3 = 1024, 512, 256
OUT_DIM = 10
OUT_PAD = 128          # lane-dense padded logits width


def _round_up(x, m):
    return ((x + m - 1) // m) * m


def mlp_kernel(x_ref,
               w1_ref, b1_ref,
               w2_ref, b2_ref,
               w3_ref, b3_ref,
               w4_ref, b4_ref,
               o_ref):
    # Fused forward for one batch tile. f32 x tile is cast to bf16 here (VPU
    # filler hidden under MXU work) instead of a separate XLA pass in HBM.
    x = x_ref[...].astype(jnp.bfloat16)

    h = jnp.dot(x, w1_ref[...], preferred_element_type=jnp.float32)
    h = jnp.maximum(h + b1_ref[...], 0.0).astype(jnp.bfloat16)

    h = jnp.dot(h, w2_ref[...], preferred_element_type=jnp.float32)
    h = jnp.maximum(h + b2_ref[...], 0.0).astype(jnp.bfloat16)

    h = jnp.dot(h, w3_ref[...], preferred_element_type=jnp.float32)
    h = jnp.maximum(h + b3_ref[...], 0.0).astype(jnp.bfloat16)

    h = jnp.dot(h, w4_ref[...], preferred_element_type=jnp.float32)
    o_ref[...] = (h + b4_ref[...]).astype(o_ref.dtype)


def prepare_params(params):
    """One-time weight prep (hoisted out of the per-call path):
    PyTorch (out, in) -> (in, out), cast to bf16, pad layer-4 output 10 -> 128.
    Biases stay f32 (tiny) as (1, out) rows."""
    (w1, b1), (w2, b2), (w3, b3), (w4, b4) = params

    def prep(w, b):
        return w.T.astype(jnp.bfloat16), b.reshape(1, -1).astype(jnp.float32)

    pw1, pb1 = prep(w1, b1)
    pw2, pb2 = prep(w2, b2)
    pw3, pb3 = prep(w3, b3)

    pw4 = jnp.zeros((H3, OUT_PAD), jnp.bfloat16).at[:, :OUT_DIM].set(
        w4.T.astype(jnp.bfloat16))
    pb4 = jnp.zeros((1, OUT_PAD), jnp.float32).at[:, :OUT_DIM].set(
        b4.reshape(1, -1).astype(jnp.float32))
    return (pw1, pb1, pw2, pb2, pw3, pb3, pw4, pb4)


def _vmem_capacity_bytes():
    try:
        return int(pltpu.get_tpu_info().vmem_capacity_bytes)
    except Exception:
        return 64 << 20  # conservative (v7x per-TC)


def _pick_batch_tile(B, batch_tile, cap_bytes):
    # Bigger tiles on 128 MiB VMEM parts (v5e/v6e); 512 on 64 MiB parts (v7x).
    max_tile = 1024 if cap_bytes >= (128 << 20) else 512
    bt = max(8, min(_round_up(int(batch_tile), 8), max_tile))  # (8,128) sublane rule
    b8 = _round_up(B, 8)
    tb = min(bt, b8)
    # Ensure >= 2 grid steps for large batches so the "parallel" grid axis can
    # shard across both TensorCores on v7x (one extra ~0.35us step on 1-TC chips).
    if b8 >= 256 and pl.cdiv(B, tb) < 2:
        tb = _round_up(pl.cdiv(b8, 2), 8)
    return tb


def _vmem_limit_bytes(tb, cap_bytes):
    # Explicit working-set budget (weights single-buffered, x/out double-buffered).
    w_bytes = (IN_DIM * H1 + H1 * H2 + H2 * H3 + H3 * OUT_PAD) * 2   # bf16, x1
    b_bytes = (H1 + H2 + H3 + OUT_PAD) * 4                            # f32 biases
    x_bytes = 2 * tb * IN_DIM * 4                                     # f32 x, dbuf
    o_bytes = 2 * tb * OUT_PAD * 4                                    # f32 out, dbuf
    act_bytes = tb * (H1 + H2 + H3 + OUT_PAD) * (4 + 2)               # f32 acc + bf16
    budget = w_bytes + b_bytes + x_bytes + o_bytes + act_bytes
    budget = (budget * 5) // 4 + (8 << 20)        # headroom for Mosaic scratch
    if cap_bytes >= (128 << 20):
        hard_cap = 96 << 20                       # v5e / v6e
    else:
        hard_cap = min(48 << 20, (cap_bytes * 3) // 4)   # v7x: 48 of 64 MiB
    return max(32 << 20, min(budget, hard_cap))


def _resident_spec(shape):
    """Weights/biases: constant index_map -> resident across the grid.
    Single-buffer them (the second pipeline buffer would be pure waste)."""
    index_map = lambda i: (0, 0)
    try:
        return pl.BlockSpec(shape, index_map, pipeline_mode=pl.Buffered(1))
    except Exception:
        return pl.BlockSpec(shape, index_map)


def linear_net_forward(x, prepared, *, batch_tile=512):
    """x: (B, 3, 32, 32) float32 NCHW. Returns (B, 10) float32 logits."""
    B = x.shape[0]
    x_flat = x.reshape(B, IN_DIM)        # flatten only; stays f32 (cast in-kernel)

    cap = _vmem_capacity_bytes()
    tb = _pick_batch_tile(B, batch_tile, cap)
    nb = pl.cdiv(B, tb)                  # partial last tile masked by Pallas; no jnp.pad

    (w1, b1, w2, b2, w3, b3, w4, b4) = prepared
    args = (x_flat, w1, b1, w2, b2, w3, b3, w4, b4)

    in_specs = [
        pl.BlockSpec((tb, IN_DIM), lambda i: (i, 0)),   # x: tiled over batch
        _resident_spec((IN_DIM, H1)),                   # weights/biases: full block,
        _resident_spec((1, H1)),                        #   constant index map,
        _resident_spec((H1, H2)),                       #   single-buffered
        _resident_spec((1, H2)),
        _resident_spec((H2, H3)),
        _resident_spec((1, H3)),
        _resident_spec((H3, OUT_PAD)),
        _resident_spec((1, OUT_PAD)),
    ]
    out_spec = pl.BlockSpec((tb, OUT_PAD), lambda i: (i, 0))

    flops = 2 * B * (IN_DIM * H1 + H1 * H2 + H2 * H3 + H3 * OUT_PAD)
    bytes_accessed = sum(int(a.size) * a.dtype.itemsize for a in args)
    bytes_accessed += B * OUT_PAD * 4
    cost = pl.CostEstimate(flops=flops, transcendentals=0,
                           bytes_accessed=bytes_accessed)

    out = pl.pallas_call(
        mlp_kernel,
        out_shape=jax.ShapeDtypeStruct((B, OUT_PAD), jnp.float32),
        grid=(nb,),
        in_specs=in_specs,
        out_specs=out_spec,
        compiler_params=pltpu.CompilerParams(
            dimension_semantics=("parallel",),
            vmem_limit_bytes=_vmem_limit_bytes(tb, cap)),
        cost_estimate=cost,
    )(*args)

    return out[:, :OUT_DIM]


def init_params(key):
    """Deterministic init mirroring nn.Linear shapes (out_features, in_features)."""
    dims = [(IN_DIM, H1), (H1, H2), (H2, H3), (H3, OUT_DIM)]
    params = []
    for (fan_in, fan_out) in dims:
        key, kw, kb = jax.random.split(key, 3)
        bound = 1.0 / jnp.sqrt(fan_in)
        w = jax.random.uniform(kw, (fan_out, fan_in), jnp.float32, -bound, bound)
        b = jax.random.uniform(kb, (fan_out,), jnp.float32, -bound, bound)
        params.append((w, b))
    return params


def reference_forward_f32(x, params):
    h = x.reshape(x.shape[0], -1)
    (w1, b1), (w2, b2), (w3, b3), (w4, b4) = params
    h = jnp.maximum(h @ w1.T + b1, 0.0)
    h = jnp.maximum(h @ w2.T + b2, 0.0)
    h = jnp.maximum(h @ w3.T + b3, 0.0)
    return h @ w4.T + b4


def reference_forward_bf16(x, prepared):
    """Same quantization choices as the kernel (bf16 operands, f32 accum)."""
    (w1, b1, w2, b2, w3, b3, w4, b4) = prepared
    h = x.reshape(x.shape[0], -1).astype(jnp.bfloat16)
    h = jnp.maximum(jnp.dot(h, w1, preferred_element_type=jnp.float32) + b1, 0.0)
    h = jnp.maximum(jnp.dot(h.astype(jnp.bfloat16), w2,
                            preferred_element_type=jnp.float32) + b2, 0.0)
    h = jnp.maximum(jnp.dot(h.astype(jnp.bfloat16), w3,
                            preferred_element_type=jnp.float32) + b3, 0.0)
    h = jnp.dot(h.astype(jnp.bfloat16), w4,
                preferred_element_type=jnp.float32) + b4
    return h[:, :OUT_DIM]


if __name__ == "__main__":
    key = jax.random.PRNGKey(0)
    key, kx = jax.random.split(key)

    B = 2
    x = jax.random.normal(kx, (B, 3, 32, 32), jnp.float32)  # NCHW, as in PyTorch
    params = init_params(key)
    prepared = prepare_params(params)   # one-time prep, not per call

    out = linear_net_forward(x, prepared)
    out = jax.block_until_ready(out)
    assert out.shape == (B, OUT_DIM), out.shape

    # Tight check vs a reference using identical bf16 quantization.
    ref_q = reference_forward_bf16(x, prepared)
    assert jnp.allclose(out, ref_q, atol=2e-2, rtol=2e-2), "mismatch vs bf16 reference"

    # Loose check vs the full-f32 PyTorch-equivalent math (bf16 rounding only).
    ref_f32 = reference_forward_f32(x, params)
    assert jnp.allclose(out, ref_f32, atol=8e-2, rtol=8e-2), "mismatch vs f32 reference"

    print("KERNEL_OK")
</pallas_src>

<mosaic_0001>
module attributes {stable_mosaic.version = 11 : i64} {
  func.func @mlp_kernel(%arg0: i32, %arg1: memref<8x3072xf32, #tpu.memory_space<vmem>>, %arg2: memref<3072x1024xbf16, #tpu.memory_space<vmem>>, %arg3: memref<1x1024xf32, #tpu.memory_space<vmem>>, %arg4: memref<1024x512xbf16, #tpu.memory_space<vmem>>, %arg5: memref<1x512xf32, #tpu.memory_space<vmem>>, %arg6: memref<512x256xbf16, #tpu.memory_space<vmem>>, %arg7: memref<1x256xf32, #tpu.memory_space<vmem>>, %arg8: memref<256x128xbf16, #tpu.memory_space<vmem>>, %arg9: memref<1x128xf32, #tpu.memory_space<vmem>>, %arg10: memref<8x128xf32, #tpu.memory_space<vmem>>) attributes {dimension_semantics = [#tpu.dimension_semantics<parallel>], iteration_bounds = array<i64: 1>, scalar_prefetch = 0 : i64, scratch_operands = 0 : i64, tpu.core_type = #tpu.core_type<tc>, window_params = [{transform_indices = @transform_0, window_bounds = array<i64: 8, 3072>}, {pipeline_mode = #tpu.pipeline_mode<synchronous>, transform_indices = @transform_1, window_bounds = array<i64: 3072, 1024>}, {pipeline_mode = #tpu.pipeline_mode<synchronous>, transform_indices = @transform_2, window_bounds = array<i64: 1, 1024>}, {pipeline_mode = #tpu.pipeline_mode<synchronous>, transform_indices = @transform_3, window_bounds = array<i64: 1024, 512>}, {pipeline_mode = #tpu.pipeline_mode<synchronous>, transform_indices = @transform_4, window_bounds = array<i64: 1, 512>}, {pipeline_mode = #tpu.pipeline_mode<synchronous>, transform_indices = @transform_5, window_bounds = array<i64: 512, 256>}, {pipeline_mode = #tpu.pipeline_mode<synchronous>, transform_indices = @transform_6, window_bounds = array<i64: 1, 256>}, {pipeline_mode = #tpu.pipeline_mode<synchronous>, transform_indices = @transform_7, window_bounds = array<i64: 256, 128>}, {pipeline_mode = #tpu.pipeline_mode<synchronous>, transform_indices = @transform_8, window_bounds = array<i64: 1, 128>}, {transform_indices = @transform_9, window_bounds = array<i64: 8, 128>}]} {
    %c0 = arith.constant 0 : index
    %c0_0 = arith.constant 0 : index
    %0 = vector.load %arg1[%c0, %c0_0] : memref<8x3072xf32, #tpu.memory_space<vmem>>, vector<8x3072xf32>
    %1 = arith.truncf %0 : vector<8x3072xf32> to vector<8x3072xbf16>
    %c0_1 = arith.constant 0 : index
    %c0_2 = arith.constant 0 : index
    %2 = vector.load %arg2[%c0_1, %c0_2] : memref<3072x1024xbf16, #tpu.memory_space<vmem>>, vector<3072x1024xbf16>
    %cst = arith.constant dense<0.000000e+00> : vector<8x1024xf32>
    %3 = tpu.matmul %1, %2, %cst {dimension_numbers = #tpu.dot_dimension_numbers<[1], [0], [0], [1], [0, 0, 1, 1], [], []>} : vector<8x3072xbf16>, vector<3072x1024xbf16>, vector<8x1024xf32> -> vector<8x1024xf32>
    %c0_3 = arith.constant 0 : index
    %c0_4 = arith.constant 0 : index
    %4 = vector.load %arg3[%c0_3, %c0_4] : memref<1x1024xf32, #tpu.memory_space<vmem>>, vector<1x1024xf32>
    %5 = vector.broadcast %4 : vector<1x1024xf32> to vector<8x1024xf32>
    %6 = arith.addf %3, %5 : vector<8x1024xf32>
    %cst_5 = arith.constant 0.000000e+00 : f32
    %7 = vector.broadcast %cst_5 : f32 to vector<8x1024xf32>
    %8 = arith.maximumf %6, %7 : vector<8x1024xf32>
    %9 = arith.truncf %8 : vector<8x1024xf32> to vector<8x1024xbf16>
    %c0_6 = arith.constant 0 : index
    %c0_7 = arith.constant 0 : index
    %10 = vector.load %arg4[%c0_6, %c0_7] : memref<1024x512xbf16, #tpu.memory_space<vmem>>, vector<1024x512xbf16>
    %cst_8 = arith.constant dense<0.000000e+00> : vector<8x512xf32>
    %11 = tpu.matmul %9, %10, %cst_8 {dimension_numbers = #tpu.dot_dimension_numbers<[1], [0], [0], [1], [0, 0, 1, 1], [], []>} : vector<8x1024xbf16>, vector<1024x512xbf16>, vector<8x512xf32> -> vector<8x512xf32>
    %c0_9 = arith.constant 0 : index
    %c0_10 = arith.constant 0 : index
    %12 = vector.load %arg5[%c0_9, %c0_10] : memref<1x512xf32, #tpu.memory_space<vmem>>, vector<1x512xf32>
    %13 = vector.broadcast %12 : vector<1x512xf32> to vector<8x512xf32>
    %14 = arith.addf %11, %13 : vector<8x512xf32>
    %cst_11 = arith.constant 0.000000e+00 : f32
    %15 = vector.broadcast %cst_11 : f32 to vector<8x512xf32>
    %16 = arith.maximumf %14, %15 : vector<8x512xf32>
    %17 = arith.truncf %16 : vector<8x512xf32> to vector<8x512xbf16>
    %c0_12 = arith.constant 0 : index
    %c0_13 = arith.constant 0 : index
    %18 = vector.load %arg6[%c0_12, %c0_13] : memref<512x256xbf16, #tpu.memory_space<vmem>>, vector<512x256xbf16>
    %cst_14 = arith.constant dense<0.000000e+00> : vector<8x256xf32>
    %19 = tpu.matmul %17, %18, %cst_14 {dimension_numbers = #tpu.dot_dimension_numbers<[1], [0], [0], [1], [0, 0, 1, 1], [], []>} : vector<8x512xbf16>, vector<512x256xbf16>, vector<8x256xf32> -> vector<8x256xf32>
    %c0_15 = arith.constant 0 : index
    %c0_16 = arith.constant 0 : index
    %20 = vector.load %arg7[%c0_15, %c0_16] : memref<1x256xf32, #tpu.memory_space<vmem>>, vector<1x256xf32>
    %21 = vector.broadcast %20 : vector<1x256xf32> to vector<8x256xf32>
    %22 = arith.addf %19, %21 : vector<8x256xf32>
    %cst_17 = arith.constant 0.000000e+00 : f32
    %23 = vector.broadcast %cst_17 : f32 to vector<8x256xf32>
    %24 = arith.maximumf %22, %23 : vector<8x256xf32>
    %25 = arith.truncf %24 : vector<8x256xf32> to vector<8x256xbf16>
    %c0_18 = arith.constant 0 : index
    %c0_19 = arith.constant 0 : index
    %26 = vector.load %arg8[%c0_18, %c0_19] : memref<256x128xbf16, #tpu.memory_space<vmem>>, vector<256x128xbf16>
    %cst_20 = arith.constant dense<0.000000e+00> : vector<8x128xf32>
    %27 = tpu.matmul %25, %26, %cst_20 {dimension_numbers = #tpu.dot_dimension_numbers<[1], [0], [0], [1], [0, 0, 1, 1], [], []>} : vector<8x256xbf16>, vector<256x128xbf16>, vector<8x128xf32> -> vector<8x128xf32>
    %c0_21 = arith.constant 0 : index
    %c0_22 = arith.constant 0 : index
    %28 = vector.load %arg9[%c0_21, %c0_22] : memref<1x128xf32, #tpu.memory_space<vmem>>, vector<1x128xf32>
    %29 = vector.broadcast %28 : vector<1x128xf32> to vector<8x128xf32>
    %30 = arith.addf %27, %29 : vector<8x128xf32>
    %c0_23 = arith.constant 0 : index
    %c0_24 = arith.constant 0 : index
    %31 = vector.load %arg10[%c0_23, %c0_24] : memref<8x128xf32, #tpu.memory_space<vmem>>, vector<8x128xf32>
    tpu.vector_store %arg10[%c0_23, %c0_24], %30 {strides = array<i32>} : memref<8x128xf32, #tpu.memory_space<vmem>>, vector<8x128xf32>,
    return
  }
  func.func @transform_0(%arg0: i32) -> (i32, i32) {
    %c0_i32 = arith.constant 0 : i32
    %c0_i32_0 = arith.constant 0 : i32
    return %arg0, %c0_i32 : i32, i32
  }
  func.func @transform_1(%arg0: i32) -> (i32, i32) {
    %c0_i32 = arith.constant 0 : i32
    %c0_i32_0 = arith.constant 0 : i32
    %c0_i32_1 = arith.constant 0 : i32
    return %c0_i32, %c0_i32_0 : i32, i32
  }
  func.func @transform_2(%arg0: i32) -> (i32, i32) {
    %c0_i32 = arith.constant 0 : i32
    %c0_i32_0 = arith.constant 0 : i32
    %c0_i32_1 = arith.constant 0 : i32
    return %c0_i32, %c0_i32_0 : i32, i32
  }
  func.func @transform_3(%arg0: i32) -> (i32, i32) {
    %c0_i32 = arith.constant 0 : i32
    %c0_i32_0 = arith.constant 0 : i32
    %c0_i32_1 = arith.constant 0 : i32
    return %c0_i32, %c0_i32_0 : i32, i32
  }
  func.func @transform_4(%arg0: i32) -> (i32, i32) {
    %c0_i32 = arith.constant 0 : i32
    %c0_i32_0 = arith.constant 0 : i32
    %c0_i32_1 = arith.constant 0 : i32
    return %c0_i32, %c0_i32_0 : i32, i32
  }
  func.func @transform_5(%arg0: i32) -> (i32, i32) {
    %c0_i32 = arith.constant 0 : i32
    %c0_i32_0 = arith.constant 0 : i32
    %c0_i32_1 = arith.constant 0 : i32
    return %c0_i32, %c0_i32_0 : i32, i32
  }
  func.func @transform_6(%arg0: i32) -> (i32, i32) {
    %c0_i32 = arith.constant 0 : i32
    %c0_i32_0 = arith.constant 0 : i32
    %c0_i32_1 = arith.constant 0 : i32
    return %c0_i32, %c0_i32_0 : i32, i32
  }
  func.func @transform_7(%arg0: i32) -> (i32, i32) {
    %c0_i32 = arith.constant 0 : i32
    %c0_i32_0 = arith.constant 0 : i32
    %c0_i32_1 = arith.constant 0 : i32
    return %c0_i32, %c0_i32_0 : i32, i32
  }
  func.func @transform_8(%arg0: i32) -> (i32, i32) {
    %c0_i32 = arith.constant 0 : i32
    %c0_i32_0 = arith.constant 0 : i32
    %c0_i32_1 = arith.constant 0 : i32
    return %c0_i32, %c0_i32_0 : i32, i32
  }
  func.func @transform_9(%arg0: i32) -> (i32, i32) {
    %c0_i32 = arith.constant 0 : i32
    %c0_i32_0 = arith.constant 0 : i32
    return %arg0, %c0_i32 : i32, i32
  }
}

</mosaic_0001>

<bundles_post_ra>
// kernel: tpu_custom_call.1
= control target key start
LH: loop header
LB: loop body
LE: loop exit
PB: predicated region body
PF: predicated region fallthrough
CT: control target
= control target key end

     0   :  { %14 = vsyncpa [#allocation3], 0  ;;  %s17722_s0 = inlined_call_operand.hbm [shape: f32[2,3072], index: 0, kind: input, shape index: {}]   ;;  %s17723_s1 = inlined_call_operand.hbm [shape: bf16[3072,1024], index: 1, kind: input, shape index: {}]   ;;  %s17724_s2 = inlined_call_operand.hbm [shape: f32[1,1024], index: 2, kind: input, shape index: {}]   ;;  %s17725_s3 = inlined_call_operand.hbm [shape: bf16[1024,512], index: 3, kind: input, shape index: {}]   ;;  %s17726_s4 = inlined_call_operand.hbm [shape: f32[1,512], index: 4, kind: input, shape index: {}]   ;;  %s17727_s5 = inlined_call_operand.hbm [shape: bf16[512,256], index: 5, kind: input, shape index: {}]   ;;  %s17728_s6 = inlined_call_operand.hbm [shape: f32[1,256], index: 6, kind: input, shape index: {}]   ;;  %s17729_s7 = inlined_call_operand.hbm [shape: bf16[256,128], index: 7, kind: input, shape index: {}]   ;;  %s17730_s8 = inlined_call_operand.hbm [shape: f32[1,128], index: 8, kind: input, shape index: {}]   ;;  %s17731_s9 = inlined_call_operand.hbm [shape: f32[2,128], index: 9, kind: output, shape index: {}]  }
   0x1   :  { %15 = vsyncpa [#allocation6], 0 }
   0x2   :  { %16 = vsyncpa [#allocation9], 0 }
   0x3   :  { %17 = vsyncpa [#allocation12], 0 }
   0x4   :  { %18 = vsyncpa [#allocation15], 0 }
   0x5   :  { %19 = vsyncpa [#allocation4], 0 }
   0x6   :  { %24 = vsyncadd [#allocation3], 2304  ;;  %s17174_s30 = smov [#allocation5]   ;;  %s16942_s13 = scalar_lea.hbm %s17723_s1, 196608 }
   0x7   :  { %s37_s10 = sshll.u32 %s17174_s30, 4  ;;  %p16943_p0 = scmp.ne.s32.totalorder %s17723_s1, %s16942_s13  ;;  %s38_s10 = int_to_ptr.vmem [resolvable:$true] %s37_s10 }
   0x8   :  { %p16946_p1 = scmp.lt.u32.totalorder %s16942_s13, %s17723_s1 }
   0xa   :  { %p16948_p2 = pnand %p16946_p1, %p16943_p0 }
   0xc   :  { %16951 = shalt.err (!%p16948_p2)
}
   0xd   :  { %s16952_s18 = scalar_lea.vmem %s38_s10, 196608  ;;  %p16957_p4 = scmp.lt.s32.totalorder %s38_s10, %s38_s10 }
   0xe   :  { %p16953_p3 = scmp.ne.s32.totalorder %s38_s10, %s16952_s18  ;;  %p16958_p5 = scmp.lt.s32.totalorder %s16952_s18, %s16952_s18 }
  0x10   :  { %p16959_p6 = por %p16958_p5, %p16957_p4 }
  0x12   :  { %p16960_p7 = pnand %p16959_p6, %p16953_p3 }
  0x14   :  { %16963 = shalt.err (!%p16960_p7)
}
  0x15   :  { %s17175_s19 = smov 512   ;;  %s17176_s20 = smov 32  }
  0x16   :  { %43 = dma.hbm_to_vmem [thread:$0]  %s17723_s1, 196608, %s38_s10, [#allocation6], %s17175_s19, %s17175_s19, %s17176_s20  }
  0x17   :  { %s17177_s23 = smov [#allocation8]   ;;  %s16964_s27 = scalar_lea.hbm %s17725_s3, 32768 }
  0x18   :  { %s59_s24 = sshll.u32 %s17177_s23, 4  ;;  %p16965_p8 = scmp.ne.s32.totalorder %s17725_s3, %s16964_s27  ;;  %s60_s24 = int_to_ptr.vmem [resolvable:$true] %s59_s24 }
  0x19   :  { %p16968_p9 = scmp.lt.u32.totalorder %s16964_s27, %s17725_s3 }
  0x1b   :  { %p16970_p10 = pnand %p16968_p9, %p16965_p8 }
  0x1d   :  { %16973 = shalt.err (!%p16970_p10)
}
  0x1e   :  { %s16974_s12 = scalar_lea.vmem %s60_s24, 32768  ;;  %p16979_p12 = scmp.lt.s32.totalorder %s60_s24, %s60_s24 }
  0x1f   :  { %p16975_p11 = scmp.ne.s32.totalorder %s60_s24, %s16974_s12  ;;  %p16980_p13 = scmp.lt.s32.totalorder %s16974_s12, %s16974_s12 }
  0x21   :  { %p16981_p0 = por %p16980_p13, %p16979_p12 }
  0x23   :  { %p16982_p1 = pnand %p16981_p0, %p16975_p11 }
  0x25   :  { %16985 = shalt.err (!%p16982_p1)
}
  0x26   :  { %s17178_s1 = smov 256   ;;  %s17179_s10 = smov 16  }
  0x27   :  { %65 = dma.hbm_to_vmem [thread:$0]  %s17725_s3, 32768, %s60_s24, [#allocation9], %s17178_s1, %s17178_s1, %s17179_s10  }
  0x28   :  { %s17180_s15 = smov [#allocation11]   ;;  %s16986_s19 = scalar_lea.hbm %s17727_s5, 8192 }
  0x29   :  { %s81_s16 = sshll.u32 %s17180_s15, 4  ;;  %p16987_p2 = scmp.ne.s32.totalorder %s17727_s5, %s16986_s19  ;;  %s82_s16 = int_to_ptr.vmem [resolvable:$true] %s81_s16 }
  0x2a   :  { %p16990_p3 = scmp.lt.u32.totalorder %s16986_s19, %s17727_s5 }
  0x2c   :  { %p16992_p4 = pnand %p16990_p3, %p16987_p2 }
  0x2e   :  { %16995 = shalt.err (!%p16992_p4)
}
  0x2f   :  { %s16996_s26 = scalar_lea.vmem %s82_s16, 8192  ;;  %p17001_p6 = scmp.lt.s32.totalorder %s82_s16, %s82_s16 }
  0x30   :  { %p16997_p5 = scmp.ne.s32.totalorder %s82_s16, %s16996_s26  ;;  %p17002_p7 = scmp.lt.s32.totalorder %s16996_s26, %s16996_s26 }
  0x32   :  { %p17003_p8 = por %p17002_p7, %p17001_p6 }
  0x34   :  { %p17004_p9 = pnand %p17003_p8, %p16997_p5 }
  0x36   :  { %17007 = shalt.err (!%p17004_p9)
}
  0x37   :  { %s17181_s3 = smov 128   ;;  %s17182_s24 = smov 8  }
  0x38   :  { %87 = dma.hbm_to_vmem [thread:$0]  %s17727_s5, 8192, %s82_s16, [#allocation12], %s17181_s3, %s17181_s3, %s17182_s24  }
  0x39   :  { %s17183_s29 = smov [#allocation14]   ;;  %s17008_s1 = scalar_lea.hbm %s17729_s7, 2048 }
  0x3a   :  { %s103_s30 = sshll.u32 %s17183_s29, 4  ;;  %p17009_p10 = scmp.ne.s32.totalorder %s17729_s7, %s17008_s1  ;;  %s104_s30 = int_to_ptr.vmem [resolvable:$true] %s103_s30 }
  0x3b   :  { %p17012_p11 = scmp.lt.u32.totalorder %s17008_s1, %s17729_s7 }
  0x3d   :  { %p17014_p12 = pnand %p17012_p11, %p17009_p10 }
  0x3f   :  { %17017 = shalt.err (!%p17014_p12)
}
  0x40   :  { %s17018_s17 = scalar_lea.vmem %s104_s30, 2048  ;;  %p17023_p0 = scmp.lt.s32.totalorder %s104_s30, %s104_s30 }
  0x41   :  { %p17019_p13 = scmp.ne.s32.totalorder %s104_s30, %s17018_s17  ;;  %p17024_p1 = scmp.lt.s32.totalorder %s17018_s17, %s17018_s17 }
  0x43   :  { %p17025_p2 = por %p17024_p1, %p17023_p0 }
  0x45   :  { %p17026_p3 = pnand %p17025_p2, %p17019_p13 }
  0x47   :  { %17029 = shalt.err (!%p17026_p3)
}
  0x48   :  { %s17184_s5 = smov 64   ;;  %s17185_s16 = smov 4  }
  0x49   :  { %109 = dma.hbm_to_vmem [thread:$0]  %s17729_s7, 2048, %s104_s30, [#allocation15], %s17184_s5, %s17184_s5, %s17185_s16  }
  0x4a   :  { %s17186_s21 = smov [#allocation2]   ;;  %s17030_s26 = scalar_lea.hbm %s17722_s0, 768 }
  0x4b   :  { %s25_s22 = sshll.u32 %s17186_s21, 4  ;;  %p17031_p4 = scmp.ne.s32.totalorder %s17722_s0, %s17030_s26  ;;  %s26_s22 = int_to_ptr.vmem [resolvable:$true] %s25_s22 }
  0x4c   :  { %p17034_p5 = scmp.lt.u32.totalorder %s17030_s26, %s17722_s0 }
  0x4e   :  { %p17036_p6 = pnand %p17034_p5, %p17031_p4 }
  0x50   :  { %17039 = shalt.err (!%p17036_p6)
}
  0x51   :  { %s17040_s29 = scalar_lea.vmem %s26_s22, 768  ;;  %s17044_s7 = scalar_lea.vmem %s26_s22, 3072 }
  0x52   :  { %p17041_p7 = scmp.ne.s32.totalorder %s26_s22, %s17040_s29  ;;  %p17045_p8 = scmp.lt.s32.totalorder %s26_s22, %s26_s22 }
  0x53   :  { %p17046_p9 = scmp.lt.s32.totalorder %s17044_s7, %s17040_s29 }
  0x55   :  { %p17047_p10 = por %p17046_p9, %p17045_p8 }
  0x57   :  { %p17048_p11 = pnand %p17047_p10, %p17041_p7 }
  0x59   :  { %17051 = shalt.err (!%p17048_p11)
}
  0x5a   :  { %s17187_s30 = smov 768   ;;  %s17188_s11 = smov 48  }
  0x5b   :  { %31 = dma.hbm_to_vmem [thread:$0]  %s17722_s0, 768, %s26_s22, [#allocation3], %s17187_s30, %s17187_s30, %s17188_s11  }
  0x5c   :  { %s17189_s10 = smov [#allocation7]   ;;  %s17190_s14 = smov [#allocation10]  }
  0x5d   :  { %s50_s13 = sshll.u32 %s17189_s10, 4  ;;  %s72_s15 = sshll.u32 %s17190_s14, 4  ;;  %s51_s13 = int_to_ptr.vmem [resolvable:$true] %s50_s13  ;;  %s73_s15 = int_to_ptr.vmem [resolvable:$true] %s72_s15 }
  0x5e   :  { %s17052_s16 = scalar_lea.hbm %s17724_s2, 128 }
  0x5f   :  { %p17053_p12 = scmp.ne.s32.totalorder %s17724_s2, %s17052_s16  ;;  %p17056_p13 = scmp.lt.u32.totalorder %s17052_s16, %s17724_s2 }
  0x61   :  { %p17058_p0 = pnand %p17056_p13, %p17053_p12 }
  0x63   :  { %17061 = shalt.err (!%p17058_p0)
}
  0x64   :  { %s17062_s0 = scalar_lea.vmem %s51_s13, 128  ;;  %p17067_p2 = scmp.lt.s32.totalorder %s51_s13, %s51_s13 }
  0x65   :  { %p17063_p1 = scmp.ne.s32.totalorder %s51_s13, %s17062_s0  ;;  %p17068_p3 = scmp.lt.s32.totalorder %s17062_s0, %s17062_s0 }
  0x67   :  { %p17069_p4 = por %p17068_p3, %p17067_p2 }
  0x69   :  { %p17070_p5 = pnand %p17069_p4, %p17063_p1 }
  0x6b   :  { %17073 = shalt.err (!%p17070_p5)
}
  0x6c   :  { %53 = dma.hbm_to_vmem [thread:$0]  %s17724_s2, 128, %s51_s13, [#allocation6]  }
  0x6d   :  { %s17074_s24 = scalar_lea.hbm %s17726_s4, 64 }
  0x6e   :  { %p17075_p6 = scmp.ne.s32.totalorder %s17726_s4, %s17074_s24  ;;  %p17078_p7 = scmp.lt.u32.totalorder %s17074_s24, %s17726_s4 }
  0x70   :  { %p17080_p8 = pnand %p17078_p7, %p17075_p6 }
  0x72   :  { %17083 = shalt.err (!%p17080_p8)
}
  0x73   :  { %s17084_s30 = scalar_lea.vmem %s73_s15, 64  ;;  %p17089_p10 = scmp.lt.s32.totalorder %s73_s15, %s73_s15 }
  0x74   :  { %p17085_p9 = scmp.ne.s32.totalorder %s73_s15, %s17084_s30  ;;  %p17090_p11 = scmp.lt.s32.totalorder %s17084_s30, %s17084_s30 }
  0x76   :  { %p17091_p12 = por %p17090_p11, %p17089_p10 }
  0x78   :  { %p17092_p13 = pnand %p17091_p12, %p17085_p9 }
  0x7a   :  { %17095 = shalt.err (!%p17092_p13)
}
  0x7b   :  { %75 = dma.hbm_to_vmem [thread:$0]  %s17726_s4, 64, %s73_s15, [#allocation9]  }
  0x7c   :  { %s17191_s12 = smov [#allocation13]   ;;  %s17192_s10 = smov [#allocation16]  }
  0x7d   :  { %s94_s1 = sshll.u32 %s17191_s12, 4  ;;  %s116_s13 = sshll.u32 %s17192_s10, 4  ;;  %s95_s1 = int_to_ptr.vmem [resolvable:$true] %s94_s1  ;;  %s117_s13 = int_to_ptr.vmem [resolvable:$true] %s116_s13 }
  0x7e   :  { %s17096_s5 = scalar_lea.hbm %s17728_s6, 32 }
  0x7f   :  { %p17097_p0 = scmp.ne.s32.totalorder %s17728_s6, %s17096_s5  ;;  %p17100_p1 = scmp.lt.u32.totalorder %s17096_s5, %s17728_s6 }
  0x81   :  { %p17102_p2 = pnand %p17100_p1, %p17097_p0 }
  0x83   :  { %17105 = shalt.err (!%p17102_p2)
}
  0x84   :  { %s17106_s4 = scalar_lea.vmem %s95_s1, 32  ;;  %p17111_p4 = scmp.lt.s32.totalorder %s95_s1, %s95_s1 }
  0x85   :  { %p17107_p3 = scmp.ne.s32.totalorder %s95_s1, %s17106_s4  ;;  %p17112_p5 = scmp.lt.s32.totalorder %s17106_s4, %s17106_s4 }
  0x87   :  { %p17113_p6 = por %p17112_p5, %p17111_p4 }
  0x89   :  { %p17114_p7 = pnand %p17113_p6, %p17107_p3 }
  0x8b   :  { %17117 = shalt.err (!%p17114_p7)
}
  0x8c   :  { %97 = dma.hbm_to_vmem [thread:$0]  %s17728_s6, 32, %s95_s1, [#allocation12]  }
  0x8d   :  { %s17118_s25 = scalar_lea.hbm %s17730_s8, 16 }
  0x8e   :  { %p17119_p8 = scmp.ne.s32.totalorder %s17730_s8, %s17118_s25  ;;  %p17122_p9 = scmp.lt.u32.totalorder %s17118_s25, %s17730_s8 }
  0x90   :  { %p17124_p10 = pnand %p17122_p9, %p17119_p8 }
  0x92   :  { %17127 = shalt.err (!%p17124_p10)
}
  0x93   :  { %s17128_s28 = scalar_lea.vmem %s117_s13, 16  ;;  %s17132_s29 = scalar_lea.vmem %s117_s13, 32 }
  0x94   :  { %p17129_p11 = scmp.ne.s32.totalorder %s117_s13, %s17128_s28  ;;  %p17133_p12 = scmp.lt.s32.totalorder %s117_s13, %s117_s13 }
  0x95   :  { %p17134_p13 = scmp.lt.s32.totalorder %s17132_s29, %s17128_s28 }
  0x97   :  { %p17135_p0 = por %p17134_p13, %p17133_p12 }
  0x99   :  { %p17136_p1 = pnand %p17135_p0, %p17129_p11 }
  0x9b   :  { %17139 = shalt.err (!%p17136_p1)
}
  0x9c   :  { %119 = dma.hbm_to_vmem [thread:$0]  %s17730_s8, 16, %s117_s13, [#allocation15]  }
  0x9d   :  { %17162 = dma.done.wait [#allocation3], 3072  }
  0x9e   :  { %17163 = vsyncadd [#allocation3], 4294964224 }
  0x9f   :  { %17164 = dma.done.wait [#allocation6], 196736  }
  0xa0   :  { %17165 = vsyncadd [#allocation6], 4294770560 }
  0xa1   :  { %17166 = dma.done.wait [#allocation9], 32832  }
  0xa2   :  { %17167 = vsyncadd [#allocation9], 4294934464 }
  0xa3   :  { %17168 = dma.done.wait [#allocation12], 8224  }
  0xa4   :  { %17169 = vsyncadd [#allocation12], 4294959072 }
  0xa5   :  { %17170 = dma.done.wait [#allocation15], 2064  }
  0xa6   :  { %17171 = vsyncadd [#allocation15], 4294965232  ;;  %v460_v0 = vld [vmem:[#allocation5] sm:$0xff]  ;;  %v17193_v35 = vmov 1983009808   ;;  %v203_v37 = vlaneseq }
  0xa7   :  { %v464_v1 = vld [vmem:[#allocation5 + $0x20] sm:$0xff]  ;;  %v201_v36 = vunpack.c.l.s4 %v17193_v35 }
  0xa8   :  { %v588_v2 = vld [vmem:[#allocation5 + $0x400] sm:$0xff]  ;;  %v14276_v3 = vcombine.high %v460_v0, %v464_v1  ;;  %v14275_v5 = vcombine.low %v460_v0, %v464_v1  ;;  %v17355_v47 = vshrl.u32 %v203_v37, 7 }
  0xa9   :  { %v592_v4 = vld [vmem:[#allocation5 + $0x420] sm:$0xff]  ;;  %v202_v46 = vunpack.c.0.s8 %v201_v36 }
  0xaa   :  { %v468_v6 = vld [vmem:[#allocation5 + $0x40] sm:$0xff]  ;;  %v14404_v8 = vcombine.high %v588_v2, %v592_v4  ;;  %v14403_v9 = vcombine.low %v588_v2, %v592_v4  ;;  %9718 = vmatprep.subr.bf16.mxu1 %v14276_v3 }
  0xab   :  { %v472_v7 = vld [vmem:[#allocation5 + $0x60] sm:$0xff]  ;;  %9719 = vmatpush1.bf16.msra.mxu1 %v14275_v5  ;;  %v17358_v58 = vsub.s32 %v202_v46, %v17355_v47 }
  0xac   :  { %v14284_v10 = vcombine.high %v468_v6, %v472_v7  ;;  %v596_v11 = vld [vmem:[#allocation5 + $0x440] sm:$0xff]  ;;  %9759 = vmatprep.subr.bf16.mxu0 %v14404_v8  ;;  %v14283_v18 = vcombine.low %v468_v6, %v472_v7 }
  0xad   :  { %v600_v12 = vld [vmem:[#allocation5 + $0x460] sm:$0xff]  ;;  %9760 = vmatpush1.bf16.msra.mxu0 %v14403_v9 }
  0xae   :  { %v476_v13 = vld [vmem:[#allocation5 + $0x80] sm:$0xff]  ;;  %v14412_v14 = vcombine.high %v596_v11, %v600_v12  ;;  %9720 = vmatprep.subr.bf16.mxu1 %v14284_v10  ;;  %v14411_v19 = vcombine.low %v596_v11, %v600_v12 }
  0xaf   :  { %v480_v15 = vld [vmem:[#allocation5 + $0xa0] sm:$0xff]  ;;  %9721 = vmatpush1.bf16.msra.mxu1 %v14283_v18 }
  0xb0   :  { %v604_v16 = vld [vmem:[#allocation5 + $0x480] sm:$0xff]  ;;  %v14292_v20 = vcombine.high %v476_v13, %v480_v15  ;;  %9761 = vmatprep.subr.bf16.mxu0 %v14412_v14  ;;  %v14291_v26 = vcombine.low %v476_v13, %v480_v15 }
  0xb1   :  { %v608_v17 = vld [vmem:[#allocation5 + $0x4a0] sm:$0xff]  ;;  %9762 = vmatpush1.bf16.msra.mxu0 %v14411_v19 }
  0xb2   :  { %v14420_v21 = vcombine.high %v604_v16, %v608_v17  ;;  %v484_v22 = vld [vmem:[#allocation5 + $0xc0] sm:$0xff]  ;;  %9722 = vmatprep.subr.bf16.mxu1 %v14292_v20  ;;  %v14419_v27 = vcombine.low %v604_v16, %v608_v17 }
  0xb3   :  { %v488_v23 = vld [vmem:[#allocation5 + $0xe0] sm:$0xff]  ;;  %9723 = vmatpush1.bf16.msra.mxu1 %v14291_v26 }
  0xb4   :  { %v612_v24 = vld [vmem:[#allocation5 + $0x4c0] sm:$0xff]  ;;  %v14300_v28 = vcombine.high %v484_v22, %v488_v23  ;;  %9763 = vmatprep.subr.bf16.mxu0 %v14420_v21  ;;  %v14299_v34 = vcombine.low %v484_v22, %v488_v23 }
  0xb5   :  { %v616_v25 = vld [vmem:[#allocation5 + $0x4e0] sm:$0xff]  ;;  %9764 = vmatpush1.bf16.msra.mxu0 %v14419_v27 }
  0xb6   :  { %v14428_v29 = vcombine.high %v612_v24, %v616_v25  ;;  %v492_v30 = vld [vmem:[#allocation5 + $0x100] sm:$0xff]  ;;  %9724 = vmatprep.subr.bf16.mxu1 %v14300_v28  ;;  %v14427_v38 = vcombine.low %v612_v24, %v616_v25 }
  0xb7   :  { %v496_v31 = vld [vmem:[#allocation5 + $0x120] sm:$0xff]  ;;  %9725 = vmatpush1.bf16.msra.mxu1 %v14299_v34 }
  0xb8   :  { %v620_v32 = vld [vmem:[#allocation5 + $0x500] sm:$0xff]  ;;  %v14308_v39 = vcombine.high %v492_v30, %v496_v31  ;;  %9765 = vmatprep.subr.bf16.mxu0 %v14428_v29  ;;  %v14307_v45 = vcombine.low %v492_v30, %v496_v31 }
  0xb9   :  { %v624_v33 = vld [vmem:[#allocation5 + $0x520] sm:$0xff]  ;;  %9766 = vmatpush1.bf16.msra.mxu0 %v14427_v38 }
  0xba   :  { %v14436_v40 = vcombine.high %v620_v32, %v624_v33  ;;  %v500_v41 = vld [vmem:[#allocation5 + $0x140] sm:$0xff]  ;;  %9726 = vmatprep.subr.bf16.mxu1 %v14308_v39  ;;  %v14435_v48 = vcombine.low %v620_v32, %v624_v33 }
  0xbb   :  { %v504_v42 = vld [vmem:[#allocation5 + $0x160] sm:$0xff]  ;;  %9727 = vmatpush1.bf16.msra.mxu1 %v14307_v45 }
  0xbc   :  { %v628_v43 = vld [vmem:[#allocation5 + $0x540] sm:$0xff]  ;;  %v14316_v49 = vcombine.high %v500_v41, %v504_v42  ;;  %9767 = vmatprep.subr.bf16.mxu0 %v14436_v40  ;;  %v14315_v55 = vcombine.low %v500_v41, %v504_v42 }
  0xbd   :  { %v632_v44 = vld [vmem:[#allocation5 + $0x560] sm:$0xff]  ;;  %9768 = vmatpush1.bf16.msra.mxu0 %v14435_v48 }
  0xbe   :  { %v14444_v50 = vcombine.high %v628_v43, %v632_v44  ;;  %v508_v51 = vld [vmem:[#allocation5 + $0x180] sm:$0xff]  ;;  %9728 = vmatprep.subr.bf16.mxu1 %v14316_v49  ;;  %v14443_v59 = vcombine.low %v628_v43, %v632_v44 }
  0xbf   :  { %v512_v52 = vld [vmem:[#allocation5 + $0x1a0] sm:$0xff]  ;;  %9729 = vmatpush1.bf16.msra.mxu1 %v14315_v55 }
  0xc0   :  { %v636_v53 = vld [vmem:[#allocation5 + $0x580] sm:$0xff]  ;;  %v14324_v60 = vcombine.high %v508_v51, %v512_v52  ;;  %9769 = vmatprep.subr.bf16.mxu0 %v14444_v50  ;;  %v14323_v4 = vcombine.low %v508_v51, %v512_v52 }
  0xc1   :  { %v640_v54 = vld [vmem:[#allocation5 + $0x5a0] sm:$0xff]  ;;  %9770 = vmatpush1.bf16.msra.mxu0 %v14443_v59 }
  0xc2   :  { %v516_v56 = vld [vmem:[#allocation5 + $0x1c0] sm:$0xff]  ;;  %v14452_v63 = vcombine.high %v636_v53, %v640_v54  ;;  %v14451_v5 = vcombine.low %v636_v53, %v640_v54  ;;  %9730 = vmatprep.subr.bf16.mxu1 %v14324_v60 }
  0xc3   :  { %v520_v57 = vld [vmem:[#allocation5 + $0x1e0] sm:$0xff]  ;;  %9731 = vmatpush1.bf16.msra.mxu1 %v14323_v4 }
  0xc4   :  { %v644_v61 = vld [vmem:[#allocation5 + $0x5c0] sm:$0xff]  ;;  %v14332_v6 = vcombine.high %v516_v56, %v520_v57  ;;  %9771 = vmatprep.subr.bf16.mxu0 %v14452_v63  ;;  %v14331_v18 = vcombine.low %v516_v56, %v520_v57 }
  0xc5   :  { %v648_v62 = vld [vmem:[#allocation5 + $0x5e0] sm:$0xff]  ;;  %9772 = vmatpush1.bf16.msra.mxu0 %v14451_v5 }
  0xc6   :  { %v16408_v0 = vld [vmem:[#allocation2] ss:$48 sps:$4 sm:$0xff]   ;;  %v16412_v2 = vld [vmem:[#allocation2 + $0x4] ss:$48 sps:$4 sm:$0xff]   ;;  %v14460_v11 = vcombine.high %v644_v61, %v648_v62  ;;  %v14459_v19 = vcombine.low %v644_v61, %v648_v62  ;;  %9732 = vmatprep.subr.bf16.mxu1 %v14332_v6 }
  0xc7   :  { %v16410_v1 = vld [vmem:[#allocation2 + $0x60] ss:$48 sps:$4 sm:$0xff]   ;;  %v16413_v3 = vld [vmem:[#allocation2 + $0x64] ss:$48 sps:$4 sm:$0xff]   ;;  %v17361_v7 = vrot.slane %v16408_v0, %v17358_v58  ;;  %v17367_v9 = vrot.slane %v16412_v2, %v17358_v58  ;;  %9733 = vmatpush1.bf16.msra.mxu1 %v14331_v18 }
  0xc8   :  { %v17364_v8 = vrot.slane %v16410_v1, %v17358_v58  ;;  %v17370_v10 = vrot.slane %v16413_v3, %v17358_v58  ;;  %v524_v12 = vld [vmem:[#allocation5 + $0x200] sm:$0xff]  ;;  %9773 = vmatprep.subr.bf16.mxu0 %v14460_v11 }
  0xc9   :  { %v528_v13 = vld [vmem:[#allocation5 + $0x220] sm:$0xff]  ;;  %9774 = vmatpush1.bf16.msra.mxu0 %v14459_v19 }
  0xca   :  { %v652_v14 = vld [vmem:[#allocation5 + $0x600] sm:$0xff]  ;;  %v229_v16 = vcombine.high %v17361_v7, %v17364_v8  ;;  %v231_v17 = vcombine.high %v17367_v9, %v17370_v10  ;;  %v14340_v20 = vcombine.high %v524_v12, %v528_v13  ;;  %v14339_v28 = vcombine.low %v524_v12, %v528_v13 }
  0xcb   :  { %v656_v15 = vld [vmem:[#allocation5 + $0x620] sm:$0xff] }
  0xcc   :  { %v17376_v21 = vpack.c.bf16 %v229_v16, %v229_v16  ;;  %v17378_v22 = vpack.c.bf16 %v231_v17, %v231_v17  ;;  %v14468_v23 = vcombine.high %v652_v14, %v656_v15  ;;  %v532_v24 = vld [vmem:[#allocation5 + $0x240] sm:$0xff]  ;;  %9734 = vmatprep.subr.bf16.mxu1 %v14340_v20  ;;  %v14467_v29 = vcombine.low %v652_v14, %v656_v15  ;;  %v16414_v16 = vld [vmem:[#allocation2 + $0x8] ss:$48 sps:$4 sm:$0xff]  }
  0xcd   :  { %v536_v25 = vld [vmem:[#allocation5 + $0x260] sm:$0xff]  ;;  %9735 = vmatpush1.bf16.msra.mxu1 %v14339_v28  ;;  %v16416_v17 = vld [vmem:[#allocation2 + $0x68] ss:$48 sps:$4 sm:$0xff]   ;;  %v17383_v28 = vrot.slane %v16414_v16, %v17358_v58 }
  0xce   :  { %v660_v26 = vld [vmem:[#allocation5 + $0x640] sm:$0xff]  ;;  %9750 = vmatprep.mubr.bf16.mxu1 %v17376_v21  ;;  %9791 = vmatprep.mubr.bf16.mxu0 %v17378_v22  ;;  %v14348_v30 = vcombine.high %v532_v24, %v536_v25  ;;  %v14347_v36 = vcombine.low %v532_v24, %v536_v25 }
  0xcf   :  { %v664_v27 = vld [vmem:[#allocation5 + $0x660] sm:$0xff]  ;;  %9775 = vmatprep.subr.bf16.mxu0 %v14468_v23 }
  0xd0   :  { %v14476_v31 = vcombine.high %v660_v26, %v664_v27  ;;  %v540_v32 = vld [vmem:[#allocation5 + $0x280] sm:$0xff]  ;;  %9776 = vmatpush1.bf16.msra.mxu0 %v14467_v29  ;;  %9736 = vmatprep.subr.bf16.mxu1 %v14348_v30  ;;  %v14475_v37 = vcombine.low %v660_v26, %v664_v27  ;;  %v461_v26 = vld [vmem:[#allocation5 + $0x8] sm:$0xff]  ;;  %v17386_v29 = vrot.slane %v16416_v17, %v17358_v58 }
  0xd1   :  { %v544_v33 = vld [vmem:[#allocation5 + $0x2a0] sm:$0xff]  ;;  %9737 = vmatpush1.bf16.msra.mxu1 %v14347_v36  ;;  %v465_v27 = vld [vmem:[#allocation5 + $0x28] sm:$0xff]  ;;  %v228_v30 = vcombine.low %v17361_v7, %v17364_v8 }
  0xd2   :  { %v668_v34 = vld [vmem:[#allocation5 + $0x680] sm:$0xff]  ;;  %v14356_v38 = vcombine.high %v540_v32, %v544_v33  ;;  %9777 = vmatprep.subr.bf16.mxu0 %v14476_v31  ;;  %v14355_v44 = vcombine.low %v540_v32, %v544_v33  ;;  %v14278_v36 = vcombine.high %v461_v26, %v465_v27 }
  0xd3   :  { %v672_v35 = vld [vmem:[#allocation5 + $0x6a0] sm:$0xff] }
  0xd4   :  { %v14484_v39 = vcombine.high %v668_v34, %v672_v35  ;;  %v548_v40 = vld [vmem:[#allocation5 + $0x2c0] sm:$0xff]  ;;  %9778 = vmatpush1.bf16.msra.mxu0 %v14475_v37  ;;  %9738 = vmatprep.subr.bf16.mxu1 %v14356_v38  ;;  %v14483_v45 = vcombine.low %v668_v34, %v672_v35  ;;  %v230_v34 = vcombine.low %v17367_v9, %v17370_v10  ;;  %v469_v38 = vld [vmem:[#allocation5 + $0x48] sm:$0xff] }
  0xd5   :  { %v552_v41 = vld [vmem:[#allocation5 + $0x2e0] sm:$0xff]  ;;  %9739 = vmatpush1.bf16.msra.mxu1 %v14355_v44 }
  0xd6   :  { %v676_v42 = vld [vmem:[#allocation5 + $0x6c0] sm:$0xff]  ;;  %v14364_v46 = vcombine.high %v548_v40, %v552_v41  ;;  %9779 = vmatprep.subr.bf16.mxu0 %v14484_v39  ;;  %v14363_v53 = vcombine.low %v548_v40, %v552_v41  ;;  %v473_v39 = vld [vmem:[#allocation5 + $0x68] sm:$0xff]  ;;  %v265_v40 = vcombine.high %v17383_v28, %v17386_v29  ;;  %v17394_v41 = vpack.c.bf16 %v228_v30, %v228_v30 }
  0xd7   :  { %v680_v43 = vld [vmem:[#allocation5 + $0x6e0] sm:$0xff]  ;;  %v14286_v10 = vcombine.high %v469_v38, %v473_v39 }
  0xd8   :  { %v14492_v48 = vcombine.high %v676_v42, %v680_v43  ;;  %v556_v49 = vld [vmem:[#allocation5 + $0x300] sm:$0xff]  ;;  %9780 = vmatpush1.bf16.msra.mxu0 %v14483_v45  ;;  %9740 = vmatprep.subr.bf16.mxu1 %v14364_v46  ;;  %v14491_v54 = vcombine.low %v676_v42, %v680_v43  ;;  %v14277_v42 = vcombine.low %v461_v26, %v465_v27  ;;  %v477_v45 = vld [vmem:[#allocation5 + $0x88] sm:$0xff] }
  0xd9   :  { %v560_v50 = vld [vmem:[#allocation5 + $0x320] sm:$0xff]  ;;  %9741 = vmatpush1.bf16.msra.mxu1 %v14363_v53  ;;  %v17396_v43 = vpack.c.bf16 %v230_v34, %v230_v34  ;;  %v481_v46 = vld [vmem:[#allocation5 + $0xa8] sm:$0xff] }
  0xda   :  { %v684_v51 = vld [vmem:[#allocation5 + $0x700] sm:$0xff]  ;;  %v14372_v55 = vcombine.high %v556_v49, %v560_v50  ;;  %9781 = vmatprep.subr.bf16.mxu0 %v14492_v48  ;;  %v14371_v62 = vcombine.low %v556_v49, %v560_v50  ;;  %v17398_v48 = vpack.c.bf16 %v265_v40, %v265_v40  ;;  %v14294_v53 = vcombine.high %v477_v45, %v481_v46 }
  0xdb   :  { %v688_v52 = vld [vmem:[#allocation5 + $0x720] sm:$0xff] }
  0xdc   :  { %v564_v56 = vld [vmem:[#allocation5 + $0x340] sm:$0xff]  ;;  %v14500_v57 = vcombine.high %v684_v51, %v688_v52  ;;  %9782 = vmatpush1.bf16.msra.mxu0 %v14491_v54  ;;  %9742 = vmatprep.subr.bf16.mxu1 %v14372_v55  ;;  %v14499_v63 = vcombine.low %v684_v51, %v688_v52  ;;  %v14285_v51 = vcombine.low %v469_v38, %v473_v39  ;;  %v485_v55 = vld [vmem:[#allocation5 + $0xc8] sm:$0xff] }
  0xdd   :  { %v568_v59 = vld [vmem:[#allocation5 + $0x360] sm:$0xff]  ;;  %9743 = vmatpush1.bf16.msra.mxu1 %v14371_v62 }
  0xde   :  { %v692_v60 = vld [vmem:[#allocation5 + $0x740] sm:$0xff]  ;;  %v14380_v0 = vcombine.high %v564_v56, %v568_v59  ;;  %9783 = vmatprep.subr.bf16.mxu0 %v14500_v57  ;;  %v14379_v6 = vcombine.low %v564_v56, %v568_v59  ;;  %v489_v56 = vld [vmem:[#allocation5 + $0xe8] sm:$0xff] }
  0xdf   :  { %v696_v61 = vld [vmem:[#allocation5 + $0x760] sm:$0xff]  ;;  %v14302_v62 = vcombine.high %v485_v55, %v489_v56 }
  0xe0   :  { %v14508_v1 = vcombine.high %v692_v60, %v696_v61  ;;  %v572_v2 = vld [vmem:[#allocation5 + $0x380] sm:$0xff]  ;;  %9784 = vmatpush1.bf16.msra.mxu0 %v14499_v63  ;;  %9744 = vmatprep.subr.bf16.mxu1 %v14380_v0  ;;  %v14507_v11 = vcombine.low %v692_v60, %v696_v61  ;;  %v14293_v60 = vcombine.low %v477_v45, %v481_v46 }
  0xe1   :  { %v576_v3 = vld [vmem:[#allocation5 + $0x3a0] sm:$0xff]  ;;  %9745 = vmatpush1.bf16.msra.mxu1 %v14379_v6 }
  0xe2   :  { %v700_v4 = vld [vmem:[#allocation5 + $0x780] sm:$0xff]  ;;  %v14388_v12 = vcombine.high %v572_v2, %v576_v3  ;;  %9785 = vmatprep.subr.bf16.mxu0 %v14508_v1  ;;  %v14387_v20 = vcombine.low %v572_v2, %v576_v3  ;;  %v493_v1 = vld [vmem:[#allocation5 + $0x108] sm:$0xff] }
  0xe3   :  { %v704_v5 = vld [vmem:[#allocation5 + $0x7a0] sm:$0xff]  ;;  %v497_v3 = vld [vmem:[#allocation5 + $0x128] sm:$0xff] }
  0xe4   :  { %v580_v13 = vld [vmem:[#allocation5 + $0x3c0] sm:$0xff]  ;;  %v14516_v14 = vcombine.high %v700_v4, %v704_v5  ;;  %9786 = vmatpush1.bf16.msra.mxu0 %v14507_v11  ;;  %9746 = vmatprep.subr.bf16.mxu1 %v14388_v12  ;;  %v14515_v23 = vcombine.low %v700_v4, %v704_v5  ;;  %v14301_v4 = vcombine.low %v485_v55, %v489_v56 }
  0xe5   :  { %v584_v15 = vld [vmem:[#allocation5 + $0x3e0] sm:$0xff]  ;;  %9747 = vmatpush1.bf16.msra.mxu1 %v14387_v20  ;;  %v14310_v6 = vcombine.high %v493_v1, %v497_v3  ;;  %v14309_v16 = vcombine.low %v493_v1, %v497_v3 }
  0xe6   :  { %v708_v18 = vld [vmem:[#allocation5 + $0x7c0] sm:$0xff]  ;;  %v14396_v24 = vcombine.high %v580_v13, %v584_v15  ;;  %9787 = vmatprep.subr.bf16.mxu0 %v14516_v14  ;;  %v14395_v33 = vcombine.low %v580_v13, %v584_v15  ;;  %v501_v13 = vld [vmem:[#allocation5 + $0x148] sm:$0xff] }
  0xe7   :  { %v712_v19 = vld [vmem:[#allocation5 + $0x7e0] sm:$0xff]  ;;  %v505_v15 = vld [vmem:[#allocation5 + $0x168] sm:$0xff] }
  0xe8   :  { %v14524_v25 = vcombine.high %v708_v18, %v712_v19  ;;  %v716_v31 = vld [vmem:[#allocation5 + $0x800] sm:$0xff]  ;;  %9788 = vmatpush1.bf16.msra.mxu0 %v14515_v23  ;;  %9748 = vmatprep.subr.bf16.mxu1 %v14396_v24  ;;  %v14523_v35 = vcombine.low %v708_v18, %v712_v19  ;;  %v14318_v18 = vcombine.high %v501_v13, %v505_v15  ;;  %v509_v23 = vld [vmem:[#allocation5 + $0x188] sm:$0xff] }
  0xe9   :  { %v720_v32 = vld [vmem:[#allocation5 + $0x820] sm:$0xff]  ;;  %9749 = vmatpush1.bf16.msra.mxu1 %v14395_v33  ;;  %v14317_v26 = vcombine.low %v501_v13, %v505_v15  ;;  %v517_v33 = vld [vmem:[#allocation5 + $0x1c8] sm:$0xff] }
  0xea   :  { %9789 = vmatprep.subr.bf16.mxu0 %v14524_v25  ;;  %v14532_v37 = vcombine.high %v716_v31, %v720_v32  ;;  %v724_v7 = vld [vmem:[#allocation5 + $0x840] sm:$0xff]  ;;  %v14531_v9 = vcombine.low %v716_v31, %v720_v32  ;;  %10210 = vmatprep.subr.bf16.mxu1 %v14278_v36  ;;  %v513_v25 = vld [vmem:[#allocation5 + $0x1a8] sm:$0xff] }
  0xeb   :  { %v728_v8 = vld [vmem:[#allocation5 + $0x860] sm:$0xff]  ;;  %v14326_v30 = vcombine.high %v509_v23, %v513_v25  ;;  %v14325_v36 = vcombine.low %v509_v23, %v513_v25 }
  0xec   :  { %9790 = vmatpush1.bf16.msra.mxu0 %v14523_v35  ;;  %v14540_v44 = vcombine.high %v724_v7, %v728_v8  ;;  %9751 = vmatmul.mubr.bf16.vlgmr.msra.gmra.mrb[0].mxu1 %v17394_v41  ;;  %v732_v49 = vld [vmem:[#allocation5 + $0x880] sm:$0xff]  ;;  %v14539_v52 = vcombine.low %v724_v7, %v728_v8  ;;  %v521_v35 = vld [vmem:[#allocation5 + $0x1e8] sm:$0xff] }
  0xed   :  { %9800 = vmatprep.subr.bf16.mxu0 %v14532_v37  ;;  %v736_v50 = vld [vmem:[#allocation5 + $0x8a0] sm:$0xff]  ;;  %10211 = vmatpush1.bf16.msra.mxu1 %v14277_v42  ;;  %v14334_v38 = vcombine.high %v517_v33, %v521_v35  ;;  %v525_v7 = vld [vmem:[#allocation5 + $0x208] sm:$0xff] }
  0xee   :  { %10212 = vmatprep.subr.bf16.mxu1 %v14286_v10  ;;  %v14548_v54 = vcombine.high %v732_v49, %v736_v50  ;;  %v740_v57 = vld [vmem:[#allocation5 + $0x8c0] sm:$0xff]  ;;  %10242 = vmatprep.mubr.bf16.mxu1 %v17376_v21  ;;  %v14547_v61 = vcombine.low %v732_v49, %v736_v50  ;;  %v529_v42 = vld [vmem:[#allocation5 + $0x228] sm:$0xff] }
  0xef   :  { %9792 = vmatmul.mubr.bf16.vlgmr.msra.gmra.mrb[0].mxu0 %v17396_v43  ;;  %v744_v59 = vld [vmem:[#allocation5 + $0x8e0] sm:$0xff]  ;;  %v533_v49 = vld [vmem:[#allocation5 + $0x248] sm:$0xff] }
  0xf0   :  { %9801 = vmatpush1.bf16.msra.mxu0 %v14531_v9  ;;  %9832 = vmatprep.mubr.bf16.mxu0 %v17398_v48  ;;  %v748_v63 = vld [vmem:[#allocation5 + $0x900] sm:$0xff]  ;;  %v14556_v2 = vcombine.high %v740_v57, %v744_v59  ;;  %v14555_v5 = vcombine.low %v740_v57, %v744_v59  ;;  %v14333_v9 = vcombine.low %v517_v33, %v521_v35  ;;  %v541_v57 = vld [vmem:[#allocation5 + $0x288] sm:$0xff] }
  0xf1   :  { %9802 = vmatprep.subr.bf16.mxu0 %v14540_v44  ;;  %10213 = vmatpush1.bf16.msra.mxu1 %v14285_v51  ;;  %v752_v0 = vld [vmem:[#allocation5 + $0x920] sm:$0xff]  ;;  %v14342_v44 = vcombine.high %v525_v7, %v529_v42  ;;  %v537_v51 = vld [vmem:[#allocation5 + $0x268] sm:$0xff] }
  0xf2   :  { %10214 = vmatprep.subr.bf16.mxu1 %v14294_v53  ;;  %v756_v11 = vld [vmem:[#allocation5 + $0x940] sm:$0xff]  ;;  %v14564_v14 = vcombine.high %v748_v63, %v752_v0  ;;  %v14563_v17 = vcombine.low %v748_v63, %v752_v0 }
  0xf3   :  { %v760_v12 = vld [vmem:[#allocation5 + $0x960] sm:$0xff] }
  0xf4   :  { %9803 = vmatpush1.bf16.msra.mxu0 %v14539_v52  ;;  %v764_v19 = vld [vmem:[#allocation5 + $0x980] sm:$0xff]  ;;  %v14572_v24 = vcombine.high %v756_v11, %v760_v12  ;;  %v14571_v27 = vcombine.low %v756_v11, %v760_v12  ;;  %v14341_v52 = vcombine.low %v525_v7, %v529_v42  ;;  %v585_v42 = vld [vmem:[#allocation5 + $0x3e8] sm:$0xff] }
  0xf5   :  { %9804 = vmatprep.subr.bf16.mxu0 %v14548_v54  ;;  %10215 = vmatpush1.bf16.msra.mxu1 %v14293_v60  ;;  %v768_v20 = vld [vmem:[#allocation5 + $0x9a0] sm:$0xff]  ;;  %v14350_v54 = vcombine.high %v533_v49, %v537_v51  ;;  %v545_v60 = vld [vmem:[#allocation5 + $0x2a8] sm:$0xff] }
  0xf6   :  { %10216 = vmatprep.subr.bf16.mxu1 %v14302_v62  ;;  %v772_v31 = vld [vmem:[#allocation5 + $0x9c0] sm:$0xff]  ;;  %v14580_v34 = vcombine.high %v764_v19, %v768_v20  ;;  %v14579_v37 = vcombine.low %v764_v19, %v768_v20  ;;  %v14358_v63 = vcombine.high %v541_v57, %v545_v60 }
  0xf7   :  { %v776_v32 = vld [vmem:[#allocation5 + $0x9e0] sm:$0xff] }
  0xf8   :  { %9805 = vmatpush1.bf16.msra.mxu0 %v14547_v61  ;;  %v780_v39 = vld [vmem:[#allocation5 + $0xa00] sm:$0xff]  ;;  %v14588_v8 = vcombine.high %v772_v31, %v776_v32  ;;  %v14587_v10 = vcombine.low %v772_v31, %v776_v32  ;;  %v14349_v61 = vcombine.low %v533_v49, %v537_v51 }
  0xf9   :  { %9806 = vmatprep.subr.bf16.mxu0 %v14556_v2  ;;  %10217 = vmatpush1.bf16.msra.mxu1 %v14301_v4  ;;  %v784_v40 = vld [vmem:[#allocation5 + $0xa20] sm:$0xff]  ;;  %v549_v2 = vld [vmem:[#allocation5 + $0x2c8] sm:$0xff] }
  0xfa   :  { %10218 = vmatprep.subr.bf16.mxu1 %v14310_v6  ;;  %v788_v45 = vld [vmem:[#allocation5 + $0xa40] sm:$0xff]  ;;  %v14596_v50 = vcombine.high %v780_v39, %v784_v40  ;;  %v14595_v53 = vcombine.low %v780_v39, %v784_v40  ;;  %v553_v4 = vld [vmem:[#allocation5 + $0x2e8] sm:$0xff] }
  0xfb   :  { %v792_v46 = vld [vmem:[#allocation5 + $0xa60] sm:$0xff]  ;;  %v14366_v11 = vcombine.high %v549_v2, %v553_v4 }
  0xfc   :  { %9807 = vmatpush1.bf16.msra.mxu0 %v14555_v5  ;;  %v796_v55 = vld [vmem:[#allocation5 + $0xa80] sm:$0xff]  ;;  %v14604_v59 = vcombine.high %v788_v45, %v792_v46  ;;  %v14603_v62 = vcombine.low %v788_v45, %v792_v46  ;;  %v14357_v5 = vcombine.low %v541_v57, %v545_v60 }
  0xfd   :  { %9808 = vmatprep.subr.bf16.mxu0 %v14564_v14  ;;  %10219 = vmatpush1.bf16.msra.mxu1 %v14309_v16  ;;  %v800_v56 = vld [vmem:[#allocation5 + $0xaa0] sm:$0xff]  ;;  %v557_v14 = vld [vmem:[#allocation5 + $0x308] sm:$0xff] }
  0xfe   :  { %10220 = vmatprep.subr.bf16.mxu1 %v14318_v18  ;;  %v804_v0 = vld [vmem:[#allocation5 + $0xac0] sm:$0xff]  ;;  %v14612_v3 = vcombine.high %v796_v55, %v800_v56  ;;  %v14611_v6 = vcombine.low %v796_v55, %v800_v56  ;;  %v561_v16 = vld [vmem:[#allocation5 + $0x328] sm:$0xff] }
  0xff   :  { %v808_v1 = vld [vmem:[#allocation5 + $0xae0] sm:$0xff]  ;;  %v14374_v19 = vcombine.high %v557_v14, %v561_v16 }
 0x100   :  { %9809 = vmatpush1.bf16.msra.mxu0 %v14563_v17  ;;  %v812_v12 = vld [vmem:[#allocation5 + $0xb00] sm:$0xff]  ;;  %v14620_v15 = vcombine.high %v804_v0, %v808_v1  ;;  %v14365_v17 = vcombine.low %v549_v2, %v553_v4  ;;  %v14619_v18 = vcombine.low %v804_v0, %v808_v1  ;;  %v597_v0 = vld [vmem:[#allocation5 + $0x448] sm:$0xff] }
 0x101   :  { %9810 = vmatprep.subr.bf16.mxu0 %v14572_v24  ;;  %10221 = vmatpush1.bf16.msra.mxu1 %v14317_v26  ;;  %v816_v13 = vld [vmem:[#allocation5 + $0xb20] sm:$0xff]  ;;  %v565_v24 = vld [vmem:[#allocation5 + $0x348] sm:$0xff] }
 0x102   :  { %10222 = vmatprep.subr.bf16.mxu1 %v14326_v30  ;;  %v820_v20 = vld [vmem:[#allocation5 + $0xb40] sm:$0xff]  ;;  %v14628_v25 = vcombine.high %v812_v12, %v816_v13  ;;  %v569_v26 = vld [vmem:[#allocation5 + $0x368] sm:$0xff]  ;;  %v14627_v30 = vcombine.low %v812_v12, %v816_v13 }
 0x103   :  { %v824_v23 = vld [vmem:[#allocation5 + $0xb60] sm:$0xff]  ;;  %v14382_v31 = vcombine.high %v565_v24, %v569_v26  ;;  %v601_v2 = vld [vmem:[#allocation5 + $0x468] sm:$0xff] }
 0x104   :  { %9811 = vmatpush1.bf16.msra.mxu0 %v14571_v27  ;;  %v14373_v27 = vcombine.low %v557_v14, %v561_v16  ;;  %v828_v32 = vld [vmem:[#allocation5 + $0xb80] sm:$0xff]  ;;  %v14636_v35 = vcombine.high %v820_v20, %v824_v23  ;;  %v605_v12 = vld [vmem:[#allocation5 + $0x488] sm:$0xff]  ;;  %v14413_v16 = vcombine.low %v597_v0, %v601_v2 }
 0x105   :  { %9812 = vmatprep.subr.bf16.mxu0 %v14580_v34  ;;  %10223 = vmatpush1.bf16.msra.mxu1 %v14325_v36  ;;  %v832_v33 = vld [vmem:[#allocation5 + $0xba0] sm:$0xff]  ;;  %v573_v34 = vld [vmem:[#allocation5 + $0x388] sm:$0xff] }
 0x106   :  { %10224 = vmatprep.subr.bf16.mxu1 %v14334_v38  ;;  %v577_v36 = vld [vmem:[#allocation5 + $0x3a8] sm:$0xff]  ;;  %v14635_v38 = vcombine.low %v820_v20, %v824_v23  ;;  %v836_v40 = vld [vmem:[#allocation5 + $0xbc0] sm:$0xff]  ;;  %v14643_v46 = vcombine.low %v828_v32, %v832_v33 }
 0x107   :  { %v14390_v39 = vcombine.high %v573_v34, %v577_v36  ;;  %v840_v7 = vld [vmem:[#allocation5 + $0xbe0] sm:$0xff]  ;;  %v14389_v45 = vcombine.low %v573_v34, %v577_v36  ;;  %v609_v14 = vld [vmem:[#allocation5 + $0x4a8] sm:$0xff] }
 0x108   :  { %9813 = vmatpush1.bf16.msra.mxu0 %v14579_v37  ;;  %v14381_v37 = vcombine.low %v565_v24, %v569_v26  ;;  %v848_v51 = vld [vmem:[#allocation5 + $0xc20] sm:$0xff]  ;;  %v14651_v60 = vcombine.low %v836_v40, %v840_v7  ;;  %v613_v23 = vld [vmem:[#allocation5 + $0x4c8] sm:$0xff]  ;;  %v14421_v26 = vcombine.low %v605_v12, %v609_v14 }
 0x109   :  { %9814 = vmatprep.subr.bf16.mxu0 %v14588_v8  ;;  %10225 = vmatpush1.bf16.msra.mxu1 %v14333_v9  ;;  %v581_v8 = vld [vmem:[#allocation5 + $0x3c8] sm:$0xff]  ;;  %v872_v20 = vld [vmem:[#allocation5 + $0xce0] sm:$0xff] }
 0x10a   :  { %10226 = vmatprep.subr.bf16.mxu1 %v14342_v44  ;;  %v16418_v9 = vld [vmem:[#allocation2 + $0xc] ss:$48 sps:$4 sm:$0xff]   ;;  %v14398_v49 = vcombine.high %v581_v8, %v585_v42  ;;  %v14397_v57 = vcombine.low %v581_v8, %v585_v42 }
 0x10b   :  { %v16419_v44 = vld [vmem:[#allocation2 + $0x6c] ss:$48 sps:$4 sm:$0xff]   ;;  %v17405_v55 = vrot.slane %v16418_v9, %v17358_v58 }
 0x10c   :  { %9815 = vmatpush1.bf16.msra.mxu0 %v14587_v10  ;;  %v14644_v10 = vcombine.high %v828_v32, %v832_v33  ;;  %v17408_v56 = vrot.slane %v16419_v44, %v17358_v58  ;;  %v880_v32 = vld [vmem:[#allocation5 + $0xd20] sm:$0xff]  ;;  %v621_v33 = vld [vmem:[#allocation5 + $0x508] sm:$0xff] }
 0x10d   :  { %9816 = vmatprep.subr.bf16.mxu0 %v14596_v50  ;;  %10227 = vmatpush1.bf16.msra.mxu1 %v14341_v52  ;;  %v844_v50 = vld [vmem:[#allocation5 + $0xc00] sm:$0xff]  ;;  %v589_v52 = vld [vmem:[#allocation5 + $0x408] sm:$0xff] }
 0x10e   :  { %10228 = vmatprep.subr.bf16.mxu1 %v14350_v54  ;;  %v593_v54 = vld [vmem:[#allocation5 + $0x428] sm:$0xff]  ;;  %v14660_v1 = vcombine.high %v844_v50, %v848_v51 }
 0x10f   :  { %v14405_v4 = vcombine.low %v589_v52, %v593_v54  ;;  %v633_v42 = vld [vmem:[#allocation5 + $0x568] sm:$0xff] }
 0x110   :  { %9817 = vmatpush1.bf16.msra.mxu0 %v14595_v53  ;;  %v14652_v53 = vcombine.high %v836_v40, %v840_v7  ;;  %v888_v40 = vld [vmem:[#allocation5 + $0xd60] sm:$0xff]  ;;  %v629_v7 = vld [vmem:[#allocation5 + $0x548] sm:$0xff] }
 0x111   :  { %9818 = vmatprep.subr.bf16.mxu0 %v14604_v59  ;;  %10229 = vmatpush1.bf16.msra.mxu1 %v14349_v61  ;;  %v264_v59 = vcombine.low %v17383_v28, %v17386_v29  ;;  %v14406_v61 = vcombine.high %v589_v52, %v593_v54  ;;  %v14414_v28 = vcombine.high %v597_v0, %v601_v2  ;;  %v860_v29 = vld [vmem:[#allocation5 + $0xc80] sm:$0xff] }
 0x112   :  { %10230 = vmatprep.subr.bf16.mxu1 %v14358_v63  ;;  %v856_v63 = vld [vmem:[#allocation5 + $0xc60] sm:$0xff]  ;;  %v14446_v44 = vcombine.high %v629_v7, %v633_v42  ;;  %v14445_v52 = vcombine.low %v629_v7, %v633_v42 }
 0x113   :  { %v908_v2 = vld [vmem:[#allocation5 + $0xe00] sm:$0xff] }
 0x114   :  { %9819 = vmatpush1.bf16.msra.mxu0 %v14603_v62  ;;  %v852_v62 = vld [vmem:[#allocation5 + $0xc40] sm:$0xff] }
 0x115   :  { %9820 = vmatprep.subr.bf16.mxu0 %v14612_v3  ;;  %10231 = vmatpush1.bf16.msra.mxu1 %v14357_v5  ;;  %v267_v3 = vcombine.high %v17405_v55, %v17408_v56  ;;  %v17414_v5 = vpack.c.bf16 %v264_v59, %v264_v59  ;;  %v14668_v13 = vcombine.high %v852_v62, %v856_v63  ;;  %v904_v59 = vld [vmem:[#allocation5 + $0xde0] sm:$0xff] }
 0x116   :  { %10232 = vmatprep.subr.bf16.mxu1 %v14366_v11  ;;  %v864_v11 = vld [vmem:[#allocation5 + $0xca0] sm:$0xff] }
 0x117   :  { %v14676_v24 = vcombine.high %v860_v29, %v864_v11  ;;  %v944_v42 = vld [vmem:[#allocation5 + $0xf20] sm:$0xff] }
 0x118   :  { %9821 = vmatpush1.bf16.msra.mxu0 %v14611_v6  ;;  %v14659_v6 = vcombine.low %v844_v50, %v848_v51  ;;  %v641_v51 = vld [vmem:[#allocation5 + $0x5a8] sm:$0xff] }
 0x119   :  { %9822 = vmatprep.subr.bf16.mxu0 %v14620_v15  ;;  %10233 = vmatpush1.bf16.msra.mxu1 %v14365_v17  ;;  %v17416_v15 = vpack.c.bf16 %v267_v3, %v267_v3  ;;  %v14667_v17 = vcombine.low %v852_v62, %v856_v63  ;;  %v649_v62 = vld [vmem:[#allocation5 + $0x5e8] sm:$0xff]  ;;  %v912_v3 = vld [vmem:[#allocation5 + $0xe20] sm:$0xff] }
 0x11a   :  { %10234 = vmatprep.subr.bf16.mxu1 %v14374_v19  ;;  %v868_v19 = vld [vmem:[#allocation5 + $0xcc0] sm:$0xff] }
 0x11b   :  { %v14684_v34 = vcombine.high %v868_v19, %v872_v20 }
 0x11c   :  { %9823 = vmatpush1.bf16.msra.mxu0 %v14619_v18  ;;  %v14422_v18 = vcombine.high %v605_v12, %v609_v14  ;;  %v920_v14 = vld [vmem:[#allocation5 + $0xe60] sm:$0xff] }
 0x11d   :  { %9824 = vmatprep.subr.bf16.mxu0 %v14628_v25  ;;  %10235 = vmatpush1.bf16.msra.mxu1 %v14373_v27  ;;  %v617_v25 = vld [vmem:[#allocation5 + $0x4e8] sm:$0xff]  ;;  %v14675_v27 = vcombine.low %v860_v29, %v864_v11 }
 0x11e   :  { %10236 = vmatprep.subr.bf16.mxu1 %v14382_v31  ;;  %v876_v31 = vld [vmem:[#allocation5 + $0xd00] sm:$0xff]  ;;  %v14429_v36 = vcombine.low %v613_v23, %v617_v25 }
 0x11f   :  { %v14692_v8 = vcombine.high %v876_v31, %v880_v32 }
 0x120   :  { %9825 = vmatpush1.bf16.msra.mxu0 %v14627_v30  ;;  %v14430_v30 = vcombine.high %v613_v23, %v617_v25  ;;  %v928_v25 = vld [vmem:[#allocation5 + $0xea0] sm:$0xff] }
 0x121   :  { %9826 = vmatprep.subr.bf16.mxu0 %v14636_v35  ;;  %10237 = vmatpush1.bf16.msra.mxu1 %v14381_v37  ;;  %v625_v35 = vld [vmem:[#allocation5 + $0x528] sm:$0xff]  ;;  %v14683_v37 = vcombine.low %v868_v19, %v872_v20  ;;  %v14723_v20 = vcombine.low %v908_v2, %v912_v3 }
 0x122   :  { %10238 = vmatprep.subr.bf16.mxu1 %v14390_v39  ;;  %v884_v39 = vld [vmem:[#allocation5 + $0xd40] sm:$0xff]  ;;  %v14437_v9 = vcombine.low %v621_v33, %v625_v35 }
 0x123   :  { %v14700_v50 = vcombine.high %v884_v39, %v888_v40 }
 0x124   :  { %9827 = vmatpush1.bf16.msra.mxu0 %v14635_v38  ;;  %v14438_v38 = vcombine.high %v621_v33, %v625_v35  ;;  %v936_v35 = vld [vmem:[#allocation5 + $0xee0] sm:$0xff] }
 0x125   :  { %9828 = vmatprep.subr.bf16.mxu0 %v14644_v10  ;;  %10239 = vmatpush1.bf16.msra.mxu1 %v14389_v45  ;;  %v14691_v10 = vcombine.low %v876_v31, %v880_v32  ;;  %v892_v45 = vld [vmem:[#allocation5 + $0xd80] sm:$0xff] }
 0x126   :  { %10240 = vmatprep.subr.bf16.mxu1 %v14398_v49  ;;  %v637_v49 = vld [vmem:[#allocation5 + $0x588] sm:$0xff] }
 0x127   :  { %v14454_v54 = vcombine.high %v637_v49, %v641_v51  ;;  %v14453_v63 = vcombine.low %v637_v49, %v641_v51  ;;  %v952_v51 = vld [vmem:[#allocation5 + $0xf60] sm:$0xff] }
 0x128   :  { %9829 = vmatpush1.bf16.msra.mxu0 %v14643_v46  ;;  %v896_v46 = vld [vmem:[#allocation5 + $0xda0] sm:$0xff] }
 0x129   :  { %9830 = vmatprep.subr.bf16.mxu0 %v14652_v53  ;;  %10241 = vmatpush1.bf16.msra.mxu1 %v14397_v57  ;;  %v14699_v53 = vcombine.low %v884_v39, %v888_v40  ;;  %v900_v57 = vld [vmem:[#allocation5 + $0xdc0] sm:$0xff]  ;;  %v14707_v0 = vcombine.low %v892_v45, %v896_v46 }
 0x12a   :  { %10251 = vmatprep.subr.bf16.mxu1 %v14406_v61  ;;  %v645_v61 = vld [vmem:[#allocation5 + $0x5c8] sm:$0xff]  ;;  %v14715_v11 = vcombine.low %v900_v57, %v904_v59 }
 0x12b   :  { %v14461_v29 = vcombine.low %v645_v61, %v649_v62 }
 0x12c   :  { %9831 = vmatpush1.bf16.msra.mxu0 %v14651_v60  ;;  %10243 = vmatmul.mubr.bf16.vlgmr.msra.gmra.mrb[4].mxu1 %v17394_v41  ;;  %v14708_v60 = vcombine.high %v892_v45, %v896_v46 }
 0x12d   :  { %9841 = vmatprep.subr.bf16.mxu0 %v14660_v1  ;;  %10252 = vmatpush1.bf16.msra.mxu1 %v14405_v4  ;;  %v14462_v1 = vcombine.high %v645_v61, %v649_v62  ;;  %v653_v4 = vld [vmem:[#allocation5 + $0x608] sm:$0xff]  ;;  %v956_v61 = vld [vmem:[#allocation5 + $0xf80] sm:$0xff] }
 0x12e   :  { %10253 = vmatprep.subr.bf16.mxu1 %v14414_v28  ;;  %10283 = vmatprep.mubr.bf16.mxu1 %v17378_v22  ;;  %v657_v28 = vld [vmem:[#allocation5 + $0x628] sm:$0xff]  ;;  %v960_v62 = vld [vmem:[#allocation5 + $0xfa0] sm:$0xff] }
 0x12f   :  { %9833 = vmatmul.mubr.bf16.vlgmr.msra.gmra.mrb[0].mxu0 %v17414_v5  ;;  %v14470_v12 = vcombine.high %v653_v4, %v657_v28  ;;  %v14469_v19 = vcombine.low %v653_v4, %v657_v28  ;;  %v968_v28 = vld [vmem:[#allocation5 + $0xfe0] sm:$0xff] }
 0x130   :  { %9842 = vmatpush1.bf16.msra.mxu0 %v14659_v6  ;;  %9873 = vmatprep.mubr.bf16.mxu0 %v17416_v15  ;;  %v14716_v6 = vcombine.high %v900_v57, %v904_v59 }
 0x131   :  { %9843 = vmatprep.subr.bf16.mxu0 %v14668_v13  ;;  %10254 = vmatpush1.bf16.msra.mxu1 %v14413_v16  ;;  %v916_v13 = vld [vmem:[#allocation5 + $0xe40] sm:$0xff]  ;;  %v661_v16 = vld [vmem:[#allocation5 + $0x648] sm:$0xff] }
 0x132   :  { %10255 = vmatprep.subr.bf16.mxu1 %v14422_v18  ;;  %v665_v18 = vld [vmem:[#allocation5 + $0x668] sm:$0xff]  ;;  %v14731_v32 = vcombine.low %v916_v13, %v920_v14 }
 0x133   :  { %v14478_v23 = vcombine.high %v661_v16, %v665_v18  ;;  %v14477_v31 = vcombine.low %v661_v16, %v665_v18 }
 0x134   :  { %9844 = vmatpush1.bf16.msra.mxu0 %v14667_v17  ;;  %v14724_v17 = vcombine.high %v908_v2, %v912_v3 }
 0x135   :  { %9845 = vmatprep.subr.bf16.mxu0 %v14676_v24  ;;  %10256 = vmatpush1.bf16.msra.mxu1 %v14421_v26  ;;  %v924_v24 = vld [vmem:[#allocation5 + $0xe80] sm:$0xff]  ;;  %v669_v26 = vld [vmem:[#allocation5 + $0x688] sm:$0xff] }
 0x136   :  { %10257 = vmatprep.subr.bf16.mxu1 %v14430_v30  ;;  %v673_v30 = vld [vmem:[#allocation5 + $0x6a8] sm:$0xff]  ;;  %v14739_v40 = vcombine.low %v924_v24, %v928_v25 }
 0x137   :  { %v14486_v33 = vcombine.high %v669_v26, %v673_v30  ;;  %v14485_v39 = vcombine.low %v669_v26, %v673_v30 }
 0x138   :  { %9846 = vmatpush1.bf16.msra.mxu0 %v14675_v27  ;;  %v14732_v27 = vcombine.high %v916_v13, %v920_v14  ;;  %v14772_v13 = vcombine.high %v956_v61, %v960_v62  ;;  %v16422_v14 = vld [vmem:[#allocation2 + $0x70] ss:$48 sps:$4 sm:$0xff]  }
 0x139   :  { %9847 = vmatprep.subr.bf16.mxu0 %v14684_v34  ;;  %10258 = vmatpush1.bf16.msra.mxu1 %v14429_v36  ;;  %v932_v34 = vld [vmem:[#allocation5 + $0xec0] sm:$0xff]  ;;  %v677_v36 = vld [vmem:[#allocation5 + $0x6c8] sm:$0xff] }
 0x13a   :  { %10259 = vmatprep.subr.bf16.mxu1 %v14438_v38  ;;  %v681_v38 = vld [vmem:[#allocation5 + $0x6e8] sm:$0xff]  ;;  %v14747_v46 = vcombine.low %v932_v34, %v936_v35 }
 0x13b   :  { %v14494_v7 = vcombine.high %v677_v36, %v681_v38  ;;  %v14493_v45 = vcombine.low %v677_v36, %v681_v38  ;;  %v725_v36 = vld [vmem:[#allocation5 + $0x848] sm:$0xff] }
 0x13c   :  { %9848 = vmatpush1.bf16.msra.mxu0 %v14683_v37  ;;  %v14740_v37 = vcombine.high %v924_v24, %v928_v25  ;;  %v721_v25 = vld [vmem:[#allocation5 + $0x828] sm:$0xff] }
 0x13d   :  { %9849 = vmatprep.subr.bf16.mxu0 %v14692_v8  ;;  %10260 = vmatpush1.bf16.msra.mxu1 %v14437_v9  ;;  %v940_v8 = vld [vmem:[#allocation5 + $0xf00] sm:$0xff]  ;;  %v685_v9 = vld [vmem:[#allocation5 + $0x708] sm:$0xff] }
 0x13e   :  { %10261 = vmatprep.subr.bf16.mxu1 %v14446_v44  ;;  %v689_v44 = vld [vmem:[#allocation5 + $0x728] sm:$0xff]  ;;  %v14755_v59 = vcombine.low %v940_v8, %v944_v42 }
 0x13f   :  { %v14502_v49 = vcombine.high %v685_v9, %v689_v44  ;;  %v14501_v57 = vcombine.low %v685_v9, %v689_v44  ;;  %v729_v38 = vld [vmem:[#allocation5 + $0x868] sm:$0xff] }
 0x140   :  { %9850 = vmatpush1.bf16.msra.mxu0 %v14691_v10  ;;  %v14748_v10 = vcombine.high %v932_v34, %v936_v35  ;;  %v980_v34 = vld [vmem:[#allocation5 + $0x1040] sm:$0xff]  ;;  %v733_v9 = vld [vmem:[#allocation5 + $0x888] sm:$0xff] }
 0x141   :  { %9851 = vmatprep.subr.bf16.mxu0 %v14700_v50  ;;  %10262 = vmatpush1.bf16.msra.mxu1 %v14445_v52  ;;  %v948_v50 = vld [vmem:[#allocation5 + $0xf40] sm:$0xff]  ;;  %v693_v52 = vld [vmem:[#allocation5 + $0x748] sm:$0xff] }
 0x142   :  { %10263 = vmatprep.subr.bf16.mxu1 %v14454_v54  ;;  %v697_v54 = vld [vmem:[#allocation5 + $0x768] sm:$0xff]  ;;  %v14763_v3 = vcombine.low %v948_v50, %v952_v51  ;;  %v984_v35 = vld [vmem:[#allocation5 + $0x1060] sm:$0xff] }
 0x143   :  { %v14509_v2 = vcombine.low %v693_v52, %v697_v54  ;;  %v737_v44 = vld [vmem:[#allocation5 + $0x8a8] sm:$0xff] }
 0x144   :  { %9852 = vmatpush1.bf16.msra.mxu0 %v14699_v53  ;;  %v14756_v53 = vcombine.high %v940_v8, %v944_v42  ;;  %v992_v42 = vld [vmem:[#allocation5 + $0x10a0] sm:$0xff] }
 0x145   :  { %9853 = vmatprep.subr.bf16.mxu0 %v14708_v60  ;;  %10264 = vmatpush1.bf16.msra.mxu1 %v14453_v63  ;;  %v14510_v60 = vcombine.high %v693_v52, %v697_v54  ;;  %v701_v63 = vld [vmem:[#allocation5 + $0x788] sm:$0xff]  ;;  %v1000_v52 = vld [vmem:[#allocation5 + $0x10e0] sm:$0xff] }
 0x146   :  { %10265 = vmatprep.subr.bf16.mxu1 %v14462_v1  ;;  %v705_v1 = vld [vmem:[#allocation5 + $0x7a8] sm:$0xff] }
 0x147   :  { %v14518_v4 = vcombine.high %v701_v63, %v705_v1  ;;  %v14517_v16 = vcombine.low %v701_v63, %v705_v1  ;;  %v1008_v63 = vld [vmem:[#allocation5 + $0x1120] sm:$0xff] }
 0x148   :  { %9854 = vmatpush1.bf16.msra.mxu0 %v14707_v0  ;;  %v14764_v0 = vcombine.high %v948_v50, %v952_v51  ;;  %v14550_v50 = vcombine.high %v733_v9, %v737_v44  ;;  %v996_v51 = vld [vmem:[#allocation5 + $0x10c0] sm:$0xff] }
 0x149   :  { %9855 = vmatprep.subr.bf16.mxu0 %v14716_v6  ;;  %10266 = vmatpush1.bf16.msra.mxu1 %v14461_v29  ;;  %v964_v6 = vld [vmem:[#allocation5 + $0xfc0] sm:$0xff]  ;;  %v709_v29 = vld [vmem:[#allocation5 + $0x7c8] sm:$0xff]  ;;  %v14812_v1 = vcombine.high %v996_v51, %v1000_v52 }
 0x14a   :  { %10267 = vmatprep.subr.bf16.mxu1 %v14470_v12  ;;  %v16420_v12 = vld [vmem:[#allocation2 + $0x10] ss:$48 sps:$4 sm:$0xff]   ;;  %v14780_v24 = vcombine.high %v964_v6, %v968_v28 }
 0x14b   :  { %v17423_v26 = vrot.slane %v16420_v12, %v17358_v58 }
 0x14c   :  { %9856 = vmatpush1.bf16.msra.mxu0 %v14715_v11  ;;  %v713_v11 = vld [vmem:[#allocation5 + $0x7e8] sm:$0xff] }
 0x14d   :  { %9857 = vmatprep.subr.bf16.mxu0 %v14724_v17  ;;  %10268 = vmatpush1.bf16.msra.mxu1 %v14469_v19  ;;  %v14771_v17 = vcombine.low %v956_v61, %v960_v62  ;;  %v14526_v18 = vcombine.high %v709_v29, %v713_v11  ;;  %v972_v19 = vld [vmem:[#allocation5 + $0x1000] sm:$0xff]  ;;  %v14525_v30 = vcombine.low %v709_v29, %v713_v11  ;;  %v757_v11 = vld [vmem:[#allocation5 + $0x948] sm:$0xff] }
 0x14e   :  { %10269 = vmatprep.subr.bf16.mxu1 %v14478_v23  ;;  %v717_v23 = vld [vmem:[#allocation5 + $0x808] sm:$0xff]  ;;  %v1004_v62 = vld [vmem:[#allocation5 + $0x1100] sm:$0xff] }
 0x14f   :  { %v1016_v29 = vld [vmem:[#allocation5 + $0x1160] sm:$0xff]  ;;  %v14820_v12 = vcombine.high %v1004_v62, %v1008_v63 }
 0x150   :  { %9858 = vmatpush1.bf16.msra.mxu0 %v14723_v20  ;;  %v976_v20 = vld [vmem:[#allocation5 + $0x1020] sm:$0xff] }
 0x151   :  { %9859 = vmatprep.subr.bf16.mxu0 %v14732_v27  ;;  %10270 = vmatpush1.bf16.msra.mxu1 %v14477_v31  ;;  %v17426_v27 = vrot.slane %v16422_v14, %v17358_v58  ;;  %v266_v31 = vcombine.low %v17405_v55, %v17408_v56  ;;  %v14787_v8 = vcombine.low %v972_v19, %v976_v20  ;;  %v988_v56 = vld [vmem:[#allocation5 + $0x1080] sm:$0xff] }
 0x152   :  { %10271 = vmatprep.subr.bf16.mxu1 %v14486_v33  ;;  %v14534_v33 = vcombine.high %v717_v23, %v721_v25  ;;  %v14542_v55 = vcombine.high %v725_v36, %v729_v38  ;;  %v14804_v54 = vcombine.high %v988_v56, %v992_v42 }
 0x154   :  { %9860 = vmatpush1.bf16.msra.mxu0 %v14731_v32  ;;  %v14779_v32 = vcombine.low %v964_v6, %v968_v28  ;;  %v1012_v28 = vld [vmem:[#allocation5 + $0x1140] sm:$0xff] }
 0x155   :  { %9861 = vmatprep.subr.bf16.mxu0 %v14740_v37  ;;  %10272 = vmatpush1.bf16.msra.mxu1 %v14485_v39  ;;  %v14788_v37 = vcombine.high %v972_v19, %v976_v20  ;;  %v301_v39 = vcombine.high %v17423_v26, %v17426_v27  ;;  %v1024_v19 = vld [vmem:[#allocation5 + $0x11a0] sm:$0xff]  ;;  %v765_v20 = vld [vmem:[#allocation5 + $0x988] sm:$0xff] }
 0x156   :  { %10273 = vmatprep.subr.bf16.mxu1 %v14494_v7  ;;  %v17432_v7 = vpack.c.bf16 %v266_v31, %v266_v31 }
 0x158   :  { %9862 = vmatpush1.bf16.msra.mxu0 %v14739_v40  ;;  %v14533_v40 = vcombine.low %v717_v23, %v721_v25  ;;  %v14828_v23 = vcombine.high %v1012_v28, %v1016_v29 }
 0x159   :  { %9863 = vmatprep.subr.bf16.mxu0 %v14748_v10  ;;  %10274 = vmatpush1.bf16.msra.mxu1 %v14493_v45  ;;  %v14796_v10 = vcombine.high %v980_v34, %v984_v35  ;;  %v17434_v45 = vpack.c.bf16 %v301_v39, %v301_v39 }
 0x15a   :  { %10275 = vmatprep.subr.bf16.mxu1 %v14502_v49  ;;  %v14795_v49 = vcombine.low %v980_v34, %v984_v35  ;;  %v773_v34 = vld [vmem:[#allocation5 + $0x9c8] sm:$0xff] }
 0x15c   :  { %9864 = vmatpush1.bf16.msra.mxu0 %v14747_v46  ;;  %v14541_v46 = vcombine.low %v725_v36, %v729_v38  ;;  %v777_v36 = vld [vmem:[#allocation5 + $0x9e8] sm:$0xff] }
 0x15d   :  { %9865 = vmatprep.subr.bf16.mxu0 %v14756_v53  ;;  %10276 = vmatpush1.bf16.msra.mxu1 %v14501_v57  ;;  %v741_v53 = vld [vmem:[#allocation5 + $0x8c8] sm:$0xff]  ;;  %v14590_v39 = vcombine.high %v773_v34, %v777_v36 }
 0x15e   :  { %10277 = vmatprep.subr.bf16.mxu1 %v14510_v60  ;;  %v745_v57 = vld [vmem:[#allocation5 + $0x8e8] sm:$0xff]  ;;  %v14803_v60 = vcombine.low %v988_v56, %v992_v42 }
 0x15f   :  { %v14558_v61 = vcombine.high %v741_v53, %v745_v57  ;;  %v785_v42 = vld [vmem:[#allocation5 + $0xa28] sm:$0xff] }
 0x160   :  { %9866 = vmatpush1.bf16.msra.mxu0 %v14755_v59  ;;  %v14549_v59 = vcombine.low %v733_v9, %v737_v44  ;;  %v14589_v9 = vcombine.low %v773_v34, %v777_v36 }
 0x161   :  { %9867 = vmatprep.subr.bf16.mxu0 %v14764_v0  ;;  %10278 = vmatpush1.bf16.msra.mxu1 %v14509_v2  ;;  %v749_v0 = vld [vmem:[#allocation5 + $0x908] sm:$0xff] }
 0x162   :  { %10279 = vmatprep.subr.bf16.mxu1 %v14518_v4  ;;  %v753_v2 = vld [vmem:[#allocation5 + $0x928] sm:$0xff]  ;;  %v14811_v4 = vcombine.low %v996_v51, %v1000_v52 }
 0x163   :  { %v14566_v6 = vcombine.high %v749_v0, %v753_v2  ;;  %v14565_v14 = vcombine.low %v749_v0, %v753_v2  ;;  %v793_v52 = vld [vmem:[#allocation5 + $0xa68] sm:$0xff] }
 0x164   :  { %9868 = vmatpush1.bf16.msra.mxu0 %v14763_v3  ;;  %v14557_v3 = vcombine.low %v741_v53, %v745_v57 }
 0x165   :  { %9869 = vmatprep.subr.bf16.mxu0 %v14772_v13  ;;  %10280 = vmatpush1.bf16.msra.mxu1 %v14517_v16  ;;  %v761_v13 = vld [vmem:[#allocation5 + $0x968] sm:$0xff]  ;;  %v14819_v16 = vcombine.low %v1004_v62, %v1008_v63 }
 0x166   :  { %10281 = vmatprep.subr.bf16.mxu1 %v14526_v18  ;;  %v1020_v18 = vld [vmem:[#allocation5 + $0x1180] sm:$0xff]  ;;  %v14573_v25 = vcombine.low %v757_v11, %v761_v13  ;;  %v801_v63 = vld [vmem:[#allocation5 + $0xaa8] sm:$0xff] }
 0x167   :  { %v14836_v35 = vcombine.high %v1020_v18, %v1024_v19  ;;  %v14835_v38 = vcombine.low %v1020_v18, %v1024_v19  ;;  %v817_v19 = vld [vmem:[#allocation5 + $0xb28] sm:$0xff] }
 0x168   :  { %9870 = vmatpush1.bf16.msra.mxu0 %v14771_v17  ;;  %v14574_v17 = vcombine.high %v757_v11, %v761_v13 }
 0x169   :  { %9871 = vmatprep.subr.bf16.mxu0 %v14780_v24  ;;  %10282 = vmatpush1.bf16.msra.mxu1 %v14525_v30  ;;  %v769_v24 = vld [vmem:[#allocation5 + $0x9a8] sm:$0xff]  ;;  %v14827_v30 = vcombine.low %v1012_v28, %v1016_v29 }
 0x16a   :  { %10292 = vmatprep.subr.bf16.mxu1 %v14534_v33  ;;  %v14582_v31 = vcombine.high %v765_v20, %v769_v24  ;;  %v1032_v33 = vld [vmem:[#allocation5 + $0x11e0] sm:$0xff]  ;;  %v809_v29 = vld [vmem:[#allocation5 + $0xae8] sm:$0xff] }
 0x16c   :  { %9872 = vmatpush1.bf16.msra.mxu0 %v14779_v32  ;;  %10284 = vmatmul.mubr.bf16.vlgmr.msra.gmra.mrb[4].mxu1 %v17396_v43  ;;  %v1028_v32 = vld [vmem:[#allocation5 + $0x11c0] sm:$0xff] }
 0x16d   :  { %9882 = vmatprep.subr.bf16.mxu0 %v14788_v37  ;;  %10293 = vmatpush1.bf16.msra.mxu1 %v14533_v40  ;;  %v14581_v37 = vcombine.low %v765_v20, %v769_v24  ;;  %v1036_v40 = vld [vmem:[#allocation5 + $0x1200] sm:$0xff]  ;;  %v14844_v56 = vcombine.high %v1028_v32, %v1032_v33 }
 0x16e   :  { %10294 = vmatprep.subr.bf16.mxu1 %v14542_v55  ;;  %10324 = vmatprep.mubr.bf16.mxu1 %v17398_v48  ;;  %v781_v55 = vld [vmem:[#allocation5 + $0xa08] sm:$0xff] }
 0x16f   :  { %9874 = vmatmul.mubr.bf16.vlgmr.msra.gmra.mrb[0].mxu0 %v17432_v7  ;;  %v14598_v44 = vcombine.high %v781_v55, %v785_v42  ;;  %v14597_v53 = vcombine.low %v781_v55, %v785_v42 }
 0x170   :  { %9883 = vmatpush1.bf16.msra.mxu0 %v14787_v8  ;;  %9914 = vmatprep.mubr.bf16.mxu0 %v17434_v45  ;;  %v1040_v8 = vld [vmem:[#allocation5 + $0x1220] sm:$0xff] }
 0x171   :  { %9884 = vmatprep.subr.bf16.mxu0 %v14796_v10  ;;  %10295 = vmatpush1.bf16.msra.mxu1 %v14541_v46  ;;  %v14843_v10 = vcombine.low %v1028_v32, %v1032_v33  ;;  %v1044_v46 = vld [vmem:[#allocation5 + $0x1240] sm:$0xff]  ;;  %v14852_v51 = vcombine.high %v1036_v40, %v1040_v8  ;;  %v825_v33 = vld [vmem:[#allocation5 + $0xb68] sm:$0xff] }
 0x172   :  { %10296 = vmatprep.subr.bf16.mxu1 %v14550_v50  ;;  %v789_v50 = vld [vmem:[#allocation5 + $0xa48] sm:$0xff] }
 0x173   :  { %v14606_v57 = vcombine.high %v789_v50, %v793_v52  ;;  %v14605_v0 = vcombine.low %v789_v50, %v793_v52 }
 0x174   :  { %9885 = vmatpush1.bf16.msra.mxu0 %v14795_v49  ;;  %v1048_v49 = vld [vmem:[#allocation5 + $0x1260] sm:$0xff] }
 0x175   :  { %9886 = vmatprep.subr.bf16.mxu0 %v14804_v54  ;;  %10297 = vmatpush1.bf16.msra.mxu1 %v14549_v59  ;;  %v14851_v54 = vcombine.low %v1036_v40, %v1040_v8  ;;  %v1052_v59 = vld [vmem:[#allocation5 + $0x1280] sm:$0xff]  ;;  %v14860_v62 = vcombine.high %v1044_v46, %v1048_v49  ;;  %v833_v8 = vld [vmem:[#allocation5 + $0xba8] sm:$0xff] }
 0x176   :  { %10298 = vmatprep.subr.bf16.mxu1 %v14558_v61  ;;  %v797_v61 = vld [vmem:[#allocation5 + $0xa88] sm:$0xff] }
 0x177   :  { %v14614_v2 = vcombine.high %v797_v61, %v801_v63  ;;  %v14613_v11 = vcombine.low %v797_v61, %v801_v63 }
 0x178   :  { %9887 = vmatpush1.bf16.msra.mxu0 %v14803_v60  ;;  %v1056_v60 = vld [vmem:[#allocation5 + $0x12a0] sm:$0xff] }
 0x179   :  { %9888 = vmatprep.subr.bf16.mxu0 %v14812_v1  ;;  %10299 = vmatpush1.bf16.msra.mxu1 %v14557_v3  ;;  %v14859_v1 = vcombine.low %v1044_v46, %v1048_v49  ;;  %v1060_v3 = vld [vmem:[#allocation5 + $0x12c0] sm:$0xff]  ;;  %v14868_v28 = vcombine.high %v1052_v59, %v1056_v60  ;;  %v841_v46 = vld [vmem:[#allocation5 + $0xbe8] sm:$0xff] }
 0x17a   :  { %10300 = vmatprep.subr.bf16.mxu1 %v14566_v6  ;;  %v805_v6 = vld [vmem:[#allocation5 + $0xac8] sm:$0xff]  ;;  %v16424_v49 = vld [vmem:[#allocation2 + $0x14] ss:$48 sps:$4 sm:$0xff]  }
 0x17b   :  { %v14622_v13 = vcombine.high %v805_v6, %v809_v29  ;;  %v14621_v20 = vcombine.low %v805_v6, %v809_v29  ;;  %v17441_v63 = vrot.slane %v16424_v49, %v17358_v58  ;;  %v1108_v6 = vld [vmem:[#allocation5 + $0x1440] sm:$0xff]  ;;  %v853_v29 = vld [vmem:[#allocation5 + $0xc48] sm:$0xff] }
 0x17c   :  { %9889 = vmatpush1.bf16.msra.mxu0 %v14811_v4  ;;  %v1064_v4 = vld [vmem:[#allocation5 + $0x12e0] sm:$0xff]  ;;  %v885_v49 = vld [vmem:[#allocation5 + $0xd48] sm:$0xff] }
 0x17d   :  { %9890 = vmatprep.subr.bf16.mxu0 %v14820_v12  ;;  %10301 = vmatpush1.bf16.msra.mxu1 %v14565_v14  ;;  %v14867_v12 = vcombine.low %v1052_v59, %v1056_v60  ;;  %v1068_v14 = vld [vmem:[#allocation5 + $0x1300] sm:$0xff]  ;;  %v14876_v18 = vcombine.high %v1060_v3, %v1064_v4  ;;  %v845_v60 = vld [vmem:[#allocation5 + $0xc08] sm:$0xff] }
 0x17e   :  { %10302 = vmatprep.subr.bf16.mxu1 %v14574_v17  ;;  %v813_v17 = vld [vmem:[#allocation5 + $0xb08] sm:$0xff]  ;;  %v1104_v59 = vld [vmem:[#allocation5 + $0x1420] sm:$0xff] }
 0x17f   :  { %v14630_v24 = vcombine.high %v813_v17, %v817_v19  ;;  %v14629_v34 = vcombine.low %v813_v17, %v817_v19 }
 0x180   :  { %9891 = vmatpush1.bf16.msra.mxu0 %v14819_v16  ;;  %v1072_v16 = vld [vmem:[#allocation5 + $0x1320] sm:$0xff] }
 0x181   :  { %9892 = vmatprep.subr.bf16.mxu0 %v14828_v23  ;;  %10303 = vmatpush1.bf16.msra.mxu1 %v14573_v25  ;;  %v14875_v23 = vcombine.low %v1060_v3, %v1064_v4  ;;  %v1076_v25 = vld [vmem:[#allocation5 + $0x1340] sm:$0xff]  ;;  %v14884_v32 = vcombine.high %v1068_v14, %v1072_v16 }
 0x182   :  { %10304 = vmatprep.subr.bf16.mxu1 %v14582_v31  ;;  %v821_v31 = vld [vmem:[#allocation5 + $0xb48] sm:$0xff] }
 0x183   :  { %v14638_v36 = vcombine.high %v821_v31, %v825_v33  ;;  %v14637_v55 = vcombine.low %v821_v31, %v825_v33  ;;  %v869_v33 = vld [vmem:[#allocation5 + $0xcc8] sm:$0xff] }
 0x184   :  { %9893 = vmatpush1.bf16.msra.mxu0 %v14827_v30  ;;  %v1080_v30 = vld [vmem:[#allocation5 + $0x1360] sm:$0xff] }
 0x185   :  { %9894 = vmatprep.subr.bf16.mxu0 %v14836_v35  ;;  %10305 = vmatpush1.bf16.msra.mxu1 %v14581_v37  ;;  %v14883_v35 = vcombine.low %v1068_v14, %v1072_v16  ;;  %v1084_v37 = vld [vmem:[#allocation5 + $0x1380] sm:$0xff]  ;;  %v14892_v40 = vcombine.high %v1076_v25, %v1080_v30 }
 0x186   :  { %10306 = vmatprep.subr.bf16.mxu1 %v14590_v39  ;;  %v829_v39 = vld [vmem:[#allocation5 + $0xb88] sm:$0xff] }
 0x187   :  { %v14646_v42 = vcombine.high %v829_v39, %v833_v8  ;;  %v14645_v52 = vcombine.low %v829_v39, %v833_v8  ;;  %v877_v8 = vld [vmem:[#allocation5 + $0xd08] sm:$0xff] }
 0x188   :  { %9895 = vmatpush1.bf16.msra.mxu0 %v14835_v38  ;;  %v1088_v38 = vld [vmem:[#allocation5 + $0x13a0] sm:$0xff] }
 0x189   :  { %9896 = vmatprep.subr.bf16.mxu0 %v14844_v56  ;;  %10307 = vmatpush1.bf16.msra.mxu1 %v14589_v9  ;;  %v14891_v56 = vcombine.low %v1076_v25, %v1080_v30  ;;  %v1092_v9 = vld [vmem:[#allocation5 + $0x13c0] sm:$0xff]  ;;  %v14900_v50 = vcombine.high %v1084_v37, %v1088_v38 }
 0x18a   :  { %10308 = vmatprep.subr.bf16.mxu1 %v14598_v44  ;;  %v837_v44 = vld [vmem:[#allocation5 + $0xbc8] sm:$0xff] }
 0x18c   :  { %9897 = vmatpush1.bf16.msra.mxu0 %v14843_v10  ;;  %v1096_v10 = vld [vmem:[#allocation5 + $0x13e0] sm:$0xff] }
 0x18d   :  { %9898 = vmatprep.subr.bf16.mxu0 %v14852_v51  ;;  %10309 = vmatpush1.bf16.msra.mxu1 %v14597_v53  ;;  %v16425_v51 = vld [vmem:[#allocation2 + $0x74] ss:$48 sps:$4 sm:$0xff]   ;;  %v14899_v53 = vcombine.low %v1084_v37, %v1088_v38  ;;  %v14908_v61 = vcombine.high %v1092_v9, %v1096_v10  ;;  %v14907_v3 = vcombine.low %v1092_v9, %v1096_v10 }
 0x18e   :  { %10310 = vmatprep.subr.bf16.mxu1 %v14606_v57  ;;  %v1100_v57 = vld [vmem:[#allocation5 + $0x1400] sm:$0xff] }
 0x18f   :  { %v14915_v17 = vcombine.low %v1100_v57, %v1104_v59 }
 0x190   :  { %9899 = vmatpush1.bf16.msra.mxu0 %v14851_v54  ;;  %v14654_v54 = vcombine.high %v837_v44, %v841_v46 }
 0x191   :  { %9900 = vmatprep.subr.bf16.mxu0 %v14860_v62  ;;  %10311 = vmatpush1.bf16.msra.mxu1 %v14605_v0  ;;  %v849_v62 = vld [vmem:[#allocation5 + $0xc28] sm:$0xff]  ;;  %v17444_v0 = vrot.slane %v16425_v51, %v17358_v58  ;;  %v1140_v51 = vld [vmem:[#allocation5 + $0x1540] sm:$0xff] }
 0x192   :  { %10312 = vmatprep.subr.bf16.mxu1 %v14614_v2  ;;  %v300_v2 = vcombine.low %v17423_v26, %v17426_v27  ;;  %v14662_v4 = vcombine.high %v845_v60, %v849_v62  ;;  %v14661_v14 = vcombine.low %v845_v60, %v849_v62  ;;  %v1116_v27 = vld [vmem:[#allocation5 + $0x1480] sm:$0xff]  ;;  %v893_v60 = vld [vmem:[#allocation5 + $0xd88] sm:$0xff] }
 0x193   :  { %v1148_v62 = vld [vmem:[#allocation5 + $0x1580] sm:$0xff] }
 0x194   :  { %9901 = vmatpush1.bf16.msra.mxu0 %v14859_v1  ;;  %v14653_v1 = vcombine.low %v837_v44, %v841_v46  ;;  %v17450_v16 = vpack.c.bf16 %v300_v2, %v300_v2 }
 0x195   :  { %9902 = vmatprep.subr.bf16.mxu0 %v14868_v28  ;;  %10313 = vmatpush1.bf16.msra.mxu1 %v14613_v11  ;;  %v1112_v28 = vld [vmem:[#allocation5 + $0x1460] sm:$0xff]  ;;  %v14916_v11 = vcombine.high %v1100_v57, %v1104_v59 }
 0x196   :  { %10314 = vmatprep.subr.bf16.mxu1 %v14622_v13  ;;  %v303_v13 = vcombine.high %v17441_v63, %v17444_v0  ;;  %v14924_v19 = vcombine.high %v1108_v6, %v1112_v28  ;;  %v14923_v30 = vcombine.low %v1108_v6, %v1112_v28 }
 0x198   :  { %9903 = vmatpush1.bf16.msra.mxu0 %v14867_v12  ;;  %v857_v12 = vld [vmem:[#allocation5 + $0xc68] sm:$0xff] }
 0x199   :  { %9904 = vmatprep.subr.bf16.mxu0 %v14876_v18  ;;  %10315 = vmatpush1.bf16.msra.mxu1 %v14621_v20  ;;  %v14670_v26 = vcombine.high %v853_v29, %v857_v12  ;;  %v861_v18 = vld [vmem:[#allocation5 + $0xc88] sm:$0xff]  ;;  %v14669_v25 = vcombine.low %v853_v29, %v857_v12 }
 0x19a   :  { %10316 = vmatprep.subr.bf16.mxu1 %v14630_v24  ;;  %v865_v20 = vld [vmem:[#allocation5 + $0xca8] sm:$0xff]  ;;  %v1120_v24 = vld [vmem:[#allocation5 + $0x14a0] sm:$0xff] }
 0x19b   :  { %v14678_v31 = vcombine.high %v861_v18, %v865_v20  ;;  %v14677_v37 = vcombine.low %v861_v18, %v865_v20  ;;  %v14931_v38 = vcombine.low %v1116_v27, %v1120_v24  ;;  %v901_v29 = vld [vmem:[#allocation5 + $0xdc8] sm:$0xff] }
 0x19c   :  { %9905 = vmatpush1.bf16.msra.mxu0 %v14875_v23  ;;  %v17452_v23 = vpack.c.bf16 %v303_v13, %v303_v13  ;;  %v1156_v13 = vld [vmem:[#allocation5 + $0x15c0] sm:$0xff] }
 0x19d   :  { %9906 = vmatprep.subr.bf16.mxu0 %v14884_v32  ;;  %10317 = vmatpush1.bf16.msra.mxu1 %v14629_v34  ;;  %v14932_v32 = vcombine.high %v1116_v27, %v1120_v24  ;;  %v873_v34 = vld [vmem:[#allocation5 + $0xce8] sm:$0xff] }
 0x19e   :  { %10318 = vmatprep.subr.bf16.mxu1 %v14638_v36  ;;  %v1128_v36 = vld [vmem:[#allocation5 + $0x14e0] sm:$0xff]  ;;  %v14686_v39 = vcombine.high %v869_v33, %v873_v34  ;;  %v14685_v9 = vcombine.low %v869_v33, %v873_v34  ;;  %v909_v24 = vld [vmem:[#allocation5 + $0xe08] sm:$0xff] }
 0x1a0   :  { %9907 = vmatpush1.bf16.msra.mxu0 %v14883_v35  ;;  %v1124_v35 = vld [vmem:[#allocation5 + $0x14c0] sm:$0xff] }
 0x1a1   :  { %9908 = vmatprep.subr.bf16.mxu0 %v14892_v40  ;;  %10319 = vmatpush1.bf16.msra.mxu1 %v14637_v55  ;;  %v14940_v40 = vcombine.high %v1124_v35, %v1128_v36  ;;  %v881_v55 = vld [vmem:[#allocation5 + $0xd28] sm:$0xff]  ;;  %v14939_v10 = vcombine.low %v1124_v35, %v1128_v36 }
 0x1a2   :  { %10320 = vmatprep.subr.bf16.mxu1 %v14646_v42  ;;  %v1136_v42 = vld [vmem:[#allocation5 + $0x1520] sm:$0xff]  ;;  %v14694_v44 = vcombine.high %v877_v8, %v881_v55  ;;  %v917_v36 = vld [vmem:[#allocation5 + $0xe48] sm:$0xff] }
 0x1a4   :  { %9909 = vmatpush1.bf16.msra.mxu0 %v14891_v56  ;;  %v1132_v56 = vld [vmem:[#allocation5 + $0x1500] sm:$0xff] }
 0x1a5   :  { %9910 = vmatprep.subr.bf16.mxu0 %v14900_v50  ;;  %10321 = vmatpush1.bf16.msra.mxu1 %v14645_v52  ;;  %v14948_v46 = vcombine.high %v1132_v56, %v1136_v42  ;;  %v889_v50 = vld [vmem:[#allocation5 + $0xd68] sm:$0xff]  ;;  %v1144_v52 = vld [vmem:[#allocation5 + $0x1560] sm:$0xff] }
 0x1a6   :  { %10322 = vmatprep.subr.bf16.mxu1 %v14654_v54  ;;  %v14947_v54 = vcombine.low %v1132_v56, %v1136_v42  ;;  %v14702_v57 = vcombine.high %v885_v49, %v889_v50  ;;  %v14956_v59 = vcombine.high %v1140_v51, %v1144_v52  ;;  %v14701_v2 = vcombine.low %v885_v49, %v889_v50  ;;  %v925_v42 = vld [vmem:[#allocation5 + $0xe88] sm:$0xff] }
 0x1a8   :  { %9911 = vmatpush1.bf16.msra.mxu0 %v14899_v53  ;;  %v14693_v53 = vcombine.low %v877_v8, %v881_v55 }
 0x1a9   :  { %9912 = vmatprep.subr.bf16.mxu0 %v14908_v61  ;;  %10323 = vmatpush1.bf16.msra.mxu1 %v14653_v1  ;;  %v897_v61 = vld [vmem:[#allocation5 + $0xda8] sm:$0xff]  ;;  %v1152_v1 = vld [vmem:[#allocation5 + $0x15a0] sm:$0xff] }
 0x1aa   :  { %10333 = vmatprep.subr.bf16.mxu1 %v14662_v4  ;;  %v14710_v4 = vcombine.high %v893_v60, %v897_v61  ;;  %v14964_v28 = vcombine.high %v1148_v62, %v1152_v1  ;;  %v14963_v18 = vcombine.low %v1148_v62, %v1152_v1  ;;  %v941_v1 = vld [vmem:[#allocation5 + $0xf08] sm:$0xff] }
 0x1ac   :  { %9913 = vmatpush1.bf16.msra.mxu0 %v14907_v3  ;;  %10325 = vmatmul.mubr.bf16.vlgmr.msra.gmra.mrb[4].mxu1 %v17414_v5  ;;  %v14955_v3 = vcombine.low %v1140_v51, %v1144_v52  ;;  %v933_v52 = vld [vmem:[#allocation5 + $0xec8] sm:$0xff] }
 0x1ad   :  { %9923 = vmatprep.subr.bf16.mxu0 %v14916_v11  ;;  %10334 = vmatpush1.bf16.msra.mxu1 %v14661_v14  ;;  %v905_v11 = vld [vmem:[#allocation5 + $0xde8] sm:$0xff]  ;;  %v1160_v14 = vld [vmem:[#allocation5 + $0x15e0] sm:$0xff] }
 0x1ae   :  { %10335 = vmatprep.subr.bf16.mxu1 %v14670_v26  ;;  %10365 = vmatprep.mubr.bf16.mxu1 %v17416_v15  ;;  %v14709_v26 = vcombine.low %v893_v60, %v897_v61  ;;  %v14972_v20 = vcombine.high %v1156_v13, %v1160_v14  ;;  %v14971_v33 = vcombine.low %v1156_v13, %v1160_v14  ;;  %v949_v14 = vld [vmem:[#allocation5 + $0xf48] sm:$0xff] }
 0x1af   :  { %9915 = vmatmul.mubr.bf16.vlgmr.msra.gmra.mrb[0].mxu0 %v17450_v16 }
 0x1b0   :  { %9924 = vmatpush1.bf16.msra.mxu0 %v14915_v17  ;;  %9955 = vmatprep.mubr.bf16.mxu0 %v17452_v23 }
 0x1b1   :  { %9925 = vmatprep.subr.bf16.mxu0 %v14924_v19  ;;  %10336 = vmatpush1.bf16.msra.mxu1 %v14669_v25  ;;  %v14718_v19 = vcombine.high %v901_v29, %v905_v11  ;;  %v913_v25 = vld [vmem:[#allocation5 + $0xe28] sm:$0xff] }
 0x1b2   :  { %10337 = vmatprep.subr.bf16.mxu1 %v14678_v31  ;;  %v1168_v31 = vld [vmem:[#allocation5 + $0x1620] sm:$0xff]  ;;  %v14726_v34 = vcombine.high %v909_v24, %v913_v25 }
 0x1b4   :  { %9926 = vmatpush1.bf16.msra.mxu0 %v14923_v30  ;;  %v1164_v30 = vld [vmem:[#allocation5 + $0x1600] sm:$0xff] }
 0x1b5   :  { %9927 = vmatprep.subr.bf16.mxu0 %v14932_v32  ;;  %10338 = vmatpush1.bf16.msra.mxu1 %v14677_v37  ;;  %v14717_v32 = vcombine.low %v901_v29, %v905_v11  ;;  %v14980_v35 = vcombine.high %v1164_v30, %v1168_v31  ;;  %v921_v37 = vld [vmem:[#allocation5 + $0xe68] sm:$0xff]  ;;  %v14979_v8 = vcombine.low %v1164_v30, %v1168_v31  ;;  %v1212_v31 = vld [vmem:[#allocation5 + $0x1780] sm:$0xff] }
 0x1b6   :  { %10339 = vmatprep.subr.bf16.mxu1 %v14686_v39  ;;  %v1176_v39 = vld [vmem:[#allocation5 + $0x1660] sm:$0xff]  ;;  %v14734_v55 = vcombine.high %v917_v36, %v921_v37  ;;  %v961_v30 = vld [vmem:[#allocation5 + $0xfa8] sm:$0xff] }
 0x1b8   :  { %9928 = vmatpush1.bf16.msra.mxu0 %v14931_v38  ;;  %v1172_v38 = vld [vmem:[#allocation5 + $0x1640] sm:$0xff] }
 0x1b9   :  { %9929 = vmatprep.subr.bf16.mxu0 %v14940_v40  ;;  %10340 = vmatpush1.bf16.msra.mxu1 %v14685_v9  ;;  %v14725_v40 = vcombine.low %v909_v24, %v913_v25  ;;  %v14988_v56 = vcombine.high %v1172_v38, %v1176_v39  ;;  %v929_v9 = vld [vmem:[#allocation5 + $0xea8] sm:$0xff]  ;;  %v14987_v49 = vcombine.low %v1172_v38, %v1176_v39 }
 0x1ba   :  { %10341 = vmatprep.subr.bf16.mxu1 %v14694_v44  ;;  %v1184_v44 = vld [vmem:[#allocation5 + $0x16a0] sm:$0xff]  ;;  %v14742_v50 = vcombine.high %v925_v42, %v929_v9  ;;  %v957_v25 = vld [vmem:[#allocation5 + $0xf88] sm:$0xff] }
 0x1bb   :  { %v969_v38 = vld [vmem:[#allocation5 + $0xfe8] sm:$0xff] }
 0x1bc   :  { %9930 = vmatpush1.bf16.msra.mxu0 %v14939_v10  ;;  %v1180_v10 = vld [vmem:[#allocation5 + $0x1680] sm:$0xff]  ;;  %v16426_v39 = vld [vmem:[#allocation2 + $0x18] ss:$48 sps:$4 sm:$0xff]  }
 0x1bd   :  { %9931 = vmatprep.subr.bf16.mxu0 %v14948_v46  ;;  %10342 = vmatpush1.bf16.msra.mxu1 %v14693_v53  ;;  %v14733_v46 = vcombine.low %v917_v36, %v921_v37  ;;  %v14996_v51 = vcombine.high %v1180_v10, %v1184_v44  ;;  %v937_v53 = vld [vmem:[#allocation5 + $0xee8] sm:$0xff]  ;;  %v14995_v60 = vcombine.low %v1180_v10, %v1184_v44 }
 0x1be   :  { %10343 = vmatprep.subr.bf16.mxu1 %v14702_v57  ;;  %v1192_v57 = vld [vmem:[#allocation5 + $0x16e0] sm:$0xff]  ;;  %v14750_v61 = vcombine.high %v933_v52, %v937_v53  ;;  %v965_v36 = vld [vmem:[#allocation5 + $0xfc8] sm:$0xff] }
 0x1bf   :  { %v17458_v6 = vpop.f32.mrb[0].mxu1  ;;  %v973_v44 = vld [vmem:[#allocation5 + $0x1008] sm:$0xff] }
 0x1c0   :  { %9932 = vmatpush1.bf16.msra.mxu0 %v14947_v54  ;;  %v17460_v12 = vpop.f32.mrb[1].mxu1  ;;  %v1188_v54 = vld [vmem:[#allocation5 + $0x16c0] sm:$0xff] }
 0x1c1   :  { %9933 = vmatprep.subr.bf16.mxu0 %v14956_v59  ;;  %v9756_v17 = vpop.f32.mrb[2].mxu1  ;;  %10344 = vmatpush1.bf16.msra.mxu1 %v14701_v2  ;;  %v14741_v59 = vcombine.low %v925_v42, %v929_v9  ;;  %v15004_v62 = vcombine.high %v1188_v54, %v1192_v57  ;;  %v945_v2 = vld [vmem:[#allocation5 + $0xf28] sm:$0xff]  ;;  %v15003_v29 = vcombine.low %v1188_v54, %v1192_v57 }
 0x1c2   :  { %v9757_v27 = vpop.f32.mrb[3].mxu1  ;;  %10345 = vmatprep.subr.bf16.mxu1 %v14710_v4  ;;  %v1200_v4 = vld [vmem:[#allocation5 + $0x1720] sm:$0xff]  ;;  %v14758_v11 = vcombine.high %v941_v1, %v945_v2  ;;  %v953_v17 = vld [vmem:[#allocation5 + $0xf68] sm:$0xff]  ;;  %v14782_v9 = vcombine.high %v965_v36, %v969_v38  ;;  %v302_v54 = vcombine.low %v17441_v63, %v17444_v0 }
 0x1c3   :  { %v1208_v27 = vld [vmem:[#allocation5 + $0x1760] sm:$0xff] }
 0x1c4   :  { %9934 = vmatpush1.bf16.msra.mxu0 %v14955_v3  ;;  %v1196_v3 = vld [vmem:[#allocation5 + $0x1700] sm:$0xff] }
 0x1c5   :  { %9935 = vmatprep.subr.bf16.mxu0 %v14964_v28  ;;  %10346 = vmatpush1.bf16.msra.mxu1 %v14709_v26  ;;  %v14749_v28 = vcombine.low %v933_v52, %v937_v53  ;;  %v15012_v13 = vcombine.high %v1196_v3, %v1200_v4  ;;  %v1204_v26 = vld [vmem:[#allocation5 + $0x1740] sm:$0xff]  ;;  %v14781_v53 = vcombine.low %v965_v36, %v969_v38  ;;  %v1005_v36 = vld [vmem:[#allocation5 + $0x1108] sm:$0xff] }
 0x1c6   :  { %10347 = vmatprep.subr.bf16.mxu1 %v14718_v19  ;;  %v15011_v19 = vcombine.low %v1196_v3, %v1200_v4  ;;  %v15020_v24 = vcombine.high %v1204_v26, %v1208_v27  ;;  %v1232_v52 = vld [vmem:[#allocation5 + $0x1820] sm:$0xff] }
 0x1c7   :  { %v1240_v3 = vld [vmem:[#allocation5 + $0x1860] sm:$0xff] }
 0x1c8   :  { %9936 = vmatpush1.bf16.msra.mxu0 %v14963_v18  ;;  %v14757_v18 = vcombine.low %v941_v1, %v945_v2  ;;  %v1236_v2 = vld [vmem:[#allocation5 + $0x1840] sm:$0xff] }
 0x1c9   :  { %9937 = vmatprep.subr.bf16.mxu0 %v14972_v20  ;;  %10348 = vmatpush1.bf16.msra.mxu1 %v14717_v32  ;;  %v14766_v20 = vcombine.high %v949_v14, %v953_v17  ;;  %v1216_v32 = vld [vmem:[#allocation5 + $0x17a0] sm:$0xff]  ;;  %v15052_v0 = vcombine.high %v1236_v2, %v1240_v3 }
 0x1ca   :  { %10349 = vmatprep.subr.bf16.mxu1 %v14726_v34  ;;  %v15019_v34 = vcombine.low %v1204_v26, %v1208_v27  ;;  %v15028_v37 = vcombine.high %v1212_v31, %v1216_v32  ;;  %v15027_v42 = vcombine.low %v1212_v31, %v1216_v32  ;;  %v1248_v26 = vld [vmem:[#allocation5 + $0x18a0] sm:$0xff] }
 0x1cb   :  { %v1256_v31 = vld [vmem:[#allocation5 + $0x18e0] sm:$0xff] }
 0x1cc   :  { %9938 = vmatpush1.bf16.msra.mxu0 %v14971_v33  ;;  %v14765_v33 = vcombine.low %v949_v14, %v953_v17  ;;  %v1244_v17 = vld [vmem:[#allocation5 + $0x1880] sm:$0xff] }
 0x1cd   :  { %9939 = vmatprep.subr.bf16.mxu0 %v14980_v35  ;;  %10350 = vmatpush1.bf16.msra.mxu1 %v14725_v40  ;;  %v14774_v35 = vcombine.high %v957_v25, %v961_v30  ;;  %v16428_v40 = vld [vmem:[#allocation2 + $0x78] ss:$48 sps:$4 sm:$0xff]   ;;  %v1260_v38 = vld [vmem:[#allocation5 + $0x1900] sm:$0xff] }
 0x1ce   :  { %10351 = vmatprep.subr.bf16.mxu1 %v14734_v55  ;;  %v1224_v55 = vld [vmem:[#allocation5 + $0x17e0] sm:$0xff] }
 0x1d0   :  { %9940 = vmatpush1.bf16.msra.mxu0 %v14979_v8  ;;  %v1220_v8 = vld [vmem:[#allocation5 + $0x17c0] sm:$0xff] }
 0x1d1   :  { %9941 = vmatprep.subr.bf16.mxu0 %v14988_v56  ;;  %10352 = vmatpush1.bf16.msra.mxu1 %v14733_v46  ;;  %v14773_v56 = vcombine.low %v957_v25, %v961_v30  ;;  %v15036_v10 = vcombine.high %v1220_v8, %v1224_v55  ;;  %v977_v46 = vld [vmem:[#allocation5 + $0x1028] sm:$0xff]  ;;  %v15035_v57 = vcombine.low %v1220_v8, %v1224_v55  ;;  %v1252_v30 = vld [vmem:[#allocation5 + $0x18c0] sm:$0xff] }
 0x1d2   :  { %10353 = vmatprep.subr.bf16.mxu1 %v14742_v50  ;;  %v17466_v50 = vrot.slane %v16428_v40, %v17358_v58  ;;  %v14789_v4 = vcombine.low %v973_v44, %v977_v46  ;;  %v1001_v25 = vld [vmem:[#allocation5 + $0x10e8] sm:$0xff]  ;;  %v15067_v8 = vcombine.low %v1252_v30, %v1256_v31 }
 0x1d4   :  { %9942 = vmatpush1.bf16.msra.mxu0 %v14987_v49  ;;  %v17463_v49 = vrot.slane %v16426_v39, %v17358_v58  ;;  %v1264_v39 = vld [vmem:[#allocation5 + $0x1920] sm:$0xff] }
 0x1d5   :  { %9943 = vmatprep.subr.bf16.mxu0 %v14996_v51  ;;  %10354 = vmatpush1.bf16.msra.mxu1 %v14741_v59  ;;  %v1228_v51 = vld [vmem:[#allocation5 + $0x1800] sm:$0xff]  ;;  %v14790_v59 = vcombine.high %v973_v44, %v977_v46 }
 0x1d6   :  { %10355 = vmatprep.subr.bf16.mxu1 %v14750_v61  ;;  %v981_v61 = vld [vmem:[#allocation5 + $0x1048] sm:$0xff]  ;;  %v337_v1 = vcombine.high %v17463_v49, %v17466_v50  ;;  %v1272_v44 = vld [vmem:[#allocation5 + $0x1960] sm:$0xff] }
 0x1d8   :  { %9944 = vmatpush1.bf16.msra.mxu0 %v14995_v60  ;;  %v15044_v60 = vcombine.high %v1228_v51, %v1232_v52  ;;  %v17474_v14 = vpack.c.bf16 %v337_v1, %v337_v1 }
 0x1d9   :  { %9945 = vmatprep.subr.bf16.mxu0 %v15004_v62  ;;  %10356 = vmatpush1.bf16.msra.mxu1 %v14749_v28  ;;  %v985_v62 = vld [vmem:[#allocation5 + $0x1068] sm:$0xff]  ;;  %v17472_v28 = vpack.c.bf16 %v302_v54, %v302_v54 }
 0x1da   :  { %10357 = vmatprep.subr.bf16.mxu1 %v14758_v11  ;;  %v14798_v63 = vcombine.high %v981_v61, %v985_v62  ;;  %v989_v11 = vld [vmem:[#allocation5 + $0x1088] sm:$0xff]  ;;  %v14797_v27 = vcombine.low %v981_v61, %v985_v62 }
 0x1db   :  { %v1021_v54 = vld [vmem:[#allocation5 + $0x1188] sm:$0xff] }
 0x1dc   :  { %9946 = vmatpush1.bf16.msra.mxu0 %v15003_v29  ;;  %v15043_v29 = vcombine.low %v1228_v51, %v1232_v52  ;;  %v15075_v51 = vcombine.low %v1260_v38, %v1264_v39 }
 0x1dd   :  { %9947 = vmatprep.subr.bf16.mxu0 %v15012_v13  ;;  %10358 = vmatpush1.bf16.msra.mxu1 %v14757_v18  ;;  %v993_v13 = vld [vmem:[#allocation5 + $0x10a8] sm:$0xff]  ;;  %v15051_v18 = vcombine.low %v1236_v2, %v1240_v3 }
 0x1de   :  { %10359 = vmatprep.subr.bf16.mxu1 %v14766_v20  ;;  %v15060_v20 = vcombine.high %v1244_v17, %v1248_v26  ;;  %v14805_v32 = vcombine.low %v989_v11, %v993_v13  ;;  %v1029_v3 = vld [vmem:[#allocation5 + $0x11c8] sm:$0xff] }
 0x1e0   :  { %9948 = vmatpush1.bf16.msra.mxu0 %v15011_v19  ;;  %v14806_v19 = vcombine.high %v989_v11, %v993_v13 }
 0x1e1   :  { %9949 = vmatprep.subr.bf16.mxu0 %v15020_v24  ;;  %10360 = vmatpush1.bf16.msra.mxu1 %v14765_v33  ;;  %v997_v24 = vld [vmem:[#allocation5 + $0x10c8] sm:$0xff]  ;;  %v15059_v33 = vcombine.low %v1244_v17, %v1248_v26 }
 0x1e2   :  { %10361 = vmatprep.subr.bf16.mxu1 %v14774_v35  ;;  %v15068_v35 = vcombine.high %v1252_v30, %v1256_v31  ;;  %v14813_v40 = vcombine.low %v997_v24, %v1001_v25  ;;  %v1037_v26 = vld [vmem:[#allocation5 + $0x1208] sm:$0xff] }
 0x1e3   :  { %v1045_v31 = vld [vmem:[#allocation5 + $0x1248] sm:$0xff] }
 0x1e4   :  { %9950 = vmatpush1.bf16.msra.mxu0 %v15019_v34  ;;  %v14814_v34 = vcombine.high %v997_v24, %v1001_v25 }
 0x1e5   :  { %9951 = vmatprep.subr.bf16.mxu0 %v15028_v37  ;;  %10362 = vmatpush1.bf16.msra.mxu1 %v14773_v56  ;;  %v1009_v37 = vld [vmem:[#allocation5 + $0x1128] sm:$0xff]  ;;  %v15076_v56 = vcombine.high %v1260_v38, %v1264_v39 }
 0x1e6   :  { %10363 = vmatprep.subr.bf16.mxu1 %v14782_v9  ;;  %v14822_v55 = vcombine.high %v1005_v36, %v1009_v37  ;;  %v1017_v9 = vld [vmem:[#allocation5 + $0x1168] sm:$0xff]  ;;  %v14821_v46 = vcombine.low %v1005_v36, %v1009_v37 }
 0x1e7   :  { %v1053_v39 = vld [vmem:[#allocation5 + $0x1288] sm:$0xff] }
 0x1e8   :  { %9952 = vmatpush1.bf16.msra.mxu0 %v15027_v42  ;;  %v1013_v42 = vld [vmem:[#allocation5 + $0x1148] sm:$0xff] }
 0x1e9   :  { %9953 = vmatprep.subr.bf16.mxu0 %v15036_v10  ;;  %10364 = vmatpush1.bf16.msra.mxu1 %v14781_v53  ;;  %v1268_v10 = vld [vmem:[#allocation5 + $0x1940] sm:$0xff]  ;;  %v14830_v52 = vcombine.high %v1013_v42, %v1017_v9  ;;  %v14829_v61 = vcombine.low %v1013_v42, %v1017_v9 }
 0x1ea   :  { %10374 = vmatprep.subr.bf16.mxu1 %v14790_v59  ;;  %v15084_v53 = vcombine.high %v1268_v10, %v1272_v44  ;;  %v1276_v59 = vld [vmem:[#allocation5 + $0x1980] sm:$0xff]  ;;  %v15083_v62 = vcombine.low %v1268_v10, %v1272_v44  ;;  %v1061_v44 = vld [vmem:[#allocation5 + $0x12c8] sm:$0xff] }
 0x1ec   :  { %9954 = vmatpush1.bf16.msra.mxu0 %v15035_v57  ;;  %10366 = vmatmul.mubr.bf16.vlgmr.msra.gmra.mrb[4].mxu1 %v17432_v7  ;;  %v1025_v57 = vld [vmem:[#allocation5 + $0x11a8] sm:$0xff] }
 0x1ed   :  { %9964 = vmatprep.subr.bf16.mxu0 %v15044_v60  ;;  %10375 = vmatpush1.bf16.msra.mxu1 %v14789_v4  ;;  %v1280_v60 = vld [vmem:[#allocation5 + $0x19a0] sm:$0xff]  ;;  %v14838_v1 = vcombine.high %v1021_v54, %v1025_v57  ;;  %v1033_v4 = vld [vmem:[#allocation5 + $0x11e8] sm:$0xff] }
 0x1ee   :  { %10376 = vmatprep.subr.bf16.mxu1 %v14798_v63  ;;  %10406 = vmatprep.mubr.bf16.mxu1 %v17434_v45  ;;  %v15092_v2 = vcombine.high %v1276_v59, %v1280_v60  ;;  %v1288_v63 = vld [vmem:[#allocation5 + $0x19e0] sm:$0xff]  ;;  %v15091_v11 = vcombine.low %v1276_v59, %v1280_v60  ;;  %v14846_v13 = vcombine.high %v1029_v3, %v1033_v4  ;;  %v1069_v60 = vld [vmem:[#allocation5 + $0x1308] sm:$0xff] }
 0x1ef   :  { %9956 = vmatmul.mubr.bf16.vlgmr.msra.gmra.mrb[0].mxu0 %v17472_v28 }
 0x1f0   :  { %9965 = vmatpush1.bf16.msra.mxu0 %v15043_v29  ;;  %9996 = vmatprep.mubr.bf16.mxu0 %v17474_v14  ;;  %v1284_v29 = vld [vmem:[#allocation5 + $0x19c0] sm:$0xff] }
 0x1f1   :  { %9966 = vmatprep.subr.bf16.mxu0 %v15052_v0  ;;  %10377 = vmatpush1.bf16.msra.mxu1 %v14797_v27  ;;  %v14837_v0 = vcombine.low %v1021_v54, %v1025_v57  ;;  %v15100_v17 = vcombine.high %v1284_v29, %v1288_v63  ;;  %v1041_v27 = vld [vmem:[#allocation5 + $0x1228] sm:$0xff]  ;;  %v15099_v24 = vcombine.low %v1284_v29, %v1288_v63 }
 0x1f2   :  { %10378 = vmatprep.subr.bf16.mxu1 %v14806_v19  ;;  %v1296_v19 = vld [vmem:[#allocation5 + $0x1a20] sm:$0xff]  ;;  %v14854_v25 = vcombine.high %v1037_v26, %v1041_v27  ;;  %v1077_v63 = vld [vmem:[#allocation5 + $0x1348] sm:$0xff] }
 0x1f4   :  { %9967 = vmatpush1.bf16.msra.mxu0 %v15051_v18  ;;  %v1292_v18 = vld [vmem:[#allocation5 + $0x1a00] sm:$0xff] }
 0x1f5   :  { %9968 = vmatprep.subr.bf16.mxu0 %v15060_v20  ;;  %10379 = vmatpush1.bf16.msra.mxu1 %v14805_v32  ;;  %v14845_v20 = vcombine.low %v1029_v3, %v1033_v4  ;;  %v15108_v30 = vcombine.high %v1292_v18, %v1296_v19  ;;  %v1049_v32 = vld [vmem:[#allocation5 + $0x1268] sm:$0xff]  ;;  %v15107_v36 = vcombine.low %v1292_v18, %v1296_v19 }
 0x1f6   :  { %10380 = vmatprep.subr.bf16.mxu1 %v14814_v34  ;;  %v1304_v34 = vld [vmem:[#allocation5 + $0x1a60] sm:$0xff]  ;;  %v14862_v37 = vcombine.high %v1045_v31, %v1049_v32  ;;  %v1085_v19 = vld [vmem:[#allocation5 + $0x1388] sm:$0xff] }
 0x1f8   :  { %9969 = vmatpush1.bf16.msra.mxu0 %v15059_v33  ;;  %v1300_v33 = vld [vmem:[#allocation5 + $0x1a40] sm:$0xff] }
 0x1f9   :  { %9970 = vmatprep.subr.bf16.mxu0 %v15068_v35  ;;  %10381 = vmatpush1.bf16.msra.mxu1 %v14813_v40  ;;  %v14853_v35 = vcombine.low %v1037_v26, %v1041_v27  ;;  %v15116_v38 = vcombine.high %v1300_v33, %v1304_v34  ;;  %v1057_v40 = vld [vmem:[#allocation5 + $0x12a8] sm:$0xff]  ;;  %v15115_v42 = vcombine.low %v1300_v33, %v1304_v34 }
 0x1fa   :  { %10382 = vmatprep.subr.bf16.mxu1 %v14822_v55  ;;  %v1312_v55 = vld [vmem:[#allocation5 + $0x1aa0] sm:$0xff]  ;;  %v14870_v9 = vcombine.high %v1053_v39, %v1057_v40  ;;  %v1093_v33 = vld [vmem:[#allocation5 + $0x13c8] sm:$0xff] }
 0x1fc   :  { %9971 = vmatpush1.bf16.msra.mxu0 %v15067_v8  ;;  %v1308_v8 = vld [vmem:[#allocation5 + $0x1a80] sm:$0xff] }
 0x1fd   :  { %9972 = vmatprep.subr.bf16.mxu0 %v15076_v56  ;;  %10383 = vmatpush1.bf16.msra.mxu1 %v14821_v46  ;;  %v14861_v56 = vcombine.low %v1045_v31, %v1049_v32  ;;  %v15124_v10 = vcombine.high %v1308_v8, %v1312_v55  ;;  %v1065_v46 = vld [vmem:[#allocation5 + $0x12e8] sm:$0xff]  ;;  %v15123_v54 = vcombine.low %v1308_v8, %v1312_v55 }
 0x1fe   :  { %10384 = vmatprep.subr.bf16.mxu1 %v14830_v52  ;;  %v1320_v52 = vld [vmem:[#allocation5 + $0x1ae0] sm:$0xff]  ;;  %v14878_v57 = vcombine.high %v1061_v44, %v1065_v46 }
 0x200   :  { %9973 = vmatpush1.bf16.msra.mxu0 %v15075_v51  ;;  %v1316_v51 = vld [vmem:[#allocation5 + $0x1ac0] sm:$0xff] }
 0x201   :  { %9974 = vmatprep.subr.bf16.mxu0 %v15084_v53  ;;  %10385 = vmatpush1.bf16.msra.mxu1 %v14829_v61  ;;  %v14869_v53 = vcombine.low %v1053_v39, %v1057_v40  ;;  %v15132_v59 = vcombine.high %v1316_v51, %v1320_v52  ;;  %v1073_v61 = vld [vmem:[#allocation5 + $0x1328] sm:$0xff]  ;;  %v15131_v3 = vcombine.low %v1316_v51, %v1320_v52  ;;  %v1352_v39 = vld [vmem:[#allocation5 + $0x1be0] sm:$0xff] }
 0x202   :  { %10386 = vmatprep.subr.bf16.mxu1 %v14838_v1  ;;  %v1328_v1 = vld [vmem:[#allocation5 + $0x1b20] sm:$0xff]  ;;  %v14886_v4 = vcombine.high %v1069_v60, %v1073_v61 }
 0x203   :  { %v1360_v51 = vld [vmem:[#allocation5 + $0x1c20] sm:$0xff] }
 0x204   :  { %9975 = vmatpush1.bf16.msra.mxu0 %v15083_v62  ;;  %v1324_v62 = vld [vmem:[#allocation5 + $0x1b00] sm:$0xff] }
 0x205   :  { %9976 = vmatprep.subr.bf16.mxu0 %v15092_v2  ;;  %10387 = vmatpush1.bf16.msra.mxu1 %v14837_v0  ;;  %v14877_v2 = vcombine.low %v1061_v44, %v1065_v46  ;;  %v15140_v29 = vcombine.high %v1324_v62, %v1328_v1  ;;  %v1081_v0 = vld [vmem:[#allocation5 + $0x1368] sm:$0xff]  ;;  %v15139_v26 = vcombine.low %v1324_v62, %v1328_v1  ;;  %v1356_v46 = vld [vmem:[#allocation5 + $0x1c00] sm:$0xff] }
 0x206   :  { %10388 = vmatprep.subr.bf16.mxu1 %v14846_v13  ;;  %v1336_v13 = vld [vmem:[#allocation5 + $0x1b60] sm:$0xff]  ;;  %v14894_v27 = vcombine.high %v1077_v63, %v1081_v0 }
 0x207   :  { %v1364_v1 = vld [vmem:[#allocation5 + $0x1c40] sm:$0xff] }
 0x208   :  { %9977 = vmatpush1.bf16.msra.mxu0 %v15091_v11  ;;  %v1332_v11 = vld [vmem:[#allocation5 + $0x1b40] sm:$0xff] }
 0x209   :  { %9978 = vmatprep.subr.bf16.mxu0 %v15100_v17  ;;  %10389 = vmatpush1.bf16.msra.mxu1 %v14845_v20  ;;  %v14885_v17 = vcombine.low %v1069_v60, %v1073_v61  ;;  %v15148_v18 = vcombine.high %v1332_v11, %v1336_v13  ;;  %v1089_v20 = vld [vmem:[#allocation5 + $0x13a8] sm:$0xff]  ;;  %v15147_v31 = vcombine.low %v1332_v11, %v1336_v13  ;;  %v1372_v13 = vld [vmem:[#allocation5 + $0x1c80] sm:$0xff] }
 0x20a   :  { %10390 = vmatprep.subr.bf16.mxu1 %v14854_v25  ;;  %v1344_v25 = vld [vmem:[#allocation5 + $0x1ba0] sm:$0xff]  ;;  %v14902_v32 = vcombine.high %v1085_v19, %v1089_v20  ;;  %v14901_v40 = vcombine.low %v1085_v19, %v1089_v20  ;;  %v1109_v60 = vld [vmem:[#allocation5 + $0x1448] sm:$0xff] }
 0x20b   :  { %v1113_v61 = vld [vmem:[#allocation5 + $0x1468] sm:$0xff] }
 0x20c   :  { %9979 = vmatpush1.bf16.msra.mxu0 %v15099_v24  ;;  %v1340_v24 = vld [vmem:[#allocation5 + $0x1b80] sm:$0xff]  ;;  %v1125_v20 = vld [vmem:[#allocation5 + $0x14c8] sm:$0xff] }
 0x20d   :  { %9980 = vmatprep.subr.bf16.mxu0 %v15108_v30  ;;  %10391 = vmatpush1.bf16.msra.mxu1 %v14853_v35  ;;  %v14893_v30 = vcombine.low %v1077_v63, %v1081_v0  ;;  %v15156_v34 = vcombine.high %v1340_v24, %v1344_v25  ;;  %v1097_v35 = vld [vmem:[#allocation5 + $0x13e8] sm:$0xff]  ;;  %v15155_v8 = vcombine.low %v1340_v24, %v1344_v25  ;;  %v1380_v25 = vld [vmem:[#allocation5 + $0x1cc0] sm:$0xff] }
 0x20e   :  { %10392 = vmatprep.subr.bf16.mxu1 %v14862_v37  ;;  %v16431_v37 = vld [vmem:[#allocation2 + $0x7c] ss:$48 sps:$4 sm:$0xff]   ;;  %v14910_v55 = vcombine.high %v1093_v33, %v1097_v35  ;;  %v14909_v52 = vcombine.low %v1093_v33, %v1097_v35 }
 0x20f   :  { %v17484_v44 = vrot.slane %v16431_v37, %v17358_v58  ;;  %v1117_v63 = vld [vmem:[#allocation5 + $0x1488] sm:$0xff]  ;;  %v1388_v37 = vld [vmem:[#allocation5 + $0x1d00] sm:$0xff] }
 0x210   :  { %9981 = vmatpush1.bf16.msra.mxu0 %v15107_v36  ;;  %v16430_v36 = vld [vmem:[#allocation2 + $0x1c] ss:$48 sps:$4 sm:$0xff]  }
 0x211   :  { %9982 = vmatprep.subr.bf16.mxu0 %v15116_v38  ;;  %10393 = vmatpush1.bf16.msra.mxu1 %v14861_v56  ;;  %v1348_v38 = vld [vmem:[#allocation5 + $0x1bc0] sm:$0xff]  ;;  %v1121_v0 = vld [vmem:[#allocation5 + $0x14a8] sm:$0xff] }
 0x212   :  { %10394 = vmatprep.subr.bf16.mxu1 %v14870_v9  ;;  %v15164_v56 = vcombine.high %v1348_v38, %v1352_v39  ;;  %v1105_v9 = vld [vmem:[#allocation5 + $0x1428] sm:$0xff] }
 0x213   :  { %v1129_v24 = vld [vmem:[#allocation5 + $0x14e8] sm:$0xff] }
 0x214   :  { %9983 = vmatpush1.bf16.msra.mxu0 %v15115_v42  ;;  %v1101_v42 = vld [vmem:[#allocation5 + $0x1408] sm:$0xff]  ;;  %v14942_v33 = vcombine.high %v1125_v20, %v1129_v24 }
 0x215   :  { %9984 = vmatprep.subr.bf16.mxu0 %v15124_v10  ;;  %10395 = vmatpush1.bf16.msra.mxu1 %v14869_v53  ;;  %v17481_v10 = vrot.slane %v16430_v36, %v17358_v58  ;;  %v336_v53 = vcombine.low %v17463_v49, %v17466_v50  ;;  %v14926_v49 = vcombine.high %v1109_v60, %v1113_v61  ;;  %v1133_v35 = vld [vmem:[#allocation5 + $0x1508] sm:$0xff] }
 0x216   :  { %10396 = vmatprep.subr.bf16.mxu1 %v14878_v57  ;;  %v14918_v57 = vcombine.high %v1101_v42, %v1105_v9  ;;  %v1137_v36 = vld [vmem:[#allocation5 + $0x1528] sm:$0xff] }
 0x217   :  { %v339_v62 = vcombine.high %v17481_v10, %v17484_v44 }
 0x218   :  { %9985 = vmatpush1.bf16.msra.mxu0 %v15123_v54  ;;  %v15163_v54 = vcombine.low %v1348_v38, %v1352_v39  ;;  %v1392_v38 = vld [vmem:[#allocation5 + $0x1d20] sm:$0xff]  ;;  %v14941_v39 = vcombine.low %v1125_v20, %v1129_v24 }
 0x219   :  { %9986 = vmatprep.subr.bf16.mxu0 %v15132_v59  ;;  %10397 = vmatpush1.bf16.msra.mxu1 %v14877_v2  ;;  %v15172_v59 = vcombine.high %v1356_v46, %v1360_v51  ;;  %v1368_v2 = vld [vmem:[#allocation5 + $0x1c60] sm:$0xff]  ;;  %v17492_v11 = vpack.c.bf16 %v339_v62, %v339_v62 }
 0x21a   :  { %10398 = vmatprep.subr.bf16.mxu1 %v14886_v4  ;;  %v17490_v4 = vpack.c.bf16 %v336_v53, %v336_v53  ;;  %v15180_v50 = vcombine.high %v1364_v1, %v1368_v2  ;;  %v1424_v20 = vld [vmem:[#allocation5 + $0x1e20] sm:$0xff] }
 0x21c   :  { %9987 = vmatpush1.bf16.msra.mxu0 %v15131_v3  ;;  %v14917_v3 = vcombine.low %v1101_v42, %v1105_v9  ;;  %v1145_v42 = vld [vmem:[#allocation5 + $0x1568] sm:$0xff]  ;;  %v1396_v9 = vld [vmem:[#allocation5 + $0x1d40] sm:$0xff] }
 0x21d   :  { %9988 = vmatprep.subr.bf16.mxu0 %v15140_v29  ;;  %10399 = vmatpush1.bf16.msra.mxu1 %v14885_v17  ;;  %v15171_v29 = vcombine.low %v1356_v46, %v1360_v51  ;;  %v1376_v17 = vld [vmem:[#allocation5 + $0x1ca0] sm:$0xff]  ;;  %v14949_v51 = vcombine.low %v1133_v35, %v1137_v36 }
 0x21e   :  { %10400 = vmatprep.subr.bf16.mxu1 %v14894_v27  ;;  %v15179_v27 = vcombine.low %v1364_v1, %v1368_v2  ;;  %v15188_v19 = vcombine.high %v1372_v13, %v1376_v17  ;;  %v1400_v46 = vld [vmem:[#allocation5 + $0x1d60] sm:$0xff] }
 0x21f   :  { %v15211_v1 = vcombine.low %v1396_v9, %v1400_v46 }
 0x220   :  { %9989 = vmatpush1.bf16.msra.mxu0 %v15139_v26  ;;  %v14925_v26 = vcombine.low %v1109_v60, %v1113_v61  ;;  %v1404_v60 = vld [vmem:[#allocation5 + $0x1d80] sm:$0xff] }
 0x221   :  { %9990 = vmatprep.subr.bf16.mxu0 %v15148_v18  ;;  %10401 = vmatpush1.bf16.msra.mxu1 %v14893_v30  ;;  %v14934_v18 = vcombine.high %v1117_v63, %v1121_v0  ;;  %v1384_v30 = vld [vmem:[#allocation5 + $0x1ce0] sm:$0xff] }
 0x222   :  { %10402 = vmatprep.subr.bf16.mxu1 %v14902_v32  ;;  %v15187_v32 = vcombine.low %v1372_v13, %v1376_v17  ;;  %v1408_v61 = vld [vmem:[#allocation5 + $0x1da0] sm:$0xff] }
 0x223   :  { %v15219_v13 = vcombine.low %v1404_v60, %v1408_v61 }
 0x224   :  { %9991 = vmatpush1.bf16.msra.mxu0 %v15147_v31  ;;  %v14933_v31 = vcombine.low %v1117_v63, %v1121_v0  ;;  %v1416_v63 = vld [vmem:[#allocation5 + $0x1de0] sm:$0xff] }
 0x225   :  { %9992 = vmatprep.subr.bf16.mxu0 %v15156_v34  ;;  %10403 = vmatpush1.bf16.msra.mxu1 %v14901_v40  ;;  %v15196_v34 = vcombine.high %v1380_v25, %v1384_v30  ;;  %v15195_v40 = vcombine.low %v1380_v25, %v1384_v30 }
 0x226   :  { %10404 = vmatprep.subr.bf16.mxu1 %v14910_v55  ;;  %v15204_v55 = vcombine.high %v1388_v37, %v1392_v38 }
 0x228   :  { %9993 = vmatpush1.bf16.msra.mxu0 %v15155_v8  ;;  %v14950_v8 = vcombine.high %v1133_v35, %v1137_v36  ;;  %v1432_v35 = vld [vmem:[#allocation5 + $0x1e60] sm:$0xff] }
 0x229   :  { %9994 = vmatprep.subr.bf16.mxu0 %v15164_v56  ;;  %10405 = vmatpush1.bf16.msra.mxu1 %v14909_v52  ;;  %v1141_v56 = vld [vmem:[#allocation5 + $0x1548] sm:$0xff]  ;;  %v15203_v52 = vcombine.low %v1388_v37, %v1392_v38 }
 0x22a   :  { %10415 = vmatprep.subr.bf16.mxu1 %v14918_v57  ;;  %v14958_v53 = vcombine.high %v1141_v56, %v1145_v42  ;;  %v1149_v57 = vld [vmem:[#allocation5 + $0x1588] sm:$0xff]  ;;  %v14957_v62 = vcombine.low %v1141_v56, %v1145_v42  ;;  %v1440_v56 = vld [vmem:[#allocation5 + $0x1ea0] sm:$0xff] }
 0x22c   :  { %9995 = vmatpush1.bf16.msra.mxu0 %v15163_v54  ;;  %10407 = vmatmul.mubr.bf16.vlgmr.msra.gmra.mrb[4].mxu1 %v17450_v16  ;;  %v15212_v54 = vcombine.high %v1396_v9, %v1400_v46 }
 0x22d   :  { %10005 = vmatprep.subr.bf16.mxu0 %v15172_v59  ;;  %10416 = vmatpush1.bf16.msra.mxu1 %v14917_v3  ;;  %v1153_v59 = vld [vmem:[#allocation5 + $0x15a8] sm:$0xff]  ;;  %v15220_v3 = vcombine.high %v1404_v60, %v1408_v61 }
 0x22e   :  { %10417 = vmatprep.subr.bf16.mxu1 %v14926_v49  ;;  %10447 = vmatprep.mubr.bf16.mxu1 %v17452_v23  ;;  %v14966_v2 = vcombine.high %v1149_v57, %v1153_v59  ;;  %v1161_v49 = vld [vmem:[#allocation5 + $0x15e8] sm:$0xff]  ;;  %v14965_v0 = vcombine.low %v1149_v57, %v1153_v59  ;;  %v1448_v57 = vld [vmem:[#allocation5 + $0x1ee0] sm:$0xff] }
 0x22f   :  { %9997 = vmatmul.mubr.bf16.vlgmr.msra.gmra.mrb[0].mxu0 %v17490_v4 }
 0x230   :  { %10006 = vmatpush1.bf16.msra.mxu0 %v15171_v29  ;;  %10037 = vmatprep.mubr.bf16.mxu0 %v17492_v11  ;;  %v1157_v29 = vld [vmem:[#allocation5 + $0x15c8] sm:$0xff] }
 0x231   :  { %10007 = vmatprep.subr.bf16.mxu0 %v15180_v50  ;;  %10418 = vmatpush1.bf16.msra.mxu1 %v14925_v26  ;;  %v1412_v50 = vld [vmem:[#allocation5 + $0x1dc0] sm:$0xff]  ;;  %v14974_v17 = vcombine.high %v1157_v29, %v1161_v49  ;;  %v14973_v24 = vcombine.low %v1157_v29, %v1161_v49 }
 0x232   :  { %10419 = vmatprep.subr.bf16.mxu1 %v14934_v18  ;;  %v15228_v26 = vcombine.high %v1412_v50, %v1416_v63  ;;  %v1169_v18 = vld [vmem:[#allocation5 + $0x1628] sm:$0xff]  ;;  %v15227_v25 = vcombine.low %v1412_v50, %v1416_v63  ;;  %v1456_v29 = vld [vmem:[#allocation5 + $0x1f20] sm:$0xff] }
 0x234   :  { %10008 = vmatpush1.bf16.msra.mxu0 %v15179_v27  ;;  %v1165_v27 = vld [vmem:[#allocation5 + $0x1608] sm:$0xff] }
 0x235   :  { %10009 = vmatprep.subr.bf16.mxu0 %v15188_v19  ;;  %10420 = vmatpush1.bf16.msra.mxu1 %v14933_v31  ;;  %v1420_v19 = vld [vmem:[#allocation5 + $0x1e00] sm:$0xff]  ;;  %v14982_v30 = vcombine.high %v1165_v27, %v1169_v18  ;;  %v14981_v36 = vcombine.low %v1165_v27, %v1169_v18 }
 0x236   :  { %10421 = vmatprep.subr.bf16.mxu1 %v14942_v33  ;;  %v15236_v31 = vcombine.high %v1420_v19, %v1424_v20  ;;  %v1177_v33 = vld [vmem:[#allocation5 + $0x1668] sm:$0xff]  ;;  %v15235_v37 = vcombine.low %v1420_v19, %v1424_v20  ;;  %v1464_v27 = vld [vmem:[#allocation5 + $0x1f60] sm:$0xff] }
 0x238   :  { %10010 = vmatpush1.bf16.msra.mxu0 %v15187_v32  ;;  %v1173_v32 = vld [vmem:[#allocation5 + $0x1648] sm:$0xff] }
 0x239   :  { %10011 = vmatprep.subr.bf16.mxu0 %v15196_v34  ;;  %10422 = vmatpush1.bf16.msra.mxu1 %v14941_v39  ;;  %v1428_v34 = vld [vmem:[#allocation5 + $0x1e40] sm:$0xff]  ;;  %v14990_v38 = vcombine.high %v1173_v32, %v1177_v33  ;;  %v14989_v42 = vcombine.low %v1173_v32, %v1177_v33 }
 0x23a   :  { %10423 = vmatprep.subr.bf16.mxu1 %v14950_v8  ;;  %v15244_v39 = vcombine.high %v1428_v34, %v1432_v35  ;;  %v1185_v8 = vld [vmem:[#allocation5 + $0x16a8] sm:$0xff]  ;;  %v15243_v9 = vcombine.low %v1428_v34, %v1432_v35  ;;  %v1472_v32 = vld [vmem:[#allocation5 + $0x1fa0] sm:$0xff] }
 0x23c   :  { %10012 = vmatpush1.bf16.msra.mxu0 %v15195_v40  ;;  %v1181_v40 = vld [vmem:[#allocation5 + $0x1688] sm:$0xff] }
 0x23d   :  { %10013 = vmatprep.subr.bf16.mxu0 %v15204_v55  ;;  %10424 = vmatpush1.bf16.msra.mxu1 %v14949_v51  ;;  %v1436_v55 = vld [vmem:[#allocation5 + $0x1e80] sm:$0xff]  ;;  %v14998_v46 = vcombine.high %v1181_v40, %v1185_v8  ;;  %v14997_v59 = vcombine.low %v1181_v40, %v1185_v8 }
 0x23e   :  { %10425 = vmatprep.subr.bf16.mxu1 %v14958_v53  ;;  %v15252_v51 = vcombine.high %v1436_v55, %v1440_v56  ;;  %v1193_v53 = vld [vmem:[#allocation5 + $0x16e8] sm:$0xff]  ;;  %v15251_v60 = vcombine.low %v1436_v55, %v1440_v56  ;;  %v16434_v40 = vld [vmem:[#allocation2 + $0x80] ss:$48 sps:$4 sm:$0xff]  }
 0x23f   :  { %v1476_v8 = vld [vmem:[#allocation5 + $0x1fc0] sm:$0xff] }
 0x240   :  { %10014 = vmatpush1.bf16.msra.mxu0 %v15203_v52  ;;  %v1189_v52 = vld [vmem:[#allocation5 + $0x16c8] sm:$0xff]  ;;  %v1480_v55 = vld [vmem:[#allocation5 + $0x1fe0] sm:$0xff] }
 0x241   :  { %10015 = vmatprep.subr.bf16.mxu0 %v15212_v54  ;;  %10426 = vmatpush1.bf16.msra.mxu1 %v14957_v62  ;;  %v1444_v54 = vld [vmem:[#allocation5 + $0x1ec0] sm:$0xff]  ;;  %v15006_v61 = vcombine.high %v1189_v52, %v1193_v53  ;;  %v15005_v49 = vcombine.low %v1189_v52, %v1193_v53  ;;  %v1233_v52 = vld [vmem:[#allocation5 + $0x1828] sm:$0xff] }
 0x242   :  { %10427 = vmatprep.subr.bf16.mxu1 %v14966_v2  ;;  %v15260_v62 = vcombine.high %v1444_v54, %v1448_v57  ;;  %v1201_v2 = vld [vmem:[#allocation5 + $0x1728] sm:$0xff]  ;;  %v15259_v50 = vcombine.low %v1444_v54, %v1448_v57  ;;  %v17502_v54 = vrot.slane %v16434_v40, %v17358_v58  ;;  %v1484_v57 = vld [vmem:[#allocation5 + $0x2000] sm:$0xff] }
 0x243   :  { %v1261_v40 = vld [vmem:[#allocation5 + $0x1908] sm:$0xff] }
 0x244   :  { %10016 = vmatpush1.bf16.msra.mxu0 %v15211_v1  ;;  %v1197_v1 = vld [vmem:[#allocation5 + $0x1708] sm:$0xff] }
 0x245   :  { %10017 = vmatprep.subr.bf16.mxu0 %v15220_v3  ;;  %10428 = vmatpush1.bf16.msra.mxu1 %v14965_v0  ;;  %v1452_v3 = vld [vmem:[#allocation5 + $0x1f00] sm:$0xff]  ;;  %v15014_v63 = vcombine.high %v1197_v1, %v1201_v2  ;;  %v15013_v18 = vcombine.low %v1197_v1, %v1201_v2 }
 0x246   :  { %10429 = vmatprep.subr.bf16.mxu1 %v14974_v17  ;;  %v15268_v0 = vcombine.high %v1452_v3, %v1456_v29  ;;  %v1209_v17 = vld [vmem:[#allocation5 + $0x1768] sm:$0xff]  ;;  %v15267_v19 = vcombine.low %v1452_v3, %v1456_v29 }
 0x247   :  { %v1237_v3 = vld [vmem:[#allocation5 + $0x1848] sm:$0xff] }
 0x248   :  { %10018 = vmatpush1.bf16.msra.mxu0 %v15219_v13  ;;  %v1205_v13 = vld [vmem:[#allocation5 + $0x1748] sm:$0xff] }
 0x249   :  { %10019 = vmatprep.subr.bf16.mxu0 %v15228_v26  ;;  %10430 = vmatpush1.bf16.msra.mxu1 %v14973_v24  ;;  %v1460_v26 = vld [vmem:[#allocation5 + $0x1f40] sm:$0xff]  ;;  %v15022_v20 = vcombine.high %v1205_v13, %v1209_v17  ;;  %v15021_v33 = vcombine.low %v1205_v13, %v1209_v17  ;;  %v1241_v29 = vld [vmem:[#allocation5 + $0x1868] sm:$0xff] }
 0x24a   :  { %10431 = vmatprep.subr.bf16.mxu1 %v14982_v30  ;;  %v15276_v24 = vcombine.high %v1460_v26, %v1464_v27  ;;  %v1217_v30 = vld [vmem:[#allocation5 + $0x17a8] sm:$0xff]  ;;  %v15275_v34 = vcombine.low %v1460_v26, %v1464_v27 }
 0x24b   :  { %v1245_v26 = vld [vmem:[#allocation5 + $0x1888] sm:$0xff] }
 0x24c   :  { %10020 = vmatpush1.bf16.msra.mxu0 %v15227_v25  ;;  %v1213_v25 = vld [vmem:[#allocation5 + $0x1788] sm:$0xff] }
 0x24d   :  { %10021 = vmatprep.subr.bf16.mxu0 %v15236_v31  ;;  %10432 = vmatpush1.bf16.msra.mxu1 %v14981_v36  ;;  %v1468_v31 = vld [vmem:[#allocation5 + $0x1f80] sm:$0xff]  ;;  %v15030_v35 = vcombine.high %v1213_v25, %v1217_v30  ;;  %v1221_v36 = vld [vmem:[#allocation5 + $0x17c8] sm:$0xff]  ;;  %v15029_v56 = vcombine.low %v1213_v25, %v1217_v30 }
 0x24e   :  { %10433 = vmatprep.subr.bf16.mxu1 %v14990_v38  ;;  %v1225_v38 = vld [vmem:[#allocation5 + $0x17e8] sm:$0xff] }
 0x24f   :  { %v1249_v27 = vld [vmem:[#allocation5 + $0x18a8] sm:$0xff] }
 0x250   :  { %10022 = vmatpush1.bf16.msra.mxu0 %v15235_v37  ;;  %v15284_v37 = vcombine.high %v1468_v31, %v1472_v32  ;;  %v15062_v30 = vcombine.high %v1245_v26, %v1249_v27 }
 0x251   :  { %10023 = vmatprep.subr.bf16.mxu0 %v15244_v39  ;;  %10434 = vmatpush1.bf16.msra.mxu1 %v14989_v42  ;;  %v16432_v39 = vld [vmem:[#allocation2 + $0x20] ss:$48 sps:$4 sm:$0xff]   ;;  %v15283_v42 = vcombine.low %v1468_v31, %v1472_v32  ;;  %v1253_v32 = vld [vmem:[#allocation5 + $0x18c8] sm:$0xff] }
 0x252   :  { %10435 = vmatprep.subr.bf16.mxu1 %v14998_v46  ;;  %v15292_v46 = vcombine.high %v1476_v8, %v1480_v55  ;;  %v17499_v53 = vrot.slane %v16432_v39, %v17358_v58 }
 0x254   :  { %10024 = vmatpush1.bf16.msra.mxu0 %v15243_v9  ;;  %v15038_v9 = vcombine.high %v1221_v36, %v1225_v38 }
 0x255   :  { %10025 = vmatprep.subr.bf16.mxu0 %v15252_v51  ;;  %10436 = vmatpush1.bf16.msra.mxu1 %v14997_v59  ;;  %v1229_v51 = vld [vmem:[#allocation5 + $0x1808] sm:$0xff]  ;;  %v1488_v59 = vld [vmem:[#allocation5 + $0x2020] sm:$0xff] }
 0x256   :  { %10437 = vmatprep.subr.bf16.mxu1 %v15006_v61  ;;  %v338_v61 = vcombine.low %v17481_v10, %v17484_v44  ;;  %v15046_v1 = vcombine.high %v1229_v51, %v1233_v52  ;;  %v15300_v2 = vcombine.high %v1484_v57, %v1488_v59  ;;  %v15299_v17 = vcombine.low %v1484_v57, %v1488_v59  ;;  %v1273_v57 = vld [vmem:[#allocation5 + $0x1968] sm:$0xff]  ;;  %v1524_v59 = vld [vmem:[#allocation5 + $0x2140] sm:$0xff] }
 0x257   :  { %v15054_v10 = vcombine.high %v1237_v3, %v1241_v29 }
 0x258   :  { %10026 = vmatpush1.bf16.msra.mxu0 %v15251_v60  ;;  %v15037_v60 = vcombine.low %v1221_v36, %v1225_v38  ;;  %v17508_v13 = vpack.c.bf16 %v338_v61, %v338_v61  ;;  %v15061_v36 = vcombine.low %v1245_v26, %v1249_v27  ;;  %v1289_v26 = vld [vmem:[#allocation5 + $0x19e8] sm:$0xff]  ;;  %v1540_v27 = vld [vmem:[#allocation5 + $0x21c0] sm:$0xff] }
 0x259   :  { %10027 = vmatprep.subr.bf16.mxu0 %v15260_v62  ;;  %10438 = vmatpush1.bf16.msra.mxu1 %v15005_v49  ;;  %v15291_v62 = vcombine.low %v1476_v8, %v1480_v55  ;;  %v373_v49 = vcombine.high %v17499_v53, %v17502_v54  ;;  %v1265_v8 = vld [vmem:[#allocation5 + $0x1928] sm:$0xff]  ;;  %v1516_v55 = vld [vmem:[#allocation5 + $0x2100] sm:$0xff] }
 0x25a   :  { %10439 = vmatprep.subr.bf16.mxu1 %v15014_v63  ;;  %v1496_v63 = vld [vmem:[#allocation5 + $0x2060] sm:$0xff]  ;;  %v15077_v61 = vcombine.low %v1261_v40, %v1265_v8 }
 0x25c   :  { %10028 = vmatpush1.bf16.msra.mxu0 %v15259_v50  ;;  %v1492_v50 = vld [vmem:[#allocation5 + $0x2040] sm:$0xff] }
 0x25d   :  { %10029 = vmatprep.subr.bf16.mxu0 %v15268_v0  ;;  %10440 = vmatpush1.bf16.msra.mxu1 %v15013_v18  ;;  %v15045_v0 = vcombine.low %v1229_v51, %v1233_v52  ;;  %v15308_v44 = vcombine.high %v1492_v50, %v1496_v63  ;;  %v17510_v18 = vpack.c.bf16 %v373_v49, %v373_v49  ;;  %v1269_v52 = vld [vmem:[#allocation5 + $0x1948] sm:$0xff]  ;;  %v1532_v49 = vld [vmem:[#allocation5 + $0x2180] sm:$0xff] }
 0x25e   :  { %10441 = vmatprep.subr.bf16.mxu1 %v15022_v20  ;;  %v1504_v20 = vld [vmem:[#allocation5 + $0x20a0] sm:$0xff]  ;;  %v15307_v25 = vcombine.low %v1492_v50, %v1496_v63  ;;  %v15085_v63 = vcombine.low %v1269_v52, %v1273_v57 }
 0x25f   :  { %v1536_v50 = vld [vmem:[#allocation5 + $0x21a0] sm:$0xff] }
 0x260   :  { %10030 = vmatpush1.bf16.msra.mxu0 %v15267_v19  ;;  %v1500_v19 = vld [vmem:[#allocation5 + $0x2080] sm:$0xff] }
 0x261   :  { %10031 = vmatprep.subr.bf16.mxu0 %v15276_v24  ;;  %10442 = vmatpush1.bf16.msra.mxu1 %v15021_v33  ;;  %v15053_v24 = vcombine.low %v1237_v3, %v1241_v29  ;;  %v15316_v31 = vcombine.high %v1500_v19, %v1504_v20  ;;  %v1257_v33 = vld [vmem:[#allocation5 + $0x18e8] sm:$0xff] }
 0x262   :  { %10443 = vmatprep.subr.bf16.mxu1 %v15030_v35  ;;  %v1512_v35 = vld [vmem:[#allocation5 + $0x20e0] sm:$0xff]  ;;  %v15070_v38 = vcombine.high %v1253_v32, %v1257_v33  ;;  %v1277_v3 = vld [vmem:[#allocation5 + $0x1988] sm:$0xff] }
 0x263   :  { %v1281_v29 = vld [vmem:[#allocation5 + $0x19a8] sm:$0xff] }
 0x264   :  { %10032 = vmatpush1.bf16.msra.mxu0 %v15275_v34  ;;  %v1508_v34 = vld [vmem:[#allocation5 + $0x20c0] sm:$0xff] }
 0x265   :  { %10033 = vmatprep.subr.bf16.mxu0 %v15284_v37  ;;  %10444 = vmatpush1.bf16.msra.mxu1 %v15029_v56  ;;  %v15315_v37 = vcombine.low %v1500_v19, %v1504_v20  ;;  %v15324_v39 = vcombine.high %v1508_v34, %v1512_v35  ;;  %v1520_v56 = vld [vmem:[#allocation5 + $0x2120] sm:$0xff]  ;;  %v15093_v20 = vcombine.low %v1277_v3, %v1281_v29 }
 0x266   :  { %10445 = vmatprep.subr.bf16.mxu1 %v15038_v9  ;;  %v15323_v9 = vcombine.low %v1508_v34, %v1512_v35  ;;  %v15332_v51 = vcombine.high %v1516_v55, %v1520_v56  ;;  %v1544_v19 = vld [vmem:[#allocation5 + $0x21e0] sm:$0xff] }
 0x267   :  { %v1552_v34 = vld [vmem:[#allocation5 + $0x2220] sm:$0xff] }
 0x268   :  { %10034 = vmatpush1.bf16.msra.mxu0 %v15283_v42  ;;  %v15069_v42 = vcombine.low %v1253_v32, %v1257_v33  ;;  %v1297_v32 = vld [vmem:[#allocation5 + $0x1a28] sm:$0xff]  ;;  %v1548_v33 = vld [vmem:[#allocation5 + $0x2200] sm:$0xff] }
 0x269   :  { %10035 = vmatprep.subr.bf16.mxu0 %v15292_v46  ;;  %10446 = vmatpush1.bf16.msra.mxu1 %v15037_v60  ;;  %v15078_v46 = vcombine.high %v1261_v40, %v1265_v8  ;;  %v1528_v60 = vld [vmem:[#allocation5 + $0x2160] sm:$0xff]  ;;  %v1305_v40 = vld [vmem:[#allocation5 + $0x1a68] sm:$0xff] }
 0x26a   :  { %10456 = vmatprep.subr.bf16.mxu1 %v15046_v1  ;;  %v15086_v1 = vcombine.high %v1269_v52, %v1273_v57  ;;  %v1556_v8 = vld [vmem:[#allocation5 + $0x2240] sm:$0xff]  ;;  %v1313_v52 = vld [vmem:[#allocation5 + $0x1aa8] sm:$0xff] }
 0x26b   :  { %v1564_v57 = vld [vmem:[#allocation5 + $0x2280] sm:$0xff] }
 0x26c   :  { %10036 = vmatpush1.bf16.msra.mxu0 %v15291_v62  ;;  %10448 = vmatmul.mubr.bf16.vlgmr.msra.gmra.mrb[4].mxu1 %v17472_v28  ;;  %v15331_v62 = vcombine.low %v1516_v55, %v1520_v56  ;;  %v1560_v55 = vld [vmem:[#allocation5 + $0x2260] sm:$0xff] }
 0x26d   :  { %10046 = vmatprep.subr.bf16.mxu0 %v15300_v2  ;;  %10457 = vmatpush1.bf16.msra.mxu1 %v15045_v0  ;;  %v15340_v2 = vcombine.high %v1524_v59, %v1528_v60  ;;  %v15339_v0 = vcombine.low %v1524_v59, %v1528_v60  ;;  %v1568_v59 = vld [vmem:[#allocation5 + $0x22a0] sm:$0xff] }
 0x26e   :  { %10458 = vmatprep.subr.bf16.mxu1 %v15054_v10  ;;  %10488 = vmatprep.mubr.bf16.mxu1 %v17474_v14  ;;  %v15348_v10 = vcombine.high %v1532_v49, %v1536_v50 }
 0x26f   :  { %10038 = vmatmul.mubr.bf16.vlgmr.msra.gmra.mrb[0].mxu0 %v17508_v13 }
 0x270   :  { %10047 = vmatpush1.bf16.msra.mxu0 %v15299_v17  ;;  %10078 = vmatprep.mubr.bf16.mxu0 %v17510_v18  ;;  %v15094_v17 = vcombine.high %v1277_v3, %v1281_v29  ;;  %v1321_v3 = vld [vmem:[#allocation5 + $0x1ae8] sm:$0xff]  ;;  %v1572_v29 = vld [vmem:[#allocation5 + $0x22c0] sm:$0xff] }
 0x271   :  { %10048 = vmatprep.subr.bf16.mxu0 %v15308_v44  ;;  %10459 = vmatpush1.bf16.msra.mxu1 %v15053_v24  ;;  %v1285_v44 = vld [vmem:[#allocation5 + $0x19c8] sm:$0xff]  ;;  %v15347_v24 = vcombine.low %v1532_v49, %v1536_v50  ;;  %v1576_v49 = vld [vmem:[#allocation5 + $0x22e0] sm:$0xff] }
 0x272   :  { %10460 = vmatprep.subr.bf16.mxu1 %v15062_v30  ;;  %v15356_v30 = vcombine.high %v1540_v27, %v1544_v19  ;;  %v15101_v35 = vcombine.low %v1285_v44, %v1289_v26 }
 0x274   :  { %10049 = vmatpush1.bf16.msra.mxu0 %v15307_v25  ;;  %v15102_v25 = vcombine.high %v1285_v44, %v1289_v26  ;;  %v1329_v44 = vld [vmem:[#allocation5 + $0x1b28] sm:$0xff]  ;;  %v1580_v26 = vld [vmem:[#allocation5 + $0x2300] sm:$0xff] }
 0x275   :  { %10050 = vmatprep.subr.bf16.mxu0 %v15316_v31  ;;  %10461 = vmatpush1.bf16.msra.mxu1 %v15061_v36  ;;  %v1293_v31 = vld [vmem:[#allocation5 + $0x1a08] sm:$0xff]  ;;  %v15355_v36 = vcombine.low %v1540_v27, %v1544_v19  ;;  %v1584_v27 = vld [vmem:[#allocation5 + $0x2320] sm:$0xff] }
 0x276   :  { %10462 = vmatprep.subr.bf16.mxu1 %v15070_v38  ;;  %v15364_v38 = vcombine.high %v1548_v33, %v1552_v34  ;;  %v15109_v56 = vcombine.low %v1293_v31, %v1297_v32 }
 0x278   :  { %10051 = vmatpush1.bf16.msra.mxu0 %v15315_v37  ;;  %v15110_v37 = vcombine.high %v1293_v31, %v1297_v32  ;;  %v1337_v31 = vld [vmem:[#allocation5 + $0x1b68] sm:$0xff]  ;;  %v1588_v32 = vld [vmem:[#allocation5 + $0x2340] sm:$0xff] }
 0x279   :  { %10052 = vmatprep.subr.bf16.mxu0 %v15324_v39  ;;  %10463 = vmatpush1.bf16.msra.mxu1 %v15069_v42  ;;  %v1301_v39 = vld [vmem:[#allocation5 + $0x1a48] sm:$0xff]  ;;  %v15363_v42 = vcombine.low %v1548_v33, %v1552_v34  ;;  %v1592_v33 = vld [vmem:[#allocation5 + $0x2360] sm:$0xff] }
 0x27a   :  { %10464 = vmatprep.subr.bf16.mxu1 %v15078_v46  ;;  %v15372_v46 = vcombine.high %v1556_v8, %v1560_v55  ;;  %v15117_v60 = vcombine.low %v1301_v39, %v1305_v40 }
 0x27c   :  { %10053 = vmatpush1.bf16.msra.mxu0 %v15323_v9  ;;  %v15118_v9 = vcombine.high %v1301_v39, %v1305_v40  ;;  %v1345_v39 = vld [vmem:[#allocation5 + $0x1ba8] sm:$0xff]  ;;  %v1596_v40 = vld [vmem:[#allocation5 + $0x2380] sm:$0xff] }
 0x27d   :  { %10054 = vmatprep.subr.bf16.mxu0 %v15332_v51  ;;  %10465 = vmatpush1.bf16.msra.mxu1 %v15077_v61  ;;  %v1309_v51 = vld [vmem:[#allocation5 + $0x1a88] sm:$0xff]  ;;  %v15371_v61 = vcombine.low %v1556_v8, %v1560_v55  ;;  %v1600_v8 = vld [vmem:[#allocation5 + $0x23a0] sm:$0xff] }
 0x27e   :  { %10466 = vmatprep.subr.bf16.mxu1 %v15086_v1  ;;  %v15380_v1 = vcombine.high %v1564_v57, %v1568_v59  ;;  %v15125_v50 = vcombine.low %v1309_v51, %v1313_v52 }
 0x280   :  { %10055 = vmatpush1.bf16.msra.mxu0 %v15331_v62  ;;  %v15126_v62 = vcombine.high %v1309_v51, %v1313_v52  ;;  %v1353_v51 = vld [vmem:[#allocation5 + $0x1be8] sm:$0xff]  ;;  %v16436_v52 = vld [vmem:[#allocation2 + $0x24] ss:$48 sps:$4 sm:$0xff]  }
 0x281   :  { %10056 = vmatprep.subr.bf16.mxu0 %v15340_v2  ;;  %10467 = vmatpush1.bf16.msra.mxu1 %v15085_v63  ;;  %v1317_v2 = vld [vmem:[#allocation5 + $0x1ac8] sm:$0xff]  ;;  %v15379_v63 = vcombine.low %v1564_v57, %v1568_v59  ;;  %v16437_v57 = vld [vmem:[#allocation2 + $0x84] ss:$48 sps:$4 sm:$0xff]  }
 0x282   :  { %10468 = vmatprep.subr.bf16.mxu1 %v15094_v17  ;;  %v15388_v17 = vcombine.high %v1572_v29, %v1576_v49  ;;  %v15133_v19 = vcombine.low %v1317_v2, %v1321_v3  ;;  %v1604_v59 = vld [vmem:[#allocation5 + $0x23c0] sm:$0xff] }
 0x284   :  { %10057 = vmatpush1.bf16.msra.mxu0 %v15339_v0  ;;  %v15134_v0 = vcombine.high %v1317_v2, %v1321_v3  ;;  %v1357_v3 = vld [vmem:[#allocation5 + $0x1c08] sm:$0xff] }
 0x285   :  { %10058 = vmatprep.subr.bf16.mxu0 %v15348_v10  ;;  %10469 = vmatpush1.bf16.msra.mxu1 %v15093_v20  ;;  %v1325_v10 = vld [vmem:[#allocation5 + $0x1b08] sm:$0xff]  ;;  %v15387_v20 = vcombine.low %v1572_v29, %v1576_v49  ;;  %v17517_v49 = vrot.slane %v16436_v52, %v17358_v58 }
 0x286   :  { %10470 = vmatprep.subr.bf16.mxu1 %v15102_v25  ;;  %v15396_v25 = vcombine.high %v1580_v26, %v1584_v27  ;;  %v15141_v34 = vcombine.low %v1325_v10, %v1329_v44  ;;  %v1361_v29 = vld [vmem:[#allocation5 + $0x1c28] sm:$0xff] }
 0x288   :  { %10059 = vmatpush1.bf16.msra.mxu0 %v15347_v24  ;;  %v15142_v24 = vcombine.high %v1325_v10, %v1329_v44  ;;  %v372_v10 = vcombine.low %v17499_v53, %v17502_v54 }
 0x289   :  { %10060 = vmatprep.subr.bf16.mxu0 %v15356_v30  ;;  %10471 = vmatpush1.bf16.msra.mxu1 %v15101_v35  ;;  %v1333_v30 = vld [vmem:[#allocation5 + $0x1b48] sm:$0xff]  ;;  %v15395_v35 = vcombine.low %v1580_v26, %v1584_v27  ;;  %v15174_v26 = vcombine.high %v1357_v3, %v1361_v29 }
 0x28a   :  { %10472 = vmatprep.subr.bf16.mxu1 %v15110_v37  ;;  %v15404_v37 = vcombine.high %v1588_v32, %v1592_v33  ;;  %v15149_v55 = vcombine.low %v1333_v30, %v1337_v31 }
 0x28c   :  { %10061 = vmatpush1.bf16.msra.mxu0 %v15355_v36  ;;  %v15150_v36 = vcombine.high %v1333_v30, %v1337_v31  ;;  %v1624_v30 = vld [vmem:[#allocation5 + $0x2460] sm:$0xff]  ;;  %v15173_v31 = vcombine.low %v1357_v3, %v1361_v29 }
 0x28d   :  { %10062 = vmatprep.subr.bf16.mxu0 %v15364_v38  ;;  %10473 = vmatpush1.bf16.msra.mxu1 %v15109_v56  ;;  %v1341_v38 = vld [vmem:[#allocation5 + $0x1b88] sm:$0xff]  ;;  %v15403_v56 = vcombine.low %v1588_v32, %v1592_v33  ;;  %v17526_v32 = vpack.c.bf16 %v372_v10, %v372_v10  ;;  %v1652_v10 = vld [vmem:[#allocation5 + $0x2540] sm:$0xff] }
 0x28e   :  { %10474 = vmatprep.subr.bf16.mxu1 %v15118_v9  ;;  %v1349_v9 = vld [vmem:[#allocation5 + $0x1bc8] sm:$0xff] }
 0x290   :  { %10063 = vmatpush1.bf16.msra.mxu0 %v15363_v42  ;;  %v15158_v42 = vcombine.high %v1341_v38, %v1345_v39 }
 0x291   :  { %10064 = vmatprep.subr.bf16.mxu0 %v15372_v46  ;;  %10475 = vmatpush1.bf16.msra.mxu1 %v15117_v60  ;;  %v15412_v46 = vcombine.high %v1596_v40, %v1600_v8  ;;  %v1608_v60 = vld [vmem:[#allocation5 + $0x23e0] sm:$0xff] }
 0x292   :  { %10476 = vmatprep.subr.bf16.mxu1 %v15126_v62  ;;  %v15411_v62 = vcombine.low %v1596_v40, %v1600_v8  ;;  %v15420_v2 = vcombine.high %v1604_v59, %v1608_v60  ;;  %v15419_v44 = vcombine.low %v1604_v59, %v1608_v60  ;;  %v1389_v60 = vld [vmem:[#allocation5 + $0x1d08] sm:$0xff] }
 0x294   :  { %10065 = vmatpush1.bf16.msra.mxu0 %v15371_v61  ;;  %v15157_v61 = vcombine.low %v1341_v38, %v1345_v39  ;;  %v1632_v38 = vld [vmem:[#allocation5 + $0x24a0] sm:$0xff] }
 0x295   :  { %10066 = vmatprep.subr.bf16.mxu0 %v15380_v1  ;;  %10477 = vmatpush1.bf16.msra.mxu1 %v15125_v50  ;;  %v15166_v1 = vcombine.high %v1349_v9, %v1353_v51  ;;  %v17520_v50 = vrot.slane %v16437_v57, %v17358_v58 }
 0x296   :  { %10478 = vmatprep.subr.bf16.mxu1 %v15134_v0  ;;  %v1616_v0 = vld [vmem:[#allocation5 + $0x2420] sm:$0xff] }
 0x298   :  { %10067 = vmatpush1.bf16.msra.mxu0 %v15379_v63  ;;  %v1612_v63 = vld [vmem:[#allocation5 + $0x2400] sm:$0xff] }
 0x299   :  { %10068 = vmatprep.subr.bf16.mxu0 %v15388_v17  ;;  %10479 = vmatpush1.bf16.msra.mxu1 %v15133_v19  ;;  %v15165_v17 = vcombine.low %v1349_v9, %v1353_v51  ;;  %v15428_v27 = vcombine.high %v1612_v63, %v1616_v0  ;;  %v1365_v19 = vld [vmem:[#allocation5 + $0x1c48] sm:$0xff]  ;;  %v15427_v33 = vcombine.low %v1612_v63, %v1616_v0  ;;  %v1636_v9 = vld [vmem:[#allocation5 + $0x24c0] sm:$0xff] }
 0x29a   :  { %10480 = vmatprep.subr.bf16.mxu1 %v15142_v24  ;;  %v375_v24 = vcombine.high %v17517_v49, %v17520_v50  ;;  %v1397_v0 = vld [vmem:[#allocation5 + $0x1d48] sm:$0xff] }
 0x29c   :  { %10069 = vmatpush1.bf16.msra.mxu0 %v15387_v20  ;;  %v1369_v20 = vld [vmem:[#allocation5 + $0x1c68] sm:$0xff] }
 0x29d   :  { %10070 = vmatprep.subr.bf16.mxu0 %v15396_v25  ;;  %10481 = vmatpush1.bf16.msra.mxu1 %v15141_v34  ;;  %v1620_v25 = vld [vmem:[#allocation5 + $0x2440] sm:$0xff]  ;;  %v15182_v53 = vcombine.high %v1365_v19, %v1369_v20  ;;  %v1373_v34 = vld [vmem:[#allocation5 + $0x1c88] sm:$0xff]  ;;  %v15181_v39 = vcombine.low %v1365_v19, %v1369_v20 }
 0x29e   :  { %10482 = vmatprep.subr.bf16.mxu1 %v15150_v36  ;;  %v15436_v54 = vcombine.high %v1620_v25, %v1624_v30  ;;  %v17528_v36 = vpack.c.bf16 %v375_v24, %v375_v24  ;;  %v15435_v40 = vcombine.low %v1620_v25, %v1624_v30  ;;  %v1405_v24 = vld [vmem:[#allocation5 + $0x1d88] sm:$0xff]  ;;  %v1660_v30 = vld [vmem:[#allocation5 + $0x2580] sm:$0xff] }
 0x29f   :  { %v1409_v25 = vld [vmem:[#allocation5 + $0x1da8] sm:$0xff] }
 0x2a0   :  { %10071 = vmatpush1.bf16.msra.mxu0 %v15395_v35  ;;  %v1377_v35 = vld [vmem:[#allocation5 + $0x1ca8] sm:$0xff] }
 0x2a1   :  { %10072 = vmatprep.subr.bf16.mxu0 %v15404_v37  ;;  %10483 = vmatpush1.bf16.msra.mxu1 %v15149_v55  ;;  %v1628_v37 = vld [vmem:[#allocation5 + $0x2480] sm:$0xff]  ;;  %v15190_v8 = vcombine.high %v1373_v34, %v1377_v35  ;;  %v15189_v51 = vcombine.low %v1373_v34, %v1377_v35  ;;  %v1413_v35 = vld [vmem:[#allocation5 + $0x1dc8] sm:$0xff] }
 0x2a2   :  { %10484 = vmatprep.subr.bf16.mxu1 %v15158_v42  ;;  %v15444_v55 = vcombine.high %v1628_v37, %v1632_v38  ;;  %v1385_v42 = vld [vmem:[#allocation5 + $0x1ce8] sm:$0xff]  ;;  %v15443_v52 = vcombine.low %v1628_v37, %v1632_v38  ;;  %v1668_v38 = vld [vmem:[#allocation5 + $0x25c0] sm:$0xff] }
 0x2a3   :  { %v1417_v37 = vld [vmem:[#allocation5 + $0x1de8] sm:$0xff] }
 0x2a4   :  { %10073 = vmatpush1.bf16.msra.mxu0 %v15403_v56  ;;  %v1381_v56 = vld [vmem:[#allocation5 + $0x1cc8] sm:$0xff] }
 0x2a5   :  { %10074 = vmatprep.subr.bf16.mxu0 %v15412_v46  ;;  %10485 = vmatpush1.bf16.msra.mxu1 %v15157_v61  ;;  %v1640_v46 = vld [vmem:[#allocation5 + $0x24e0] sm:$0xff]  ;;  %v15198_v57 = vcombine.high %v1381_v56, %v1385_v42  ;;  %v1393_v61 = vld [vmem:[#allocation5 + $0x1d28] sm:$0xff] }
 0x2a6   :  { %10486 = vmatprep.subr.bf16.mxu1 %v15166_v1  ;;  %v15452_v59 = vcombine.high %v1636_v9, %v1640_v46  ;;  %v1648_v1 = vld [vmem:[#allocation5 + $0x2520] sm:$0xff]  ;;  %v15451_v3 = vcombine.low %v1636_v9, %v1640_v46  ;;  %v15206_v29 = vcombine.high %v1389_v60, %v1393_v61  ;;  %v1425_v9 = vld [vmem:[#allocation5 + $0x1e28] sm:$0xff] }
 0x2a7   :  { %v1676_v46 = vld [vmem:[#allocation5 + $0x2600] sm:$0xff] }
 0x2a8   :  { %10075 = vmatpush1.bf16.msra.mxu0 %v15411_v62  ;;  %v1644_v62 = vld [vmem:[#allocation5 + $0x2500] sm:$0xff] }
 0x2a9   :  { %10076 = vmatprep.subr.bf16.mxu0 %v15420_v2  ;;  %10487 = vmatpush1.bf16.msra.mxu1 %v15165_v17  ;;  %v15197_v2 = vcombine.low %v1381_v56, %v1385_v42  ;;  %v15460_v63 = vcombine.high %v1644_v62, %v1648_v1  ;;  %v1401_v17 = vld [vmem:[#allocation5 + $0x1d68] sm:$0xff] }
 0x2aa   :  { %10497 = vmatprep.subr.bf16.mxu1 %v15174_v26  ;;  %v15205_v26 = vcombine.low %v1389_v60, %v1393_v61  ;;  %v15214_v19 = vcombine.high %v1397_v0, %v1401_v17  ;;  %v1421_v42 = vld [vmem:[#allocation5 + $0x1e08] sm:$0xff] }
 0x2ab   :  { %v1429_v61 = vld [vmem:[#allocation5 + $0x1e48] sm:$0xff] }
 0x2ac   :  { %10077 = vmatpush1.bf16.msra.mxu0 %v15419_v44  ;;  %10489 = vmatmul.mubr.bf16.vlgmr.msra.gmra.mrb[4].mxu1 %v17490_v4  ;;  %v1656_v44 = vld [vmem:[#allocation5 + $0x2560] sm:$0xff] }
 0x2ad   :  { %10087 = vmatprep.subr.bf16.mxu0 %v15428_v27  ;;  %10498 = vmatpush1.bf16.msra.mxu1 %v15173_v31  ;;  %v15459_v27 = vcombine.low %v1644_v62, %v1648_v1  ;;  %v15468_v20 = vcombine.high %v1652_v10, %v1656_v44  ;;  %v1664_v31 = vld [vmem:[#allocation5 + $0x25a0] sm:$0xff]  ;;  %v1433_v62 = vld [vmem:[#allocation5 + $0x1e68] sm:$0xff] }
 0x2ae   :  { %10499 = vmatprep.subr.bf16.mxu1 %v15182_v53  ;;  %10529 = vmatprep.mubr.bf16.mxu1 %v17492_v11  ;;  %v15467_v53 = vcombine.low %v1652_v10, %v1656_v44  ;;  %v15476_v34 = vcombine.high %v1660_v30, %v1664_v31  ;;  %v1684_v1 = vld [vmem:[#allocation5 + $0x2640] sm:$0xff]  ;;  %v1441_v10 = vld [vmem:[#allocation5 + $0x1ea8] sm:$0xff] }
 0x2af   :  { %10079 = vmatmul.mubr.bf16.vlgmr.msra.gmra.mrb[0].mxu0 %v17526_v32  ;;  %v1692_v44 = vld [vmem:[#allocation5 + $0x2680] sm:$0xff] }
 0x2b0   :  { %10088 = vmatpush1.bf16.msra.mxu0 %v15427_v33  ;;  %10119 = vmatprep.mubr.bf16.mxu0 %v17528_v36  ;;  %v15213_v33 = vcombine.low %v1397_v0, %v1401_v17  ;;  %v1437_v17 = vld [vmem:[#allocation5 + $0x1e88] sm:$0xff] }
 0x2b1   :  { %10089 = vmatprep.subr.bf16.mxu0 %v15436_v54  ;;  %10500 = vmatpush1.bf16.msra.mxu1 %v15181_v39  ;;  %v15222_v54 = vcombine.high %v1405_v24, %v1409_v25  ;;  %v1672_v39 = vld [vmem:[#allocation5 + $0x25e0] sm:$0xff] }
 0x2b2   :  { %10501 = vmatprep.subr.bf16.mxu1 %v15190_v8  ;;  %v15475_v8 = vcombine.low %v1660_v30, %v1664_v31  ;;  %v15484_v56 = vcombine.high %v1668_v38, %v1672_v39  ;;  %v1449_v30 = vld [vmem:[#allocation5 + $0x1ee8] sm:$0xff]  ;;  %v1700_v31 = vld [vmem:[#allocation5 + $0x26c0] sm:$0xff] }
 0x2b4   :  { %10090 = vmatpush1.bf16.msra.mxu0 %v15435_v40  ;;  %v15221_v40 = vcombine.low %v1405_v24, %v1409_v25  ;;  %v1445_v25 = vld [vmem:[#allocation5 + $0x1ec8] sm:$0xff] }
 0x2b5   :  { %10091 = vmatprep.subr.bf16.mxu0 %v15444_v55  ;;  %10502 = vmatpush1.bf16.msra.mxu1 %v15189_v51  ;;  %v15230_v55 = vcombine.high %v1413_v35, %v1417_v37  ;;  %v1680_v51 = vld [vmem:[#allocation5 + $0x2620] sm:$0xff] }
 0x2b6   :  { %10503 = vmatprep.subr.bf16.mxu1 %v15198_v57  ;;  %v15483_v57 = vcombine.low %v1668_v38, %v1672_v39  ;;  %v15492_v60 = vcombine.high %v1676_v46, %v1680_v51  ;;  %v1457_v38 = vld [vmem:[#allocation5 + $0x1f28] sm:$0xff]  ;;  %v1708_v39 = vld [vmem:[#allocation5 + $0x2700] sm:$0xff] }
 0x2b8   :  { %10092 = vmatpush1.bf16.msra.mxu0 %v15443_v52  ;;  %v15229_v52 = vcombine.low %v1413_v35, %v1417_v37  ;;  %v1453_v37 = vld [vmem:[#allocation5 + $0x1f08] sm:$0xff] }
 0x2b9   :  { %10093 = vmatprep.subr.bf16.mxu0 %v15452_v59  ;;  %10504 = vmatpush1.bf16.msra.mxu1 %v15197_v2  ;;  %v15238_v59 = vcombine.high %v1421_v42, %v1425_v9  ;;  %v1688_v2 = vld [vmem:[#allocation5 + $0x2660] sm:$0xff] }
 0x2ba   :  { %10505 = vmatprep.subr.bf16.mxu1 %v15206_v29  ;;  %v15491_v29 = vcombine.low %v1676_v46, %v1680_v51  ;;  %v15500_v0 = vcombine.high %v1684_v1, %v1688_v2  ;;  %v1465_v46 = vld [vmem:[#allocation5 + $0x1f68] sm:$0xff]  ;;  %v1716_v51 = vld [vmem:[#allocation5 + $0x2740] sm:$0xff] }
 0x2bc   :  { %10094 = vmatpush1.bf16.msra.mxu0 %v15451_v3  ;;  %v15237_v3 = vcombine.low %v1421_v42, %v1425_v9  ;;  %v1461_v9 = vld [vmem:[#allocation5 + $0x1f48] sm:$0xff] }
 0x2bd   :  { %10095 = vmatprep.subr.bf16.mxu0 %v15460_v63  ;;  %10506 = vmatpush1.bf16.msra.mxu1 %v15205_v26  ;;  %v15246_v63 = vcombine.high %v1429_v61, %v1433_v62  ;;  %v1696_v26 = vld [vmem:[#allocation5 + $0x26a0] sm:$0xff] }
 0x2be   :  { %10507 = vmatprep.subr.bf16.mxu1 %v15214_v19  ;;  %v15499_v19 = vcombine.low %v1684_v1, %v1688_v2  ;;  %v15508_v24 = vcombine.high %v1692_v44, %v1696_v26  ;;  %v1473_v1 = vld [vmem:[#allocation5 + $0x1fa8] sm:$0xff]  ;;  %v1724_v2 = vld [vmem:[#allocation5 + $0x2780] sm:$0xff] }
 0x2c0   :  { %10096 = vmatpush1.bf16.msra.mxu0 %v15459_v27  ;;  %v15245_v27 = vcombine.low %v1429_v61, %v1433_v62  ;;  %v1469_v62 = vld [vmem:[#allocation5 + $0x1f88] sm:$0xff] }
 0x2c1   :  { %10097 = vmatprep.subr.bf16.mxu0 %v15468_v20  ;;  %10508 = vmatpush1.bf16.msra.mxu1 %v15213_v33  ;;  %v15254_v20 = vcombine.high %v1437_v17, %v1441_v10  ;;  %v1704_v33 = vld [vmem:[#allocation5 + $0x26e0] sm:$0xff] }
 0x2c2   :  { %10509 = vmatprep.subr.bf16.mxu1 %v15222_v54  ;;  %v15507_v54 = vcombine.low %v1692_v44, %v1696_v26  ;;  %v15516_v35 = vcombine.high %v1700_v31, %v1704_v33  ;;  %v1481_v44 = vld [vmem:[#allocation5 + $0x1fe8] sm:$0xff] }
 0x2c3   :  { %v16438_v26 = vld [vmem:[#allocation2 + $0x28] ss:$48 sps:$4 sm:$0xff]  }
 0x2c4   :  { %10098 = vmatpush1.bf16.msra.mxu0 %v15467_v53  ;;  %v15253_v53 = vcombine.low %v1437_v17, %v1441_v10  ;;  %v1477_v17 = vld [vmem:[#allocation5 + $0x1fc8] sm:$0xff] }
 0x2c5   :  { %10099 = vmatprep.subr.bf16.mxu0 %v15476_v34  ;;  %10510 = vmatpush1.bf16.msra.mxu1 %v15221_v40  ;;  %v15262_v34 = vcombine.high %v1445_v25, %v1449_v30  ;;  %v1712_v40 = vld [vmem:[#allocation5 + $0x2720] sm:$0xff] }
 0x2c6   :  { %10511 = vmatprep.subr.bf16.mxu1 %v15230_v55  ;;  %v15515_v55 = vcombine.low %v1700_v31, %v1704_v33  ;;  %v15524_v42 = vcombine.high %v1708_v39, %v1712_v40  ;;  %v1485_v33 = vld [vmem:[#allocation5 + $0x2008] sm:$0xff] }
 0x2c8   :  { %10100 = vmatpush1.bf16.msra.mxu0 %v15475_v8  ;;  %v15261_v8 = vcombine.low %v1445_v25, %v1449_v30  ;;  %v15294_v30 = vcombine.high %v1477_v17, %v1481_v44 }
 0x2c9   :  { %10101 = vmatprep.subr.bf16.mxu0 %v15484_v56  ;;  %10512 = vmatpush1.bf16.msra.mxu1 %v15229_v52  ;;  %v15270_v56 = vcombine.high %v1453_v37, %v1457_v38  ;;  %v1720_v52 = vld [vmem:[#allocation5 + $0x2760] sm:$0xff] }
 0x2ca   :  { %10513 = vmatprep.subr.bf16.mxu1 %v15238_v59  ;;  %v15523_v59 = vcombine.low %v1708_v39, %v1712_v40  ;;  %v15532_v61 = vcombine.high %v1716_v51, %v1720_v52  ;;  %v374_v39 = vcombine.low %v17517_v49, %v17520_v50 }
 0x2cc   :  { %10102 = vmatpush1.bf16.msra.mxu0 %v15483_v57  ;;  %v15269_v57 = vcombine.low %v1453_v37, %v1457_v38  ;;  %v1744_v37 = vld [vmem:[#allocation5 + $0x2820] sm:$0xff]  ;;  %v15293_v38 = vcombine.low %v1477_v17, %v1481_v44  ;;  %v1509_v17 = vld [vmem:[#allocation5 + $0x20c8] sm:$0xff] }
 0x2cd   :  { %10103 = vmatprep.subr.bf16.mxu0 %v15492_v60  ;;  %10514 = vmatpush1.bf16.msra.mxu1 %v15237_v3  ;;  %v15278_v60 = vcombine.high %v1461_v9, %v1465_v46  ;;  %v1728_v3 = vld [vmem:[#allocation5 + $0x27a0] sm:$0xff] }
 0x2ce   :  { %10515 = vmatprep.subr.bf16.mxu1 %v15246_v63  ;;  %v15531_v63 = vcombine.low %v1716_v51, %v1720_v52  ;;  %v15540_v10 = vcombine.high %v1724_v2, %v1728_v3  ;;  %v15539_v25 = vcombine.low %v1724_v2, %v1728_v3  ;;  %v1752_v51 = vld [vmem:[#allocation5 + $0x2860] sm:$0xff] }
 0x2cf   :  { %v1760_v2 = vld [vmem:[#allocation5 + $0x28a0] sm:$0xff] }
 0x2d0   :  { %10104 = vmatpush1.bf16.msra.mxu0 %v15491_v29  ;;  %v15277_v29 = vcombine.low %v1461_v9, %v1465_v46  ;;  %v1748_v46 = vld [vmem:[#allocation5 + $0x2840] sm:$0xff] }
 0x2d1   :  { %10105 = vmatprep.subr.bf16.mxu0 %v15500_v0  ;;  %10516 = vmatpush1.bf16.msra.mxu1 %v15245_v27  ;;  %v15286_v0 = vcombine.high %v1469_v62, %v1473_v1  ;;  %v16440_v27 = vld [vmem:[#allocation2 + $0x88] ss:$48 sps:$4 sm:$0xff]   ;;  %v15564_v50 = vcombine.high %v1748_v46, %v1752_v51  ;;  %v1764_v44 = vld [vmem:[#allocation5 + $0x28c0] sm:$0xff] }
 0x2d2   :  { %10517 = vmatprep.subr.bf16.mxu1 %v15254_v20  ;;  %v1736_v20 = vld [vmem:[#allocation5 + $0x27e0] sm:$0xff] }
 0x2d4   :  { %10106 = vmatpush1.bf16.msra.mxu0 %v15499_v19  ;;  %v1732_v19 = vld [vmem:[#allocation5 + $0x27c0] sm:$0xff] }
 0x2d5   :  { %10107 = vmatprep.subr.bf16.mxu0 %v15508_v24  ;;  %10518 = vmatpush1.bf16.msra.mxu1 %v15253_v53  ;;  %v15285_v24 = vcombine.low %v1469_v62, %v1473_v1  ;;  %v15548_v31 = vcombine.high %v1732_v19, %v1736_v20  ;;  %v1489_v53 = vld [vmem:[#allocation5 + $0x2028] sm:$0xff]  ;;  %v15547_v40 = vcombine.low %v1732_v19, %v1736_v20  ;;  %v1756_v1 = vld [vmem:[#allocation5 + $0x2880] sm:$0xff] }
 0x2d6   :  { %10519 = vmatprep.subr.bf16.mxu1 %v15262_v34  ;;  %v17538_v34 = vrot.slane %v16440_v27, %v17358_v58  ;;  %v15301_v52 = vcombine.low %v1485_v33, %v1489_v53  ;;  %v15571_v19 = vcombine.low %v1756_v1, %v1760_v2 }
 0x2d8   :  { %10108 = vmatpush1.bf16.msra.mxu0 %v15507_v54  ;;  %v17535_v54 = vrot.slane %v16438_v26, %v17358_v58  ;;  %v1768_v26 = vld [vmem:[#allocation5 + $0x28e0] sm:$0xff] }
 0x2d9   :  { %10109 = vmatprep.subr.bf16.mxu0 %v15516_v35  ;;  %10520 = vmatpush1.bf16.msra.mxu1 %v15261_v8  ;;  %v1740_v35 = vld [vmem:[#allocation5 + $0x2800] sm:$0xff]  ;;  %v15302_v8 = vcombine.high %v1485_v33, %v1489_v53 }
 0x2da   :  { %10521 = vmatprep.subr.bf16.mxu1 %v15270_v56  ;;  %v1493_v56 = vld [vmem:[#allocation5 + $0x2048] sm:$0xff]  ;;  %v409_v9 = vcombine.high %v17535_v54, %v17538_v34  ;;  %v1776_v33 = vld [vmem:[#allocation5 + $0x2920] sm:$0xff] }
 0x2dc   :  { %10110 = vmatpush1.bf16.msra.mxu0 %v15515_v55  ;;  %v15556_v55 = vcombine.high %v1740_v35, %v1744_v37  ;;  %v17546_v62 = vpack.c.bf16 %v409_v9, %v409_v9 }
 0x2dd   :  { %10111 = vmatprep.subr.bf16.mxu0 %v15524_v42  ;;  %10522 = vmatpush1.bf16.msra.mxu1 %v15269_v57  ;;  %v1497_v42 = vld [vmem:[#allocation5 + $0x2068] sm:$0xff]  ;;  %v17544_v57 = vpack.c.bf16 %v374_v39, %v374_v39 }
 0x2de   :  { %10523 = vmatprep.subr.bf16.mxu1 %v15278_v60  ;;  %v15310_v49 = vcombine.high %v1493_v56, %v1497_v42  ;;  %v1501_v60 = vld [vmem:[#allocation5 + $0x2088] sm:$0xff]  ;;  %v15309_v3 = vcombine.low %v1493_v56, %v1497_v42 }
 0x2df   :  { %v1525_v39 = vld [vmem:[#allocation5 + $0x2148] sm:$0xff] }
 0x2e0   :  { %10112 = vmatpush1.bf16.msra.mxu0 %v15523_v59  ;;  %v15555_v59 = vcombine.low %v1740_v35, %v1744_v37  ;;  %v15579_v35 = vcombine.low %v1764_v44, %v1768_v26 }
 0x2e1   :  { %10113 = vmatprep.subr.bf16.mxu0 %v15532_v61  ;;  %10524 = vmatpush1.bf16.msra.mxu1 %v15277_v29  ;;  %v1505_v61 = vld [vmem:[#allocation5 + $0x20a8] sm:$0xff]  ;;  %v15563_v29 = vcombine.low %v1748_v46, %v1752_v51 }
 0x2e2   :  { %10525 = vmatprep.subr.bf16.mxu1 %v15286_v0  ;;  %v15572_v0 = vcombine.high %v1756_v1, %v1760_v2  ;;  %v15317_v27 = vcombine.low %v1501_v60, %v1505_v61  ;;  %v1533_v51 = vld [vmem:[#allocation5 + $0x2188] sm:$0xff] }
 0x2e3   :  { %v1541_v2 = vld [vmem:[#allocation5 + $0x21c8] sm:$0xff] }
 0x2e4   :  { %10114 = vmatpush1.bf16.msra.mxu0 %v15531_v63  ;;  %v15318_v63 = vcombine.high %v1501_v60, %v1505_v61 }
 0x2e5   :  { %10115 = vmatprep.subr.bf16.mxu0 %v15540_v10  ;;  %10526 = vmatpush1.bf16.msra.mxu1 %v15285_v24  ;;  %v1513_v10 = vld [vmem:[#allocation5 + $0x20e8] sm:$0xff]  ;;  %v15580_v24 = vcombine.high %v1764_v44, %v1768_v26 }
 0x2e6   :  { %10527 = vmatprep.subr.bf16.mxu1 %v15294_v30  ;;  %v15326_v20 = vcombine.high %v1509_v17, %v1513_v10  ;;  %v1521_v30 = vld [vmem:[#allocation5 + $0x2128] sm:$0xff]  ;;  %v15325_v53 = vcombine.low %v1509_v17, %v1513_v10 }
 0x2e7   :  { %v1549_v26 = vld [vmem:[#allocation5 + $0x2208] sm:$0xff] }
 0x2e8   :  { %10116 = vmatpush1.bf16.msra.mxu0 %v15539_v25  ;;  %v1517_v25 = vld [vmem:[#allocation5 + $0x2108] sm:$0xff] }
 0x2e9   :  { %10117 = vmatprep.subr.bf16.mxu0 %v15548_v31  ;;  %10528 = vmatpush1.bf16.msra.mxu1 %v15293_v38  ;;  %v1772_v31 = vld [vmem:[#allocation5 + $0x2900] sm:$0xff]  ;;  %v15334_v37 = vcombine.high %v1517_v25, %v1521_v30  ;;  %v15333_v56 = vcombine.low %v1517_v25, %v1521_v30 }
 0x2ea   :  { %10538 = vmatprep.subr.bf16.mxu1 %v15302_v8  ;;  %v15588_v38 = vcombine.high %v1772_v31, %v1776_v33  ;;  %v1780_v8 = vld [vmem:[#allocation5 + $0x2940] sm:$0xff]  ;;  %v15587_v42 = vcombine.low %v1772_v31, %v1776_v33  ;;  %v1557_v33 = vld [vmem:[#allocation5 + $0x2248] sm:$0xff] }
 0x2ec   :  { %10118 = vmatpush1.bf16.msra.mxu0 %v15547_v40  ;;  %10530 = vmatmul.mubr.bf16.vlgmr.msra.gmra.mrb[4].mxu1 %v17508_v13  ;;  %v1529_v40 = vld [vmem:[#allocation5 + $0x2168] sm:$0xff] }
 0x2ed   :  { %10128 = vmatprep.subr.bf16.mxu0 %v15556_v55  ;;  %10539 = vmatpush1.bf16.msra.mxu1 %v15301_v52  ;;  %v1784_v55 = vld [vmem:[#allocation5 + $0x2960] sm:$0xff]  ;;  %v15342_v9 = vcombine.high %v1525_v39, %v1529_v40  ;;  %v1537_v52 = vld [vmem:[#allocation5 + $0x21a8] sm:$0xff] }
 0x2ee   :  { %10540 = vmatprep.subr.bf16.mxu1 %v15310_v49  ;;  %10570 = vmatprep.mubr.bf16.mxu1 %v17510_v18  ;;  %v15596_v46 = vcombine.high %v1780_v8, %v1784_v55  ;;  %v1792_v49 = vld [vmem:[#allocation5 + $0x29a0] sm:$0xff]  ;;  %v15595_v60 = vcombine.low %v1780_v8, %v1784_v55  ;;  %v15350_v61 = vcombine.high %v1533_v51, %v1537_v52  ;;  %v1565_v55 = vld [vmem:[#allocation5 + $0x2288] sm:$0xff] }
 0x2ef   :  { %10120 = vmatmul.mubr.bf16.vlgmr.msra.gmra.mrb[0].mxu0 %v17544_v57 }
 0x2f0   :  { %10129 = vmatpush1.bf16.msra.mxu0 %v15555_v59  ;;  %10160 = vmatprep.mubr.bf16.mxu0 %v17546_v62  ;;  %v1788_v59 = vld [vmem:[#allocation5 + $0x2980] sm:$0xff] }
 0x2f1   :  { %10130 = vmatprep.subr.bf16.mxu0 %v15564_v50  ;;  %10541 = vmatpush1.bf16.msra.mxu1 %v15309_v3  ;;  %v15341_v50 = vcombine.low %v1525_v39, %v1529_v40  ;;  %v15604_v1 = vcombine.high %v1788_v59, %v1792_v49  ;;  %v1545_v3 = vld [vmem:[#allocation5 + $0x21e8] sm:$0xff]  ;;  %v15603_v17 = vcombine.low %v1788_v59, %v1792_v49 }
 0x2f2   :  { %10542 = vmatprep.subr.bf16.mxu1 %v15318_v63  ;;  %v1800_v63 = vld [vmem:[#allocation5 + $0x29e0] sm:$0xff]  ;;  %v15358_v10 = vcombine.high %v1541_v2, %v1545_v3  ;;  %v1573_v49 = vld [vmem:[#allocation5 + $0x22c8] sm:$0xff] }
 0x2f4   :  { %10131 = vmatpush1.bf16.msra.mxu0 %v15563_v29  ;;  %v1796_v29 = vld [vmem:[#allocation5 + $0x29c0] sm:$0xff] }
 0x2f5   :  { %10132 = vmatprep.subr.bf16.mxu0 %v15572_v0  ;;  %10543 = vmatpush1.bf16.msra.mxu1 %v15317_v27  ;;  %v15349_v0 = vcombine.low %v1533_v51, %v1537_v52  ;;  %v15612_v44 = vcombine.high %v1796_v29, %v1800_v63  ;;  %v1553_v27 = vld [vmem:[#allocation5 + $0x2228] sm:$0xff]  ;;  %v15611_v25 = vcombine.low %v1796_v29, %v1800_v63 }
 0x2f6   :  { %10544 = vmatprep.subr.bf16.mxu1 %v15326_v20  ;;  %v1808_v20 = vld [vmem:[#allocation5 + $0x2a20] sm:$0xff]  ;;  %v15366_v30 = vcombine.high %v1549_v26, %v1553_v27  ;;  %v1581_v63 = vld [vmem:[#allocation5 + $0x2308] sm:$0xff] }
 0x2f8   :  { %10133 = vmatpush1.bf16.msra.mxu0 %v15571_v19  ;;  %v1804_v19 = vld [vmem:[#allocation5 + $0x2a00] sm:$0xff] }
 0x2f9   :  { %10134 = vmatprep.subr.bf16.mxu0 %v15580_v24  ;;  %10545 = vmatpush1.bf16.msra.mxu1 %v15325_v53  ;;  %v15357_v24 = vcombine.low %v1541_v2, %v1545_v3  ;;  %v15620_v31 = vcombine.high %v1804_v19, %v1808_v20  ;;  %v1561_v53 = vld [vmem:[#allocation5 + $0x2268] sm:$0xff]  ;;  %v15619_v39 = vcombine.low %v1804_v19, %v1808_v20 }
 0x2fa   :  { %10546 = vmatprep.subr.bf16.mxu1 %v15334_v37  ;;  %v1816_v37 = vld [vmem:[#allocation5 + $0x2a60] sm:$0xff]  ;;  %v15374_v40 = vcombine.high %v1557_v33, %v1561_v53  ;;  %v1589_v20 = vld [vmem:[#allocation5 + $0x2348] sm:$0xff] }
 0x2fc   :  { %10135 = vmatpush1.bf16.msra.mxu0 %v15579_v35  ;;  %v1812_v35 = vld [vmem:[#allocation5 + $0x2a40] sm:$0xff] }
 0x2fd   :  { %10136 = vmatprep.subr.bf16.mxu0 %v15588_v38  ;;  %10547 = vmatpush1.bf16.msra.mxu1 %v15333_v56  ;;  %v15365_v38 = vcombine.low %v1549_v26, %v1553_v27  ;;  %v15628_v8 = vcombine.high %v1812_v35, %v1816_v37  ;;  %v1569_v56 = vld [vmem:[#allocation5 + $0x22a8] sm:$0xff]  ;;  %v15627_v51 = vcombine.low %v1812_v35, %v1816_v37 }
 0x2fe   :  { %10548 = vmatprep.subr.bf16.mxu1 %v15342_v9  ;;  %v1824_v9 = vld [vmem:[#allocation5 + $0x2aa0] sm:$0xff]  ;;  %v15382_v52 = vcombine.high %v1565_v55, %v1569_v56  ;;  %v1597_v37 = vld [vmem:[#allocation5 + $0x2388] sm:$0xff] }
 0x300   :  { %10137 = vmatpush1.bf16.msra.mxu0 %v15587_v42  ;;  %v1820_v42 = vld [vmem:[#allocation5 + $0x2a80] sm:$0xff] }
 0x301   :  { %10138 = vmatprep.subr.bf16.mxu0 %v15596_v46  ;;  %10549 = vmatpush1.bf16.msra.mxu1 %v15341_v50  ;;  %v15373_v46 = vcombine.low %v1557_v33, %v1561_v53  ;;  %v15636_v59 = vcombine.high %v1820_v42, %v1824_v9  ;;  %v1577_v50 = vld [vmem:[#allocation5 + $0x22e8] sm:$0xff]  ;;  %v15635_v2 = vcombine.low %v1820_v42, %v1824_v9 }
 0x302   :  { %10550 = vmatprep.subr.bf16.mxu1 %v15350_v61  ;;  %v1832_v61 = vld [vmem:[#allocation5 + $0x2ae0] sm:$0xff]  ;;  %v15390_v3 = vcombine.high %v1573_v49, %v1577_v50  ;;  %v1605_v42 = vld [vmem:[#allocation5 + $0x23c8] sm:$0xff] }
 0x304   :  { %10139 = vmatpush1.bf16.msra.mxu0 %v15595_v60  ;;  %v1828_v60 = vld [vmem:[#allocation5 + $0x2ac0] sm:$0xff] }
 0x305   :  { %10140 = vmatprep.subr.bf16.mxu0 %v15604_v1  ;;  %10551 = vmatpush1.bf16.msra.mxu1 %v15349_v0  ;;  %v15381_v1 = vcombine.low %v1565_v55, %v1569_v56  ;;  %v15644_v29 = vcombine.high %v1828_v60, %v1832_v61  ;;  %v1585_v0 = vld [vmem:[#allocation5 + $0x2328] sm:$0xff]  ;;  %v15643_v26 = vcombine.low %v1828_v60, %v1832_v61 }
 0x306   :  { %10552 = vmatprep.subr.bf16.mxu1 %v15358_v10  ;;  %v1840_v10 = vld [vmem:[#allocation5 + $0x2b20] sm:$0xff]  ;;  %v15398_v27 = vcombine.high %v1581_v63, %v1585_v0 }
 0x308   :  { %10141 = vmatpush1.bf16.msra.mxu0 %v15603_v17  ;;  %v1836_v17 = vld [vmem:[#allocation5 + $0x2b00] sm:$0xff] }
 0x309   :  { %10142 = vmatprep.subr.bf16.mxu0 %v15612_v44  ;;  %10553 = vmatpush1.bf16.msra.mxu1 %v15357_v24  ;;  %v15389_v44 = vcombine.low %v1573_v49, %v1577_v50  ;;  %v15652_v19 = vcombine.high %v1836_v17, %v1840_v10  ;;  %v1593_v24 = vld [vmem:[#allocation5 + $0x2368] sm:$0xff]  ;;  %v15651_v33 = vcombine.low %v1836_v17, %v1840_v10  ;;  %v1864_v49 = vld [vmem:[#allocation5 + $0x2be0] sm:$0xff] }
 0x30a   :  { %10554 = vmatprep.subr.bf16.mxu1 %v15366_v30  ;;  %v1848_v30 = vld [vmem:[#allocation5 + $0x2b60] sm:$0xff]  ;;  %v15406_v53 = vcombine.high %v1589_v20, %v1593_v24 }
 0x30b   :  { %v1872_v17 = vld [vmem:[#allocation5 + $0x2c20] sm:$0xff] }
 0x30c   :  { %10143 = vmatpush1.bf16.msra.mxu0 %v15611_v25  ;;  %v1844_v25 = vld [vmem:[#allocation5 + $0x2b40] sm:$0xff] }
 0x30d   :  { %10144 = vmatprep.subr.bf16.mxu0 %v15620_v31  ;;  %10555 = vmatpush1.bf16.msra.mxu1 %v15365_v38  ;;  %v15397_v31 = vcombine.low %v1581_v63, %v1585_v0  ;;  %v15660_v35 = vcombine.high %v1844_v25, %v1848_v30  ;;  %v1601_v38 = vld [vmem:[#allocation5 + $0x23a8] sm:$0xff]  ;;  %v15659_v55 = vcombine.low %v1844_v25, %v1848_v30  ;;  %v1868_v0 = vld [vmem:[#allocation5 + $0x2c00] sm:$0xff] }
 0x30e   :  { %10556 = vmatprep.subr.bf16.mxu1 %v15374_v40  ;;  %v1856_v40 = vld [vmem:[#allocation5 + $0x2ba0] sm:$0xff]  ;;  %v15414_v56 = vcombine.high %v1597_v37, %v1601_v38  ;;  %v15413_v50 = vcombine.low %v1597_v37, %v1601_v38  ;;  %v1633_v37 = vld [vmem:[#allocation5 + $0x24a8] sm:$0xff] }
 0x30f   :  { %v1880_v30 = vld [vmem:[#allocation5 + $0x2c60] sm:$0xff] }
 0x310   :  { %10145 = vmatpush1.bf16.msra.mxu0 %v15619_v39  ;;  %v1852_v39 = vld [vmem:[#allocation5 + $0x2b80] sm:$0xff] }
 0x311   :  { %10146 = vmatprep.subr.bf16.mxu0 %v15628_v8  ;;  %10557 = vmatpush1.bf16.msra.mxu1 %v15373_v46  ;;  %v15405_v8 = vcombine.low %v1589_v20, %v1593_v24  ;;  %v15668_v9 = vcombine.high %v1852_v39, %v1856_v40  ;;  %v1609_v46 = vld [vmem:[#allocation5 + $0x23e8] sm:$0xff]  ;;  %v15667_v60 = vcombine.low %v1852_v39, %v1856_v40  ;;  %v1884_v39 = vld [vmem:[#allocation5 + $0x2c80] sm:$0xff] }
 0x312   :  { %10558 = vmatprep.subr.bf16.mxu1 %v15382_v52  ;;  %v16443_v52 = vld [vmem:[#allocation2 + $0x8c] ss:$48 sps:$4 sm:$0xff]   ;;  %v15422_v61 = vcombine.high %v1605_v42, %v1609_v46  ;;  %v15421_v10 = vcombine.low %v1605_v42, %v1609_v46  ;;  %v1888_v40 = vld [vmem:[#allocation5 + $0x2ca0] sm:$0xff] }
 0x313   :  { %v17556_v63 = vrot.slane %v16443_v52, %v17358_v58  ;;  %v1621_v20 = vld [vmem:[#allocation5 + $0x2448] sm:$0xff]  ;;  %v15700_v42 = vcombine.high %v1884_v39, %v1888_v40  ;;  %v1896_v52 = vld [vmem:[#allocation5 + $0x2ce0] sm:$0xff] }
 0x314   :  { %10147 = vmatpush1.bf16.msra.mxu0 %v15627_v51  ;;  %v16442_v51 = vld [vmem:[#allocation2 + $0x2c] ss:$48 sps:$4 sm:$0xff]  }
 0x315   :  { %10148 = vmatprep.subr.bf16.mxu0 %v15636_v59  ;;  %10559 = vmatpush1.bf16.msra.mxu1 %v15381_v1  ;;  %v1860_v59 = vld [vmem:[#allocation5 + $0x2bc0] sm:$0xff]  ;;  %v1625_v24 = vld [vmem:[#allocation5 + $0x2468] sm:$0xff] }
 0x316   :  { %10560 = vmatprep.subr.bf16.mxu1 %v15390_v3  ;;  %v15676_v1 = vcombine.high %v1860_v59, %v1864_v49  ;;  %v1617_v3 = vld [vmem:[#allocation5 + $0x2428] sm:$0xff] }
 0x317   :  { %v1641_v46 = vld [vmem:[#allocation5 + $0x24e8] sm:$0xff] }
 0x318   :  { %10149 = vmatpush1.bf16.msra.mxu0 %v15635_v2  ;;  %v1613_v2 = vld [vmem:[#allocation5 + $0x2408] sm:$0xff] }
 0x319   :  { %10150 = vmatprep.subr.bf16.mxu0 %v15644_v29  ;;  %10561 = vmatpush1.bf16.msra.mxu1 %v15389_v44  ;;  %v17553_v29 = vrot.slane %v16442_v51, %v17358_v58  ;;  %v408_v44 = vcombine.low %v17535_v54, %v17538_v34  ;;  %v1876_v58 = vld [vmem:[#allocation5 + $0x2c40] sm:$0xff]  ;;  %v15438_v54 = vcombine.high %v1621_v20, %v1625_v24 }
 0x31a   :  { %10562 = vmatprep.subr.bf16.mxu1 %v15398_v27  ;;  %v15430_v27 = vcombine.high %v1613_v2, %v1617_v3  ;;  %v15692_v34 = vcombine.high %v1876_v58, %v1880_v30  ;;  %v1892_v51 = vld [vmem:[#allocation5 + $0x2cc0] sm:$0xff] }
 0x31b   :  { %v411_v25 = vcombine.high %v17553_v29, %v17556_v63 }
 0x31c   :  { %10151 = vmatpush1.bf16.msra.mxu0 %v15643_v26  ;;  %v15675_v26 = vcombine.low %v1860_v59, %v1864_v49  ;;  %v15699_v49 = vcombine.low %v1884_v39, %v1888_v40 }
 0x31d   :  { %10152 = vmatprep.subr.bf16.mxu0 %v15652_v19  ;;  %10563 = vmatpush1.bf16.msra.mxu1 %v15397_v31  ;;  %v15684_v19 = vcombine.high %v1868_v0, %v1872_v17  ;;  %v15429_v31 = vcombine.low %v1613_v2, %v1617_v3  ;;  %v17564_v38 = vpack.c.bf16 %v411_v25, %v411_v25  ;;  %v1900_v2 = vld [vmem:[#allocation5 + $0x2d00] sm:$0xff] }
 0x31e   :  { %10564 = vmatprep.subr.bf16.mxu1 %v15406_v53  ;;  %v15683_v53 = vcombine.low %v1868_v0, %v1872_v17  ;;  %v1904_v3 = vld [vmem:[#allocation5 + $0x2d20] sm:$0xff]  ;;  %v15707_v17 = vcombine.low %v1892_v51, %v1896_v52 }
 0x31f   :  { %v15715_v25 = vcombine.low %v1900_v2, %v1904_v3 }
 0x320   :  { %10153 = vmatpush1.bf16.msra.mxu0 %v15651_v33  ;;  %v17562_v33 = vpack.c.bf16 %v408_v44, %v408_v44  ;;  %v15716_v44 = vcombine.high %v1900_v2, %v1904_v3 }
 0x321   :  { %10154 = vmatprep.subr.bf16.mxu0 %v15660_v35  ;;  %10565 = vmatpush1.bf16.msra.mxu1 %v15405_v8  ;;  %v1629_v35 = vld [vmem:[#allocation5 + $0x2488] sm:$0xff]  ;;  %v15437_v8 = vcombine.low %v1621_v20, %v1625_v24  ;;  %v1912_v20 = vld [vmem:[#allocation5 + $0x2d60] sm:$0xff] }
 0x322   :  { %10566 = vmatprep.subr.bf16.mxu1 %v15414_v56  ;;  %v15446_v56 = vcombine.high %v1629_v35, %v1633_v37  ;;  %v15445_v59 = vcombine.low %v1629_v35, %v1633_v37 }
 0x324   :  { %10155 = vmatpush1.bf16.msra.mxu0 %v15659_v55  ;;  %v15691_v55 = vcombine.low %v1876_v58, %v1880_v30 }
 0x325   :  { %10156 = vmatprep.subr.bf16.mxu0 %v15668_v9  ;;  %10567 = vmatpush1.bf16.msra.mxu1 %v15413_v50  ;;  %v1637_v9 = vld [vmem:[#allocation5 + $0x24c8] sm:$0xff] }
 0x326   :  { %10568 = vmatprep.subr.bf16.mxu1 %v15422_v61  ;;  %v15454_v50 = vcombine.high %v1637_v9, %v1641_v46  ;;  %v1645_v61 = vld [vmem:[#allocation5 + $0x2508] sm:$0xff]  ;;  %v15453_v0 = vcombine.low %v1637_v9, %v1641_v46 }
 0x328   :  { %10157 = vmatpush1.bf16.msra.mxu0 %v15667_v60  ;;  %v15708_v60 = vcombine.high %v1892_v51, %v1896_v52 }
 0x329   :  { %10158 = vmatprep.subr.bf16.mxu0 %v15676_v1  ;;  %10569 = vmatpush1.bf16.msra.mxu1 %v15421_v10  ;;  %v1649_v1 = vld [vmem:[#allocation5 + $0x2528] sm:$0xff] }
 0x32a   :  { %10579 = vmatprep.subr.bf16.mxu1 %v15430_v27  ;;  %v15462_v10 = vcombine.high %v1645_v61, %v1649_v1  ;;  %v1657_v27 = vld [vmem:[#allocation5 + $0x2568] sm:$0xff]  ;;  %v15461_v24 = vcombine.low %v1645_v61, %v1649_v1 }
 0x32c   :  { %10159 = vmatpush1.bf16.msra.mxu0 %v15675_v26  ;;  %10571 = vmatmul.mubr.bf16.vlgmr.msra.gmra.mrb[4].mxu1 %v17526_v32  ;;  %v1653_v26 = vld [vmem:[#allocation5 + $0x2548] sm:$0xff] }
 0x32d   :  { %10169 = vmatprep.subr.bf16.mxu0 %v15684_v19  ;;  %10580 = vmatpush1.bf16.msra.mxu1 %v15429_v31  ;;  %v1908_v19 = vld [vmem:[#allocation5 + $0x2d40] sm:$0xff]  ;;  %v15470_v58 = vcombine.high %v1653_v26, %v1657_v27  ;;  %v1661_v31 = vld [vmem:[#allocation5 + $0x2588] sm:$0xff]  ;;  %v15469_v35 = vcombine.low %v1653_v26, %v1657_v27 }
 0x32e   :  { %10581 = vmatprep.subr.bf16.mxu1 %v15438_v54  ;;  %10611 = vmatprep.mubr.bf16.mxu1 %v17528_v36  ;;  %v15724_v30 = vcombine.high %v1908_v19, %v1912_v20  ;;  %v1916_v54 = vld [vmem:[#allocation5 + $0x2d80] sm:$0xff]  ;;  %v15723_v37 = vcombine.low %v1908_v19, %v1912_v20 }
 0x32f   :  { %10161 = vmatmul.mubr.bf16.vlgmr.msra.gmra.mrb[0].mxu0 %v17562_v33 }
 0x330   :  { %10170 = vmatpush1.bf16.msra.mxu0 %v15683_v53  ;;  %10201 = vmatprep.mubr.bf16.mxu0 %v17564_v38  ;;  %v1665_v53 = vld [vmem:[#allocation5 + $0x25a8] sm:$0xff] }
 0x331   :  { %10171 = vmatprep.subr.bf16.mxu0 %v15692_v34  ;;  %10582 = vmatpush1.bf16.msra.mxu1 %v15437_v8  ;;  %v1920_v34 = vld [vmem:[#allocation5 + $0x2da0] sm:$0xff]  ;;  %v15478_v39 = vcombine.high %v1661_v31, %v1665_v53  ;;  %v1669_v8 = vld [vmem:[#allocation5 + $0x25c8] sm:$0xff]  ;;  %v15477_v9 = vcombine.low %v1661_v31, %v1665_v53 }
 0x332   :  { %10583 = vmatprep.subr.bf16.mxu1 %v15446_v56  ;;  %v15732_v40 = vcombine.high %v1916_v54, %v1920_v34  ;;  %v1924_v56 = vld [vmem:[#allocation5 + $0x2dc0] sm:$0xff]  ;;  %v15731_v46 = vcombine.low %v1916_v54, %v1920_v34 }
 0x334   :  { %10172 = vmatpush1.bf16.msra.mxu0 %v15691_v55  ;;  %v1673_v55 = vld [vmem:[#allocation5 + $0x25e8] sm:$0xff] }
 0x335   :  { %10173 = vmatprep.subr.bf16.mxu0 %v15700_v42  ;;  %10584 = vmatpush1.bf16.msra.mxu1 %v15445_v59  ;;  %v1928_v42 = vld [vmem:[#allocation5 + $0x2de0] sm:$0xff]  ;;  %v15486_v51 = vcombine.high %v1669_v8, %v1673_v55  ;;  %v1677_v59 = vld [vmem:[#allocation5 + $0x2608] sm:$0xff]  ;;  %v15485_v61 = vcombine.low %v1669_v8, %v1673_v55 }
 0x336   :  { %10585 = vmatprep.subr.bf16.mxu1 %v15454_v50  ;;  %v15740_v52 = vcombine.high %v1924_v56, %v1928_v42  ;;  %v1932_v50 = vld [vmem:[#allocation5 + $0x2e00] sm:$0xff]  ;;  %v15739_v1 = vcombine.low %v1924_v56, %v1928_v42 }
 0x338   :  { %10174 = vmatpush1.bf16.msra.mxu0 %v15699_v49  ;;  %v1681_v49 = vld [vmem:[#allocation5 + $0x2628] sm:$0xff] }
 0x339   :  { %10175 = vmatprep.subr.bf16.mxu0 %v15708_v60  ;;  %10586 = vmatpush1.bf16.msra.mxu1 %v15453_v0  ;;  %v1936_v60 = vld [vmem:[#allocation5 + $0x2e20] sm:$0xff]  ;;  %v15494_v2 = vcombine.high %v1677_v59, %v1681_v49  ;;  %v1685_v0 = vld [vmem:[#allocation5 + $0x2648] sm:$0xff]  ;;  %v15493_v26 = vcombine.low %v1677_v59, %v1681_v49 }
 0x33a   :  { %10587 = vmatprep.subr.bf16.mxu1 %v15462_v10  ;;  %v15748_v3 = vcombine.high %v1932_v50, %v1936_v60  ;;  %v1940_v10 = vld [vmem:[#allocation5 + $0x2e40] sm:$0xff]  ;;  %v15747_v27 = vcombine.low %v1932_v50, %v1936_v60 }
 0x33c   :  { %10176 = vmatpush1.bf16.msra.mxu0 %v15707_v17  ;;  %v1689_v17 = vld [vmem:[#allocation5 + $0x2668] sm:$0xff] }
 0x33d   :  { %10177 = vmatprep.subr.bf16.mxu0 %v15716_v44  ;;  %10588 = vmatpush1.bf16.msra.mxu1 %v15461_v24  ;;  %v1944_v44 = vld [vmem:[#allocation5 + $0x2e60] sm:$0xff]  ;;  %v15502_v19 = vcombine.high %v1685_v0, %v1689_v17  ;;  %v1693_v24 = vld [vmem:[#allocation5 + $0x2688] sm:$0xff]  ;;  %v15501_v31 = vcombine.low %v1685_v0, %v1689_v17 }
 0x33e   :  { %10589 = vmatprep.subr.bf16.mxu1 %v15470_v58  ;;  %v15756_v20 = vcombine.high %v1940_v10, %v1944_v44  ;;  %v1948_v58 = vld [vmem:[#allocation5 + $0x2e80] sm:$0xff]  ;;  %v15755_v53 = vcombine.low %v1940_v10, %v1944_v44 }
 0x340   :  { %10178 = vmatpush1.bf16.msra.mxu0 %v15715_v25  ;;  %v1697_v25 = vld [vmem:[#allocation5 + $0x26a8] sm:$0xff] }
 0x341   :  { %10179 = vmatprep.subr.bf16.mxu0 %v15724_v30  ;;  %10590 = vmatpush1.bf16.msra.mxu1 %v15469_v35  ;;  %v1952_v30 = vld [vmem:[#allocation5 + $0x2ea0] sm:$0xff]  ;;  %v15510_v54 = vcombine.high %v1693_v24, %v1697_v25  ;;  %v1701_v35 = vld [vmem:[#allocation5 + $0x26c8] sm:$0xff]  ;;  %v15509_v8 = vcombine.low %v1693_v24, %v1697_v25 }
 0x342   :  { %10591 = vmatprep.subr.bf16.mxu1 %v15478_v39  ;;  %v15764_v34 = vcombine.high %v1948_v58, %v1952_v30  ;;  %v1956_v39 = vld [vmem:[#allocation5 + $0x2ec0] sm:$0xff]  ;;  %v15763_v55 = vcombine.low %v1948_v58, %v1952_v30 }
 0x344   :  { %10180 = vmatpush1.bf16.msra.mxu0 %v15723_v37  ;;  %v1705_v37 = vld [vmem:[#allocation5 + $0x26e8] sm:$0xff] }
 0x345   :  { %10181 = vmatprep.subr.bf16.mxu0 %v15732_v40  ;;  %10592 = vmatpush1.bf16.msra.mxu1 %v15477_v9  ;;  %v1960_v40 = vld [vmem:[#allocation5 + $0x2ee0] sm:$0xff]  ;;  %v15518_v56 = vcombine.high %v1701_v35, %v1705_v37  ;;  %v1709_v9 = vld [vmem:[#allocation5 + $0x2708] sm:$0xff]  ;;  %v15517_v59 = vcombine.low %v1701_v35, %v1705_v37 }
 0x346   :  { %10593 = vmatprep.subr.bf16.mxu1 %v15486_v51  ;;  %v15772_v42 = vcombine.high %v1956_v39, %v1960_v40  ;;  %v1964_v51 = vld [vmem:[#allocation5 + $0x2f00] sm:$0xff]  ;;  %v15771_v49 = vcombine.low %v1956_v39, %v1960_v40 }
 0x348   :  { %10182 = vmatpush1.bf16.msra.mxu0 %v15731_v46  ;;  %v1713_v46 = vld [vmem:[#allocation5 + $0x2728] sm:$0xff] }
 0x349   :  { %10183 = vmatprep.subr.bf16.mxu0 %v15740_v52  ;;  %10594 = vmatpush1.bf16.msra.mxu1 %v15485_v61  ;;  %v1968_v52 = vld [vmem:[#allocation5 + $0x2f20] sm:$0xff]  ;;  %v15526_v50 = vcombine.high %v1709_v9, %v1713_v46  ;;  %v1717_v61 = vld [vmem:[#allocation5 + $0x2748] sm:$0xff]  ;;  %v15525_v0 = vcombine.low %v1709_v9, %v1713_v46  ;;  %v410_v46 = vcombine.low %v17553_v29, %v17556_v63 }
 0x34a   :  { %10595 = vmatprep.subr.bf16.mxu1 %v15494_v2  ;;  %v15780_v60 = vcombine.high %v1964_v51, %v1968_v52  ;;  %v1972_v2 = vld [vmem:[#allocation5 + $0x2f40] sm:$0xff]  ;;  %v15779_v17 = vcombine.low %v1964_v51, %v1968_v52  ;;  %v1757_v63 = vld [vmem:[#allocation5 + $0x2888] sm:$0xff] }
 0x34c   :  { %10184 = vmatpush1.bf16.msra.mxu0 %v15739_v1  ;;  %v1721_v1 = vld [vmem:[#allocation5 + $0x2768] sm:$0xff] }
 0x34d   :  { %10185 = vmatprep.subr.bf16.mxu0 %v15748_v3  ;;  %10596 = vmatpush1.bf16.msra.mxu1 %v15493_v26  ;;  %v1976_v3 = vld [vmem:[#allocation5 + $0x2f60] sm:$0xff]  ;;  %v15534_v10 = vcombine.high %v1717_v61, %v1721_v1  ;;  %v1725_v26 = vld [vmem:[#allocation5 + $0x2788] sm:$0xff]  ;;  %v15533_v24 = vcombine.low %v1717_v61, %v1721_v1  ;;  %v474_v61 = vld [vmem:[#allocation5 + $0x70] sm:$0xff]  ;;  %v17572_v1 = vpack.c.bf16 %v410_v46, %v410_v46 }
 0x34e   :  { %10597 = vmatprep.subr.bf16.mxu1 %v15502_v19  ;;  %v15788_v44 = vcombine.high %v1972_v2, %v1976_v3  ;;  %v1980_v19 = vld [vmem:[#allocation5 + $0x2f80] sm:$0xff]  ;;  %v15787_v25 = vcombine.low %v1972_v2, %v1976_v3  ;;  %v1785_v46 = vld [vmem:[#allocation5 + $0x2968] sm:$0xff] }
 0x350   :  { %10186 = vmatpush1.bf16.msra.mxu0 %v15747_v27  ;;  %v1729_v27 = vld [vmem:[#allocation5 + $0x27a8] sm:$0xff] }
 0x351   :  { %10187 = vmatprep.subr.bf16.mxu0 %v15756_v20  ;;  %10598 = vmatpush1.bf16.msra.mxu1 %v15501_v31  ;;  %v1984_v20 = vld [vmem:[#allocation5 + $0x2fa0] sm:$0xff]  ;;  %v15542_v58 = vcombine.high %v1725_v26, %v1729_v27  ;;  %v1733_v31 = vld [vmem:[#allocation5 + $0x27c8] sm:$0xff]  ;;  %v15541_v35 = vcombine.low %v1725_v26, %v1729_v27 }
 0x352   :  { %10599 = vmatprep.subr.bf16.mxu1 %v15510_v54  ;;  %v15796_v30 = vcombine.high %v1980_v19, %v1984_v20  ;;  %v1988_v54 = vld [vmem:[#allocation5 + $0x2fc0] sm:$0xff]  ;;  %v15795_v37 = vcombine.low %v1980_v19, %v1984_v20 }
 0x354   :  { %10188 = vmatpush1.bf16.msra.mxu0 %v15755_v53  ;;  %v1737_v53 = vld [vmem:[#allocation5 + $0x27e8] sm:$0xff] }
 0x355   :  { %10189 = vmatprep.subr.bf16.mxu0 %v15764_v34  ;;  %10600 = vmatpush1.bf16.msra.mxu1 %v15509_v8  ;;  %v1992_v34 = vld [vmem:[#allocation5 + $0x2fe0] sm:$0xff]  ;;  %v15550_v39 = vcombine.high %v1733_v31, %v1737_v53  ;;  %v1741_v8 = vld [vmem:[#allocation5 + $0x2808] sm:$0xff]  ;;  %v15549_v9 = vcombine.low %v1733_v31, %v1737_v53 }
 0x356   :  { %10601 = vmatprep.subr.bf16.mxu1 %v15518_v56  ;;  %v15804_v40 = vcombine.high %v1988_v54, %v1992_v34  ;;  %v462_v56 = vld [vmem:[#allocation5 + $0x10] sm:$0xff]  ;;  %v15803_v51 = vcombine.low %v1988_v54, %v1992_v34 }
 0x358   :  { %10190 = vmatpush1.bf16.msra.mxu0 %v15763_v55  ;;  %v1745_v55 = vld [vmem:[#allocation5 + $0x2828] sm:$0xff] }
 0x359   :  { %10191 = vmatprep.subr.bf16.mxu0 %v15772_v42  ;;  %10602 = vmatpush1.bf16.msra.mxu1 %v15517_v59  ;;  %v466_v42 = vld [vmem:[#allocation5 + $0x30] sm:$0xff]  ;;  %v15558_v52 = vcombine.high %v1741_v8, %v1745_v55  ;;  %v15557_v2 = vcombine.low %v1741_v8, %v1745_v55 }
 0x35a   :  { %10603 = vmatprep.subr.bf16.mxu1 %v15526_v50  ;;  %v14280_v59 = vcombine.high %v462_v56, %v466_v42  ;;  %v1753_v50 = vld [vmem:[#allocation5 + $0x2868] sm:$0xff]  ;;  %v14279_v3 = vcombine.low %v462_v56, %v466_v42 }
 0x35c   :  { %10192 = vmatpush1.bf16.msra.mxu0 %v15771_v49  ;;  %v1749_v49 = vld [vmem:[#allocation5 + $0x2848] sm:$0xff] }
 0x35d   :  { %10193 = vmatprep.subr.bf16.mxu0 %v15780_v60  ;;  %10604 = vmatpush1.bf16.msra.mxu1 %v15525_v0  ;;  %v470_v60 = vld [vmem:[#allocation5 + $0x50] sm:$0xff]  ;;  %v15566_v0 = vcombine.high %v1749_v49, %v1753_v50  ;;  %v15565_v26 = vcombine.low %v1749_v49, %v1753_v50 }
 0x35e   :  { %10605 = vmatprep.subr.bf16.mxu1 %v15534_v10  ;;  %v14288_v29 = vcombine.high %v470_v60, %v474_v61  ;;  %v478_v10 = vld [vmem:[#allocation5 + $0x90] sm:$0xff]  ;;  %v14287_v27 = vcombine.low %v470_v60, %v474_v61  ;;  %v1789_v61 = vld [vmem:[#allocation5 + $0x2988] sm:$0xff] }
 0x360   :  { %10194 = vmatpush1.bf16.msra.mxu0 %v15779_v17  ;;  %v1761_v17 = vld [vmem:[#allocation5 + $0x28a8] sm:$0xff] }
 0x361   :  { %10195 = vmatprep.subr.bf16.mxu0 %v15788_v44  ;;  %10606 = vmatpush1.bf16.msra.mxu1 %v15533_v24  ;;  %v482_v44 = vld [vmem:[#allocation5 + $0xb0] sm:$0xff]  ;;  %v15574_v19 = vcombine.high %v1757_v63, %v1761_v17  ;;  %v1765_v24 = vld [vmem:[#allocation5 + $0x28c8] sm:$0xff]  ;;  %v15573_v31 = vcombine.low %v1757_v63, %v1761_v17 }
 0x362   :  { %10607 = vmatprep.subr.bf16.mxu1 %v15542_v58  ;;  %v14296_v20 = vcombine.high %v478_v10, %v482_v44  ;;  %v486_v58 = vld [vmem:[#allocation5 + $0xd0] sm:$0xff]  ;;  %v14295_v53 = vcombine.low %v478_v10, %v482_v44  ;;  %v1797_v44 = vld [vmem:[#allocation5 + $0x29c8] sm:$0xff] }
 0x364   :  { %10196 = vmatpush1.bf16.msra.mxu0 %v15787_v25  ;;  %v1769_v25 = vld [vmem:[#allocation5 + $0x28e8] sm:$0xff] }
 0x365   :  { %10197 = vmatprep.subr.bf16.mxu0 %v15796_v30  ;;  %10608 = vmatpush1.bf16.msra.mxu1 %v15541_v35  ;;  %v490_v30 = vld [vmem:[#allocation5 + $0xf0] sm:$0xff]  ;;  %v15582_v54 = vcombine.high %v1765_v24, %v1769_v25  ;;  %v1773_v35 = vld [vmem:[#allocation5 + $0x2908] sm:$0xff]  ;;  %v15581_v8 = vcombine.low %v1765_v24, %v1769_v25 }
 0x366   :  { %10609 = vmatprep.subr.bf16.mxu1 %v15550_v39  ;;  %v14304_v34 = vcombine.high %v486_v58, %v490_v30  ;;  %v494_v39 = vld [vmem:[#allocation5 + $0x110] sm:$0xff]  ;;  %v14303_v55 = vcombine.low %v486_v58, %v490_v30  ;;  %v1805_v30 = vld [vmem:[#allocation5 + $0x2a08] sm:$0xff] }
 0x368   :  { %10198 = vmatpush1.bf16.msra.mxu0 %v15795_v37  ;;  %v1777_v37 = vld [vmem:[#allocation5 + $0x2928] sm:$0xff] }
 0x369   :  { %10199 = vmatprep.subr.bf16.mxu0 %v15804_v40  ;;  %10610 = vmatpush1.bf16.msra.mxu1 %v15549_v9  ;;  %v498_v40 = vld [vmem:[#allocation5 + $0x130] sm:$0xff]  ;;  %v15590_v56 = vcombine.high %v1773_v35, %v1777_v37  ;;  %v1781_v9 = vld [vmem:[#allocation5 + $0x2948] sm:$0xff] }
 0x36a   :  { %10620 = vmatprep.subr.bf16.mxu1 %v15558_v52  ;;  %v14312_v42 = vcombine.high %v494_v39, %v498_v40  ;;  %v506_v52 = vld [vmem:[#allocation5 + $0x170] sm:$0xff]  ;;  %v14311_v49 = vcombine.low %v494_v39, %v498_v40  ;;  %v15598_v50 = vcombine.high %v1781_v9, %v1785_v46  ;;  %v1813_v40 = vld [vmem:[#allocation5 + $0x2a48] sm:$0xff] }
 0x36c   :  { %10200 = vmatpush1.bf16.msra.mxu0 %v15803_v51  ;;  %10612 = vmatmul.mubr.bf16.vlgmr.msra.gmra.mrb[4].mxu1 %v17544_v57  ;;  %v502_v51 = vld [vmem:[#allocation5 + $0x150] sm:$0xff] }
 0x36d   :  { %10702 = vmatprep.subr.bf16.mxu0 %v14280_v59  ;;  %10621 = vmatpush1.bf16.msra.mxu1 %v15557_v2  ;;  %v15589_v59 = vcombine.low %v1773_v35, %v1777_v37  ;;  %v14320_v60 = vcombine.high %v502_v51, %v506_v52  ;;  %v1793_v2 = vld [vmem:[#allocation5 + $0x29a8] sm:$0xff]  ;;  %v14319_v63 = vcombine.low %v502_v51, %v506_v52 }
 0x36e   :  { %10622 = vmatprep.subr.bf16.mxu1 %v15566_v0  ;;  %10652 = vmatprep.mubr.bf16.mxu1 %v17546_v62  ;;  %v514_v0 = vld [vmem:[#allocation5 + $0x1b0] sm:$0xff]  ;;  %v15606_v17 = vcombine.high %v1789_v61, %v1793_v2  ;;  %v1821_v52 = vld [vmem:[#allocation5 + $0x2a88] sm:$0xff] }
 0x36f   :  { %10202 = vmatmul.mubr.bf16.vlgmr.msra.gmra.mrb[0].mxu0 %v17572_v1 }
 0x370   :  { %10703 = vmatpush1.bf16.msra.mxu0 %v14279_v3  ;;  %10734 = vmatprep.mubr.bf16.mxu0 %v17376_v21  ;;  %v510_v3 = vld [vmem:[#allocation5 + $0x190] sm:$0xff] }
 0x371   :  { %10704 = vmatprep.subr.bf16.mxu0 %v14288_v29  ;;  %10623 = vmatpush1.bf16.msra.mxu1 %v15565_v26  ;;  %v15597_v29 = vcombine.low %v1781_v9, %v1785_v46  ;;  %v14328_v10 = vcombine.high %v510_v3, %v514_v0  ;;  %v1801_v26 = vld [vmem:[#allocation5 + $0x29e8] sm:$0xff]  ;;  %v14327_v24 = vcombine.low %v510_v3, %v514_v0 }
 0x372   :  { %10624 = vmatprep.subr.bf16.mxu1 %v15574_v19  ;;  %v522_v19 = vld [vmem:[#allocation5 + $0x1f0] sm:$0xff]  ;;  %v15614_v25 = vcombine.high %v1797_v44, %v1801_v26  ;;  %v1829_v0 = vld [vmem:[#allocation5 + $0x2ac8] sm:$0xff] }
 0x374   :  { %10705 = vmatpush1.bf16.msra.mxu0 %v14287_v27  ;;  %v518_v27 = vld [vmem:[#allocation5 + $0x1d0] sm:$0xff] }
 0x375   :  { %10706 = vmatprep.subr.bf16.mxu0 %v14296_v20  ;;  %10625 = vmatpush1.bf16.msra.mxu1 %v15573_v31  ;;  %v15605_v20 = vcombine.low %v1789_v61, %v1793_v2  ;;  %v14336_v58 = vcombine.high %v518_v27, %v522_v19  ;;  %v1809_v31 = vld [vmem:[#allocation5 + $0x2a28] sm:$0xff]  ;;  %v14335_v35 = vcombine.low %v518_v27, %v522_v19 }
 0x376   :  { %10626 = vmatprep.subr.bf16.mxu1 %v15582_v54  ;;  %v530_v54 = vld [vmem:[#allocation5 + $0x230] sm:$0xff]  ;;  %v15622_v37 = vcombine.high %v1805_v30, %v1809_v31  ;;  %v1837_v19 = vld [vmem:[#allocation5 + $0x2b08] sm:$0xff] }
 0x378   :  { %10707 = vmatpush1.bf16.msra.mxu0 %v14295_v53  ;;  %v526_v53 = vld [vmem:[#allocation5 + $0x210] sm:$0xff] }
 0x379   :  { %10708 = vmatprep.subr.bf16.mxu0 %v14304_v34  ;;  %10627 = vmatpush1.bf16.msra.mxu1 %v15581_v8  ;;  %v15613_v34 = vcombine.low %v1797_v44, %v1801_v26  ;;  %v14344_v39 = vcombine.high %v526_v53, %v530_v54  ;;  %v1817_v8 = vld [vmem:[#allocation5 + $0x2a68] sm:$0xff]  ;;  %v14343_v9 = vcombine.low %v526_v53, %v530_v54 }
 0x37a   :  { %10628 = vmatprep.subr.bf16.mxu1 %v15590_v56  ;;  %v538_v56 = vld [vmem:[#allocation5 + $0x270] sm:$0xff]  ;;  %v15630_v46 = vcombine.high %v1813_v40, %v1817_v8  ;;  %v1845_v54 = vld [vmem:[#allocation5 + $0x2b48] sm:$0xff] }
 0x37c   :  { %10709 = vmatpush1.bf16.msra.mxu0 %v14303_v55  ;;  %v534_v55 = vld [vmem:[#allocation5 + $0x250] sm:$0xff] }
 0x37d   :  { %10710 = vmatprep.subr.bf16.mxu0 %v14312_v42  ;;  %10629 = vmatpush1.bf16.msra.mxu1 %v15589_v59  ;;  %v15621_v42 = vcombine.low %v1805_v30, %v1809_v31  ;;  %v14352_v51 = vcombine.high %v534_v55, %v538_v56  ;;  %v1825_v59 = vld [vmem:[#allocation5 + $0x2aa8] sm:$0xff]  ;;  %v14351_v61 = vcombine.low %v534_v55, %v538_v56 }
 0x37e   :  { %10630 = vmatprep.subr.bf16.mxu1 %v15598_v50  ;;  %v546_v50 = vld [vmem:[#allocation5 + $0x2b0] sm:$0xff]  ;;  %v15638_v2 = vcombine.high %v1821_v52, %v1825_v59  ;;  %v1853_v56 = vld [vmem:[#allocation5 + $0x2b88] sm:$0xff] }
 0x380   :  { %10711 = vmatpush1.bf16.msra.mxu0 %v14311_v49  ;;  %v542_v49 = vld [vmem:[#allocation5 + $0x290] sm:$0xff] }
 0x381   :  { %10712 = vmatprep.subr.bf16.mxu0 %v14320_v60  ;;  %10631 = vmatpush1.bf16.msra.mxu1 %v15597_v29  ;;  %v15629_v60 = vcombine.low %v1813_v40, %v1817_v8  ;;  %v14360_v3 = vcombine.high %v542_v49, %v546_v50  ;;  %v1833_v29 = vld [vmem:[#allocation5 + $0x2ae8] sm:$0xff]  ;;  %v14359_v44 = vcombine.low %v542_v49, %v546_v50 }
 0x382   :  { %10632 = vmatprep.subr.bf16.mxu1 %v15606_v17  ;;  %v554_v17 = vld [vmem:[#allocation5 + $0x2f0] sm:$0xff]  ;;  %v15646_v26 = vcombine.high %v1829_v0, %v1833_v29  ;;  %v1861_v50 = vld [vmem:[#allocation5 + $0x2bc8] sm:$0xff] }
 0x384   :  { %10713 = vmatpush1.bf16.msra.mxu0 %v14319_v63  ;;  %v550_v63 = vld [vmem:[#allocation5 + $0x2d0] sm:$0xff] }
 0x385   :  { %10714 = vmatprep.subr.bf16.mxu0 %v14328_v10  ;;  %10633 = vmatpush1.bf16.msra.mxu1 %v15605_v20  ;;  %v15637_v10 = vcombine.low %v1821_v52, %v1825_v59  ;;  %v14368_v27 = vcombine.high %v550_v63, %v554_v17  ;;  %v1841_v20 = vld [vmem:[#allocation5 + $0x2b28] sm:$0xff]  ;;  %v14367_v30 = vcombine.low %v550_v63, %v554_v17 }
 0x386   :  { %10634 = vmatprep.subr.bf16.mxu1 %v15614_v25  ;;  %v562_v25 = vld [vmem:[#allocation5 + $0x330] sm:$0xff]  ;;  %v15654_v31 = vcombine.high %v1837_v19, %v1841_v20  ;;  %v1869_v17 = vld [vmem:[#allocation5 + $0x2c08] sm:$0xff] }
 0x388   :  { %10715 = vmatpush1.bf16.msra.mxu0 %v14327_v24  ;;  %v558_v24 = vld [vmem:[#allocation5 + $0x310] sm:$0xff] }
 0x389   :  { %10716 = vmatprep.subr.bf16.mxu0 %v14336_v58  ;;  %10635 = vmatpush1.bf16.msra.mxu1 %v15613_v34  ;;  %v15645_v58 = vcombine.low %v1829_v0, %v1833_v29  ;;  %v14376_v53 = vcombine.high %v558_v24, %v562_v25  ;;  %v1849_v34 = vld [vmem:[#allocation5 + $0x2b68] sm:$0xff]  ;;  %v14375_v40 = vcombine.low %v558_v24, %v562_v25 }
 0x38a   :  { %10636 = vmatprep.subr.bf16.mxu1 %v15622_v37  ;;  %v570_v37 = vld [vmem:[#allocation5 + $0x370] sm:$0xff]  ;;  %v15662_v8 = vcombine.high %v1845_v54, %v1849_v34  ;;  %v1877_v25 = vld [vmem:[#allocation5 + $0x2c48] sm:$0xff] }
 0x38c   :  { %10717 = vmatpush1.bf16.msra.mxu0 %v14335_v35  ;;  %v566_v35 = vld [vmem:[#allocation5 + $0x350] sm:$0xff] }
 0x38d   :  { %10718 = vmatprep.subr.bf16.mxu0 %v14344_v39  ;;  %10637 = vmatpush1.bf16.msra.mxu1 %v15621_v42  ;;  %v15653_v39 = vcombine.low %v1837_v19, %v1841_v20  ;;  %v14384_v55 = vcombine.high %v566_v35, %v570_v37  ;;  %v1857_v42 = vld [vmem:[#allocation5 + $0x2ba8] sm:$0xff]  ;;  %v14383_v52 = vcombine.low %v566_v35, %v570_v37 }
 0x38e   :  { %10638 = vmatprep.subr.bf16.mxu1 %v15630_v46  ;;  %v578_v46 = vld [vmem:[#allocation5 + $0x3b0] sm:$0xff]  ;;  %v15670_v59 = vcombine.high %v1853_v56, %v1857_v42  ;;  %v1885_v37 = vld [vmem:[#allocation5 + $0x2c88] sm:$0xff] }
 0x390   :  { %10719 = vmatpush1.bf16.msra.mxu0 %v14343_v9  ;;  %v574_v9 = vld [vmem:[#allocation5 + $0x390] sm:$0xff] }
 0x391   :  { %10720 = vmatprep.subr.bf16.mxu0 %v14352_v51  ;;  %10639 = vmatpush1.bf16.msra.mxu1 %v15629_v60  ;;  %v15661_v51 = vcombine.low %v1845_v54, %v1849_v34  ;;  %v14392_v49 = vcombine.high %v574_v9, %v578_v46  ;;  %v1865_v60 = vld [vmem:[#allocation5 + $0x2be8] sm:$0xff]  ;;  %v14391_v0 = vcombine.low %v574_v9, %v578_v46 }
 0x392   :  { %10640 = vmatprep.subr.bf16.mxu1 %v15638_v2  ;;  %v586_v2 = vld [vmem:[#allocation5 + $0x3f0] sm:$0xff]  ;;  %v15678_v29 = vcombine.high %v1861_v50, %v1865_v60  ;;  %v1893_v46 = vld [vmem:[#allocation5 + $0x2cc8] sm:$0xff] }
 0x394   :  { %10721 = vmatpush1.bf16.msra.mxu0 %v14351_v61  ;;  %v582_v61 = vld [vmem:[#allocation5 + $0x3d0] sm:$0xff] }
 0x395   :  { %10722 = vmatprep.subr.bf16.mxu0 %v14360_v3  ;;  %10641 = vmatpush1.bf16.msra.mxu1 %v15637_v10  ;;  %v15669_v3 = vcombine.low %v1853_v56, %v1857_v42  ;;  %v14400_v63 = vcombine.high %v582_v61, %v586_v2  ;;  %v1873_v10 = vld [vmem:[#allocation5 + $0x2c28] sm:$0xff]  ;;  %v14399_v19 = vcombine.low %v582_v61, %v586_v2 }
 0x396   :  { %10642 = vmatprep.subr.bf16.mxu1 %v15646_v26  ;;  %v594_v26 = vld [vmem:[#allocation5 + $0x430] sm:$0xff]  ;;  %v15686_v20 = vcombine.high %v1869_v17, %v1873_v10  ;;  %v1901_v2 = vld [vmem:[#allocation5 + $0x2d08] sm:$0xff] }
 0x398   :  { %10723 = vmatpush1.bf16.msra.mxu0 %v14359_v44  ;;  %v590_v44 = vld [vmem:[#allocation5 + $0x410] sm:$0xff] }
 0x399   :  { %10724 = vmatprep.subr.bf16.mxu0 %v14368_v27  ;;  %10643 = vmatpush1.bf16.msra.mxu1 %v15645_v58  ;;  %v15677_v27 = vcombine.low %v1861_v50, %v1865_v60  ;;  %v14408_v24 = vcombine.high %v590_v44, %v594_v26  ;;  %v1881_v58 = vld [vmem:[#allocation5 + $0x2c68] sm:$0xff]  ;;  %v14407_v54 = vcombine.low %v590_v44, %v594_v26 }
 0x39a   :  { %10644 = vmatprep.subr.bf16.mxu1 %v15654_v31  ;;  %v602_v31 = vld [vmem:[#allocation5 + $0x470] sm:$0xff]  ;;  %v15694_v34 = vcombine.high %v1877_v25, %v1881_v58  ;;  %v1909_v26 = vld [vmem:[#allocation5 + $0x2d48] sm:$0xff] }
 0x39c   :  { %10725 = vmatpush1.bf16.msra.mxu0 %v14367_v30  ;;  %v598_v30 = vld [vmem:[#allocation5 + $0x450] sm:$0xff] }
 0x39d   :  { %10726 = vmatprep.subr.bf16.mxu0 %v14376_v53  ;;  %10645 = vmatpush1.bf16.msra.mxu1 %v15653_v39  ;;  %v15685_v53 = vcombine.low %v1869_v17, %v1873_v10  ;;  %v14416_v35 = vcombine.high %v598_v30, %v602_v31  ;;  %v1889_v39 = vld [vmem:[#allocation5 + $0x2ca8] sm:$0xff]  ;;  %v14415_v56 = vcombine.low %v598_v30, %v602_v31 }
 0x39e   :  { %10646 = vmatprep.subr.bf16.mxu1 %v15662_v8  ;;  %v610_v8 = vld [vmem:[#allocation5 + $0x4b0] sm:$0xff]  ;;  %v15702_v42 = vcombine.high %v1885_v37, %v1889_v39  ;;  %v1917_v31 = vld [vmem:[#allocation5 + $0x2d88] sm:$0xff] }
 0x3a0   :  { %10727 = vmatpush1.bf16.msra.mxu0 %v14375_v40  ;;  %v606_v40 = vld [vmem:[#allocation5 + $0x490] sm:$0xff] }
 0x3a1   :  { %10728 = vmatprep.subr.bf16.mxu0 %v14384_v55  ;;  %10647 = vmatpush1.bf16.msra.mxu1 %v15661_v51  ;;  %v15693_v55 = vcombine.low %v1877_v25, %v1881_v58  ;;  %v14424_v9 = vcombine.high %v606_v40, %v610_v8  ;;  %v1897_v51 = vld [vmem:[#allocation5 + $0x2ce8] sm:$0xff]  ;;  %v14423_v50 = vcombine.low %v606_v40, %v610_v8 }
 0x3a2   :  { %10648 = vmatprep.subr.bf16.mxu1 %v15670_v59  ;;  %v618_v59 = vld [vmem:[#allocation5 + $0x4f0] sm:$0xff]  ;;  %v15710_v60 = vcombine.high %v1893_v46, %v1897_v51  ;;  %v1925_v8 = vld [vmem:[#allocation5 + $0x2dc8] sm:$0xff] }
 0x3a4   :  { %10729 = vmatpush1.bf16.msra.mxu0 %v14383_v52  ;;  %v614_v52 = vld [vmem:[#allocation5 + $0x4d0] sm:$0xff] }
 0x3a5   :  { %10730 = vmatprep.subr.bf16.mxu0 %v14392_v49  ;;  %10649 = vmatpush1.bf16.msra.mxu1 %v15669_v3  ;;  %v15701_v49 = vcombine.low %v1885_v37, %v1889_v39  ;;  %v14432_v61 = vcombine.high %v614_v52, %v618_v59  ;;  %v1905_v3 = vld [vmem:[#allocation5 + $0x2d28] sm:$0xff]  ;;  %v14431_v17 = vcombine.low %v614_v52, %v618_v59 }
 0x3a6   :  { %10650 = vmatprep.subr.bf16.mxu1 %v15678_v29  ;;  %v626_v29 = vld [vmem:[#allocation5 + $0x530] sm:$0xff]  ;;  %v15718_v10 = vcombine.high %v1901_v2, %v1905_v3  ;;  %v1933_v59 = vld [vmem:[#allocation5 + $0x2e08] sm:$0xff] }
 0x3a8   :  { %10731 = vmatpush1.bf16.msra.mxu0 %v14391_v0  ;;  %v622_v0 = vld [vmem:[#allocation5 + $0x510] sm:$0xff] }
 0x3a9   :  { %10732 = vmatprep.subr.bf16.mxu0 %v14400_v63  ;;  %10651 = vmatpush1.bf16.msra.mxu1 %v15677_v27  ;;  %v15709_v63 = vcombine.low %v1893_v46, %v1897_v51  ;;  %v14440_v44 = vcombine.high %v622_v0, %v626_v29  ;;  %v1913_v27 = vld [vmem:[#allocation5 + $0x2d68] sm:$0xff]  ;;  %v14439_v25 = vcombine.low %v622_v0, %v626_v29 }
 0x3aa   :  { %10661 = vmatprep.subr.bf16.mxu1 %v15686_v20  ;;  %v634_v20 = vld [vmem:[#allocation5 + $0x570] sm:$0xff]  ;;  %v15726_v58 = vcombine.high %v1909_v26, %v1913_v27  ;;  %v1941_v29 = vld [vmem:[#allocation5 + $0x2e48] sm:$0xff] }
 0x3ac   :  { %10733 = vmatpush1.bf16.msra.mxu0 %v14399_v19  ;;  %10653 = vmatmul.mubr.bf16.vlgmr.msra.gmra.mrb[4].mxu1 %v17562_v33  ;;  %v630_v19 = vld [vmem:[#allocation5 + $0x550] sm:$0xff] }
 0x3ad   :  { %10743 = vmatprep.subr.bf16.mxu0 %v14408_v24  ;;  %10662 = vmatpush1.bf16.msra.mxu1 %v15685_v53  ;;  %v15717_v24 = vcombine.low %v1901_v2, %v1905_v3  ;;  %v14448_v30 = vcombine.high %v630_v19, %v634_v20  ;;  %v1921_v53 = vld [vmem:[#allocation5 + $0x2da8] sm:$0xff]  ;;  %v14447_v37 = vcombine.low %v630_v19, %v634_v20 }
 0x3ae   :  { %10663 = vmatprep.subr.bf16.mxu1 %v15694_v34  ;;  %10693 = vmatprep.mubr.bf16.mxu1 %v17564_v38  ;;  %v642_v34 = vld [vmem:[#allocation5 + $0x5b0] sm:$0xff]  ;;  %v15734_v39 = vcombine.high %v1917_v31, %v1921_v53  ;;  %v1949_v20 = vld [vmem:[#allocation5 + $0x2e88] sm:$0xff] }
 0x3af   :  { %10735 = vmatmul.mubr.bf16.vlgmr.msra.gmra.mrb[4].mxu0 %v17394_v41 }
 0x3b0   :  { %10744 = vmatpush1.bf16.msra.mxu0 %v14407_v54  ;;  %10775 = vmatprep.mubr.bf16.mxu0 %v17378_v22  ;;  %v638_v54 = vld [vmem:[#allocation5 + $0x590] sm:$0xff] }
 0x3b1   :  { %10745 = vmatprep.subr.bf16.mxu0 %v14416_v35  ;;  %10664 = vmatpush1.bf16.msra.mxu1 %v15693_v55  ;;  %v15725_v35 = vcombine.low %v1909_v26, %v1913_v27  ;;  %v14456_v40 = vcombine.high %v638_v54, %v642_v34  ;;  %v1929_v55 = vld [vmem:[#allocation5 + $0x2de8] sm:$0xff]  ;;  %v14455_v46 = vcombine.low %v638_v54, %v642_v34 }
 0x3b2   :  { %10665 = vmatprep.subr.bf16.mxu1 %v15702_v42  ;;  %v650_v42 = vld [vmem:[#allocation5 + $0x5f0] sm:$0xff]  ;;  %v15742_v51 = vcombine.high %v1925_v8, %v1929_v55  ;;  %v1957_v34 = vld [vmem:[#allocation5 + $0x2ec8] sm:$0xff] }
 0x3b4   :  { %10746 = vmatpush1.bf16.msra.mxu0 %v14415_v56  ;;  %v646_v56 = vld [vmem:[#allocation5 + $0x5d0] sm:$0xff] }
 0x3b5   :  { %10747 = vmatprep.subr.bf16.mxu0 %v14424_v9  ;;  %10666 = vmatpush1.bf16.msra.mxu1 %v15701_v49  ;;  %v15733_v9 = vcombine.low %v1917_v31, %v1921_v53  ;;  %v14464_v52 = vcombine.high %v646_v56, %v650_v42  ;;  %v1937_v49 = vld [vmem:[#allocation5 + $0x2e28] sm:$0xff]  ;;  %v14463_v2 = vcombine.low %v646_v56, %v650_v42 }
 0x3b6   :  { %10667 = vmatprep.subr.bf16.mxu1 %v15710_v60  ;;  %v658_v60 = vld [vmem:[#allocation5 + $0x630] sm:$0xff]  ;;  %v15750_v3 = vcombine.high %v1933_v59, %v1937_v49  ;;  %v1965_v42 = vld [vmem:[#allocation5 + $0x2f08] sm:$0xff] }
 0x3b8   :  { %10748 = vmatpush1.bf16.msra.mxu0 %v14423_v50  ;;  %v654_v50 = vld [vmem:[#allocation5 + $0x610] sm:$0xff] }
 0x3b9   :  { %10749 = vmatprep.subr.bf16.mxu0 %v14432_v61  ;;  %10668 = vmatpush1.bf16.msra.mxu1 %v15709_v63  ;;  %v15741_v61 = vcombine.low %v1925_v8, %v1929_v55  ;;  %v14472_v0 = vcombine.high %v654_v50, %v658_v60  ;;  %v1945_v63 = vld [vmem:[#allocation5 + $0x2e68] sm:$0xff]  ;;  %v14471_v26 = vcombine.low %v654_v50, %v658_v60 }
 0x3ba   :  { %10669 = vmatprep.subr.bf16.mxu1 %v15718_v10  ;;  %v666_v10 = vld [vmem:[#allocation5 + $0x670] sm:$0xff]  ;;  %v15758_v27 = vcombine.high %v1941_v29, %v1945_v63  ;;  %v1973_v60 = vld [vmem:[#allocation5 + $0x2f48] sm:$0xff] }
 0x3bc   :  { %10750 = vmatpush1.bf16.msra.mxu0 %v14431_v17  ;;  %v662_v17 = vld [vmem:[#allocation5 + $0x650] sm:$0xff] }
 0x3bd   :  { %10751 = vmatprep.subr.bf16.mxu0 %v14440_v44  ;;  %10670 = vmatpush1.bf16.msra.mxu1 %v15717_v24  ;;  %v15749_v44 = vcombine.low %v1933_v59, %v1937_v49  ;;  %v14480_v19 = vcombine.high %v662_v17, %v666_v10  ;;  %v1953_v24 = vld [vmem:[#allocation5 + $0x2ea8] sm:$0xff]  ;;  %v14479_v31 = vcombine.low %v662_v17, %v666_v10 }
 0x3be   :  { %10671 = vmatprep.subr.bf16.mxu1 %v15726_v58  ;;  %v674_v58 = vld [vmem:[#allocation5 + $0x6b0] sm:$0xff]  ;;  %v15766_v53 = vcombine.high %v1949_v20, %v1953_v24  ;;  %v1981_v10 = vld [vmem:[#allocation5 + $0x2f88] sm:$0xff] }
 0x3c0   :  { %10752 = vmatpush1.bf16.msra.mxu0 %v14439_v25  ;;  %v670_v25 = vld [vmem:[#allocation5 + $0x690] sm:$0xff] }
 0x3c1   :  { %10753 = vmatprep.subr.bf16.mxu0 %v14448_v30  ;;  %10672 = vmatpush1.bf16.msra.mxu1 %v15725_v35  ;;  %v15757_v30 = vcombine.low %v1941_v29, %v1945_v63  ;;  %v14488_v54 = vcombine.high %v670_v25, %v674_v58  ;;  %v1961_v35 = vld [vmem:[#allocation5 + $0x2ee8] sm:$0xff]  ;;  %v14487_v8 = vcombine.low %v670_v25, %v674_v58 }
 0x3c2   :  { %10673 = vmatprep.subr.bf16.mxu1 %v15734_v39  ;;  %v682_v39 = vld [vmem:[#allocation5 + $0x6f0] sm:$0xff]  ;;  %v15774_v55 = vcombine.high %v1957_v34, %v1961_v35  ;;  %v1989_v58 = vld [vmem:[#allocation5 + $0x2fc8] sm:$0xff] }
 0x3c4   :  { %10754 = vmatpush1.bf16.msra.mxu0 %v14447_v37  ;;  %v678_v37 = vld [vmem:[#allocation5 + $0x6d0] sm:$0xff] }
 0x3c5   :  { %10755 = vmatprep.subr.bf16.mxu0 %v14456_v40  ;;  %10674 = vmatpush1.bf16.msra.mxu1 %v15733_v9  ;;  %v15765_v40 = vcombine.low %v1949_v20, %v1953_v24  ;;  %v14496_v56 = vcombine.high %v678_v37, %v682_v39  ;;  %v1969_v9 = vld [vmem:[#allocation5 + $0x2f28] sm:$0xff]  ;;  %v14495_v59 = vcombine.low %v678_v37, %v682_v39  ;;  %v463_v39 = vld [vmem:[#allocation5 + $0x18] sm:$0xff] }
 0x3c6   :  { %10675 = vmatprep.subr.bf16.mxu1 %v15742_v51  ;;  %v690_v51 = vld [vmem:[#allocation5 + $0x730] sm:$0xff]  ;;  %v15782_v49 = vcombine.high %v1965_v42, %v1969_v9 }
 0x3c8   :  { %10756 = vmatpush1.bf16.msra.mxu0 %v14455_v46  ;;  %v686_v46 = vld [vmem:[#allocation5 + $0x710] sm:$0xff] }
 0x3c9   :  { %10757 = vmatprep.subr.bf16.mxu0 %v14464_v52  ;;  %10676 = vmatpush1.bf16.msra.mxu1 %v15741_v61  ;;  %v15773_v52 = vcombine.low %v1957_v34, %v1961_v35  ;;  %v14504_v50 = vcombine.high %v686_v46, %v690_v51  ;;  %v1977_v61 = vld [vmem:[#allocation5 + $0x2f68] sm:$0xff]  ;;  %v14503_v29 = vcombine.low %v686_v46, %v690_v51  ;;  %v471_v51 = vld [vmem:[#allocation5 + $0x58] sm:$0xff] }
 0x3ca   :  { %10677 = vmatprep.subr.bf16.mxu1 %v15750_v3  ;;  %v698_v3 = vld [vmem:[#allocation5 + $0x770] sm:$0xff]  ;;  %v15790_v63 = vcombine.high %v1973_v60, %v1977_v61 }
 0x3cc   :  { %10758 = vmatpush1.bf16.msra.mxu0 %v14463_v2  ;;  %v694_v2 = vld [vmem:[#allocation5 + $0x750] sm:$0xff] }
 0x3cd   :  { %10759 = vmatprep.subr.bf16.mxu0 %v14472_v0  ;;  %10678 = vmatpush1.bf16.msra.mxu1 %v15749_v44  ;;  %v15781_v0 = vcombine.low %v1965_v42, %v1969_v9  ;;  %v14512_v17 = vcombine.high %v694_v2, %v698_v3  ;;  %v1985_v44 = vld [vmem:[#allocation5 + $0x2fa8] sm:$0xff]  ;;  %v14511_v20 = vcombine.low %v694_v2, %v698_v3  ;;  %v479_v3 = vld [vmem:[#allocation5 + $0x98] sm:$0xff] }
 0x3ce   :  { %10679 = vmatprep.subr.bf16.mxu1 %v15758_v27  ;;  %v706_v27 = vld [vmem:[#allocation5 + $0x7b0] sm:$0xff]  ;;  %v15798_v24 = vcombine.high %v1981_v10, %v1985_v44 }
 0x3d0   :  { %10760 = vmatpush1.bf16.msra.mxu0 %v14471_v26  ;;  %v702_v26 = vld [vmem:[#allocation5 + $0x790] sm:$0xff] }
 0x3d1   :  { %10761 = vmatprep.subr.bf16.mxu0 %v14480_v19  ;;  %10680 = vmatpush1.bf16.msra.mxu1 %v15757_v30  ;;  %v15789_v19 = vcombine.low %v1973_v60, %v1977_v61  ;;  %v14520_v25 = vcombine.high %v702_v26, %v706_v27  ;;  %v1993_v30 = vld [vmem:[#allocation5 + $0x2fe8] sm:$0xff]  ;;  %v14519_v34 = vcombine.low %v702_v26, %v706_v27  ;;  %v487_v27 = vld [vmem:[#allocation5 + $0xd8] sm:$0xff] }
 0x3d2   :  { %10681 = vmatprep.subr.bf16.mxu1 %v15766_v53  ;;  %v714_v53 = vld [vmem:[#allocation5 + $0x7f0] sm:$0xff]  ;;  %v15806_v35 = vcombine.high %v1989_v58, %v1993_v30 }
 0x3d4   :  { %10762 = vmatpush1.bf16.msra.mxu0 %v14479_v31  ;;  %v710_v31 = vld [vmem:[#allocation5 + $0x7d0] sm:$0xff] }
 0x3d5   :  { %10763 = vmatprep.subr.bf16.mxu0 %v14488_v54  ;;  %10682 = vmatpush1.bf16.msra.mxu1 %v15765_v40  ;;  %v15797_v54 = vcombine.low %v1981_v10, %v1985_v44  ;;  %v14528_v37 = vcombine.high %v710_v31, %v714_v53  ;;  %v467_v40 = vld [vmem:[#allocation5 + $0x38] sm:$0xff]  ;;  %v14527_v42 = vcombine.low %v710_v31, %v714_v53 }
 0x3d6   :  { %10683 = vmatprep.subr.bf16.mxu1 %v15774_v55  ;;  %v722_v55 = vld [vmem:[#allocation5 + $0x830] sm:$0xff]  ;;  %v14282_v9 = vcombine.high %v463_v39, %v467_v40  ;;  %v495_v53 = vld [vmem:[#allocation5 + $0x118] sm:$0xff] }
 0x3d8   :  { %10764 = vmatpush1.bf16.msra.mxu0 %v14487_v8  ;;  %v718_v8 = vld [vmem:[#allocation5 + $0x810] sm:$0xff] }
 0x3d9   :  { %10765 = vmatprep.subr.bf16.mxu0 %v14496_v56  ;;  %10684 = vmatpush1.bf16.msra.mxu1 %v15773_v52  ;;  %v15805_v56 = vcombine.low %v1989_v58, %v1993_v30  ;;  %v14536_v46 = vcombine.high %v718_v8, %v722_v55  ;;  %v475_v52 = vld [vmem:[#allocation5 + $0x78] sm:$0xff]  ;;  %v14535_v60 = vcombine.low %v718_v8, %v722_v55 }
 0x3da   :  { %10685 = vmatprep.subr.bf16.mxu1 %v15782_v49  ;;  %v730_v49 = vld [vmem:[#allocation5 + $0x870] sm:$0xff]  ;;  %v14290_v61 = vcombine.high %v471_v51, %v475_v52  ;;  %v503_v8 = vld [vmem:[#allocation5 + $0x158] sm:$0xff] }
 0x3db   :  { %v507_v55 = vld [vmem:[#allocation5 + $0x178] sm:$0xff] }
 0x3dc   :  { %10766 = vmatpush1.bf16.msra.mxu0 %v14495_v59  ;;  %v726_v59 = vld [vmem:[#allocation5 + $0x850] sm:$0xff] }
 0x3dd   :  { %10767 = vmatprep.subr.bf16.mxu0 %v14504_v50  ;;  %10686 = vmatpush1.bf16.msra.mxu1 %v15781_v0  ;;  %v14281_v50 = vcombine.low %v463_v39, %v467_v40  ;;  %v14544_v2 = vcombine.high %v726_v59, %v730_v49  ;;  %v483_v0 = vld [vmem:[#allocation5 + $0xb8] sm:$0xff]  ;;  %v14543_v10 = vcombine.low %v726_v59, %v730_v49 }
 0x3de   :  { %10687 = vmatprep.subr.bf16.mxu1 %v15790_v63  ;;  %v738_v63 = vld [vmem:[#allocation5 + $0x8b0] sm:$0xff]  ;;  %v14298_v44 = vcombine.high %v479_v3, %v483_v0  ;;  %v511_v59 = vld [vmem:[#allocation5 + $0x198] sm:$0xff] }
 0x3df   :  { %v515_v49 = vld [vmem:[#allocation5 + $0x1b8] sm:$0xff] }
 0x3e0   :  { %10768 = vmatpush1.bf16.msra.mxu0 %v14503_v29  ;;  %v734_v29 = vld [vmem:[#allocation5 + $0x890] sm:$0xff] }
 0x3e1   :  { %10769 = vmatprep.subr.bf16.mxu0 %v14512_v17  ;;  %10688 = vmatpush1.bf16.msra.mxu1 %v15789_v19  ;;  %v14289_v17 = vcombine.low %v471_v51, %v475_v52  ;;  %v14552_v26 = vcombine.high %v734_v29, %v738_v63  ;;  %v491_v19 = vld [vmem:[#allocation5 + $0xf8] sm:$0xff]  ;;  %v14551_v58 = vcombine.low %v734_v29, %v738_v63 }
 0x3e2   :  { %10689 = vmatprep.subr.bf16.mxu1 %v15798_v24  ;;  %v746_v24 = vld [vmem:[#allocation5 + $0x8f0] sm:$0xff]  ;;  %v14306_v30 = vcombine.high %v487_v27, %v491_v19  ;;  %v14322_v51 = vcombine.high %v503_v8, %v507_v55  ;;  %v519_v29 = vld [vmem:[#allocation5 + $0x1d8] sm:$0xff] }
 0x3e3   :  { %v523_v63 = vld [vmem:[#allocation5 + $0x1f8] sm:$0xff] }
 0x3e4   :  { %10770 = vmatpush1.bf16.msra.mxu0 %v14511_v20  ;;  %v742_v20 = vld [vmem:[#allocation5 + $0x8d0] sm:$0xff] }
 0x3e5   :  { %10771 = vmatprep.subr.bf16.mxu0 %v14520_v25  ;;  %10690 = vmatpush1.bf16.msra.mxu1 %v15797_v54  ;;  %v14297_v25 = vcombine.low %v479_v3, %v483_v0  ;;  %v14560_v31 = vcombine.high %v742_v20, %v746_v24  ;;  %v499_v54 = vld [vmem:[#allocation5 + $0x138] sm:$0xff]  ;;  %v14559_v39 = vcombine.low %v742_v20, %v746_v24 }
 0x3e6   :  { %10691 = vmatprep.subr.bf16.mxu1 %v15806_v35  ;;  %v754_v35 = vld [vmem:[#allocation5 + $0x930] sm:$0xff]  ;;  %v14314_v40 = vcombine.high %v495_v53, %v499_v54  ;;  %v14330_v3 = vcombine.high %v511_v59, %v515_v49  ;;  %v527_v20 = vld [vmem:[#allocation5 + $0x218] sm:$0xff] }
 0x3e7   :  { %v531_v24 = vld [vmem:[#allocation5 + $0x238] sm:$0xff] }
 0x3e8   :  { %10772 = vmatpush1.bf16.msra.mxu0 %v14519_v34  ;;  %v750_v34 = vld [vmem:[#allocation5 + $0x910] sm:$0xff] }
 0x3e9   :  { %10773 = vmatprep.subr.bf16.mxu0 %v14528_v37  ;;  %10692 = vmatpush1.bf16.msra.mxu1 %v15805_v56  ;;  %v14305_v37 = vcombine.low %v487_v27, %v491_v19  ;;  %v758_v56 = vld [vmem:[#allocation5 + $0x950] sm:$0xff]  ;;  %v14338_v27 = vcombine.high %v519_v29, %v523_v63 }
 0x3ea   :  { %11194 = vmatprep.subr.bf16.mxu1 %v14282_v9  ;;  %v14313_v9 = vcombine.low %v495_v53, %v499_v54  ;;  %v14346_v53 = vcombine.high %v527_v20, %v531_v24 }
 0x3ec   :  { %10774 = vmatpush1.bf16.msra.mxu0 %v14527_v42  ;;  %10694 = vmatmul.mubr.bf16.vlgmr.msra.gmra.mrb[4].mxu1 %v17572_v1  ;;  %v762_v42 = vld [vmem:[#allocation5 + $0x970] sm:$0xff] }
 0x3ed   :  { %10784 = vmatprep.subr.bf16.mxu0 %v14536_v46  ;;  %11195 = vmatpush1.bf16.msra.mxu1 %v14281_v50  ;;  %v14567_v46 = vcombine.low %v750_v34, %v754_v35  ;;  %v14576_v52 = vcombine.high %v758_v56, %v762_v42  ;;  %v766_v50 = vld [vmem:[#allocation5 + $0x990] sm:$0xff] }
 0x3ee   :  { %11196 = vmatprep.subr.bf16.mxu1 %v14290_v61  ;;  %11226 = vmatprep.mubr.bf16.mxu1 %v17376_v21  ;;  %v14568_v21 = vcombine.high %v750_v34, %v754_v35  ;;  %v14321_v61 = vcombine.low %v503_v8, %v507_v55  ;;  %v535_v34 = vld [vmem:[#allocation5 + $0x258] sm:$0xff] }
 0x3ef   :  { %10776 = vmatmul.mubr.bf16.vlgmr.msra.gmra.mrb[4].mxu0 %v17396_v43  ;;  %v539_v35 = vld [vmem:[#allocation5 + $0x278] sm:$0xff] }
 0x3f0   :  { %10785 = vmatpush1.bf16.msra.mxu0 %v14535_v60  ;;  %10816 = vmatprep.mubr.bf16.mxu0 %v17398_v48  ;;  %v770_v60 = vld [vmem:[#allocation5 + $0x9b0] sm:$0xff]  ;;  %v14354_v8 = vcombine.high %v535_v34, %v539_v35 }
 0x3f1   :  { %10786 = vmatprep.subr.bf16.mxu0 %v14544_v2  ;;  %11197 = vmatpush1.bf16.msra.mxu1 %v14289_v17  ;;  %v14575_v2 = vcombine.low %v758_v56, %v762_v42  ;;  %v14584_v0 = vcombine.high %v766_v50, %v770_v60  ;;  %v774_v17 = vld [vmem:[#allocation5 + $0x9d0] sm:$0xff]  ;;  %v543_v56 = vld [vmem:[#allocation5 + $0x298] sm:$0xff] }
 0x3f2   :  { %11198 = vmatprep.subr.bf16.mxu1 %v14298_v44  ;;  %v14329_v44 = vcombine.low %v511_v59, %v515_v49  ;;  %v547_v42 = vld [vmem:[#allocation5 + $0x2b8] sm:$0xff] }
 0x3f3   :  { %v14362_v59 = vcombine.high %v543_v56, %v547_v42 }
 0x3f4   :  { %10787 = vmatpush1.bf16.msra.mxu0 %v14543_v10  ;;  %v778_v10 = vld [vmem:[#allocation5 + $0x9f0] sm:$0xff] }
 0x3f5   :  { %10788 = vmatprep.subr.bf16.mxu0 %v14552_v26  ;;  %11199 = vmatpush1.bf16.msra.mxu1 %v14297_v25  ;;  %v14583_v26 = vcombine.low %v766_v50, %v770_v60  ;;  %v14592_v19 = vcombine.high %v774_v17, %v778_v10  ;;  %v782_v25 = vld [vmem:[#allocation5 + $0xa10] sm:$0xff]  ;;  %v551_v50 = vld [vmem:[#allocation5 + $0x2d8] sm:$0xff] }
 0x3f6   :  { %11200 = vmatprep.subr.bf16.mxu1 %v14306_v30  ;;  %v14337_v30 = vcombine.low %v519_v29, %v523_v63  ;;  %v555_v60 = vld [vmem:[#allocation5 + $0x2f8] sm:$0xff] }
 0x3f7   :  { %v14370_v29 = vcombine.high %v551_v50, %v555_v60 }
 0x3f8   :  { %10789 = vmatpush1.bf16.msra.mxu0 %v14551_v58  ;;  %v786_v58 = vld [vmem:[#allocation5 + $0xa30] sm:$0xff] }
 0x3f9   :  { %10790 = vmatprep.subr.bf16.mxu0 %v14560_v31  ;;  %11201 = vmatpush1.bf16.msra.mxu1 %v14305_v37  ;;  %v14591_v31 = vcombine.low %v774_v17, %v778_v10  ;;  %v14600_v54 = vcombine.high %v782_v25, %v786_v58  ;;  %v790_v37 = vld [vmem:[#allocation5 + $0xa50] sm:$0xff]  ;;  %v559_v17 = vld [vmem:[#allocation5 + $0x318] sm:$0xff] }
 0x3fa   :  { %11202 = vmatprep.subr.bf16.mxu1 %v14314_v40  ;;  %v14345_v40 = vcombine.low %v527_v20, %v531_v24  ;;  %v563_v10 = vld [vmem:[#allocation5 + $0x338] sm:$0xff] }
 0x3fb   :  { %v14378_v20 = vcombine.high %v559_v17, %v563_v10 }
 0x3fc   :  { %10791 = vmatpush1.bf16.msra.mxu0 %v14559_v39  ;;  %v794_v39 = vld [vmem:[#allocation5 + $0xa70] sm:$0xff] }
 0x3fd   :  { %10792 = vmatprep.subr.bf16.mxu0 %v14568_v21  ;;  %11203 = vmatpush1.bf16.msra.mxu1 %v14313_v9  ;;  %v14599_v21 = vcombine.low %v782_v25, %v786_v58  ;;  %v14608_v55 = vcombine.high %v790_v37, %v794_v39  ;;  %v798_v9 = vld [vmem:[#allocation5 + $0xa90] sm:$0xff]  ;;  %v567_v25 = vld [vmem:[#allocation5 + $0x358] sm:$0xff] }
 0x3fe   :  { %11204 = vmatprep.subr.bf16.mxu1 %v14322_v51  ;;  %v14353_v51 = vcombine.low %v535_v34, %v539_v35  ;;  %v571_v58 = vld [vmem:[#allocation5 + $0x378] sm:$0xff] }
 0x3ff   :  { %v14386_v34 = vcombine.high %v567_v25, %v571_v58 }
 0x400   :  { %10793 = vmatpush1.bf16.msra.mxu0 %v14567_v46  ;;  %v802_v46 = vld [vmem:[#allocation5 + $0xab0] sm:$0xff] }
 0x401   :  { %10794 = vmatprep.subr.bf16.mxu0 %v14576_v52  ;;  %11205 = vmatpush1.bf16.msra.mxu1 %v14321_v61  ;;  %v14607_v52 = vcombine.low %v790_v37, %v794_v39  ;;  %v14616_v49 = vcombine.high %v798_v9, %v802_v46  ;;  %v806_v61 = vld [vmem:[#allocation5 + $0xad0] sm:$0xff]  ;;  %v575_v37 = vld [vmem:[#allocation5 + $0x398] sm:$0xff] }
 0x402   :  { %11206 = vmatprep.subr.bf16.mxu1 %v14330_v3  ;;  %v14361_v3 = vcombine.low %v543_v56, %v547_v42  ;;  %v579_v39 = vld [vmem:[#allocation5 + $0x3b8] sm:$0xff] }
 0x403   :  { %v14394_v56 = vcombine.high %v575_v37, %v579_v39 }
 0x404   :  { %10795 = vmatpush1.bf16.msra.mxu0 %v14575_v2  ;;  %v810_v2 = vld [vmem:[#allocation5 + $0xaf0] sm:$0xff] }
 0x405   :  { %10796 = vmatprep.subr.bf16.mxu0 %v14584_v0  ;;  %11207 = vmatpush1.bf16.msra.mxu1 %v14329_v44  ;;  %v14615_v0 = vcombine.low %v798_v9, %v802_v46  ;;  %v14624_v63 = vcombine.high %v806_v61, %v810_v2  ;;  %v814_v44 = vld [vmem:[#allocation5 + $0xb10] sm:$0xff]  ;;  %v583_v9 = vld [vmem:[#allocation5 + $0x3d8] sm:$0xff] }
 0x406   :  { %11208 = vmatprep.subr.bf16.mxu1 %v14338_v27  ;;  %v14369_v27 = vcombine.low %v551_v50, %v555_v60  ;;  %v587_v46 = vld [vmem:[#allocation5 + $0x3f8] sm:$0xff] }
 0x407   :  { %v14402_v50 = vcombine.high %v583_v9, %v587_v46 }
 0x408   :  { %10797 = vmatpush1.bf16.msra.mxu0 %v14583_v26  ;;  %v818_v26 = vld [vmem:[#allocation5 + $0xb30] sm:$0xff] }
 0x409   :  { %10798 = vmatprep.subr.bf16.mxu0 %v14592_v19  ;;  %11209 = vmatpush1.bf16.msra.mxu1 %v14337_v30  ;;  %v14623_v19 = vcombine.low %v806_v61, %v810_v2  ;;  %v14632_v24 = vcombine.high %v814_v44, %v818_v26  ;;  %v822_v30 = vld [vmem:[#allocation5 + $0xb50] sm:$0xff]  ;;  %v591_v61 = vld [vmem:[#allocation5 + $0x418] sm:$0xff] }
 0x40a   :  { %11210 = vmatprep.subr.bf16.mxu1 %v14346_v53  ;;  %v14377_v53 = vcombine.low %v559_v17, %v563_v10  ;;  %v595_v2 = vld [vmem:[#allocation5 + $0x438] sm:$0xff] }
 0x40b   :  { %v14410_v17 = vcombine.high %v591_v61, %v595_v2 }
 0x40c   :  { %10799 = vmatpush1.bf16.msra.mxu0 %v14591_v31  ;;  %v826_v31 = vld [vmem:[#allocation5 + $0xb70] sm:$0xff] }
 0x40d   :  { %10800 = vmatprep.subr.bf16.mxu0 %v14600_v54  ;;  %11211 = vmatpush1.bf16.msra.mxu1 %v14345_v40  ;;  %v14631_v54 = vcombine.low %v814_v44, %v818_v26  ;;  %v14640_v35 = vcombine.high %v822_v30, %v826_v31  ;;  %v830_v40 = vld [vmem:[#allocation5 + $0xb90] sm:$0xff]  ;;  %v599_v44 = vld [vmem:[#allocation5 + $0x458] sm:$0xff] }
 0x40e   :  { %11212 = vmatprep.subr.bf16.mxu1 %v14354_v8  ;;  %v14385_v8 = vcombine.low %v567_v25, %v571_v58  ;;  %v603_v26 = vld [vmem:[#allocation5 + $0x478] sm:$0xff] }
 0x40f   :  { %v14418_v25 = vcombine.high %v599_v44, %v603_v26 }
 0x410   :  { %10801 = vmatpush1.bf16.msra.mxu0 %v14599_v21  ;;  %v834_v21 = vld [vmem:[#allocation5 + $0xbb0] sm:$0xff] }
 0x411   :  { %10802 = vmatprep.subr.bf16.mxu0 %v14608_v55  ;;  %11213 = vmatpush1.bf16.msra.mxu1 %v14353_v51  ;;  %v14639_v55 = vcombine.low %v822_v30, %v826_v31  ;;  %v14648_v42 = vcombine.high %v830_v40, %v834_v21  ;;  %v838_v51 = vld [vmem:[#allocation5 + $0xbd0] sm:$0xff]  ;;  %v607_v30 = vld [vmem:[#allocation5 + $0x498] sm:$0xff] }
 0x412   :  { %11214 = vmatprep.subr.bf16.mxu1 %v14362_v59  ;;  %v14393_v59 = vcombine.low %v575_v37, %v579_v39  ;;  %v611_v31 = vld [vmem:[#allocation5 + $0x4b8] sm:$0xff] }
 0x413   :  { %v14426_v37 = vcombine.high %v607_v30, %v611_v31 }
 0x414   :  { %10803 = vmatpush1.bf16.msra.mxu0 %v14607_v52  ;;  %v842_v52 = vld [vmem:[#allocation5 + $0xbf0] sm:$0xff] }
 0x415   :  { %10804 = vmatprep.subr.bf16.mxu0 %v14616_v49  ;;  %11215 = vmatpush1.bf16.msra.mxu1 %v14361_v3  ;;  %v14647_v49 = vcombine.low %v830_v40, %v834_v21  ;;  %v14656_v60 = vcombine.high %v838_v51, %v842_v52  ;;  %v846_v3 = vld [vmem:[#allocation5 + $0xc10] sm:$0xff]  ;;  %v615_v40 = vld [vmem:[#allocation5 + $0x4d8] sm:$0xff] }
 0x416   :  { %11216 = vmatprep.subr.bf16.mxu1 %v14370_v29  ;;  %v14401_v29 = vcombine.low %v583_v9, %v587_v46  ;;  %v619_v21 = vld [vmem:[#allocation5 + $0x4f8] sm:$0xff] }
 0x417   :  { %v623_v46 = vld [vmem:[#allocation5 + $0x518] sm:$0xff] }
 0x418   :  { %10805 = vmatpush1.bf16.msra.mxu0 %v14615_v0  ;;  %v850_v0 = vld [vmem:[#allocation5 + $0xc30] sm:$0xff] }
 0x419   :  { %10806 = vmatprep.subr.bf16.mxu0 %v14624_v63  ;;  %11217 = vmatpush1.bf16.msra.mxu1 %v14369_v27  ;;  %v14655_v63 = vcombine.low %v838_v51, %v842_v52  ;;  %v14664_v10 = vcombine.high %v846_v3, %v850_v0  ;;  %v854_v27 = vld [vmem:[#allocation5 + $0xc50] sm:$0xff]  ;;  %v627_v51 = vld [vmem:[#allocation5 + $0x538] sm:$0xff] }
 0x41a   :  { %11218 = vmatprep.subr.bf16.mxu1 %v14378_v20  ;;  %v14409_v20 = vcombine.low %v591_v61, %v595_v2  ;;  %v878_v52 = vld [vmem:[#allocation5 + $0xd10] sm:$0xff]  ;;  %v631_v2 = vld [vmem:[#allocation5 + $0x558] sm:$0xff] }
 0x41c   :  { %10807 = vmatpush1.bf16.msra.mxu0 %v14623_v19  ;;  %v858_v19 = vld [vmem:[#allocation5 + $0xc70] sm:$0xff] }
 0x41d   :  { %10808 = vmatprep.subr.bf16.mxu0 %v14632_v24  ;;  %11219 = vmatpush1.bf16.msra.mxu1 %v14377_v53  ;;  %v14663_v24 = vcombine.low %v846_v3, %v850_v0  ;;  %v14672_v58 = vcombine.high %v854_v27, %v858_v19  ;;  %v862_v53 = vld [vmem:[#allocation5 + $0xc90] sm:$0xff]  ;;  %v635_v3 = vld [vmem:[#allocation5 + $0x578] sm:$0xff]  ;;  %v1996_v0 = vld [vmem:[#allocation7] sm:$0xff] }
 0x41e   :  { %11220 = vmatprep.subr.bf16.mxu1 %v14386_v34  ;;  %v14417_v34 = vcombine.low %v599_v44, %v603_v26  ;;  %v14450_v26 = vcombine.high %v631_v2, %v635_v3 }
 0x420   :  { %10809 = vmatpush1.bf16.msra.mxu0 %v14631_v54  ;;  %v866_v54 = vld [vmem:[#allocation5 + $0xcb0] sm:$0xff] }
 0x421   :  { %10810 = vmatprep.subr.bf16.mxu0 %v14640_v35  ;;  %11221 = vmatpush1.bf16.msra.mxu1 %v14385_v8  ;;  %v14671_v35 = vcombine.low %v854_v27, %v858_v19  ;;  %v14680_v39 = vcombine.high %v862_v53, %v866_v54  ;;  %v870_v8 = vld [vmem:[#allocation5 + $0xcd0] sm:$0xff] }
 0x422   :  { %11222 = vmatprep.subr.bf16.mxu1 %v14394_v56  ;;  %v14679_v56 = vcombine.low %v862_v53, %v866_v54 }
 0x424   :  { %10811 = vmatpush1.bf16.msra.mxu0 %v14639_v55  ;;  %v874_v55 = vld [vmem:[#allocation5 + $0xcf0] sm:$0xff] }
 0x425   :  { %10812 = vmatprep.subr.bf16.mxu0 %v14648_v42  ;;  %11223 = vmatpush1.bf16.msra.mxu1 %v14393_v59  ;;  %v14434_v42 = vcombine.high %v615_v40, %v619_v21  ;;  %v14688_v9 = vcombine.high %v870_v8, %v874_v55  ;;  %v882_v59 = vld [vmem:[#allocation5 + $0xd30] sm:$0xff] }
 0x426   :  { %11224 = vmatprep.subr.bf16.mxu1 %v14402_v50  ;;  %v14687_v50 = vcombine.low %v870_v8, %v874_v55  ;;  %v14696_v61 = vcombine.high %v878_v52, %v882_v59  ;;  %v14695_v44 = vcombine.low %v878_v52, %v882_v59  ;;  %v902_v8 = vld [vmem:[#allocation5 + $0xdd0] sm:$0xff] }
 0x427   :  { %v906_v55 = vld [vmem:[#allocation5 + $0xdf0] sm:$0xff] }
 0x428   :  { %10813 = vmatpush1.bf16.msra.mxu0 %v14647_v49  ;;  %v14433_v49 = vcombine.low %v615_v40, %v619_v21  ;;  %v14720_v59 = vcombine.high %v902_v8, %v906_v55 }
 0x429   :  { %10814 = vmatprep.subr.bf16.mxu0 %v14656_v60  ;;  %11225 = vmatpush1.bf16.msra.mxu1 %v14401_v29  ;;  %v14442_v60 = vcombine.high %v623_v46, %v627_v51  ;;  %v17594_v29 = vsub.s32 1, %v17355_v47 }
 0x42a   :  { %11235 = vmatprep.subr.bf16.mxu1 %v14410_v17  ;;  %v890_v17 = vld [vmem:[#allocation5 + $0xd70] sm:$0xff] }
 0x42c   :  { %10815 = vmatpush1.bf16.msra.mxu0 %v14655_v63  ;;  %11227 = vmatmul.mubr.bf16.vlgmr.msra.gmra.mrb[8].mxu1 %v17394_v41  ;;  %v14425_v41 = vcombine.low %v607_v30, %v611_v31  ;;  %v886_v63 = vld [vmem:[#allocation5 + $0xd50] sm:$0xff]  ;;  %v14449_v31 = vcombine.low %v631_v2, %v635_v3  ;;  %v14719_v2 = vcombine.low %v902_v8, %v906_v55 }
 0x42d   :  { %10825 = vmatprep.subr.bf16.mxu0 %v14664_v10  ;;  %11236 = vmatpush1.bf16.msra.mxu1 %v14409_v20  ;;  %v14441_v10 = vcombine.low %v623_v46, %v627_v51  ;;  %v14704_v19 = vcombine.high %v886_v63, %v890_v17  ;;  %v639_v20 = vld [vmem:[#allocation5 + $0x598] sm:$0xff]  ;;  %v898_v30 = vld [vmem:[#allocation5 + $0xdb0] sm:$0xff]  ;;  %v14703_v53 = vcombine.low %v886_v63, %v890_v17 }
 0x42e   :  { %11237 = vmatprep.subr.bf16.mxu1 %v14418_v25  ;;  %11267 = vmatprep.mubr.bf16.mxu1 %v17378_v22  ;;  %v17591_v22 = vsub.s32 0, %v17355_v47  ;;  %v2005_v25 = vrot.slane %v1996_v0, %v17594_v29  ;;  %v663_v63 = vld [vmem:[#allocation5 + $0x658] sm:$0xff] }
 0x42f   :  { %10817 = vmatmul.mubr.bf16.vlgmr.msra.gmra.mrb[4].mxu0 %v17414_v5  ;;  %v667_v17 = vld [vmem:[#allocation5 + $0x678] sm:$0xff] }
 0x430   :  { %10826 = vmatpush1.bf16.msra.mxu0 %v14663_v24  ;;  %10857 = vmatprep.mubr.bf16.mxu0 %v17416_v15  ;;  %v2001_v27 = vrot.slane %v1996_v0, %v17591_v22  ;;  %v643_v24 = vld [vmem:[#allocation5 + $0x5b8] sm:$0xff]  ;;  %v9755_v40 = vadd.f32 %v17460_v12, %v2005_v25 }
 0x431   :  { %10827 = vmatprep.subr.bf16.mxu0 %v14672_v58  ;;  %11238 = vmatpush1.bf16.msra.mxu1 %v14417_v34  ;;  %v894_v58 = vld [vmem:[#allocation5 + $0xd90] sm:$0xff]  ;;  %v14458_v54 = vcombine.high %v639_v20, %v643_v24  ;;  %v659_v12 = vld [vmem:[#allocation5 + $0x638] sm:$0xff] }
 0x432   :  { %11239 = vmatprep.subr.bf16.mxu1 %v14426_v37  ;;  %v9753_v34 = vadd.f32 %v17458_v6, %v2001_v27  ;;  %v647_v37 = vld [vmem:[#allocation5 + $0x5d8] sm:$0xff]  ;;  %v14711_v51 = vcombine.low %v894_v58, %v898_v30 }
 0x433   :  { %v675_v25 = vld [vmem:[#allocation5 + $0x6b8] sm:$0xff] }
 0x434   :  { %10828 = vmatpush1.bf16.msra.mxu0 %v14671_v35  ;;  %v14712_v35 = vcombine.high %v894_v58, %v898_v30  ;;  %v926_v58 = vld [vmem:[#allocation5 + $0xe90] sm:$0xff] }
 0x435   :  { %10829 = vmatprep.subr.bf16.mxu0 %v14680_v39  ;;  %11240 = vmatpush1.bf16.msra.mxu1 %v14425_v41  ;;  %v651_v39 = vld [vmem:[#allocation5 + $0x5f8] sm:$0xff]  ;;  %v930_v30 = vld [vmem:[#allocation5 + $0xeb0] sm:$0xff] }
 0x436   :  { %11241 = vmatprep.subr.bf16.mxu1 %v14434_v42  ;;  %v14457_v42 = vcombine.low %v639_v20, %v643_v24  ;;  %v14466_v6 = vcombine.high %v647_v37, %v651_v39  ;;  %v671_v24 = vld [vmem:[#allocation5 + $0x698] sm:$0xff]  ;;  %v14743_v8 = vcombine.low %v926_v58, %v930_v30 }
 0x438   :  { %10830 = vmatpush1.bf16.msra.mxu0 %v14679_v56 }
 0x439   :  { %10831 = vmatprep.subr.bf16.mxu0 %v14688_v9  ;;  %11242 = vmatpush1.bf16.msra.mxu1 %v14433_v49  ;;  %v655_v49 = vld [vmem:[#allocation5 + $0x618] sm:$0xff] }
 0x43a   :  { %11243 = vmatprep.subr.bf16.mxu1 %v14442_v60  ;;  %v914_v60 = vld [vmem:[#allocation5 + $0xe30] sm:$0xff]  ;;  %v14474_v3 = vcombine.high %v655_v49, %v659_v12 }
 0x43c   :  { %10832 = vmatpush1.bf16.msra.mxu0 %v14687_v50  ;;  %v910_v50 = vld [vmem:[#allocation5 + $0xe10] sm:$0xff] }
 0x43d   :  { %10833 = vmatprep.subr.bf16.mxu0 %v14696_v61  ;;  %11244 = vmatpush1.bf16.msra.mxu1 %v14441_v10  ;;  %v14465_v61 = vcombine.low %v647_v37, %v651_v39  ;;  %v14728_v0 = vcombine.high %v910_v50, %v914_v60  ;;  %v918_v10 = vld [vmem:[#allocation5 + $0xe50] sm:$0xff]  ;;  %v14727_v27 = vcombine.low %v910_v50, %v914_v60  ;;  %v683_v37 = vld [vmem:[#allocation5 + $0x6f8] sm:$0xff] }
 0x43e   :  { %11245 = vmatprep.subr.bf16.mxu1 %v14450_v26  ;;  %v14473_v26 = vcombine.low %v655_v49, %v659_v12  ;;  %v934_v39 = vld [vmem:[#allocation5 + $0xed0] sm:$0xff]  ;;  %v695_v50 = vld [vmem:[#allocation5 + $0x758] sm:$0xff] }
 0x43f   :  { %v699_v60 = vld [vmem:[#allocation5 + $0x778] sm:$0xff] }
 0x440   :  { %10834 = vmatpush1.bf16.msra.mxu0 %v14695_v44  ;;  %v922_v44 = vld [vmem:[#allocation5 + $0xe70] sm:$0xff] }
 0x441   :  { %10835 = vmatprep.subr.bf16.mxu0 %v14704_v19  ;;  %11246 = vmatpush1.bf16.msra.mxu1 %v14449_v31  ;;  %v14482_v19 = vcombine.high %v663_v63, %v667_v17  ;;  %v14736_v20 = vcombine.high %v918_v10, %v922_v44  ;;  %v14481_v31 = vcombine.low %v663_v63, %v667_v17 }
 0x442   :  { %v10203_v21 = vpop.f32.mrb[0].mxu0  ;;  %11247 = vmatprep.subr.bf16.mxu1 %v14458_v54  ;;  %v14490_v54 = vcombine.high %v671_v24, %v675_v25  ;;  %v14514_v63 = vcombine.high %v695_v50, %v699_v60 }
 0x443   :  { %v17600_v41 = vadd.f32 %v10203_v21, %v9753_v34  ;;  %v10205_v56 = vpop.f32.mrb[1].mxu0  ;;  %v14744_v34 = vcombine.high %v926_v58, %v930_v30  ;;  %v14489_v21 = vcombine.low %v671_v24, %v675_v25  ;;  %v711_v58 = vld [vmem:[#allocation5 + $0x7d8] sm:$0xff] }
 0x444   :  { %v17602_v9 = vadd.f32 %v10205_v56, %v9755_v40  ;;  %v10207_v46 = vpop.f32.mrb[2].mxu0  ;;  %10836 = vmatpush1.bf16.msra.mxu0 %v14703_v53  ;;  %v14735_v53 = vcombine.low %v918_v10, %v922_v44  ;;  %v938_v40 = vld [vmem:[#allocation5 + $0xef0] sm:$0xff]  ;;  %v703_v10 = vld [vmem:[#allocation5 + $0x798] sm:$0xff] }
 0x445   :  { %v10208_v52 = vpop.f32.mrb[3].mxu0  ;;  %10837 = vmatprep.subr.bf16.mxu0 %v14712_v35  ;;  %11248 = vmatpush1.bf16.msra.mxu1 %v14457_v42  ;;  %v679_v35 = vld [vmem:[#allocation5 + $0x6d8] sm:$0xff]  ;;  %v14752_v56 = vcombine.high %v934_v39, %v938_v40 }
 0x446   :  { %11249 = vmatprep.subr.bf16.mxu1 %v14466_v6  ;;  %v14498_v55 = vcombine.high %v679_v35, %v683_v37  ;;  %v687_v42 = vld [vmem:[#allocation5 + $0x718] sm:$0xff]  ;;  %v946_v6 = vld [vmem:[#allocation5 + $0xf30] sm:$0xff]  ;;  %v14497_v52 = vcombine.low %v679_v35, %v683_v37 }
 0x447   :  { %v691_v46 = vld [vmem:[#allocation5 + $0x738] sm:$0xff] }
 0x448   :  { %10838 = vmatpush1.bf16.msra.mxu0 %v14711_v51  ;;  %v942_v51 = vld [vmem:[#allocation5 + $0xf10] sm:$0xff]  ;;  %v14506_v49 = vcombine.high %v687_v42, %v691_v46  ;;  %v707_v44 = vld [vmem:[#allocation5 + $0x7b8] sm:$0xff] }
 0x449   :  { %10839 = vmatprep.subr.bf16.mxu0 %v14720_v59  ;;  %11250 = vmatpush1.bf16.msra.mxu1 %v14465_v61  ;;  %v14751_v59 = vcombine.low %v934_v39, %v938_v40  ;;  %v14760_v12 = vcombine.high %v942_v51, %v946_v6  ;;  %v950_v61 = vld [vmem:[#allocation5 + $0xf50] sm:$0xff]  ;;  %v14522_v24 = vcombine.high %v703_v10, %v707_v44  ;;  %v715_v30 = vld [vmem:[#allocation5 + $0x7f8] sm:$0xff] }
 0x44a   :  { %11251 = vmatprep.subr.bf16.mxu1 %v14474_v3  ;;  %v14505_v3 = vcombine.low %v687_v42, %v691_v46  ;;  %v14530_v35 = vcombine.high %v711_v58, %v715_v30  ;;  %v719_v39 = vld [vmem:[#allocation5 + $0x818] sm:$0xff] }
 0x44b   :  { %v723_v40 = vld [vmem:[#allocation5 + $0x838] sm:$0xff] }
 0x44c   :  { %10840 = vmatpush1.bf16.msra.mxu0 %v14719_v2  ;;  %v954_v2 = vld [vmem:[#allocation5 + $0xf70] sm:$0xff]  ;;  %v14538_v42 = vcombine.high %v719_v39, %v723_v40 }
 0x44d   :  { %10841 = vmatprep.subr.bf16.mxu0 %v14728_v0  ;;  %11252 = vmatpush1.bf16.msra.mxu1 %v14473_v26  ;;  %v14759_v0 = vcombine.low %v942_v51, %v946_v6  ;;  %v14768_v17 = vcombine.high %v950_v61, %v954_v2  ;;  %v958_v26 = vld [vmem:[#allocation5 + $0xf90] sm:$0xff]  ;;  %v727_v51 = vld [vmem:[#allocation5 + $0x858] sm:$0xff] }
 0x44e   :  { %11253 = vmatprep.subr.bf16.mxu1 %v14482_v19  ;;  %v14513_v19 = vcombine.low %v695_v50, %v699_v60  ;;  %v731_v6 = vld [vmem:[#allocation5 + $0x878] sm:$0xff] }
 0x44f   :  { %v14546_v50 = vcombine.high %v727_v51, %v731_v6 }
 0x450   :  { %10842 = vmatpush1.bf16.msra.mxu0 %v14727_v27  ;;  %v962_v27 = vld [vmem:[#allocation5 + $0xfb0] sm:$0xff] }
 0x451   :  { %10843 = vmatprep.subr.bf16.mxu0 %v14736_v20  ;;  %11254 = vmatpush1.bf16.msra.mxu1 %v14481_v31  ;;  %v14767_v20 = vcombine.low %v950_v61, %v954_v2  ;;  %v14776_v25 = vcombine.high %v958_v26, %v962_v27  ;;  %v966_v31 = vld [vmem:[#allocation5 + $0xfd0] sm:$0xff]  ;;  %v735_v61 = vld [vmem:[#allocation5 + $0x898] sm:$0xff] }
 0x452   :  { %11255 = vmatprep.subr.bf16.mxu1 %v14490_v54  ;;  %v14521_v54 = vcombine.low %v703_v10, %v707_v44  ;;  %v739_v2 = vld [vmem:[#allocation5 + $0x8b8] sm:$0xff] }
 0x453   :  { %v14554_v10 = vcombine.high %v735_v61, %v739_v2 }
 0x454   :  { %10844 = vmatpush1.bf16.msra.mxu0 %v14735_v53  ;;  %v970_v53 = vld [vmem:[#allocation5 + $0xff0] sm:$0xff] }
 0x455   :  { %10845 = vmatprep.subr.bf16.mxu0 %v14744_v34  ;;  %11256 = vmatpush1.bf16.msra.mxu1 %v14489_v21  ;;  %v14775_v34 = vcombine.low %v958_v26, %v962_v27  ;;  %v14784_v37 = vcombine.high %v966_v31, %v970_v53  ;;  %v974_v21 = vld [vmem:[#allocation5 + $0x1010] sm:$0xff]  ;;  %v743_v26 = vld [vmem:[#allocation5 + $0x8d8] sm:$0xff] }
 0x456   :  { %11257 = vmatprep.subr.bf16.mxu1 %v14498_v55  ;;  %v14529_v55 = vcombine.low %v711_v58, %v715_v30  ;;  %v747_v27 = vld [vmem:[#allocation5 + $0x8f8] sm:$0xff] }
 0x457   :  { %v751_v30 = vld [vmem:[#allocation5 + $0x918] sm:$0xff] }
 0x458   :  { %10846 = vmatpush1.bf16.msra.mxu0 %v14743_v8  ;;  %v978_v8 = vld [vmem:[#allocation5 + $0x1030] sm:$0xff] }
 0x459   :  { %10847 = vmatprep.subr.bf16.mxu0 %v14752_v56  ;;  %11258 = vmatpush1.bf16.msra.mxu1 %v14497_v52  ;;  %v14783_v56 = vcombine.low %v966_v31, %v970_v53  ;;  %v14792_v46 = vcombine.high %v974_v21, %v978_v8  ;;  %v982_v52 = vld [vmem:[#allocation5 + $0x1050] sm:$0xff]  ;;  %v755_v31 = vld [vmem:[#allocation5 + $0x938] sm:$0xff] }
 0x45a   :  { %11259 = vmatprep.subr.bf16.mxu1 %v14506_v49  ;;  %v14537_v49 = vcombine.low %v719_v39, %v723_v40  ;;  %v1006_v53 = vld [vmem:[#allocation5 + $0x1110] sm:$0xff]  ;;  %v759_v39 = vld [vmem:[#allocation5 + $0x958] sm:$0xff] }
 0x45b   :  { %v763_v40 = vld [vmem:[#allocation5 + $0x978] sm:$0xff] }
 0x45c   :  { %10848 = vmatpush1.bf16.msra.mxu0 %v14751_v59  ;;  %v986_v59 = vld [vmem:[#allocation5 + $0x1070] sm:$0xff] }
 0x45d   :  { %10849 = vmatprep.subr.bf16.mxu0 %v14760_v12  ;;  %11260 = vmatpush1.bf16.msra.mxu1 %v14505_v3  ;;  %v14791_v12 = vcombine.low %v974_v21, %v978_v8  ;;  %v14800_v60 = vcombine.high %v982_v52, %v986_v59  ;;  %v990_v3 = vld [vmem:[#allocation5 + $0x1090] sm:$0xff] }
 0x45e   :  { %11261 = vmatprep.subr.bf16.mxu1 %v14514_v63  ;;  %v14545_v63 = vcombine.low %v727_v51, %v731_v6  ;;  %v1014_v21 = vld [vmem:[#allocation5 + $0x1150] sm:$0xff]  ;;  %v767_v51 = vld [vmem:[#allocation5 + $0x998] sm:$0xff] }
 0x45f   :  { %v1018_v8 = vld [vmem:[#allocation5 + $0x1170] sm:$0xff]  ;;  %v771_v6 = vld [vmem:[#allocation5 + $0x9b8] sm:$0xff] }
 0x460   :  { %10850 = vmatpush1.bf16.msra.mxu0 %v14759_v0  ;;  %v994_v0 = vld [vmem:[#allocation5 + $0x10b0] sm:$0xff] }
 0x461   :  { %10851 = vmatprep.subr.bf16.mxu0 %v14768_v17  ;;  %11262 = vmatpush1.bf16.msra.mxu1 %v14513_v19  ;;  %v14799_v17 = vcombine.low %v982_v52, %v986_v59  ;;  %v14808_v44 = vcombine.high %v990_v3, %v994_v0  ;;  %v998_v19 = vld [vmem:[#allocation5 + $0x10d0] sm:$0xff] }
 0x462   :  { %11263 = vmatprep.subr.bf16.mxu1 %v14522_v24  ;;  %v14807_v24 = vcombine.low %v990_v3, %v994_v0  ;;  %v1022_v52 = vld [vmem:[#allocation5 + $0x1190] sm:$0xff] }
 0x463   :  { %v1026_v59 = vld [vmem:[#allocation5 + $0x11b0] sm:$0xff] }
 0x464   :  { %10852 = vmatpush1.bf16.msra.mxu0 %v14767_v20  ;;  %v1002_v20 = vld [vmem:[#allocation5 + $0x10f0] sm:$0xff] }
 0x465   :  { %10853 = vmatprep.subr.bf16.mxu0 %v14776_v25  ;;  %11264 = vmatpush1.bf16.msra.mxu1 %v14521_v54  ;;  %v14562_v25 = vcombine.high %v743_v26, %v747_v27  ;;  %v14816_v58 = vcombine.high %v998_v19, %v1002_v20  ;;  %v1010_v54 = vld [vmem:[#allocation5 + $0x1130] sm:$0xff] }
 0x466   :  { %11265 = vmatprep.subr.bf16.mxu1 %v14530_v35  ;;  %v14815_v35 = vcombine.low %v998_v19, %v1002_v20  ;;  %v1030_v3 = vld [vmem:[#allocation5 + $0x11d0] sm:$0xff] }
 0x467   :  { %v1034_v0 = vld [vmem:[#allocation5 + $0x11f0] sm:$0xff] }
 0x468   :  { %10854 = vmatpush1.bf16.msra.mxu0 %v14775_v34  ;;  %v14561_v34 = vcombine.low %v743_v26, %v747_v27  ;;  %v783_v26 = vld [vmem:[#allocation5 + $0xa18] sm:$0xff]  ;;  %v1038_v19 = vld [vmem:[#allocation5 + $0x1210] sm:$0xff] }
 0x469   :  { %10855 = vmatprep.subr.bf16.mxu0 %v14784_v37  ;;  %11266 = vmatpush1.bf16.msra.mxu1 %v14529_v55  ;;  %v14570_v37 = vcombine.high %v751_v30, %v755_v31  ;;  %v14569_v55 = vcombine.low %v751_v30, %v755_v31  ;;  %v787_v27 = vld [vmem:[#allocation5 + $0xa38] sm:$0xff]  ;;  %v1042_v20 = vld [vmem:[#allocation5 + $0x1230] sm:$0xff] }
 0x46a   :  { %11276 = vmatprep.subr.bf16.mxu1 %v14538_v42  ;;  %v14578_v42 = vcombine.high %v759_v39, %v763_v40  ;;  %v791_v30 = vld [vmem:[#allocation5 + $0xa58] sm:$0xff] }
 0x46b   :  { %v795_v31 = vld [vmem:[#allocation5 + $0xa78] sm:$0xff] }
 0x46c   :  { %10856 = vmatpush1.bf16.msra.mxu0 %v14783_v56  ;;  %11268 = vmatmul.mubr.bf16.vlgmr.msra.gmra.mrb[8].mxu1 %v17396_v43  ;;  %v14553_v43 = vcombine.low %v735_v61, %v739_v2  ;;  %v14823_v56 = vcombine.low %v1006_v53, %v1010_v54  ;;  %v775_v61 = vld [vmem:[#allocation5 + $0x9d8] sm:$0xff] }
 0x46d   :  { %10866 = vmatprep.subr.bf16.mxu0 %v14792_v46  ;;  %11277 = vmatpush1.bf16.msra.mxu1 %v14537_v49  ;;  %v14832_v46 = vcombine.high %v1014_v21, %v1018_v8  ;;  %v14577_v49 = vcombine.low %v759_v39, %v763_v40  ;;  %v779_v2 = vld [vmem:[#allocation5 + $0x9f8] sm:$0xff] }
 0x46e   :  { %11278 = vmatprep.subr.bf16.mxu1 %v14546_v50  ;;  %11308 = vmatprep.mubr.bf16.mxu1 %v17398_v48  ;;  %v14824_v48 = vcombine.high %v1006_v53, %v1010_v54  ;;  %v14586_v50 = vcombine.high %v767_v51, %v771_v6  ;;  %v1046_v53 = vld [vmem:[#allocation5 + $0x1250] sm:$0xff]  ;;  %v799_v39 = vld [vmem:[#allocation5 + $0xa98] sm:$0xff] }
 0x46f   :  { %10858 = vmatmul.mubr.bf16.vlgmr.msra.gmra.mrb[4].mxu0 %v17432_v7  ;;  %v1050_v54 = vld [vmem:[#allocation5 + $0x1270] sm:$0xff]  ;;  %v803_v40 = vld [vmem:[#allocation5 + $0xab8] sm:$0xff] }
 0x470   :  { %10867 = vmatpush1.bf16.msra.mxu0 %v14791_v12  ;;  %10898 = vmatprep.mubr.bf16.mxu0 %v17434_v45  ;;  %v14831_v12 = vcombine.low %v1014_v21, %v1018_v8  ;;  %v1054_v21 = vld [vmem:[#allocation5 + $0x1290] sm:$0xff] }
 0x471   :  { %10868 = vmatprep.subr.bf16.mxu0 %v14800_v60  ;;  %11279 = vmatpush1.bf16.msra.mxu1 %v14545_v63  ;;  %v14840_v60 = vcombine.high %v1022_v52, %v1026_v59  ;;  %v14585_v63 = vcombine.low %v767_v51, %v771_v6  ;;  %v1058_v8 = vld [vmem:[#allocation5 + $0x12b0] sm:$0xff]  ;;  %v807_v51 = vld [vmem:[#allocation5 + $0xad8] sm:$0xff] }
 0x472   :  { %11280 = vmatprep.subr.bf16.mxu1 %v14554_v10  ;;  %v14594_v10 = vcombine.high %v775_v61, %v779_v2  ;;  %v811_v6 = vld [vmem:[#allocation5 + $0xaf8] sm:$0xff] }
 0x474   :  { %10869 = vmatpush1.bf16.msra.mxu0 %v14799_v17  ;;  %v14839_v17 = vcombine.low %v1022_v52, %v1026_v59  ;;  %v1062_v52 = vld [vmem:[#allocation5 + $0x12d0] sm:$0xff] }
 0x475   :  { %10870 = vmatprep.subr.bf16.mxu0 %v14808_v44  ;;  %11281 = vmatpush1.bf16.msra.mxu1 %v14553_v43  ;;  %v14848_v44 = vcombine.high %v1030_v3, %v1034_v0  ;;  %v14593_v43 = vcombine.low %v775_v61, %v779_v2  ;;  %v1066_v59 = vld [vmem:[#allocation5 + $0x12f0] sm:$0xff]  ;;  %v815_v61 = vld [vmem:[#allocation5 + $0xb18] sm:$0xff] }
 0x476   :  { %11282 = vmatprep.subr.bf16.mxu1 %v14562_v25  ;;  %v14602_v25 = vcombine.high %v783_v26, %v787_v27  ;;  %v819_v2 = vld [vmem:[#allocation5 + $0xb38] sm:$0xff] }
 0x478   :  { %10871 = vmatpush1.bf16.msra.mxu0 %v14807_v24  ;;  %v14847_v24 = vcombine.low %v1030_v3, %v1034_v0  ;;  %v1070_v3 = vld [vmem:[#allocation5 + $0x1310] sm:$0xff] }
 0x479   :  { %10872 = vmatprep.subr.bf16.mxu0 %v14816_v58  ;;  %11283 = vmatpush1.bf16.msra.mxu1 %v14561_v34  ;;  %v14856_v58 = vcombine.high %v1038_v19, %v1042_v20  ;;  %v14601_v34 = vcombine.low %v783_v26, %v787_v27  ;;  %v1074_v0 = vld [vmem:[#allocation5 + $0x1330] sm:$0xff]  ;;  %v823_v26 = vld [vmem:[#allocation5 + $0xb58] sm:$0xff] }
 0x47a   :  { %11284 = vmatprep.subr.bf16.mxu1 %v14570_v37  ;;  %v14610_v37 = vcombine.high %v791_v30, %v795_v31  ;;  %v827_v27 = vld [vmem:[#allocation5 + $0xb78] sm:$0xff] }
 0x47c   :  { %10873 = vmatpush1.bf16.msra.mxu0 %v14815_v35  ;;  %v14855_v35 = vcombine.low %v1038_v19, %v1042_v20  ;;  %v1078_v19 = vld [vmem:[#allocation5 + $0x1350] sm:$0xff] }
 0x47d   :  { %10874 = vmatprep.subr.bf16.mxu0 %v14824_v48  ;;  %11285 = vmatpush1.bf16.msra.mxu1 %v14569_v55  ;;  %v14864_v48 = vcombine.high %v1046_v53, %v1050_v54  ;;  %v14609_v55 = vcombine.low %v791_v30, %v795_v31  ;;  %v1082_v20 = vld [vmem:[#allocation5 + $0x1370] sm:$0xff]  ;;  %v831_v30 = vld [vmem:[#allocation5 + $0xb98] sm:$0xff] }
 0x47e   :  { %11286 = vmatprep.subr.bf16.mxu1 %v14578_v42  ;;  %v14618_v42 = vcombine.high %v799_v39, %v803_v40  ;;  %v835_v31 = vld [vmem:[#allocation5 + $0xbb8] sm:$0xff] }
 0x480   :  { %10875 = vmatpush1.bf16.msra.mxu0 %v14823_v56  ;;  %v14863_v56 = vcombine.low %v1046_v53, %v1050_v54  ;;  %v1086_v53 = vld [vmem:[#allocation5 + $0x1390] sm:$0xff] }
 0x481   :  { %10876 = vmatprep.subr.bf16.mxu0 %v14832_v46  ;;  %11287 = vmatpush1.bf16.msra.mxu1 %v14577_v49  ;;  %v14872_v46 = vcombine.high %v1054_v21, %v1058_v8  ;;  %v14617_v49 = vcombine.low %v799_v39, %v803_v40  ;;  %v1090_v54 = vld [vmem:[#allocation5 + $0x13b0] sm:$0xff]  ;;  %v839_v39 = vld [vmem:[#allocation5 + $0xbd8] sm:$0xff] }
 0x482   :  { %11288 = vmatprep.subr.bf16.mxu1 %v14586_v50  ;;  %v14626_v50 = vcombine.high %v807_v51, %v811_v6  ;;  %v843_v40 = vld [vmem:[#allocation5 + $0xbf8] sm:$0xff] }
 0x484   :  { %10877 = vmatpush1.bf16.msra.mxu0 %v14831_v12  ;;  %v14871_v12 = vcombine.low %v1054_v21, %v1058_v8  ;;  %v1094_v21 = vld [vmem:[#allocation5 + $0x13d0] sm:$0xff] }
 0x485   :  { %10878 = vmatprep.subr.bf16.mxu0 %v14840_v60  ;;  %11289 = vmatpush1.bf16.msra.mxu1 %v14585_v63  ;;  %v14880_v60 = vcombine.high %v1062_v52, %v1066_v59  ;;  %v14625_v63 = vcombine.low %v807_v51, %v811_v6  ;;  %v1098_v8 = vld [vmem:[#allocation5 + $0x13f0] sm:$0xff]  ;;  %v847_v51 = vld [vmem:[#allocation5 + $0xc18] sm:$0xff] }
 0x486   :  { %11290 = vmatprep.subr.bf16.mxu1 %v14594_v10  ;;  %v14634_v10 = vcombine.high %v815_v61, %v819_v2  ;;  %v851_v6 = vld [vmem:[#allocation5 + $0xc38] sm:$0xff] }
 0x488   :  { %10879 = vmatpush1.bf16.msra.mxu0 %v14839_v17  ;;  %v14879_v17 = vcombine.low %v1062_v52, %v1066_v59  ;;  %v1102_v52 = vld [vmem:[#allocation5 + $0x1410] sm:$0xff] }
 0x489   :  { %10880 = vmatprep.subr.bf16.mxu0 %v14848_v44  ;;  %11291 = vmatpush1.bf16.msra.mxu1 %v14593_v43  ;;  %v14888_v44 = vcombine.high %v1070_v3, %v1074_v0  ;;  %v14633_v43 = vcombine.low %v815_v61, %v819_v2  ;;  %v1106_v59 = vld [vmem:[#allocation5 + $0x1430] sm:$0xff]  ;;  %v855_v61 = vld [vmem:[#allocation5 + $0xc58] sm:$0xff] }
 0x48a   :  { %11292 = vmatprep.subr.bf16.mxu1 %v14602_v25  ;;  %v14642_v25 = vcombine.high %v823_v26, %v827_v27  ;;  %v859_v2 = vld [vmem:[#allocation5 + $0xc78] sm:$0xff] }
 0x48c   :  { %10881 = vmatpush1.bf16.msra.mxu0 %v14847_v24  ;;  %v14887_v24 = vcombine.low %v1070_v3, %v1074_v0  ;;  %v1110_v3 = vld [vmem:[#allocation5 + $0x1450] sm:$0xff] }
 0x48d   :  { %10882 = vmatprep.subr.bf16.mxu0 %v14856_v58  ;;  %11293 = vmatpush1.bf16.msra.mxu1 %v14601_v34  ;;  %v14896_v58 = vcombine.high %v1078_v19, %v1082_v20  ;;  %v14641_v34 = vcombine.low %v823_v26, %v827_v27  ;;  %v1114_v0 = vld [vmem:[#allocation5 + $0x1470] sm:$0xff]  ;;  %v863_v26 = vld [vmem:[#allocation5 + $0xc98] sm:$0xff] }
 0x48e   :  { %11294 = vmatprep.subr.bf16.mxu1 %v14610_v37  ;;  %v14650_v37 = vcombine.high %v831_v30, %v835_v31  ;;  %v867_v27 = vld [vmem:[#allocation5 + $0xcb8] sm:$0xff] }
 0x490   :  { %10883 = vmatpush1.bf16.msra.mxu0 %v14855_v35  ;;  %v14895_v35 = vcombine.low %v1078_v19, %v1082_v20  ;;  %v1118_v19 = vld [vmem:[#allocation5 + $0x1490] sm:$0xff] }
 0x491   :  { %10884 = vmatprep.subr.bf16.mxu0 %v14864_v48  ;;  %11295 = vmatpush1.bf16.msra.mxu1 %v14609_v55  ;;  %v14904_v48 = vcombine.high %v1086_v53, %v1090_v54  ;;  %v14649_v55 = vcombine.low %v831_v30, %v835_v31  ;;  %v1122_v20 = vld [vmem:[#allocation5 + $0x14b0] sm:$0xff]  ;;  %v871_v30 = vld [vmem:[#allocation5 + $0xcd8] sm:$0xff] }
 0x492   :  { %11296 = vmatprep.subr.bf16.mxu1 %v14618_v42  ;;  %v14658_v42 = vcombine.high %v839_v39, %v843_v40  ;;  %v875_v31 = vld [vmem:[#allocation5 + $0xcf8] sm:$0xff] }
 0x494   :  { %10885 = vmatpush1.bf16.msra.mxu0 %v14863_v56  ;;  %v14903_v56 = vcombine.low %v1086_v53, %v1090_v54  ;;  %v1126_v53 = vld [vmem:[#allocation5 + $0x14d0] sm:$0xff] }
 0x495   :  { %10886 = vmatprep.subr.bf16.mxu0 %v14872_v46  ;;  %11297 = vmatpush1.bf16.msra.mxu1 %v14617_v49  ;;  %v14912_v46 = vcombine.high %v1094_v21, %v1098_v8  ;;  %v14657_v49 = vcombine.low %v839_v39, %v843_v40  ;;  %v1130_v54 = vld [vmem:[#allocation5 + $0x14f0] sm:$0xff]  ;;  %v883_v39 = vld [vmem:[#allocation5 + $0xd38] sm:$0xff] }
 0x496   :  { %11298 = vmatprep.subr.bf16.mxu1 %v14626_v50  ;;  %v14666_v50 = vcombine.high %v847_v51, %v851_v6  ;;  %v1134_v40 = vld [vmem:[#allocation5 + $0x1510] sm:$0xff] }
 0x498   :  { %10887 = vmatpush1.bf16.msra.mxu0 %v14871_v12  ;;  %v14911_v12 = vcombine.low %v1094_v21, %v1098_v8  ;;  %v1138_v21 = vld [vmem:[#allocation5 + $0x1530] sm:$0xff]  ;;  %v14689_v8 = vcombine.low %v871_v30, %v875_v31 }
 0x499   :  { %10888 = vmatprep.subr.bf16.mxu0 %v14880_v60  ;;  %11299 = vmatpush1.bf16.msra.mxu1 %v14625_v63  ;;  %v14920_v60 = vcombine.high %v1102_v52, %v1106_v59  ;;  %v14665_v63 = vcombine.low %v847_v51, %v851_v6  ;;  %v1142_v51 = vld [vmem:[#allocation5 + $0x1550] sm:$0xff] }
 0x49a   :  { %11300 = vmatprep.subr.bf16.mxu1 %v14634_v10  ;;  %v14674_v10 = vcombine.high %v855_v61, %v859_v2  ;;  %v1146_v6 = vld [vmem:[#allocation5 + $0x1570] sm:$0xff] }
 0x49c   :  { %10889 = vmatpush1.bf16.msra.mxu0 %v14879_v17  ;;  %v14919_v17 = vcombine.low %v1102_v52, %v1106_v59  ;;  %v14951_v59 = vcombine.low %v1134_v40, %v1138_v21 }
 0x49d   :  { %10890 = vmatprep.subr.bf16.mxu0 %v14888_v44  ;;  %11301 = vmatpush1.bf16.msra.mxu1 %v14633_v43  ;;  %v14928_v44 = vcombine.high %v1110_v3, %v1114_v0  ;;  %v14673_v43 = vcombine.low %v855_v61, %v859_v2  ;;  %v1150_v61 = vld [vmem:[#allocation5 + $0x1590] sm:$0xff] }
 0x49e   :  { %11302 = vmatprep.subr.bf16.mxu1 %v14642_v25  ;;  %v14682_v25 = vcombine.high %v863_v26, %v867_v27  ;;  %v1154_v2 = vld [vmem:[#allocation5 + $0x15b0] sm:$0xff] }
 0x4a0   :  { %10891 = vmatpush1.bf16.msra.mxu0 %v14887_v24  ;;  %v14927_v24 = vcombine.low %v1110_v3, %v1114_v0  ;;  %v14959_v0 = vcombine.low %v1142_v51, %v1146_v6 }
 0x4a1   :  { %10892 = vmatprep.subr.bf16.mxu0 %v14896_v58  ;;  %11303 = vmatpush1.bf16.msra.mxu1 %v14641_v34  ;;  %v14936_v58 = vcombine.high %v1118_v19, %v1122_v20  ;;  %v14935_v34 = vcombine.low %v1118_v19, %v1122_v20  ;;  %v1158_v19 = vld [vmem:[#allocation5 + $0x15d0] sm:$0xff] }
 0x4a2   :  { %11304 = vmatprep.subr.bf16.mxu1 %v14650_v37  ;;  %v14944_v37 = vcombine.high %v1126_v53, %v1130_v54  ;;  %v1162_v20 = vld [vmem:[#allocation5 + $0x15f0] sm:$0xff] }
 0x4a4   :  { %10893 = vmatpush1.bf16.msra.mxu0 %v14895_v35  ;;  %v14690_v35 = vcombine.high %v871_v30, %v875_v31  ;;  %v14976_v31 = vcombine.high %v1158_v19, %v1162_v20 }
 0x4a5   :  { %10894 = vmatprep.subr.bf16.mxu0 %v14904_v48  ;;  %11305 = vmatpush1.bf16.msra.mxu1 %v14649_v55  ;;  %v879_v48 = vld [vmem:[#allocation5 + $0xd18] sm:$0xff]  ;;  %v14943_v55 = vcombine.low %v1126_v53, %v1130_v54 }
 0x4a6   :  { %11306 = vmatprep.subr.bf16.mxu1 %v14658_v42  ;;  %v887_v42 = vld [vmem:[#allocation5 + $0xd58] sm:$0xff]  ;;  %v14697_v52 = vcombine.low %v879_v48, %v883_v39 }
 0x4a7   :  { %v911_v53 = vld [vmem:[#allocation5 + $0xe18] sm:$0xff] }
 0x4a8   :  { %10895 = vmatpush1.bf16.msra.mxu0 %v14903_v56  ;;  %v14698_v56 = vcombine.high %v879_v48, %v883_v39  ;;  %v915_v54 = vld [vmem:[#allocation5 + $0xe38] sm:$0xff] }
 0x4a9   :  { %10896 = vmatprep.subr.bf16.mxu0 %v14912_v46  ;;  %11307 = vmatpush1.bf16.msra.mxu1 %v14657_v49  ;;  %v891_v46 = vld [vmem:[#allocation5 + $0xd78] sm:$0xff]  ;;  %v14730_v48 = vcombine.high %v911_v53, %v915_v54 }
 0x4aa   :  { %11317 = vmatprep.subr.bf16.mxu1 %v14666_v50  ;;  %v14706_v49 = vcombine.high %v887_v42, %v891_v46  ;;  %v895_v50 = vld [vmem:[#allocation5 + $0xd98] sm:$0xff]  ;;  %v14705_v3 = vcombine.low %v887_v42, %v891_v46 }
 0x4ac   :  { %10897 = vmatpush1.bf16.msra.mxu0 %v14911_v12  ;;  %11309 = vmatmul.mubr.bf16.vlgmr.msra.gmra.mrb[8].mxu1 %v17414_v5  ;;  %v14681_v5 = vcombine.low %v863_v26, %v867_v27  ;;  %v14960_v12 = vcombine.high %v1142_v51, %v1146_v6  ;;  %v907_v26 = vld [vmem:[#allocation5 + $0xdf8] sm:$0xff] }
 0x4ad   :  { %10907 = vmatprep.subr.bf16.mxu0 %v14920_v60  ;;  %11318 = vmatpush1.bf16.msra.mxu1 %v14665_v63  ;;  %v899_v60 = vld [vmem:[#allocation5 + $0xdb8] sm:$0xff] }
 0x4ae   :  { %11319 = vmatprep.subr.bf16.mxu1 %v14674_v10  ;;  %11349 = vmatprep.mubr.bf16.mxu1 %v17416_v15  ;;  %v14952_v15 = vcombine.high %v1134_v40, %v1138_v21  ;;  %v14714_v63 = vcombine.high %v895_v50, %v899_v60  ;;  %v14968_v10 = vcombine.high %v1150_v61, %v1154_v2  ;;  %v919_v40 = vld [vmem:[#allocation5 + $0xe58] sm:$0xff] }
 0x4af   :  { %10899 = vmatmul.mubr.bf16.vlgmr.msra.gmra.mrb[4].mxu0 %v17450_v16  ;;  %v923_v21 = vld [vmem:[#allocation5 + $0xe78] sm:$0xff] }
 0x4b0   :  { %10908 = vmatpush1.bf16.msra.mxu0 %v14919_v17  ;;  %10939 = vmatprep.mubr.bf16.mxu0 %v17452_v23  ;;  %v14738_v42 = vcombine.high %v919_v40, %v923_v21  ;;  %v927_v51 = vld [vmem:[#allocation5 + $0xe98] sm:$0xff] }
 0x4b1   :  { %10909 = vmatprep.subr.bf16.mxu0 %v14928_v44  ;;  %11320 = vmatpush1.bf16.msra.mxu1 %v14673_v43  ;;  %v903_v44 = vld [vmem:[#allocation5 + $0xdd8] sm:$0xff] }
 0x4b2   :  { %11321 = vmatprep.subr.bf16.mxu1 %v14682_v25  ;;  %v14722_v30 = vcombine.high %v903_v44, %v907_v26  ;;  %v931_v6 = vld [vmem:[#allocation5 + $0xeb8] sm:$0xff] }
 0x4b4   :  { %10910 = vmatpush1.bf16.msra.mxu0 %v14927_v24  ;;  %v14713_v24 = vcombine.low %v895_v50, %v899_v60  ;;  %v14746_v50 = vcombine.high %v927_v51, %v931_v6 }
 0x4b5   :  { %10911 = vmatprep.subr.bf16.mxu0 %v14936_v58  ;;  %11322 = vmatpush1.bf16.msra.mxu1 %v14681_v5  ;;  %v14967_v58 = vcombine.low %v1150_v61, %v1154_v2  ;;  %v1166_v5 = vld [vmem:[#allocation5 + $0x1610] sm:$0xff]  ;;  %v935_v61 = vld [vmem:[#allocation5 + $0xed8] sm:$0xff] }
 0x4b6   :  { %11323 = vmatprep.subr.bf16.mxu1 %v14690_v35  ;;  %v14721_v35 = vcombine.low %v903_v44, %v907_v26  ;;  %v939_v2 = vld [vmem:[#allocation5 + $0xef8] sm:$0xff] }
 0x4b7   :  { %v14754_v44 = vcombine.high %v935_v61, %v939_v2 }
 0x4b8   :  { %10912 = vmatpush1.bf16.msra.mxu0 %v14935_v34  ;;  %v1170_v34 = vld [vmem:[#allocation5 + $0x1630] sm:$0xff] }
 0x4b9   :  { %10913 = vmatprep.subr.bf16.mxu0 %v14944_v37  ;;  %11324 = vmatpush1.bf16.msra.mxu1 %v14689_v8  ;;  %v14975_v37 = vcombine.low %v1158_v19, %v1162_v20  ;;  %v14984_v39 = vcombine.high %v1166_v5, %v1170_v34  ;;  %v1174_v8 = vld [vmem:[#allocation5 + $0x1650] sm:$0xff]  ;;  %v943_v19 = vld [vmem:[#allocation5 + $0xf18] sm:$0xff] }
 0x4ba   :  { %11325 = vmatprep.subr.bf16.mxu1 %v14698_v56  ;;  %v14729_v56 = vcombine.low %v911_v53, %v915_v54  ;;  %v947_v20 = vld [vmem:[#allocation5 + $0xf38] sm:$0xff] }
 0x4bb   :  { %v951_v53 = vld [vmem:[#allocation5 + $0xf58] sm:$0xff] }
 0x4bc   :  { %10914 = vmatpush1.bf16.msra.mxu0 %v14943_v55  ;;  %v1178_v55 = vld [vmem:[#allocation5 + $0x1670] sm:$0xff]  ;;  %v955_v54 = vld [vmem:[#allocation5 + $0xf78] sm:$0xff] }
 0x4bd   :  { %10915 = vmatprep.subr.bf16.mxu0 %v14952_v15  ;;  %11326 = vmatpush1.bf16.msra.mxu1 %v14697_v52  ;;  %v14983_v15 = vcombine.low %v1166_v5, %v1170_v34  ;;  %v14992_v46 = vcombine.high %v1174_v8, %v1178_v55  ;;  %v1182_v52 = vld [vmem:[#allocation5 + $0x1690] sm:$0xff] }
 0x4be   :  { %11327 = vmatprep.subr.bf16.mxu1 %v14706_v49  ;;  %v14737_v49 = vcombine.low %v919_v40, %v923_v21  ;;  %v1206_v5 = vld [vmem:[#allocation5 + $0x1750] sm:$0xff]  ;;  %v959_v40 = vld [vmem:[#allocation5 + $0xf98] sm:$0xff] }
 0x4bf   :  { %v17612_v17 = vpop.f32.mrb[4].mxu1  ;;  %v1210_v34 = vld [vmem:[#allocation5 + $0x1770] sm:$0xff]  ;;  %v963_v21 = vld [vmem:[#allocation5 + $0xfb8] sm:$0xff] }
 0x4c0   :  { %10916 = vmatpush1.bf16.msra.mxu0 %v14951_v59  ;;  %v17614_v27 = vpop.f32.mrb[5].mxu1  ;;  %v1186_v59 = vld [vmem:[#allocation5 + $0x16b0] sm:$0xff] }
 0x4c1   :  { %10917 = vmatprep.subr.bf16.mxu0 %v14960_v12  ;;  %v10699_v43 = vpop.f32.mrb[6].mxu1  ;;  %11328 = vmatpush1.bf16.msra.mxu1 %v14705_v3  ;;  %v14991_v12 = vcombine.low %v1174_v8, %v1178_v55  ;;  %v15000_v60 = vcombine.high %v1182_v52, %v1186_v59  ;;  %v1190_v3 = vld [vmem:[#allocation5 + $0x16d0] sm:$0xff] }
 0x4c2   :  { %v10700_v25 = vpop.f32.mrb[7].mxu1  ;;  %11329 = vmatprep.subr.bf16.mxu1 %v14714_v63  ;;  %v14745_v63 = vcombine.low %v927_v51, %v931_v6  ;;  %v1198_v43 = vld [vmem:[#allocation5 + $0x1710] sm:$0xff]  ;;  %v967_v51 = vld [vmem:[#allocation5 + $0xfd8] sm:$0xff] }
 0x4c3   :  { %v14753_v25 = vcombine.low %v935_v61, %v939_v2  ;;  %v1214_v8 = vld [vmem:[#allocation5 + $0x1790] sm:$0xff]  ;;  %v971_v6 = vld [vmem:[#allocation5 + $0xff8] sm:$0xff] }
 0x4c4   :  { %10918 = vmatpush1.bf16.msra.mxu0 %v14959_v0  ;;  %v1194_v0 = vld [vmem:[#allocation5 + $0x16f0] sm:$0xff]  ;;  %v975_v61 = vld [vmem:[#allocation5 + $0x1018] sm:$0xff] }
 0x4c5   :  { %10919 = vmatprep.subr.bf16.mxu0 %v14968_v10  ;;  %11330 = vmatpush1.bf16.msra.mxu1 %v14713_v24  ;;  %v14999_v10 = vcombine.low %v1182_v52, %v1186_v59  ;;  %v15008_v26 = vcombine.high %v1190_v3, %v1194_v0  ;;  %v1202_v24 = vld [vmem:[#allocation5 + $0x1730] sm:$0xff]  ;;  %v979_v2 = vld [vmem:[#allocation5 + $0x1038] sm:$0xff] }
 0x4c6   :  { %11331 = vmatprep.subr.bf16.mxu1 %v14722_v30  ;;  %v14762_v30 = vcombine.high %v943_v19, %v947_v20  ;;  %v1218_v55 = vld [vmem:[#allocation5 + $0x17b0] sm:$0xff] }
 0x4c7   :  { %v1222_v52 = vld [vmem:[#allocation5 + $0x17d0] sm:$0xff] }
 0x4c8   :  { %10920 = vmatpush1.bf16.msra.mxu0 %v14967_v58  ;;  %v15007_v58 = vcombine.low %v1190_v3, %v1194_v0  ;;  %v1226_v59 = vld [vmem:[#allocation5 + $0x17f0] sm:$0xff] }
 0x4c9   :  { %10921 = vmatprep.subr.bf16.mxu0 %v14976_v31  ;;  %11332 = vmatpush1.bf16.msra.mxu1 %v14721_v35  ;;  %v15016_v31 = vcombine.high %v1198_v43, %v1202_v24  ;;  %v14761_v35 = vcombine.low %v943_v19, %v947_v20  ;;  %v1230_v3 = vld [vmem:[#allocation5 + $0x1810] sm:$0xff]  ;;  %v983_v19 = vld [vmem:[#allocation5 + $0x1058] sm:$0xff] }
 0x4ca   :  { %11333 = vmatprep.subr.bf16.mxu1 %v14730_v48  ;;  %v14770_v48 = vcombine.high %v951_v53, %v955_v54  ;;  %v1234_v0 = vld [vmem:[#allocation5 + $0x1830] sm:$0xff]  ;;  %v987_v20 = vld [vmem:[#allocation5 + $0x1078] sm:$0xff] }
 0x4cc   :  { %10922 = vmatpush1.bf16.msra.mxu0 %v14975_v37  ;;  %v15015_v37 = vcombine.low %v1198_v43, %v1202_v24  ;;  %v1238_v43 = vld [vmem:[#allocation5 + $0x1850] sm:$0xff] }
 0x4cd   :  { %10923 = vmatprep.subr.bf16.mxu0 %v14984_v39  ;;  %11334 = vmatpush1.bf16.msra.mxu1 %v14729_v56  ;;  %v15024_v39 = vcombine.high %v1206_v5, %v1210_v34  ;;  %v14769_v56 = vcombine.low %v951_v53, %v955_v54  ;;  %v1242_v24 = vld [vmem:[#allocation5 + $0x1870] sm:$0xff]  ;;  %v991_v53 = vld [vmem:[#allocation5 + $0x1098] sm:$0xff] }
 0x4ce   :  { %11335 = vmatprep.subr.bf16.mxu1 %v14738_v42  ;;  %v14778_v42 = vcombine.high %v959_v40, %v963_v21  ;;  %v995_v54 = vld [vmem:[#allocation5 + $0x10b8] sm:$0xff] }
 0x4d0   :  { %10924 = vmatpush1.bf16.msra.mxu0 %v14983_v15  ;;  %v15023_v15 = vcombine.low %v1206_v5, %v1210_v34  ;;  %v1246_v5 = vld [vmem:[#allocation5 + $0x1890] sm:$0xff] }
 0x4d1   :  { %10925 = vmatprep.subr.bf16.mxu0 %v14992_v46  ;;  %11336 = vmatpush1.bf16.msra.mxu1 %v14737_v49  ;;  %v15032_v46 = vcombine.high %v1214_v8, %v1218_v55  ;;  %v14777_v49 = vcombine.low %v959_v40, %v963_v21  ;;  %v1250_v34 = vld [vmem:[#allocation5 + $0x18b0] sm:$0xff]  ;;  %v999_v40 = vld [vmem:[#allocation5 + $0x10d8] sm:$0xff] }
 0x4d2   :  { %11337 = vmatprep.subr.bf16.mxu1 %v14746_v50  ;;  %v14786_v50 = vcombine.high %v967_v51, %v971_v6  ;;  %v1003_v21 = vld [vmem:[#allocation5 + $0x10f8] sm:$0xff] }
 0x4d4   :  { %10926 = vmatpush1.bf16.msra.mxu0 %v14991_v12  ;;  %v15031_v12 = vcombine.low %v1214_v8, %v1218_v55  ;;  %v1254_v8 = vld [vmem:[#allocation5 + $0x18d0] sm:$0xff] }
 0x4d5   :  { %10927 = vmatprep.subr.bf16.mxu0 %v15000_v60  ;;  %11338 = vmatpush1.bf16.msra.mxu1 %v14745_v63  ;;  %v15040_v60 = vcombine.high %v1222_v52, %v1226_v59  ;;  %v14785_v63 = vcombine.low %v967_v51, %v971_v6  ;;  %v1258_v55 = vld [vmem:[#allocation5 + $0x18f0] sm:$0xff]  ;;  %v1011_v51 = vld [vmem:[#allocation5 + $0x1138] sm:$0xff] }
 0x4d6   :  { %11339 = vmatprep.subr.bf16.mxu1 %v14754_v44  ;;  %v14794_v44 = vcombine.high %v975_v61, %v979_v2  ;;  %v1262_v6 = vld [vmem:[#allocation5 + $0x1910] sm:$0xff] }
 0x4d8   :  { %10928 = vmatpush1.bf16.msra.mxu0 %v14999_v10  ;;  %v15039_v10 = vcombine.low %v1222_v52, %v1226_v59  ;;  %v1266_v52 = vld [vmem:[#allocation5 + $0x1930] sm:$0xff]  ;;  %v14817_v59 = vcombine.low %v999_v40, %v1003_v21 }
 0x4d9   :  { %10929 = vmatprep.subr.bf16.mxu0 %v15008_v26  ;;  %11340 = vmatpush1.bf16.msra.mxu1 %v14753_v25  ;;  %v15048_v26 = vcombine.high %v1230_v3, %v1234_v0  ;;  %v14793_v25 = vcombine.low %v975_v61, %v979_v2  ;;  %v1270_v61 = vld [vmem:[#allocation5 + $0x1950] sm:$0xff] }
 0x4da   :  { %11341 = vmatprep.subr.bf16.mxu1 %v14762_v30  ;;  %v14802_v30 = vcombine.high %v983_v19, %v987_v20  ;;  %v1274_v2 = vld [vmem:[#allocation5 + $0x1970] sm:$0xff] }
 0x4dc   :  { %10930 = vmatpush1.bf16.msra.mxu0 %v15007_v58  ;;  %v15047_v58 = vcombine.low %v1230_v3, %v1234_v0  ;;  %v15079_v0 = vcombine.low %v1262_v6, %v1266_v52 }
 0x4dd   :  { %10931 = vmatprep.subr.bf16.mxu0 %v15016_v31  ;;  %11342 = vmatpush1.bf16.msra.mxu1 %v14761_v35  ;;  %v15056_v31 = vcombine.high %v1238_v43, %v1242_v24  ;;  %v14801_v35 = vcombine.low %v983_v19, %v987_v20  ;;  %v1278_v19 = vld [vmem:[#allocation5 + $0x1990] sm:$0xff] }
 0x4de   :  { %11343 = vmatprep.subr.bf16.mxu1 %v14770_v48  ;;  %v14810_v48 = vcombine.high %v991_v53, %v995_v54  ;;  %v1282_v20 = vld [vmem:[#allocation5 + $0x19b0] sm:$0xff] }
 0x4e0   :  { %10932 = vmatpush1.bf16.msra.mxu0 %v15015_v37  ;;  %v15055_v37 = vcombine.low %v1238_v43, %v1242_v24  ;;  %v15087_v24 = vcombine.low %v1270_v61, %v1274_v2 }
 0x4e1   :  { %10933 = vmatprep.subr.bf16.mxu0 %v15024_v39  ;;  %11344 = vmatpush1.bf16.msra.mxu1 %v14769_v56  ;;  %v15064_v39 = vcombine.high %v1246_v5, %v1250_v34  ;;  %v15063_v56 = vcombine.low %v1246_v5, %v1250_v34  ;;  %v15095_v34 = vcombine.low %v1278_v19, %v1282_v20 }
 0x4e2   :  { %11345 = vmatprep.subr.bf16.mxu1 %v14778_v42  ;;  %v15072_v42 = vcombine.high %v1254_v8, %v1258_v55 }
 0x4e4   :  { %10934 = vmatpush1.bf16.msra.mxu0 %v15023_v15  ;;  %v14818_v15 = vcombine.high %v999_v40, %v1003_v21  ;;  %v1294_v40 = vld [vmem:[#allocation5 + $0x1a10] sm:$0xff] }
 0x4e5   :  { %10935 = vmatprep.subr.bf16.mxu0 %v15032_v46  ;;  %11346 = vmatpush1.bf16.msra.mxu1 %v14777_v49  ;;  %v1007_v46 = vld [vmem:[#allocation5 + $0x1118] sm:$0xff]  ;;  %v15071_v49 = vcombine.low %v1254_v8, %v1258_v55  ;;  %v1298_v21 = vld [vmem:[#allocation5 + $0x1a30] sm:$0xff] }
 0x4e6   :  { %11347 = vmatprep.subr.bf16.mxu1 %v14786_v50  ;;  %v1015_v50 = vld [vmem:[#allocation5 + $0x1158] sm:$0xff]  ;;  %v14825_v3 = vcombine.low %v1007_v46, %v1011_v51 }
 0x4e8   :  { %10936 = vmatpush1.bf16.msra.mxu0 %v15031_v12  ;;  %v14826_v12 = vcombine.high %v1007_v46, %v1011_v51  ;;  %v1302_v46 = vld [vmem:[#allocation5 + $0x1a50] sm:$0xff] }
 0x4e9   :  { %10937 = vmatprep.subr.bf16.mxu0 %v15040_v60  ;;  %11348 = vmatpush1.bf16.msra.mxu1 %v14785_v63  ;;  %v1019_v60 = vld [vmem:[#allocation5 + $0x1178] sm:$0xff]  ;;  %v1306_v51 = vld [vmem:[#allocation5 + $0x1a70] sm:$0xff] }
 0x4ea   :  { %11358 = vmatprep.subr.bf16.mxu1 %v14794_v44  ;;  %v14834_v63 = vcombine.high %v1015_v50, %v1019_v60  ;;  %v1023_v44 = vld [vmem:[#allocation5 + $0x1198] sm:$0xff]  ;;  %v14833_v43 = vcombine.low %v1015_v50, %v1019_v60  ;;  %v1310_v50 = vld [vmem:[#allocation5 + $0x1a90] sm:$0xff] }
 0x4eb   :  { %v1314_v60 = vld [vmem:[#allocation5 + $0x1ab0] sm:$0xff] }
 0x4ec   :  { %10938 = vmatpush1.bf16.msra.mxu0 %v15039_v10  ;;  %11350 = vmatmul.mubr.bf16.vlgmr.msra.gmra.mrb[8].mxu1 %v17432_v7  ;;  %v14809_v7 = vcombine.low %v991_v53, %v995_v54  ;;  %v15088_v10 = vcombine.high %v1270_v61, %v1274_v2  ;;  %v1286_v53 = vld [vmem:[#allocation5 + $0x19d0] sm:$0xff]  ;;  %v15119_v2 = vcombine.low %v1302_v46, %v1306_v51 }
 0x4ed   :  { %10948 = vmatprep.subr.bf16.mxu0 %v15048_v26  ;;  %11359 = vmatpush1.bf16.msra.mxu1 %v14793_v25  ;;  %v1027_v26 = vld [vmem:[#allocation5 + $0x11b8] sm:$0xff]  ;;  %v1290_v54 = vld [vmem:[#allocation5 + $0x19f0] sm:$0xff] }
 0x4ee   :  { %11360 = vmatprep.subr.bf16.mxu1 %v14802_v30  ;;  %11390 = vmatprep.mubr.bf16.mxu1 %v17434_v45  ;;  %v15080_v45 = vcombine.high %v1262_v6, %v1266_v52  ;;  %v14842_v25 = vcombine.high %v1023_v44, %v1027_v26  ;;  %v1031_v30 = vld [vmem:[#allocation5 + $0x11d8] sm:$0xff]  ;;  %v14841_v5 = vcombine.low %v1023_v44, %v1027_v26  ;;  %v1318_v44 = vld [vmem:[#allocation5 + $0x1ad0] sm:$0xff] }
 0x4ef   :  { %10940 = vmatmul.mubr.bf16.vlgmr.msra.gmra.mrb[4].mxu0 %v17472_v28  ;;  %v15103_v55 = vcombine.low %v1286_v53, %v1290_v54  ;;  %v15111_v52 = vcombine.low %v1294_v40, %v1298_v21  ;;  %v1322_v26 = vld [vmem:[#allocation5 + $0x1af0] sm:$0xff] }
 0x4f0   :  { %10949 = vmatpush1.bf16.msra.mxu0 %v15047_v58  ;;  %10980 = vmatprep.mubr.bf16.mxu0 %v17474_v14  ;;  %v15096_v58 = vcombine.high %v1278_v19, %v1282_v20  ;;  %v15127_v20 = vcombine.low %v1310_v50, %v1314_v60 }
 0x4f1   :  { %10950 = vmatprep.subr.bf16.mxu0 %v15056_v31  ;;  %11361 = vmatpush1.bf16.msra.mxu1 %v14801_v35  ;;  %v1035_v31 = vld [vmem:[#allocation5 + $0x11f8] sm:$0xff] }
 0x4f2   :  { %11362 = vmatprep.subr.bf16.mxu1 %v14810_v48  ;;  %v14850_v35 = vcombine.high %v1031_v30, %v1035_v31  ;;  %v1039_v48 = vld [vmem:[#allocation5 + $0x1218] sm:$0xff]  ;;  %v14849_v8 = vcombine.low %v1031_v30, %v1035_v31  ;;  %v1326_v30 = vld [vmem:[#allocation5 + $0x1b10] sm:$0xff] }
 0x4f3   :  { %v1330_v31 = vld [vmem:[#allocation5 + $0x1b30] sm:$0xff] }
 0x4f4   :  { %10951 = vmatpush1.bf16.msra.mxu0 %v15055_v37  ;;  %v15104_v37 = vcombine.high %v1286_v53, %v1290_v54  ;;  %v15135_v54 = vcombine.low %v1318_v44, %v1322_v26 }
 0x4f5   :  { %10952 = vmatprep.subr.bf16.mxu0 %v15064_v39  ;;  %11363 = vmatpush1.bf16.msra.mxu1 %v14809_v7  ;;  %v1043_v39 = vld [vmem:[#allocation5 + $0x1238] sm:$0xff] }
 0x4f6   :  { %11364 = vmatprep.subr.bf16.mxu1 %v14818_v15  ;;  %v14858_v7 = vcombine.high %v1039_v48, %v1043_v39  ;;  %v1047_v15 = vld [vmem:[#allocation5 + $0x1258] sm:$0xff]  ;;  %v14857_v6 = vcombine.low %v1039_v48, %v1043_v39  ;;  %v1334_v48 = vld [vmem:[#allocation5 + $0x1b50] sm:$0xff] }
 0x4f7   :  { %v1338_v39 = vld [vmem:[#allocation5 + $0x1b70] sm:$0xff] }
 0x4f8   :  { %10953 = vmatpush1.bf16.msra.mxu0 %v15063_v56  ;;  %v15112_v56 = vcombine.high %v1294_v40, %v1298_v21  ;;  %v15143_v21 = vcombine.low %v1326_v30, %v1330_v31 }
 0x4f9   :  { %10954 = vmatprep.subr.bf16.mxu0 %v15072_v42  ;;  %11365 = vmatpush1.bf16.msra.mxu1 %v14817_v59  ;;  %v1051_v42 = vld [vmem:[#allocation5 + $0x1278] sm:$0xff] }
 0x4fa   :  { %11366 = vmatprep.subr.bf16.mxu1 %v14826_v12  ;;  %v14866_v59 = vcombine.high %v1047_v15, %v1051_v42  ;;  %v1055_v12 = vld [vmem:[#allocation5 + $0x1298] sm:$0xff]  ;;  %v14865_v61 = vcombine.low %v1047_v15, %v1051_v42  ;;  %v1342_v15 = vld [vmem:[#allocation5 + $0x1b90] sm:$0xff] }
 0x4fb   :  { %v1346_v42 = vld [vmem:[#allocation5 + $0x1bb0] sm:$0xff] }
 0x4fc   :  { %10955 = vmatpush1.bf16.msra.mxu0 %v15071_v49  ;;  %v15120_v49 = vcombine.high %v1302_v46, %v1306_v51  ;;  %v15151_v51 = vcombine.low %v1334_v48, %v1338_v39 }
 0x4fd   :  { %10956 = vmatprep.subr.bf16.mxu0 %v15080_v45  ;;  %11367 = vmatpush1.bf16.msra.mxu1 %v14825_v3  ;;  %v1059_v45 = vld [vmem:[#allocation5 + $0x12b8] sm:$0xff] }
 0x4fe   :  { %11368 = vmatprep.subr.bf16.mxu1 %v14834_v63  ;;  %v14874_v3 = vcombine.high %v1055_v12, %v1059_v45  ;;  %v1063_v63 = vld [vmem:[#allocation5 + $0x12d8] sm:$0xff]  ;;  %v14873_v19 = vcombine.low %v1055_v12, %v1059_v45  ;;  %v1350_v12 = vld [vmem:[#allocation5 + $0x1bd0] sm:$0xff] }
 0x4ff   :  { %v1354_v45 = vld [vmem:[#allocation5 + $0x1bf0] sm:$0xff] }
 0x500   :  { %10957 = vmatpush1.bf16.msra.mxu0 %v15079_v0  ;;  %v15128_v0 = vcombine.high %v1310_v50, %v1314_v60  ;;  %v15159_v60 = vcombine.low %v1342_v15, %v1346_v42 }
 0x501   :  { %10958 = vmatprep.subr.bf16.mxu0 %v15088_v10  ;;  %11369 = vmatpush1.bf16.msra.mxu1 %v14833_v43  ;;  %v1067_v10 = vld [vmem:[#allocation5 + $0x12f8] sm:$0xff] }
 0x502   :  { %11370 = vmatprep.subr.bf16.mxu1 %v14842_v25  ;;  %v14882_v43 = vcombine.high %v1063_v63, %v1067_v10  ;;  %v1071_v25 = vld [vmem:[#allocation5 + $0x1318] sm:$0xff]  ;;  %v14881_v53 = vcombine.low %v1063_v63, %v1067_v10  ;;  %v1358_v63 = vld [vmem:[#allocation5 + $0x1c10] sm:$0xff] }
 0x503   :  { %v1362_v10 = vld [vmem:[#allocation5 + $0x1c30] sm:$0xff] }
 0x504   :  { %10959 = vmatpush1.bf16.msra.mxu0 %v15087_v24  ;;  %v15136_v24 = vcombine.high %v1318_v44, %v1322_v26  ;;  %v15167_v26 = vcombine.low %v1350_v12, %v1354_v45 }
 0x505   :  { %10960 = vmatprep.subr.bf16.mxu0 %v15096_v58  ;;  %11371 = vmatpush1.bf16.msra.mxu1 %v14841_v5  ;;  %v1075_v58 = vld [vmem:[#allocation5 + $0x1338] sm:$0xff] }
 0x506   :  { %11372 = vmatprep.subr.bf16.mxu1 %v14850_v35  ;;  %v14890_v5 = vcombine.high %v1071_v25, %v1075_v58  ;;  %v1079_v35 = vld [vmem:[#allocation5 + $0x1358] sm:$0xff]  ;;  %v14889_v40 = vcombine.low %v1071_v25, %v1075_v58  ;;  %v1366_v25 = vld [vmem:[#allocation5 + $0x1c50] sm:$0xff] }
 0x507   :  { %v1370_v58 = vld [vmem:[#allocation5 + $0x1c70] sm:$0xff] }
 0x508   :  { %10961 = vmatpush1.bf16.msra.mxu0 %v15095_v34  ;;  %v15144_v34 = vcombine.high %v1326_v30, %v1330_v31  ;;  %v15175_v31 = vcombine.low %v1358_v63, %v1362_v10 }
 0x509   :  { %10962 = vmatprep.subr.bf16.mxu0 %v15104_v37  ;;  %11373 = vmatpush1.bf16.msra.mxu1 %v14849_v8  ;;  %v1083_v37 = vld [vmem:[#allocation5 + $0x1378] sm:$0xff] }
 0x50a   :  { %11374 = vmatprep.subr.bf16.mxu1 %v14858_v7  ;;  %v14898_v8 = vcombine.high %v1079_v35, %v1083_v37  ;;  %v1087_v7 = vld [vmem:[#allocation5 + $0x1398] sm:$0xff]  ;;  %v14897_v46 = vcombine.low %v1079_v35, %v1083_v37  ;;  %v1374_v35 = vld [vmem:[#allocation5 + $0x1c90] sm:$0xff] }
 0x50b   :  { %v1378_v37 = vld [vmem:[#allocation5 + $0x1cb0] sm:$0xff] }
 0x50c   :  { %10963 = vmatpush1.bf16.msra.mxu0 %v15103_v55  ;;  %v15152_v55 = vcombine.high %v1334_v48, %v1338_v39  ;;  %v15183_v39 = vcombine.low %v1366_v25, %v1370_v58 }
 0x50d   :  { %10964 = vmatprep.subr.bf16.mxu0 %v15112_v56  ;;  %11375 = vmatpush1.bf16.msra.mxu1 %v14857_v6  ;;  %v1091_v56 = vld [vmem:[#allocation5 + $0x13b8] sm:$0xff] }
 0x50e   :  { %11376 = vmatprep.subr.bf16.mxu1 %v14866_v59  ;;  %v14906_v6 = vcombine.high %v1087_v7, %v1091_v56  ;;  %v1095_v59 = vld [vmem:[#allocation5 + $0x13d8] sm:$0xff]  ;;  %v14905_v50 = vcombine.low %v1087_v7, %v1091_v56  ;;  %v1382_v7 = vld [vmem:[#allocation5 + $0x1cd0] sm:$0xff] }
 0x50f   :  { %v1386_v56 = vld [vmem:[#allocation5 + $0x1cf0] sm:$0xff] }
 0x510   :  { %10965 = vmatpush1.bf16.msra.mxu0 %v15111_v52  ;;  %v15160_v52 = vcombine.high %v1342_v15, %v1346_v42  ;;  %v15191_v15 = vcombine.low %v1374_v35, %v1378_v37 }
 0x511   :  { %10966 = vmatprep.subr.bf16.mxu0 %v15120_v49  ;;  %11377 = vmatpush1.bf16.msra.mxu1 %v14865_v61  ;;  %v1099_v49 = vld [vmem:[#allocation5 + $0x13f8] sm:$0xff] }
 0x512   :  { %11378 = vmatprep.subr.bf16.mxu1 %v14874_v3  ;;  %v14914_v61 = vcombine.high %v1095_v59, %v1099_v49  ;;  %v1103_v3 = vld [vmem:[#allocation5 + $0x1418] sm:$0xff]  ;;  %v14913_v44 = vcombine.low %v1095_v59, %v1099_v49  ;;  %v1394_v59 = vld [vmem:[#allocation5 + $0x1d30] sm:$0xff] }
 0x514   :  { %10967 = vmatpush1.bf16.msra.mxu0 %v15119_v2  ;;  %v15168_v2 = vcombine.high %v1350_v12, %v1354_v45  ;;  %v15199_v12 = vcombine.low %v1382_v7, %v1386_v56 }
 0x515   :  { %10968 = vmatprep.subr.bf16.mxu0 %v15128_v0  ;;  %11379 = vmatpush1.bf16.msra.mxu1 %v14873_v19  ;;  %v1107_v0 = vld [vmem:[#allocation5 + $0x1438] sm:$0xff] }
 0x516   :  { %11380 = vmatprep.subr.bf16.mxu1 %v14882_v43  ;;  %v14922_v19 = vcombine.high %v1103_v3, %v1107_v0  ;;  %v1111_v43 = vld [vmem:[#allocation5 + $0x1458] sm:$0xff]  ;;  %v14921_v30 = vcombine.low %v1103_v3, %v1107_v0 }
 0x518   :  { %10969 = vmatpush1.bf16.msra.mxu0 %v15127_v20  ;;  %v15176_v20 = vcombine.high %v1358_v63, %v1362_v10 }
 0x519   :  { %10970 = vmatprep.subr.bf16.mxu0 %v15136_v24  ;;  %11381 = vmatpush1.bf16.msra.mxu1 %v14881_v53  ;;  %v1115_v24 = vld [vmem:[#allocation5 + $0x1478] sm:$0xff] }
 0x51a   :  { %11382 = vmatprep.subr.bf16.mxu1 %v14890_v5  ;;  %v14930_v53 = vcombine.high %v1111_v43, %v1115_v24  ;;  %v1119_v5 = vld [vmem:[#allocation5 + $0x1498] sm:$0xff]  ;;  %v14929_v48 = vcombine.low %v1111_v43, %v1115_v24 }
 0x51c   :  { %10971 = vmatpush1.bf16.msra.mxu0 %v15135_v54  ;;  %v15184_v54 = vcombine.high %v1366_v25, %v1370_v58 }
 0x51d   :  { %10972 = vmatprep.subr.bf16.mxu0 %v15144_v34  ;;  %11383 = vmatpush1.bf16.msra.mxu1 %v14889_v40  ;;  %v1123_v34 = vld [vmem:[#allocation5 + $0x14b8] sm:$0xff] }
 0x51e   :  { %11384 = vmatprep.subr.bf16.mxu1 %v14898_v8  ;;  %v14938_v40 = vcombine.high %v1119_v5, %v1123_v34  ;;  %v1127_v8 = vld [vmem:[#allocation5 + $0x14d8] sm:$0xff] }
 0x520   :  { %10973 = vmatpush1.bf16.msra.mxu0 %v15143_v21  ;;  %v15192_v21 = vcombine.high %v1374_v35, %v1378_v37 }
 0x521   :  { %10974 = vmatprep.subr.bf16.mxu0 %v15152_v55  ;;  %11385 = vmatpush1.bf16.msra.mxu1 %v14897_v46  ;;  %v1131_v55 = vld [vmem:[#allocation5 + $0x14f8] sm:$0xff]  ;;  %v15200_v46 = vcombine.high %v1382_v7, %v1386_v56 }
 0x522   :  { %11386 = vmatprep.subr.bf16.mxu1 %v14906_v6  ;;  %v14946_v42 = vcombine.high %v1127_v8, %v1131_v55  ;;  %v1139_v6 = vld [vmem:[#allocation5 + $0x1538] sm:$0xff]  ;;  %v14945_v49 = vcombine.low %v1127_v8, %v1131_v55 }
 0x524   :  { %10975 = vmatpush1.bf16.msra.mxu0 %v15151_v51  ;;  %v1135_v51 = vld [vmem:[#allocation5 + $0x1518] sm:$0xff] }
 0x525   :  { %10976 = vmatprep.subr.bf16.mxu0 %v15160_v52  ;;  %11387 = vmatpush1.bf16.msra.mxu1 %v14905_v50  ;;  %v1390_v52 = vld [vmem:[#allocation5 + $0x1d10] sm:$0xff]  ;;  %v14954_v45 = vcombine.high %v1135_v51, %v1139_v6  ;;  %v1143_v50 = vld [vmem:[#allocation5 + $0x1558] sm:$0xff]  ;;  %v14953_v3 = vcombine.low %v1135_v51, %v1139_v6 }
 0x526   :  { %11388 = vmatprep.subr.bf16.mxu1 %v14914_v61  ;;  %v1398_v61 = vld [vmem:[#allocation5 + $0x1d50] sm:$0xff]  ;;  %v15207_v0 = vcombine.low %v1390_v52, %v1394_v59 }
 0x528   :  { %10977 = vmatpush1.bf16.msra.mxu0 %v15159_v60  ;;  %v1147_v60 = vld [vmem:[#allocation5 + $0x1578] sm:$0xff] }
 0x529   :  { %10978 = vmatprep.subr.bf16.mxu0 %v15168_v2  ;;  %11389 = vmatpush1.bf16.msra.mxu1 %v14913_v44  ;;  %v1402_v2 = vld [vmem:[#allocation5 + $0x1d70] sm:$0xff]  ;;  %v14962_v63 = vcombine.high %v1143_v50, %v1147_v60  ;;  %v1151_v44 = vld [vmem:[#allocation5 + $0x1598] sm:$0xff]  ;;  %v14961_v43 = vcombine.low %v1143_v50, %v1147_v60 }
 0x52a   :  { %11399 = vmatprep.subr.bf16.mxu1 %v14922_v19  ;;  %v15216_v10 = vcombine.high %v1398_v61, %v1402_v2  ;;  %v1406_v19 = vld [vmem:[#allocation5 + $0x1d90] sm:$0xff]  ;;  %v15215_v24 = vcombine.low %v1398_v61, %v1402_v2 }
 0x52c   :  { %10979 = vmatpush1.bf16.msra.mxu0 %v15167_v26  ;;  %11391 = vmatmul.mubr.bf16.vlgmr.msra.gmra.mrb[8].mxu1 %v17450_v16  ;;  %v14937_v16 = vcombine.low %v1119_v5, %v1123_v34  ;;  %v1155_v26 = vld [vmem:[#allocation5 + $0x15b8] sm:$0xff] }
 0x52d   :  { %10989 = vmatprep.subr.bf16.mxu0 %v15176_v20  ;;  %11400 = vmatpush1.bf16.msra.mxu1 %v14921_v30  ;;  %v1410_v20 = vld [vmem:[#allocation5 + $0x1db0] sm:$0xff]  ;;  %v14970_v25 = vcombine.high %v1151_v44, %v1155_v26  ;;  %v1159_v30 = vld [vmem:[#allocation5 + $0x15d8] sm:$0xff]  ;;  %v14969_v5 = vcombine.low %v1151_v44, %v1155_v26 }
 0x52e   :  { %11401 = vmatprep.subr.bf16.mxu1 %v14930_v53  ;;  %11431 = vmatprep.mubr.bf16.mxu1 %v17452_v23  ;;  %v15208_v23 = vcombine.high %v1390_v52, %v1394_v59  ;;  %v15224_v58 = vcombine.high %v1406_v19, %v1410_v20  ;;  %v1414_v53 = vld [vmem:[#allocation5 + $0x1dd0] sm:$0xff]  ;;  %v15223_v34 = vcombine.low %v1406_v19, %v1410_v20 }
 0x52f   :  { %10981 = vmatmul.mubr.bf16.vlgmr.msra.gmra.mrb[4].mxu0 %v17490_v4 }
 0x530   :  { %10990 = vmatpush1.bf16.msra.mxu0 %v15175_v31  ;;  %11021 = vmatprep.mubr.bf16.mxu0 %v17492_v11  ;;  %v1163_v31 = vld [vmem:[#allocation5 + $0x15f8] sm:$0xff] }
 0x531   :  { %10991 = vmatprep.subr.bf16.mxu0 %v15184_v54  ;;  %11402 = vmatpush1.bf16.msra.mxu1 %v14929_v48  ;;  %v1418_v54 = vld [vmem:[#allocation5 + $0x1df0] sm:$0xff]  ;;  %v14978_v35 = vcombine.high %v1159_v30, %v1163_v31  ;;  %v1167_v48 = vld [vmem:[#allocation5 + $0x1618] sm:$0xff]  ;;  %v14977_v8 = vcombine.low %v1159_v30, %v1163_v31 }
 0x532   :  { %11403 = vmatprep.subr.bf16.mxu1 %v14938_v40  ;;  %v15232_v37 = vcombine.high %v1414_v53, %v1418_v54  ;;  %v1422_v40 = vld [vmem:[#allocation5 + $0x1e10] sm:$0xff]  ;;  %v15231_v55 = vcombine.low %v1414_v53, %v1418_v54 }
 0x534   :  { %10992 = vmatpush1.bf16.msra.mxu0 %v15183_v39  ;;  %v1171_v39 = vld [vmem:[#allocation5 + $0x1638] sm:$0xff] }
 0x535   :  { %10993 = vmatprep.subr.bf16.mxu0 %v15192_v21  ;;  %11404 = vmatpush1.bf16.msra.mxu1 %v14937_v16  ;;  %v1426_v21 = vld [vmem:[#allocation5 + $0x1e30] sm:$0xff]  ;;  %v14986_v7 = vcombine.high %v1167_v48, %v1171_v39  ;;  %v1175_v16 = vld [vmem:[#allocation5 + $0x1658] sm:$0xff]  ;;  %v14985_v51 = vcombine.low %v1167_v48, %v1171_v39 }
 0x536   :  { %11405 = vmatprep.subr.bf16.mxu1 %v14946_v42  ;;  %v15240_v56 = vcombine.high %v1422_v40, %v1426_v21  ;;  %v1430_v42 = vld [vmem:[#allocation5 + $0x1e50] sm:$0xff]  ;;  %v15239_v6 = vcombine.low %v1422_v40, %v1426_v21 }
 0x538   :  { %10994 = vmatpush1.bf16.msra.mxu0 %v15191_v15  ;;  %v1179_v15 = vld [vmem:[#allocation5 + $0x1678] sm:$0xff] }
 0x539   :  { %10995 = vmatprep.subr.bf16.mxu0 %v15200_v46  ;;  %11406 = vmatpush1.bf16.msra.mxu1 %v14945_v49  ;;  %v1434_v46 = vld [vmem:[#allocation5 + $0x1e70] sm:$0xff]  ;;  %v14994_v52 = vcombine.high %v1175_v16, %v1179_v15  ;;  %v1183_v49 = vld [vmem:[#allocation5 + $0x1698] sm:$0xff]  ;;  %v14993_v50 = vcombine.low %v1175_v16, %v1179_v15 }
 0x53a   :  { %11407 = vmatprep.subr.bf16.mxu1 %v14954_v45  ;;  %v15248_v59 = vcombine.high %v1430_v42, %v1434_v46  ;;  %v1438_v45 = vld [vmem:[#allocation5 + $0x1e90] sm:$0xff]  ;;  %v15247_v60 = vcombine.low %v1430_v42, %v1434_v46 }
 0x53c   :  { %10996 = vmatpush1.bf16.msra.mxu0 %v15199_v12  ;;  %v1187_v12 = vld [vmem:[#allocation5 + $0x16b8] sm:$0xff] }
 0x53d   :  { %10997 = vmatprep.subr.bf16.mxu0 %v15208_v23  ;;  %11408 = vmatpush1.bf16.msra.mxu1 %v14953_v3  ;;  %v1442_v23 = vld [vmem:[#allocation5 + $0x1eb0] sm:$0xff]  ;;  %v15002_v61 = vcombine.high %v1183_v49, %v1187_v12  ;;  %v1191_v3 = vld [vmem:[#allocation5 + $0x16d8] sm:$0xff]  ;;  %v15001_v44 = vcombine.low %v1183_v49, %v1187_v12 }
 0x53e   :  { %11409 = vmatprep.subr.bf16.mxu1 %v14962_v63  ;;  %v15256_v2 = vcombine.high %v1438_v45, %v1442_v23  ;;  %v1446_v63 = vld [vmem:[#allocation5 + $0x1ed0] sm:$0xff]  ;;  %v15255_v26 = vcombine.low %v1438_v45, %v1442_v23 }
 0x540   :  { %10998 = vmatpush1.bf16.msra.mxu0 %v15207_v0  ;;  %v1195_v0 = vld [vmem:[#allocation5 + $0x16f8] sm:$0xff] }
 0x541   :  { %10999 = vmatprep.subr.bf16.mxu0 %v15216_v10  ;;  %11410 = vmatpush1.bf16.msra.mxu1 %v14961_v43  ;;  %v1450_v10 = vld [vmem:[#allocation5 + $0x1ef0] sm:$0xff]  ;;  %v15010_v19 = vcombine.high %v1191_v3, %v1195_v0  ;;  %v1199_v43 = vld [vmem:[#allocation5 + $0x1718] sm:$0xff]  ;;  %v15009_v30 = vcombine.low %v1191_v3, %v1195_v0 }
 0x542   :  { %11411 = vmatprep.subr.bf16.mxu1 %v14970_v25  ;;  %v15264_v20 = vcombine.high %v1446_v63, %v1450_v10  ;;  %v1454_v25 = vld [vmem:[#allocation5 + $0x1f10] sm:$0xff]  ;;  %v15263_v31 = vcombine.low %v1446_v63, %v1450_v10 }
 0x544   :  { %11000 = vmatpush1.bf16.msra.mxu0 %v15215_v24  ;;  %v1203_v24 = vld [vmem:[#allocation5 + $0x1738] sm:$0xff] }
 0x545   :  { %11001 = vmatprep.subr.bf16.mxu0 %v15224_v58  ;;  %11412 = vmatpush1.bf16.msra.mxu1 %v14969_v5  ;;  %v1458_v58 = vld [vmem:[#allocation5 + $0x1f30] sm:$0xff]  ;;  %v15018_v53 = vcombine.high %v1199_v43, %v1203_v24  ;;  %v1207_v5 = vld [vmem:[#allocation5 + $0x1758] sm:$0xff]  ;;  %v15017_v48 = vcombine.low %v1199_v43, %v1203_v24 }
 0x546   :  { %11413 = vmatprep.subr.bf16.mxu1 %v14978_v35  ;;  %v15272_v54 = vcombine.high %v1454_v25, %v1458_v58  ;;  %v1462_v35 = vld [vmem:[#allocation5 + $0x1f50] sm:$0xff]  ;;  %v15271_v39 = vcombine.low %v1454_v25, %v1458_v58 }
 0x548   :  { %11002 = vmatpush1.bf16.msra.mxu0 %v15223_v34  ;;  %v1211_v34 = vld [vmem:[#allocation5 + $0x1778] sm:$0xff] }
 0x549   :  { %11003 = vmatprep.subr.bf16.mxu0 %v15232_v37  ;;  %11414 = vmatpush1.bf16.msra.mxu1 %v14977_v8  ;;  %v1466_v37 = vld [vmem:[#allocation5 + $0x1f70] sm:$0xff]  ;;  %v15026_v40 = vcombine.high %v1207_v5, %v1211_v34  ;;  %v1215_v8 = vld [vmem:[#allocation5 + $0x1798] sm:$0xff]  ;;  %v15025_v16 = vcombine.low %v1207_v5, %v1211_v34 }
 0x54a   :  { %11415 = vmatprep.subr.bf16.mxu1 %v14986_v7  ;;  %v15280_v21 = vcombine.high %v1462_v35, %v1466_v37  ;;  %v1470_v7 = vld [vmem:[#allocation5 + $0x1f90] sm:$0xff]  ;;  %v15279_v15 = vcombine.low %v1462_v35, %v1466_v37 }
 0x54c   :  { %11004 = vmatpush1.bf16.msra.mxu0 %v15231_v55  ;;  %v1219_v55 = vld [vmem:[#allocation5 + $0x17b8] sm:$0xff] }
 0x54d   :  { %11005 = vmatprep.subr.bf16.mxu0 %v15240_v56  ;;  %11416 = vmatpush1.bf16.msra.mxu1 %v14985_v51  ;;  %v1474_v56 = vld [vmem:[#allocation5 + $0x1fb0] sm:$0xff]  ;;  %v15034_v42 = vcombine.high %v1215_v8, %v1219_v55  ;;  %v1223_v51 = vld [vmem:[#allocation5 + $0x17d8] sm:$0xff]  ;;  %v15033_v49 = vcombine.low %v1215_v8, %v1219_v55 }
 0x54e   :  { %11417 = vmatprep.subr.bf16.mxu1 %v14994_v52  ;;  %v15288_v46 = vcombine.high %v1470_v7, %v1474_v56  ;;  %v1478_v52 = vld [vmem:[#allocation5 + $0x1fd0] sm:$0xff]  ;;  %v15287_v12 = vcombine.low %v1470_v7, %v1474_v56  ;;  %v1263_v56 = vld [vmem:[#allocation5 + $0x1918] sm:$0xff] }
 0x550   :  { %11006 = vmatpush1.bf16.msra.mxu0 %v15239_v6  ;;  %v1227_v6 = vld [vmem:[#allocation5 + $0x17f8] sm:$0xff] }
 0x551   :  { %11007 = vmatprep.subr.bf16.mxu0 %v15248_v59  ;;  %11418 = vmatpush1.bf16.msra.mxu1 %v14993_v50  ;;  %v1482_v59 = vld [vmem:[#allocation5 + $0x1ff0] sm:$0xff]  ;;  %v15042_v45 = vcombine.high %v1223_v51, %v1227_v6  ;;  %v1231_v50 = vld [vmem:[#allocation5 + $0x1818] sm:$0xff]  ;;  %v15041_v3 = vcombine.low %v1223_v51, %v1227_v6 }
 0x552   :  { %11419 = vmatprep.subr.bf16.mxu1 %v15002_v61  ;;  %v15296_v23 = vcombine.high %v1478_v52, %v1482_v59  ;;  %v1486_v61 = vld [vmem:[#allocation5 + $0x2010] sm:$0xff]  ;;  %v15295_v0 = vcombine.low %v1478_v52, %v1482_v59  ;;  %v1271_v52 = vld [vmem:[#allocation5 + $0x1958] sm:$0xff] }
 0x553   :  { %v1275_v59 = vld [vmem:[#allocation5 + $0x1978] sm:$0xff] }
 0x554   :  { %11008 = vmatpush1.bf16.msra.mxu0 %v15247_v60  ;;  %v1235_v60 = vld [vmem:[#allocation5 + $0x1838] sm:$0xff] }
 0x555   :  { %11009 = vmatprep.subr.bf16.mxu0 %v15256_v2  ;;  %11420 = vmatpush1.bf16.msra.mxu1 %v15001_v44  ;;  %v1490_v2 = vld [vmem:[#allocation5 + $0x2030] sm:$0xff]  ;;  %v15050_v63 = vcombine.high %v1231_v50, %v1235_v60  ;;  %v1239_v44 = vld [vmem:[#allocation5 + $0x1858] sm:$0xff]  ;;  %v15049_v43 = vcombine.low %v1231_v50, %v1235_v60  ;;  %v15090_v50 = vcombine.high %v1271_v52, %v1275_v59 }
 0x556   :  { %11421 = vmatprep.subr.bf16.mxu1 %v15010_v19  ;;  %v15304_v10 = vcombine.high %v1486_v61, %v1490_v2  ;;  %v1494_v19 = vld [vmem:[#allocation5 + $0x2050] sm:$0xff]  ;;  %v15303_v24 = vcombine.low %v1486_v61, %v1490_v2  ;;  %v1279_v61 = vld [vmem:[#allocation5 + $0x1998] sm:$0xff] }
 0x557   :  { %v1283_v2 = vld [vmem:[#allocation5 + $0x19b8] sm:$0xff] }
 0x558   :  { %11010 = vmatpush1.bf16.msra.mxu0 %v15255_v26  ;;  %v1243_v26 = vld [vmem:[#allocation5 + $0x1878] sm:$0xff] }
 0x559   :  { %11011 = vmatprep.subr.bf16.mxu0 %v15264_v20  ;;  %11422 = vmatpush1.bf16.msra.mxu1 %v15009_v30  ;;  %v1498_v20 = vld [vmem:[#allocation5 + $0x2070] sm:$0xff]  ;;  %v15058_v25 = vcombine.high %v1239_v44, %v1243_v26  ;;  %v1247_v30 = vld [vmem:[#allocation5 + $0x1898] sm:$0xff]  ;;  %v15057_v5 = vcombine.low %v1239_v44, %v1243_v26  ;;  %v15098_v44 = vcombine.high %v1279_v61, %v1283_v2 }
 0x55a   :  { %11423 = vmatprep.subr.bf16.mxu1 %v15018_v53  ;;  %v15312_v58 = vcombine.high %v1494_v19, %v1498_v20  ;;  %v1502_v53 = vld [vmem:[#allocation5 + $0x2090] sm:$0xff]  ;;  %v15311_v34 = vcombine.low %v1494_v19, %v1498_v20  ;;  %v1287_v19 = vld [vmem:[#allocation5 + $0x19d8] sm:$0xff] }
 0x55b   :  { %v1291_v20 = vld [vmem:[#allocation5 + $0x19f8] sm:$0xff] }
 0x55c   :  { %11012 = vmatpush1.bf16.msra.mxu0 %v15263_v31  ;;  %v1251_v31 = vld [vmem:[#allocation5 + $0x18b8] sm:$0xff] }
 0x55d   :  { %11013 = vmatprep.subr.bf16.mxu0 %v15272_v54  ;;  %11424 = vmatpush1.bf16.msra.mxu1 %v15017_v48  ;;  %v1506_v54 = vld [vmem:[#allocation5 + $0x20b0] sm:$0xff]  ;;  %v15066_v35 = vcombine.high %v1247_v30, %v1251_v31  ;;  %v1255_v48 = vld [vmem:[#allocation5 + $0x18d8] sm:$0xff] }
 0x55e   :  { %11425 = vmatprep.subr.bf16.mxu1 %v15026_v40  ;;  %v15320_v37 = vcombine.high %v1502_v53, %v1506_v54  ;;  %v1510_v40 = vld [vmem:[#allocation5 + $0x20d0] sm:$0xff]  ;;  %v15319_v8 = vcombine.low %v1502_v53, %v1506_v54  ;;  %v1295_v53 = vld [vmem:[#allocation5 + $0x1a18] sm:$0xff] }
 0x55f   :  { %v1299_v54 = vld [vmem:[#allocation5 + $0x1a38] sm:$0xff] }
 0x560   :  { %11014 = vmatpush1.bf16.msra.mxu0 %v15271_v39  ;;  %v1259_v39 = vld [vmem:[#allocation5 + $0x18f8] sm:$0xff] }
 0x561   :  { %11015 = vmatprep.subr.bf16.mxu0 %v15280_v21  ;;  %11426 = vmatpush1.bf16.msra.mxu1 %v15025_v16  ;;  %v1514_v21 = vld [vmem:[#allocation5 + $0x20f0] sm:$0xff]  ;;  %v15074_v55 = vcombine.high %v1255_v48, %v1259_v39  ;;  %v1267_v16 = vld [vmem:[#allocation5 + $0x1938] sm:$0xff] }
 0x562   :  { %11427 = vmatprep.subr.bf16.mxu1 %v15034_v42  ;;  %v15328_v7 = vcombine.high %v1510_v40, %v1514_v21  ;;  %v1522_v42 = vld [vmem:[#allocation5 + $0x2130] sm:$0xff]  ;;  %v15327_v51 = vcombine.low %v1510_v40, %v1514_v21  ;;  %v15082_v6 = vcombine.high %v1263_v56, %v1267_v16  ;;  %v1303_v40 = vld [vmem:[#allocation5 + $0x1a58] sm:$0xff] }
 0x563   :  { %v1307_v21 = vld [vmem:[#allocation5 + $0x1a78] sm:$0xff] }
 0x564   :  { %11016 = vmatpush1.bf16.msra.mxu0 %v15279_v15  ;;  %v1518_v15 = vld [vmem:[#allocation5 + $0x2110] sm:$0xff] }
 0x565   :  { %11017 = vmatprep.subr.bf16.mxu0 %v15288_v46  ;;  %11428 = vmatpush1.bf16.msra.mxu1 %v15033_v49  ;;  %v15073_v46 = vcombine.low %v1255_v48, %v1259_v39  ;;  %v1526_v49 = vld [vmem:[#allocation5 + $0x2150] sm:$0xff]  ;;  %v15114_v48 = vcombine.high %v1295_v53, %v1299_v54 }
 0x566   :  { %11429 = vmatprep.subr.bf16.mxu1 %v15042_v45  ;;  %v15081_v45 = vcombine.low %v1263_v56, %v1267_v16  ;;  %v15122_v56 = vcombine.high %v1303_v40, %v1307_v21 }
 0x568   :  { %11018 = vmatpush1.bf16.msra.mxu0 %v15287_v12  ;;  %v1530_v12 = vld [vmem:[#allocation5 + $0x2170] sm:$0xff] }
 0x569   :  { %11019 = vmatprep.subr.bf16.mxu0 %v15296_v23  ;;  %11430 = vmatpush1.bf16.msra.mxu1 %v15041_v3  ;;  %v15335_v23 = vcombine.low %v1518_v15, %v1522_v42  ;;  %v15344_v60 = vcombine.high %v1526_v49, %v1530_v12  ;;  %v1534_v3 = vld [vmem:[#allocation5 + $0x2190] sm:$0xff] }
 0x56a   :  { %11440 = vmatprep.subr.bf16.mxu1 %v15050_v63  ;;  %v15089_v63 = vcombine.low %v1271_v52, %v1275_v59 }
 0x56c   :  { %11020 = vmatpush1.bf16.msra.mxu0 %v15295_v0  ;;  %11432 = vmatmul.mubr.bf16.vlgmr.msra.gmra.mrb[8].mxu1 %v17472_v28  ;;  %v15065_v28 = vcombine.low %v1247_v30, %v1251_v31  ;;  %v1538_v0 = vld [vmem:[#allocation5 + $0x21b0] sm:$0xff]  ;;  %v15106_v30 = vcombine.high %v1287_v19, %v1291_v20 }
 0x56d   :  { %11030 = vmatprep.subr.bf16.mxu0 %v15304_v10  ;;  %11441 = vmatpush1.bf16.msra.mxu1 %v15049_v43  ;;  %v15343_v10 = vcombine.low %v1526_v49, %v1530_v12  ;;  %v15352_v26 = vcombine.high %v1534_v3, %v1538_v0  ;;  %v1542_v43 = vld [vmem:[#allocation5 + $0x21d0] sm:$0xff]  ;;  %v1319_v49 = vld [vmem:[#allocation5 + $0x1ad8] sm:$0xff] }
 0x56e   :  { %11442 = vmatprep.subr.bf16.mxu1 %v15058_v25  ;;  %11472 = vmatprep.mubr.bf16.mxu1 %v17474_v14  ;;  %v15336_v14 = vcombine.high %v1518_v15, %v1522_v42  ;;  %v15097_v25 = vcombine.low %v1279_v61, %v1283_v2  ;;  %v1311_v15 = vld [vmem:[#allocation5 + $0x1a98] sm:$0xff] }
 0x56f   :  { %11022 = vmatmul.mubr.bf16.vlgmr.msra.gmra.mrb[4].mxu0 %v17508_v13  ;;  %v1315_v42 = vld [vmem:[#allocation5 + $0x1ab8] sm:$0xff] }
 0x570   :  { %11031 = vmatpush1.bf16.msra.mxu0 %v15303_v24  ;;  %11062 = vmatprep.mubr.bf16.mxu0 %v17510_v18  ;;  %v1546_v24 = vld [vmem:[#allocation5 + $0x21f0] sm:$0xff]  ;;  %v15130_v52 = vcombine.high %v1311_v15, %v1315_v42  ;;  %v1323_v12 = vld [vmem:[#allocation5 + $0x1af8] sm:$0xff] }
 0x571   :  { %11032 = vmatprep.subr.bf16.mxu0 %v15312_v58  ;;  %11443 = vmatpush1.bf16.msra.mxu1 %v15057_v5  ;;  %v15351_v58 = vcombine.low %v1534_v3, %v1538_v0  ;;  %v15360_v31 = vcombine.high %v1542_v43, %v1546_v24  ;;  %v1550_v5 = vld [vmem:[#allocation5 + $0x2210] sm:$0xff]  ;;  %v15138_v61 = vcombine.high %v1319_v49, %v1323_v12  ;;  %v1327_v3 = vld [vmem:[#allocation5 + $0x1b18] sm:$0xff] }
 0x572   :  { %11444 = vmatprep.subr.bf16.mxu1 %v15066_v35  ;;  %v15105_v35 = vcombine.low %v1287_v19, %v1291_v20  ;;  %v1331_v0 = vld [vmem:[#allocation5 + $0x1b38] sm:$0xff] }
 0x573   :  { %v15146_v19 = vcombine.high %v1327_v3, %v1331_v0 }
 0x574   :  { %11033 = vmatpush1.bf16.msra.mxu0 %v15311_v34  ;;  %v1554_v34 = vld [vmem:[#allocation5 + $0x2230] sm:$0xff] }
 0x575   :  { %11034 = vmatprep.subr.bf16.mxu0 %v15320_v37  ;;  %11445 = vmatpush1.bf16.msra.mxu1 %v15065_v28  ;;  %v15359_v37 = vcombine.low %v1542_v43, %v1546_v24  ;;  %v15368_v39 = vcombine.high %v1550_v5, %v1554_v34  ;;  %v1558_v28 = vld [vmem:[#allocation5 + $0x2250] sm:$0xff]  ;;  %v1335_v43 = vld [vmem:[#allocation5 + $0x1b58] sm:$0xff] }
 0x576   :  { %11446 = vmatprep.subr.bf16.mxu1 %v15074_v55  ;;  %v15113_v55 = vcombine.low %v1295_v53, %v1299_v54  ;;  %v1339_v24 = vld [vmem:[#allocation5 + $0x1b78] sm:$0xff] }
 0x577   :  { %v15154_v53 = vcombine.high %v1335_v43, %v1339_v24 }
 0x578   :  { %11035 = vmatpush1.bf16.msra.mxu0 %v15319_v8  ;;  %v1562_v8 = vld [vmem:[#allocation5 + $0x2270] sm:$0xff] }
 0x579   :  { %11036 = vmatprep.subr.bf16.mxu0 %v15328_v7  ;;  %11447 = vmatpush1.bf16.msra.mxu1 %v15073_v46  ;;  %v15367_v7 = vcombine.low %v1550_v5, %v1554_v34  ;;  %v15376_v16 = vcombine.high %v1558_v28, %v1562_v8  ;;  %v1566_v46 = vld [vmem:[#allocation5 + $0x2290] sm:$0xff]  ;;  %v1343_v5 = vld [vmem:[#allocation5 + $0x1b98] sm:$0xff] }
 0x57a   :  { %11448 = vmatprep.subr.bf16.mxu1 %v15082_v6  ;;  %v15121_v6 = vcombine.low %v1303_v40, %v1307_v21  ;;  %v1347_v34 = vld [vmem:[#allocation5 + $0x1bb8] sm:$0xff] }
 0x57b   :  { %v15162_v40 = vcombine.high %v1343_v5, %v1347_v34 }
 0x57c   :  { %11037 = vmatpush1.bf16.msra.mxu0 %v15327_v51  ;;  %v1570_v51 = vld [vmem:[#allocation5 + $0x22b0] sm:$0xff] }
 0x57d   :  { %11038 = vmatprep.subr.bf16.mxu0 %v15336_v14  ;;  %11449 = vmatpush1.bf16.msra.mxu1 %v15081_v45  ;;  %v15375_v14 = vcombine.low %v1558_v28, %v1562_v8  ;;  %v15384_v59 = vcombine.high %v1566_v46, %v1570_v51  ;;  %v1574_v45 = vld [vmem:[#allocation5 + $0x22d0] sm:$0xff]  ;;  %v1351_v28 = vld [vmem:[#allocation5 + $0x1bd8] sm:$0xff] }
 0x57e   :  { %11450 = vmatprep.subr.bf16.mxu1 %v15090_v50  ;;  %v15129_v50 = vcombine.low %v1311_v15, %v1315_v42  ;;  %v1355_v8 = vld [vmem:[#allocation5 + $0x1bf8] sm:$0xff] }
 0x57f   :  { %v15170_v15 = vcombine.high %v1351_v28, %v1355_v8 }
 0x580   :  { %11039 = vmatpush1.bf16.msra.mxu0 %v15335_v23  ;;  %v1578_v23 = vld [vmem:[#allocation5 + $0x22f0] sm:$0xff] }
 0x581   :  { %11040 = vmatprep.subr.bf16.mxu0 %v15344_v60  ;;  %11451 = vmatpush1.bf16.msra.mxu1 %v15089_v63  ;;  %v15383_v60 = vcombine.low %v1566_v46, %v1570_v51  ;;  %v15392_v2 = vcombine.high %v1574_v45, %v1578_v23  ;;  %v1582_v63 = vld [vmem:[#allocation5 + $0x2310] sm:$0xff]  ;;  %v1359_v46 = vld [vmem:[#allocation5 + $0x1c18] sm:$0xff] }
 0x582   :  { %11452 = vmatprep.subr.bf16.mxu1 %v15098_v44  ;;  %v15137_v44 = vcombine.low %v1319_v49, %v1323_v12  ;;  %v1363_v51 = vld [vmem:[#allocation5 + $0x1c38] sm:$0xff] }
 0x583   :  { %v15178_v49 = vcombine.high %v1359_v46, %v1363_v51 }
 0x584   :  { %11041 = vmatpush1.bf16.msra.mxu0 %v15343_v10  ;;  %v1586_v10 = vld [vmem:[#allocation5 + $0x2330] sm:$0xff] }
 0x585   :  { %11042 = vmatprep.subr.bf16.mxu0 %v15352_v26  ;;  %11453 = vmatpush1.bf16.msra.mxu1 %v15097_v25  ;;  %v15391_v26 = vcombine.low %v1574_v45, %v1578_v23  ;;  %v15400_v20 = vcombine.high %v1582_v63, %v1586_v10  ;;  %v1590_v25 = vld [vmem:[#allocation5 + $0x2350] sm:$0xff]  ;;  %v1367_v45 = vld [vmem:[#allocation5 + $0x1c58] sm:$0xff] }
 0x586   :  { %11454 = vmatprep.subr.bf16.mxu1 %v15106_v30  ;;  %v15145_v30 = vcombine.low %v1327_v3, %v1331_v0  ;;  %v1371_v23 = vld [vmem:[#allocation5 + $0x1c78] sm:$0xff] }
 0x587   :  { %v15186_v3 = vcombine.high %v1367_v45, %v1371_v23 }
 0x588   :  { %11043 = vmatpush1.bf16.msra.mxu0 %v15351_v58  ;;  %v1594_v58 = vld [vmem:[#allocation5 + $0x2370] sm:$0xff] }
 0x589   :  { %11044 = vmatprep.subr.bf16.mxu0 %v15360_v31  ;;  %11455 = vmatpush1.bf16.msra.mxu1 %v15105_v35  ;;  %v15399_v31 = vcombine.low %v1582_v63, %v1586_v10  ;;  %v15408_v54 = vcombine.high %v1590_v25, %v1594_v58  ;;  %v1598_v35 = vld [vmem:[#allocation5 + $0x2390] sm:$0xff]  ;;  %v1375_v63 = vld [vmem:[#allocation5 + $0x1c98] sm:$0xff] }
 0x58a   :  { %11456 = vmatprep.subr.bf16.mxu1 %v15114_v48  ;;  %v15153_v48 = vcombine.low %v1335_v43, %v1339_v24  ;;  %v1379_v10 = vld [vmem:[#allocation5 + $0x1cb8] sm:$0xff] }
 0x58b   :  { %v15194_v43 = vcombine.high %v1375_v63, %v1379_v10 }
 0x58c   :  { %11045 = vmatpush1.bf16.msra.mxu0 %v15359_v37  ;;  %v1602_v37 = vld [vmem:[#allocation5 + $0x23b0] sm:$0xff] }
 0x58d   :  { %11046 = vmatprep.subr.bf16.mxu0 %v15368_v39  ;;  %11457 = vmatpush1.bf16.msra.mxu1 %v15113_v55  ;;  %v15407_v39 = vcombine.low %v1590_v25, %v1594_v58  ;;  %v15416_v21 = vcombine.high %v1598_v35, %v1602_v37  ;;  %v1606_v55 = vld [vmem:[#allocation5 + $0x23d0] sm:$0xff]  ;;  %v1383_v25 = vld [vmem:[#allocation5 + $0x1cd8] sm:$0xff] }
 0x58e   :  { %11458 = vmatprep.subr.bf16.mxu1 %v15122_v56  ;;  %v15161_v56 = vcombine.low %v1343_v5, %v1347_v34  ;;  %v1387_v58 = vld [vmem:[#allocation5 + $0x1cf8] sm:$0xff] }
 0x58f   :  { %v1391_v34 = vld [vmem:[#allocation5 + $0x1d18] sm:$0xff] }
 0x590   :  { %11047 = vmatpush1.bf16.msra.mxu0 %v15367_v7  ;;  %v1610_v7 = vld [vmem:[#allocation5 + $0x23f0] sm:$0xff] }
 0x591   :  { %11048 = vmatprep.subr.bf16.mxu0 %v15376_v16  ;;  %11459 = vmatpush1.bf16.msra.mxu1 %v15121_v6  ;;  %v15415_v16 = vcombine.low %v1598_v35, %v1602_v37  ;;  %v15424_v42 = vcombine.high %v1606_v55, %v1610_v7  ;;  %v1614_v6 = vld [vmem:[#allocation5 + $0x2410] sm:$0xff]  ;;  %v1395_v35 = vld [vmem:[#allocation5 + $0x1d38] sm:$0xff] }
 0x592   :  { %11460 = vmatprep.subr.bf16.mxu1 %v15130_v52  ;;  %v15169_v52 = vcombine.low %v1351_v28, %v1355_v8  ;;  %v1646_v37 = vld [vmem:[#allocation5 + $0x2510] sm:$0xff]  ;;  %v1399_v28 = vld [vmem:[#allocation5 + $0x1d58] sm:$0xff] }
 0x593   :  { %v1403_v8 = vld [vmem:[#allocation5 + $0x1d78] sm:$0xff] }
 0x594   :  { %11049 = vmatpush1.bf16.msra.mxu0 %v15375_v14  ;;  %v1618_v14 = vld [vmem:[#allocation5 + $0x2430] sm:$0xff] }
 0x595   :  { %11050 = vmatprep.subr.bf16.mxu0 %v15384_v59  ;;  %11461 = vmatpush1.bf16.msra.mxu1 %v15129_v50  ;;  %v15423_v59 = vcombine.low %v1606_v55, %v1610_v7  ;;  %v15432_v12 = vcombine.high %v1614_v6, %v1618_v14  ;;  %v1622_v50 = vld [vmem:[#allocation5 + $0x2450] sm:$0xff] }
 0x596   :  { %11462 = vmatprep.subr.bf16.mxu1 %v15138_v61  ;;  %v15177_v61 = vcombine.low %v1359_v46, %v1363_v51  ;;  %v1654_v55 = vld [vmem:[#allocation5 + $0x2550] sm:$0xff]  ;;  %v1407_v46 = vld [vmem:[#allocation5 + $0x1d98] sm:$0xff] }
 0x597   :  { %v1658_v7 = vld [vmem:[#allocation5 + $0x2570] sm:$0xff]  ;;  %v1411_v51 = vld [vmem:[#allocation5 + $0x1db8] sm:$0xff] }
 0x598   :  { %11051 = vmatpush1.bf16.msra.mxu0 %v15383_v60  ;;  %v1626_v60 = vld [vmem:[#allocation5 + $0x2470] sm:$0xff] }
 0x599   :  { %11052 = vmatprep.subr.bf16.mxu0 %v15392_v2  ;;  %11463 = vmatpush1.bf16.msra.mxu1 %v15137_v44  ;;  %v15431_v2 = vcombine.low %v1614_v6, %v1618_v14  ;;  %v15440_v0 = vcombine.high %v1622_v50, %v1626_v60  ;;  %v1630_v44 = vld [vmem:[#allocation5 + $0x2490] sm:$0xff] }
 0x59a   :  { %11464 = vmatprep.subr.bf16.mxu1 %v15146_v19  ;;  %v15185_v19 = vcombine.low %v1367_v45, %v1371_v23  ;;  %v1662_v6 = vld [vmem:[#allocation5 + $0x2590] sm:$0xff]  ;;  %v1415_v45 = vld [vmem:[#allocation5 + $0x1dd8] sm:$0xff] }
 0x59b   :  { %v1666_v14 = vld [vmem:[#allocation5 + $0x25b0] sm:$0xff]  ;;  %v1419_v23 = vld [vmem:[#allocation5 + $0x1df8] sm:$0xff] }
 0x59c   :  { %11053 = vmatpush1.bf16.msra.mxu0 %v15391_v26  ;;  %v1634_v26 = vld [vmem:[#allocation5 + $0x24b0] sm:$0xff] }
 0x59d   :  { %11054 = vmatprep.subr.bf16.mxu0 %v15400_v20  ;;  %11465 = vmatpush1.bf16.msra.mxu1 %v15145_v30  ;;  %v15439_v20 = vcombine.low %v1622_v50, %v1626_v60  ;;  %v15448_v24 = vcombine.high %v1630_v44, %v1634_v26  ;;  %v1638_v30 = vld [vmem:[#allocation5 + $0x24d0] sm:$0xff] }
 0x59e   :  { %11466 = vmatprep.subr.bf16.mxu1 %v15154_v53  ;;  %v15447_v53 = vcombine.low %v1630_v44, %v1634_v26  ;;  %v1670_v50 = vld [vmem:[#allocation5 + $0x25d0] sm:$0xff] }
 0x59f   :  { %v1674_v60 = vld [vmem:[#allocation5 + $0x25f0] sm:$0xff] }
 0x5a0   :  { %11055 = vmatpush1.bf16.msra.mxu0 %v15399_v31  ;;  %v1642_v31 = vld [vmem:[#allocation5 + $0x24f0] sm:$0xff] }
 0x5a1   :  { %11056 = vmatprep.subr.bf16.mxu0 %v15408_v54  ;;  %11467 = vmatpush1.bf16.msra.mxu1 %v15153_v48  ;;  %v15202_v54 = vcombine.high %v1383_v25, %v1387_v58  ;;  %v15456_v5 = vcombine.high %v1638_v30, %v1642_v31  ;;  %v1650_v48 = vld [vmem:[#allocation5 + $0x2530] sm:$0xff] }
 0x5a2   :  { %11468 = vmatprep.subr.bf16.mxu1 %v15162_v40  ;;  %v15455_v40 = vcombine.low %v1638_v30, %v1642_v31  ;;  %v1678_v44 = vld [vmem:[#allocation5 + $0x2610] sm:$0xff] }
 0x5a3   :  { %v1682_v26 = vld [vmem:[#allocation5 + $0x2630] sm:$0xff] }
 0x5a4   :  { %11057 = vmatpush1.bf16.msra.mxu0 %v15407_v39  ;;  %v15201_v39 = vcombine.low %v1383_v25, %v1387_v58  ;;  %v1431_v25 = vld [vmem:[#allocation5 + $0x1e58] sm:$0xff]  ;;  %v1686_v30 = vld [vmem:[#allocation5 + $0x2650] sm:$0xff] }
 0x5a5   :  { %11058 = vmatprep.subr.bf16.mxu0 %v15416_v21  ;;  %11469 = vmatpush1.bf16.msra.mxu1 %v15161_v56  ;;  %v15210_v21 = vcombine.high %v1391_v34, %v1395_v35  ;;  %v15209_v56 = vcombine.low %v1391_v34, %v1395_v35  ;;  %v1435_v58 = vld [vmem:[#allocation5 + $0x1e78] sm:$0xff]  ;;  %v1690_v31 = vld [vmem:[#allocation5 + $0x2670] sm:$0xff] }
 0x5a6   :  { %11470 = vmatprep.subr.bf16.mxu1 %v15170_v15  ;;  %v15218_v15 = vcombine.high %v1399_v28, %v1403_v8  ;;  %v1439_v34 = vld [vmem:[#allocation5 + $0x1e98] sm:$0xff] }
 0x5a7   :  { %v1443_v35 = vld [vmem:[#allocation5 + $0x1eb8] sm:$0xff] }
 0x5a8   :  { %11059 = vmatpush1.bf16.msra.mxu0 %v15415_v16  ;;  %v15463_v16 = vcombine.low %v1646_v37, %v1650_v48 }
 0x5a9   :  { %11060 = vmatprep.subr.bf16.mxu0 %v15424_v42  ;;  %11471 = vmatpush1.bf16.msra.mxu1 %v15169_v52  ;;  %v15472_v42 = vcombine.high %v1654_v55, %v1658_v7  ;;  %v15217_v52 = vcombine.low %v1399_v28, %v1403_v8  ;;  %v1447_v28 = vld [vmem:[#allocation5 + $0x1ed8] sm:$0xff] }
 0x5aa   :  { %11481 = vmatprep.subr.bf16.mxu1 %v15178_v49  ;;  %v15226_v49 = vcombine.high %v1407_v46, %v1411_v51  ;;  %v1451_v8 = vld [vmem:[#allocation5 + $0x1ef8] sm:$0xff] }
 0x5ac   :  { %11061 = vmatpush1.bf16.msra.mxu0 %v15423_v59  ;;  %11473 = vmatmul.mubr.bf16.vlgmr.msra.gmra.mrb[8].mxu1 %v17490_v4  ;;  %v15193_v4 = vcombine.low %v1375_v63, %v1379_v10  ;;  %v15471_v59 = vcombine.low %v1654_v55, %v1658_v7  ;;  %v1423_v63 = vld [vmem:[#allocation5 + $0x1e18] sm:$0xff]  ;;  %v1702_v55 = vld [vmem:[#allocation5 + $0x26d0] sm:$0xff] }
 0x5ad   :  { %11071 = vmatprep.subr.bf16.mxu0 %v15432_v12  ;;  %11482 = vmatpush1.bf16.msra.mxu1 %v15177_v61  ;;  %v15480_v12 = vcombine.high %v1662_v6, %v1666_v14  ;;  %v15225_v61 = vcombine.low %v1407_v46, %v1411_v51  ;;  %v1427_v10 = vld [vmem:[#allocation5 + $0x1e38] sm:$0xff]  ;;  %v1706_v7 = vld [vmem:[#allocation5 + $0x26f0] sm:$0xff] }
 0x5ae   :  { %11483 = vmatprep.subr.bf16.mxu1 %v15186_v3  ;;  %11513 = vmatprep.mubr.bf16.mxu1 %v17492_v11  ;;  %v15464_v11 = vcombine.high %v1646_v37, %v1650_v48  ;;  %v15234_v3 = vcombine.high %v1415_v45, %v1419_v23  ;;  %v1694_v37 = vld [vmem:[#allocation5 + $0x2690] sm:$0xff]  ;;  %v1455_v46 = vld [vmem:[#allocation5 + $0x1f18] sm:$0xff] }
 0x5af   :  { %11063 = vmatmul.mubr.bf16.vlgmr.msra.gmra.mrb[4].mxu0 %v17526_v32  ;;  %v1698_v48 = vld [vmem:[#allocation5 + $0x26b0] sm:$0xff]  ;;  %v1459_v51 = vld [vmem:[#allocation5 + $0x1f38] sm:$0xff] }
 0x5b0   :  { %11072 = vmatpush1.bf16.msra.mxu0 %v15431_v2  ;;  %11103 = vmatprep.mubr.bf16.mxu0 %v17528_v36  ;;  %v15479_v2 = vcombine.low %v1662_v6, %v1666_v14  ;;  %v1710_v6 = vld [vmem:[#allocation5 + $0x2710] sm:$0xff] }
 0x5b1   :  { %11073 = vmatprep.subr.bf16.mxu0 %v15440_v0  ;;  %11484 = vmatpush1.bf16.msra.mxu1 %v15185_v19  ;;  %v15488_v0 = vcombine.high %v1670_v50, %v1674_v60  ;;  %v15233_v19 = vcombine.low %v1415_v45, %v1419_v23  ;;  %v1714_v14 = vld [vmem:[#allocation5 + $0x2730] sm:$0xff]  ;;  %v1463_v45 = vld [vmem:[#allocation5 + $0x1f58] sm:$0xff] }
 0x5b2   :  { %11485 = vmatprep.subr.bf16.mxu1 %v15194_v43  ;;  %v15242_v43 = vcombine.high %v1423_v63, %v1427_v10  ;;  %v1467_v23 = vld [vmem:[#allocation5 + $0x1f78] sm:$0xff] }
 0x5b4   :  { %11074 = vmatpush1.bf16.msra.mxu0 %v15439_v20  ;;  %v15487_v20 = vcombine.low %v1670_v50, %v1674_v60  ;;  %v1718_v50 = vld [vmem:[#allocation5 + $0x2750] sm:$0xff] }
 0x5b5   :  { %11075 = vmatprep.subr.bf16.mxu0 %v15448_v24  ;;  %11486 = vmatpush1.bf16.msra.mxu1 %v15193_v4  ;;  %v15496_v24 = vcombine.high %v1678_v44, %v1682_v26  ;;  %v15241_v4 = vcombine.low %v1423_v63, %v1427_v10  ;;  %v1722_v60 = vld [vmem:[#allocation5 + $0x2770] sm:$0xff]  ;;  %v1471_v63 = vld [vmem:[#allocation5 + $0x1f98] sm:$0xff] }
 0x5b6   :  { %11487 = vmatprep.subr.bf16.mxu1 %v15202_v54  ;;  %v15250_v54 = vcombine.high %v1431_v25, %v1435_v58  ;;  %v1475_v10 = vld [vmem:[#allocation5 + $0x1fb8] sm:$0xff] }
 0x5b8   :  { %11076 = vmatpush1.bf16.msra.mxu0 %v15447_v53  ;;  %v15495_v53 = vcombine.low %v1678_v44, %v1682_v26  ;;  %v1726_v44 = vld [vmem:[#allocation5 + $0x2790] sm:$0xff] }
 0x5b9   :  { %11077 = vmatprep.subr.bf16.mxu0 %v15456_v5  ;;  %11488 = vmatpush1.bf16.msra.mxu1 %v15201_v39  ;;  %v15504_v5 = vcombine.high %v1686_v30, %v1690_v31  ;;  %v15249_v39 = vcombine.low %v1431_v25, %v1435_v58  ;;  %v1730_v26 = vld [vmem:[#allocation5 + $0x27b0] sm:$0xff]  ;;  %v1479_v25 = vld [vmem:[#allocation5 + $0x1fd8] sm:$0xff] }
 0x5ba   :  { %11489 = vmatprep.subr.bf16.mxu1 %v15210_v21  ;;  %v15258_v21 = vcombine.high %v1439_v34, %v1443_v35  ;;  %v1483_v58 = vld [vmem:[#allocation5 + $0x1ff8] sm:$0xff] }
 0x5bc   :  { %11078 = vmatpush1.bf16.msra.mxu0 %v15455_v40  ;;  %v15503_v40 = vcombine.low %v1686_v30, %v1690_v31  ;;  %v1734_v30 = vld [vmem:[#allocation5 + $0x27d0] sm:$0xff] }
 0x5bd   :  { %11079 = vmatprep.subr.bf16.mxu0 %v15464_v11  ;;  %11490 = vmatpush1.bf16.msra.mxu1 %v15209_v56  ;;  %v15512_v11 = vcombine.high %v1694_v37, %v1698_v48  ;;  %v15257_v56 = vcombine.low %v1439_v34, %v1443_v35  ;;  %v1738_v31 = vld [vmem:[#allocation5 + $0x27f0] sm:$0xff]  ;;  %v1487_v34 = vld [vmem:[#allocation5 + $0x2018] sm:$0xff] }
 0x5be   :  { %11491 = vmatprep.subr.bf16.mxu1 %v15218_v15  ;;  %v15266_v15 = vcombine.high %v1447_v28, %v1451_v8  ;;  %v1491_v35 = vld [vmem:[#allocation5 + $0x2038] sm:$0xff] }
 0x5c0   :  { %11080 = vmatpush1.bf16.msra.mxu0 %v15463_v16  ;;  %v15511_v16 = vcombine.low %v1694_v37, %v1698_v48  ;;  %v1742_v37 = vld [vmem:[#allocation5 + $0x2810] sm:$0xff] }
 0x5c1   :  { %11081 = vmatprep.subr.bf16.mxu0 %v15472_v42  ;;  %11492 = vmatpush1.bf16.msra.mxu1 %v15217_v52  ;;  %v15520_v42 = vcombine.high %v1702_v55, %v1706_v7  ;;  %v15265_v52 = vcombine.low %v1447_v28, %v1451_v8  ;;  %v1746_v48 = vld [vmem:[#allocation5 + $0x2830] sm:$0xff]  ;;  %v1495_v28 = vld [vmem:[#allocation5 + $0x2058] sm:$0xff] }
 0x5c2   :  { %11493 = vmatprep.subr.bf16.mxu1 %v15226_v49  ;;  %v15274_v49 = vcombine.high %v1455_v46, %v1459_v51  ;;  %v1499_v8 = vld [vmem:[#allocation5 + $0x2078] sm:$0xff] }
 0x5c4   :  { %11082 = vmatpush1.bf16.msra.mxu0 %v15471_v59  ;;  %v15519_v59 = vcombine.low %v1702_v55, %v1706_v7  ;;  %v1750_v55 = vld [vmem:[#allocation5 + $0x2850] sm:$0xff] }
 0x5c5   :  { %11083 = vmatprep.subr.bf16.mxu0 %v15480_v12  ;;  %11494 = vmatpush1.bf16.msra.mxu1 %v15225_v61  ;;  %v15528_v12 = vcombine.high %v1710_v6, %v1714_v14  ;;  %v15273_v61 = vcombine.low %v1455_v46, %v1459_v51  ;;  %v1754_v7 = vld [vmem:[#allocation5 + $0x2870] sm:$0xff]  ;;  %v1503_v46 = vld [vmem:[#allocation5 + $0x2098] sm:$0xff] }
 0x5c6   :  { %11495 = vmatprep.subr.bf16.mxu1 %v15234_v3  ;;  %v15282_v3 = vcombine.high %v1463_v45, %v1467_v23  ;;  %v1507_v51 = vld [vmem:[#allocation5 + $0x20b8] sm:$0xff] }
 0x5c8   :  { %11084 = vmatpush1.bf16.msra.mxu0 %v15479_v2  ;;  %v15527_v2 = vcombine.low %v1710_v6, %v1714_v14  ;;  %v1758_v6 = vld [vmem:[#allocation5 + $0x2890] sm:$0xff] }
 0x5c9   :  { %11085 = vmatprep.subr.bf16.mxu0 %v15488_v0  ;;  %11496 = vmatpush1.bf16.msra.mxu1 %v15233_v19  ;;  %v15536_v0 = vcombine.high %v1718_v50, %v1722_v60  ;;  %v15281_v19 = vcombine.low %v1463_v45, %v1467_v23  ;;  %v1762_v14 = vld [vmem:[#allocation5 + $0x28b0] sm:$0xff]  ;;  %v1511_v45 = vld [vmem:[#allocation5 + $0x20d8] sm:$0xff] }
 0x5ca   :  { %11497 = vmatprep.subr.bf16.mxu1 %v15242_v43  ;;  %v15290_v43 = vcombine.high %v1471_v63, %v1475_v10  ;;  %v1515_v23 = vld [vmem:[#allocation5 + $0x20f8] sm:$0xff] }
 0x5cc   :  { %11086 = vmatpush1.bf16.msra.mxu0 %v15487_v20  ;;  %v15535_v20 = vcombine.low %v1718_v50, %v1722_v60  ;;  %v1766_v50 = vld [vmem:[#allocation5 + $0x28d0] sm:$0xff] }
 0x5cd   :  { %11087 = vmatprep.subr.bf16.mxu0 %v15496_v24  ;;  %11498 = vmatpush1.bf16.msra.mxu1 %v15241_v4  ;;  %v15544_v24 = vcombine.high %v1726_v44, %v1730_v26  ;;  %v15289_v4 = vcombine.low %v1471_v63, %v1475_v10  ;;  %v1770_v60 = vld [vmem:[#allocation5 + $0x28f0] sm:$0xff]  ;;  %v1523_v63 = vld [vmem:[#allocation5 + $0x2138] sm:$0xff] }
 0x5ce   :  { %11499 = vmatprep.subr.bf16.mxu1 %v15250_v54  ;;  %v15298_v54 = vcombine.high %v1479_v25, %v1483_v58  ;;  %v1774_v10 = vld [vmem:[#allocation5 + $0x2910] sm:$0xff] }
 0x5d0   :  { %11088 = vmatpush1.bf16.msra.mxu0 %v15495_v53  ;;  %v15543_v53 = vcombine.low %v1726_v44, %v1730_v26  ;;  %v1778_v44 = vld [vmem:[#allocation5 + $0x2930] sm:$0xff]  ;;  %v15329_v26 = vcombine.low %v1511_v45, %v1515_v23 }
 0x5d1   :  { %11089 = vmatprep.subr.bf16.mxu0 %v15504_v5  ;;  %11500 = vmatpush1.bf16.msra.mxu1 %v15249_v39  ;;  %v15552_v5 = vcombine.high %v1734_v30, %v1738_v31  ;;  %v15297_v39 = vcombine.low %v1479_v25, %v1483_v58  ;;  %v1782_v25 = vld [vmem:[#allocation5 + $0x2950] sm:$0xff] }
 0x5d2   :  { %11501 = vmatprep.subr.bf16.mxu1 %v15258_v21  ;;  %v15306_v21 = vcombine.high %v1487_v34, %v1491_v35  ;;  %v1786_v58 = vld [vmem:[#allocation5 + $0x2970] sm:$0xff] }
 0x5d4   :  { %11090 = vmatpush1.bf16.msra.mxu0 %v15503_v40  ;;  %v15551_v40 = vcombine.low %v1734_v30, %v1738_v31  ;;  %v15591_v31 = vcombine.low %v1774_v10, %v1778_v44 }
 0x5d5   :  { %11091 = vmatprep.subr.bf16.mxu0 %v15512_v11  ;;  %11502 = vmatpush1.bf16.msra.mxu1 %v15257_v56  ;;  %v15560_v11 = vcombine.high %v1742_v37, %v1746_v48  ;;  %v15305_v56 = vcombine.low %v1487_v34, %v1491_v35  ;;  %v1790_v34 = vld [vmem:[#allocation5 + $0x2990] sm:$0xff] }
 0x5d6   :  { %11503 = vmatprep.subr.bf16.mxu1 %v15266_v15  ;;  %v15314_v15 = vcombine.high %v1495_v28, %v1499_v8  ;;  %v1794_v35 = vld [vmem:[#allocation5 + $0x29b0] sm:$0xff] }
 0x5d8   :  { %11092 = vmatpush1.bf16.msra.mxu0 %v15511_v16  ;;  %v15559_v16 = vcombine.low %v1742_v37, %v1746_v48  ;;  %v15599_v48 = vcombine.low %v1782_v25, %v1786_v58 }
 0x5d9   :  { %11093 = vmatprep.subr.bf16.mxu0 %v15520_v42  ;;  %11504 = vmatpush1.bf16.msra.mxu1 %v15265_v52  ;;  %v15568_v42 = vcombine.high %v1750_v55, %v1754_v7  ;;  %v15313_v52 = vcombine.low %v1495_v28, %v1499_v8  ;;  %v1798_v28 = vld [vmem:[#allocation5 + $0x29d0] sm:$0xff] }
 0x5da   :  { %11505 = vmatprep.subr.bf16.mxu1 %v15274_v49  ;;  %v15322_v49 = vcombine.high %v1503_v46, %v1507_v51  ;;  %v1802_v8 = vld [vmem:[#allocation5 + $0x29f0] sm:$0xff] }
 0x5dc   :  { %11094 = vmatpush1.bf16.msra.mxu0 %v15519_v59  ;;  %v15567_v59 = vcombine.low %v1750_v55, %v1754_v7  ;;  %v15607_v7 = vcombine.low %v1790_v34, %v1794_v35 }
 0x5dd   :  { %11095 = vmatprep.subr.bf16.mxu0 %v15528_v12  ;;  %11506 = vmatpush1.bf16.msra.mxu1 %v15273_v61  ;;  %v15576_v12 = vcombine.high %v1758_v6, %v1762_v14  ;;  %v15575_v61 = vcombine.low %v1758_v6, %v1762_v14  ;;  %v15615_v14 = vcombine.low %v1798_v28, %v1802_v8 }
 0x5de   :  { %11507 = vmatprep.subr.bf16.mxu1 %v15282_v3  ;;  %v15584_v3 = vcombine.high %v1766_v50, %v1770_v60 }
 0x5e0   :  { %11096 = vmatpush1.bf16.msra.mxu0 %v15527_v2  ;;  %v15330_v2 = vcombine.high %v1511_v45, %v1515_v23  ;;  %v1814_v45 = vld [vmem:[#allocation5 + $0x2a50] sm:$0xff] }
 0x5e1   :  { %11097 = vmatprep.subr.bf16.mxu0 %v15536_v0  ;;  %11508 = vmatpush1.bf16.msra.mxu1 %v15281_v19  ;;  %v1519_v0 = vld [vmem:[#allocation5 + $0x2118] sm:$0xff]  ;;  %v15583_v19 = vcombine.low %v1766_v50, %v1770_v60  ;;  %v1818_v23 = vld [vmem:[#allocation5 + $0x2a70] sm:$0xff] }
 0x5e2   :  { %11509 = vmatprep.subr.bf16.mxu1 %v15290_v43  ;;  %v1527_v43 = vld [vmem:[#allocation5 + $0x2158] sm:$0xff]  ;;  %v15337_v30 = vcombine.low %v1519_v0, %v1523_v63 }
 0x5e4   :  { %11098 = vmatpush1.bf16.msra.mxu0 %v15535_v20  ;;  %v15338_v20 = vcombine.high %v1519_v0, %v1523_v63  ;;  %v1822_v0 = vld [vmem:[#allocation5 + $0x2a90] sm:$0xff] }
 0x5e5   :  { %11099 = vmatprep.subr.bf16.mxu0 %v15544_v24  ;;  %11510 = vmatpush1.bf16.msra.mxu1 %v15289_v4  ;;  %v1531_v24 = vld [vmem:[#allocation5 + $0x2178] sm:$0xff]  ;;  %v1826_v63 = vld [vmem:[#allocation5 + $0x2ab0] sm:$0xff] }
 0x5e6   :  { %11511 = vmatprep.subr.bf16.mxu1 %v15298_v54  ;;  %v15346_v4 = vcombine.high %v1527_v43, %v1531_v24  ;;  %v1535_v54 = vld [vmem:[#allocation5 + $0x2198] sm:$0xff]  ;;  %v15345_v37 = vcombine.low %v1527_v43, %v1531_v24  ;;  %v1830_v43 = vld [vmem:[#allocation5 + $0x2ad0] sm:$0xff] }
 0x5e7   :  { %v1834_v24 = vld [vmem:[#allocation5 + $0x2af0] sm:$0xff] }
 0x5e8   :  { %11100 = vmatpush1.bf16.msra.mxu0 %v15543_v53  ;;  %v15600_v53 = vcombine.high %v1782_v25, %v1786_v58  ;;  %v15639_v58 = vcombine.low %v1822_v0, %v1826_v63 }
 0x5e9   :  { %11101 = vmatprep.subr.bf16.mxu0 %v15552_v5  ;;  %11512 = vmatpush1.bf16.msra.mxu1 %v15297_v39  ;;  %v1539_v5 = vld [vmem:[#allocation5 + $0x21b8] sm:$0xff] }
 0x5ea   :  { %11522 = vmatprep.subr.bf16.mxu1 %v15306_v21  ;;  %v15354_v39 = vcombine.high %v1535_v54, %v1539_v5  ;;  %v1543_v21 = vld [vmem:[#allocation5 + $0x21d8] sm:$0xff]  ;;  %v15353_v55 = vcombine.low %v1535_v54, %v1539_v5  ;;  %v1838_v54 = vld [vmem:[#allocation5 + $0x2b10] sm:$0xff] }
 0x5eb   :  { %v1842_v5 = vld [vmem:[#allocation5 + $0x2b30] sm:$0xff] }
 0x5ec   :  { %11102 = vmatpush1.bf16.msra.mxu0 %v15551_v40  ;;  %11514 = vmatmul.mubr.bf16.vlgmr.msra.gmra.mrb[8].mxu1 %v17508_v13  ;;  %v15321_v13 = vcombine.low %v1503_v46, %v1507_v51  ;;  %v15608_v40 = vcombine.high %v1790_v34, %v1794_v35  ;;  %v1806_v46 = vld [vmem:[#allocation5 + $0x2a10] sm:$0xff]  ;;  %v15647_v35 = vcombine.low %v1830_v43, %v1834_v24 }
 0x5ed   :  { %11112 = vmatprep.subr.bf16.mxu0 %v15560_v11  ;;  %11523 = vmatpush1.bf16.msra.mxu1 %v15305_v56  ;;  %v1547_v11 = vld [vmem:[#allocation5 + $0x21f8] sm:$0xff]  ;;  %v1810_v51 = vld [vmem:[#allocation5 + $0x2a30] sm:$0xff] }
 0x5ee   :  { %11524 = vmatprep.subr.bf16.mxu1 %v15314_v15  ;;  %11554 = vmatprep.mubr.bf16.mxu1 %v17510_v18  ;;  %v15592_v18 = vcombine.high %v1774_v10, %v1778_v44  ;;  %v15362_v56 = vcombine.high %v1543_v21, %v1547_v11  ;;  %v1551_v15 = vld [vmem:[#allocation5 + $0x2218] sm:$0xff]  ;;  %v15361_v6 = vcombine.low %v1543_v21, %v1547_v11  ;;  %v1846_v21 = vld [vmem:[#allocation5 + $0x2b50] sm:$0xff] }
 0x5ef   :  { %11104 = vmatmul.mubr.bf16.vlgmr.msra.gmra.mrb[4].mxu0 %v17544_v57  ;;  %v15623_v60 = vcombine.low %v1806_v46, %v1810_v51  ;;  %v15631_v44 = vcombine.low %v1814_v45, %v1818_v23  ;;  %v1850_v11 = vld [vmem:[#allocation5 + $0x2b70] sm:$0xff] }
 0x5f0   :  { %11113 = vmatpush1.bf16.msra.mxu0 %v15559_v16  ;;  %11144 = vmatprep.mubr.bf16.mxu0 %v17546_v62  ;;  %v15616_v16 = vcombine.high %v1798_v28, %v1802_v8  ;;  %v15655_v8 = vcombine.low %v1838_v54, %v1842_v5 }
 0x5f1   :  { %11114 = vmatprep.subr.bf16.mxu0 %v15568_v42  ;;  %11525 = vmatpush1.bf16.msra.mxu1 %v15313_v52  ;;  %v1555_v42 = vld [vmem:[#allocation5 + $0x2238] sm:$0xff] }
 0x5f2   :  { %11526 = vmatprep.subr.bf16.mxu1 %v15322_v49  ;;  %v15370_v52 = vcombine.high %v1551_v15, %v1555_v42  ;;  %v1559_v49 = vld [vmem:[#allocation5 + $0x2258] sm:$0xff]  ;;  %v15369_v50 = vcombine.low %v1551_v15, %v1555_v42  ;;  %v1854_v15 = vld [vmem:[#allocation5 + $0x2b90] sm:$0xff] }
 0x5f3   :  { %v1858_v42 = vld [vmem:[#allocation5 + $0x2bb0] sm:$0xff] }
 0x5f4   :  { %11115 = vmatpush1.bf16.msra.mxu0 %v15567_v59  ;;  %v15624_v59 = vcombine.high %v1806_v46, %v1810_v51  ;;  %v15663_v51 = vcombine.low %v1846_v21, %v1850_v11 }
 0x5f5   :  { %11116 = vmatprep.subr.bf16.mxu0 %v15576_v12  ;;  %11527 = vmatpush1.bf16.msra.mxu1 %v15321_v13  ;;  %v1563_v12 = vld [vmem:[#allocation5 + $0x2278] sm:$0xff] }
 0x5f6   :  { %11528 = vmatprep.subr.bf16.mxu1 %v15330_v2  ;;  %v15378_v13 = vcombine.high %v1559_v49, %v1563_v12  ;;  %v1567_v2 = vld [vmem:[#allocation5 + $0x2298] sm:$0xff]  ;;  %v15377_v10 = vcombine.low %v1559_v49, %v1563_v12  ;;  %v1862_v49 = vld [vmem:[#allocation5 + $0x2bd0] sm:$0xff] }
 0x5f7   :  { %v1866_v12 = vld [vmem:[#allocation5 + $0x2bf0] sm:$0xff] }
 0x5f8   :  { %11117 = vmatpush1.bf16.msra.mxu0 %v15575_v61  ;;  %v15632_v61 = vcombine.high %v1814_v45, %v1818_v23  ;;  %v15671_v23 = vcombine.low %v1854_v15, %v1858_v42 }
 0x5f9   :  { %11118 = vmatprep.subr.bf16.mxu0 %v15584_v3  ;;  %11529 = vmatpush1.bf16.msra.mxu1 %v15329_v26  ;;  %v1571_v3 = vld [vmem:[#allocation5 + $0x22b8] sm:$0xff] }
 0x5fa   :  { %11530 = vmatprep.subr.bf16.mxu1 %v15338_v20  ;;  %v15386_v26 = vcombine.high %v1567_v2, %v1571_v3  ;;  %v1575_v20 = vld [vmem:[#allocation5 + $0x22d8] sm:$0xff]  ;;  %v15385_v25 = vcombine.low %v1567_v2, %v1571_v3  ;;  %v1870_v2 = vld [vmem:[#allocation5 + $0x2c10] sm:$0xff] }
 0x5fb   :  { %v1874_v3 = vld [vmem:[#allocation5 + $0x2c30] sm:$0xff] }
 0x5fc   :  { %11119 = vmatpush1.bf16.msra.mxu0 %v15583_v19  ;;  %v15640_v19 = vcombine.high %v1822_v0, %v1826_v63  ;;  %v15679_v63 = vcombine.low %v1862_v49, %v1866_v12 }
 0x5fd   :  { %11120 = vmatprep.subr.bf16.mxu0 %v15592_v18  ;;  %11531 = vmatpush1.bf16.msra.mxu1 %v15337_v30  ;;  %v1579_v18 = vld [vmem:[#allocation5 + $0x22f8] sm:$0xff] }
 0x5fe   :  { %11532 = vmatprep.subr.bf16.mxu1 %v15346_v4  ;;  %v15394_v30 = vcombine.high %v1575_v20, %v1579_v18  ;;  %v1583_v4 = vld [vmem:[#allocation5 + $0x2318] sm:$0xff]  ;;  %v15393_v34 = vcombine.low %v1575_v20, %v1579_v18  ;;  %v1878_v20 = vld [vmem:[#allocation5 + $0x2c50] sm:$0xff] }
 0x5ff   :  { %v1882_v18 = vld [vmem:[#allocation5 + $0x2c70] sm:$0xff] }
 0x600   :  { %11121 = vmatpush1.bf16.msra.mxu0 %v15591_v31  ;;  %v15648_v31 = vcombine.high %v1830_v43, %v1834_v24  ;;  %v15687_v24 = vcombine.low %v1870_v2, %v1874_v3 }
 0x601   :  { %11122 = vmatprep.subr.bf16.mxu0 %v15600_v53  ;;  %11533 = vmatpush1.bf16.msra.mxu1 %v15345_v37  ;;  %v1587_v53 = vld [vmem:[#allocation5 + $0x2338] sm:$0xff] }
 0x602   :  { %11534 = vmatprep.subr.bf16.mxu1 %v15354_v39  ;;  %v15402_v37 = vcombine.high %v1583_v4, %v1587_v53  ;;  %v1591_v39 = vld [vmem:[#allocation5 + $0x2358] sm:$0xff]  ;;  %v15401_v28 = vcombine.low %v1583_v4, %v1587_v53  ;;  %v1886_v4 = vld [vmem:[#allocation5 + $0x2c90] sm:$0xff] }
 0x603   :  { %v1890_v53 = vld [vmem:[#allocation5 + $0x2cb0] sm:$0xff] }
 0x604   :  { %11123 = vmatpush1.bf16.msra.mxu0 %v15599_v48  ;;  %v15656_v48 = vcombine.high %v1838_v54, %v1842_v5  ;;  %v15695_v5 = vcombine.low %v1878_v20, %v1882_v18 }
 0x605   :  { %11124 = vmatprep.subr.bf16.mxu0 %v15608_v40  ;;  %11535 = vmatpush1.bf16.msra.mxu1 %v15353_v55  ;;  %v1595_v40 = vld [vmem:[#allocation5 + $0x2378] sm:$0xff] }
 0x606   :  { %11536 = vmatprep.subr.bf16.mxu1 %v15362_v56  ;;  %v15410_v55 = vcombine.high %v1591_v39, %v1595_v40  ;;  %v1599_v56 = vld [vmem:[#allocation5 + $0x2398] sm:$0xff]  ;;  %v15409_v46 = vcombine.low %v1591_v39, %v1595_v40  ;;  %v1894_v39 = vld [vmem:[#allocation5 + $0x2cd0] sm:$0xff] }
 0x607   :  { %v1898_v40 = vld [vmem:[#allocation5 + $0x2cf0] sm:$0xff] }
 0x608   :  { %11125 = vmatpush1.bf16.msra.mxu0 %v15607_v7  ;;  %v15664_v7 = vcombine.high %v1846_v21, %v1850_v11  ;;  %v15703_v21 = vcombine.low %v1886_v4, %v1890_v53 }
 0x609   :  { %11126 = vmatprep.subr.bf16.mxu0 %v15616_v16  ;;  %11537 = vmatpush1.bf16.msra.mxu1 %v15361_v6  ;;  %v1603_v16 = vld [vmem:[#allocation5 + $0x23b8] sm:$0xff] }
 0x60a   :  { %11538 = vmatprep.subr.bf16.mxu1 %v15370_v52  ;;  %v15418_v6 = vcombine.high %v1599_v56, %v1603_v16  ;;  %v1607_v52 = vld [vmem:[#allocation5 + $0x23d8] sm:$0xff]  ;;  %v15417_v45 = vcombine.low %v1599_v56, %v1603_v16  ;;  %v1906_v56 = vld [vmem:[#allocation5 + $0x2d30] sm:$0xff] }
 0x60c   :  { %11127 = vmatpush1.bf16.msra.mxu0 %v15615_v14  ;;  %v15672_v14 = vcombine.high %v1854_v15, %v1858_v42  ;;  %v15711_v15 = vcombine.low %v1894_v39, %v1898_v40 }
 0x60d   :  { %11128 = vmatprep.subr.bf16.mxu0 %v15624_v59  ;;  %11539 = vmatpush1.bf16.msra.mxu1 %v15369_v50  ;;  %v1611_v59 = vld [vmem:[#allocation5 + $0x23f8] sm:$0xff] }
 0x60e   :  { %11540 = vmatprep.subr.bf16.mxu1 %v15378_v13  ;;  %v15426_v50 = vcombine.high %v1607_v52, %v1611_v59  ;;  %v1615_v13 = vld [vmem:[#allocation5 + $0x2418] sm:$0xff]  ;;  %v15425_v0 = vcombine.low %v1607_v52, %v1611_v59 }
 0x610   :  { %11129 = vmatpush1.bf16.msra.mxu0 %v15623_v60  ;;  %v15680_v60 = vcombine.high %v1862_v49, %v1866_v12 }
 0x611   :  { %11130 = vmatprep.subr.bf16.mxu0 %v15632_v61  ;;  %11541 = vmatpush1.bf16.msra.mxu1 %v15377_v10  ;;  %v1619_v61 = vld [vmem:[#allocation5 + $0x2438] sm:$0xff] }
 0x612   :  { %11542 = vmatprep.subr.bf16.mxu1 %v15386_v26  ;;  %v15434_v10 = vcombine.high %v1615_v13, %v1619_v61  ;;  %v1623_v26 = vld [vmem:[#allocation5 + $0x2458] sm:$0xff]  ;;  %v15433_v43 = vcombine.low %v1615_v13, %v1619_v61 }
 0x614   :  { %11131 = vmatpush1.bf16.msra.mxu0 %v15631_v44  ;;  %v15688_v44 = vcombine.high %v1870_v2, %v1874_v3 }
 0x615   :  { %11132 = vmatprep.subr.bf16.mxu0 %v15640_v19  ;;  %11543 = vmatpush1.bf16.msra.mxu1 %v15385_v25  ;;  %v1627_v19 = vld [vmem:[#allocation5 + $0x2478] sm:$0xff] }
 0x616   :  { %11544 = vmatprep.subr.bf16.mxu1 %v15394_v30  ;;  %v15442_v25 = vcombine.high %v1623_v26, %v1627_v19  ;;  %v1631_v30 = vld [vmem:[#allocation5 + $0x2498] sm:$0xff]  ;;  %v15441_v54 = vcombine.low %v1623_v26, %v1627_v19 }
 0x618   :  { %11133 = vmatpush1.bf16.msra.mxu0 %v15639_v58  ;;  %v15696_v58 = vcombine.high %v1878_v20, %v1882_v18 }
 0x619   :  { %11134 = vmatprep.subr.bf16.mxu0 %v15648_v31  ;;  %11545 = vmatpush1.bf16.msra.mxu1 %v15393_v34  ;;  %v1635_v31 = vld [vmem:[#allocation5 + $0x24b8] sm:$0xff] }
 0x61a   :  { %11546 = vmatprep.subr.bf16.mxu1 %v15402_v37  ;;  %v15450_v34 = vcombine.high %v1631_v30, %v1635_v31  ;;  %v1639_v37 = vld [vmem:[#allocation5 + $0x24d8] sm:$0xff] }
 0x61c   :  { %11135 = vmatpush1.bf16.msra.mxu0 %v15647_v35  ;;  %v15704_v35 = vcombine.high %v1886_v4, %v1890_v53 }
 0x61d   :  { %11136 = vmatprep.subr.bf16.mxu0 %v15656_v48  ;;  %11547 = vmatpush1.bf16.msra.mxu1 %v15401_v28  ;;  %v1643_v48 = vld [vmem:[#allocation5 + $0x24f8] sm:$0xff]  ;;  %v15712_v28 = vcombine.high %v1894_v39, %v1898_v40 }
 0x61e   :  { %11548 = vmatprep.subr.bf16.mxu1 %v15410_v55  ;;  %v15458_v11 = vcombine.high %v1639_v37, %v1643_v48  ;;  %v1651_v55 = vld [vmem:[#allocation5 + $0x2538] sm:$0xff]  ;;  %v15457_v16 = vcombine.low %v1639_v37, %v1643_v48 }
 0x620   :  { %11137 = vmatpush1.bf16.msra.mxu0 %v15655_v8  ;;  %v1647_v8 = vld [vmem:[#allocation5 + $0x2518] sm:$0xff] }
 0x621   :  { %11138 = vmatprep.subr.bf16.mxu0 %v15664_v7  ;;  %11549 = vmatpush1.bf16.msra.mxu1 %v15409_v46  ;;  %v1902_v7 = vld [vmem:[#allocation5 + $0x2d10] sm:$0xff]  ;;  %v15466_v42 = vcombine.high %v1647_v8, %v1651_v55  ;;  %v1655_v46 = vld [vmem:[#allocation5 + $0x2558] sm:$0xff]  ;;  %v15465_v52 = vcombine.low %v1647_v8, %v1651_v55 }
 0x622   :  { %11550 = vmatprep.subr.bf16.mxu1 %v15418_v6  ;;  %v1910_v6 = vld [vmem:[#allocation5 + $0x2d50] sm:$0xff]  ;;  %v15719_v59 = vcombine.low %v1902_v7, %v1906_v56 }
 0x624   :  { %11139 = vmatpush1.bf16.msra.mxu0 %v15663_v51  ;;  %v1659_v51 = vld [vmem:[#allocation5 + $0x2578] sm:$0xff] }
 0x625   :  { %11140 = vmatprep.subr.bf16.mxu0 %v15672_v14  ;;  %11551 = vmatpush1.bf16.msra.mxu1 %v15417_v45  ;;  %v1914_v14 = vld [vmem:[#allocation5 + $0x2d70] sm:$0xff]  ;;  %v15474_v49 = vcombine.high %v1655_v46, %v1659_v51  ;;  %v1663_v45 = vld [vmem:[#allocation5 + $0x2598] sm:$0xff]  ;;  %v15473_v13 = vcombine.low %v1655_v46, %v1659_v51 }
 0x626   :  { %11552 = vmatprep.subr.bf16.mxu1 %v15426_v50  ;;  %v15728_v12 = vcombine.high %v1910_v6, %v1914_v14  ;;  %v1918_v50 = vld [vmem:[#allocation5 + $0x2d90] sm:$0xff]  ;;  %v15727_v61 = vcombine.low %v1910_v6, %v1914_v14 }
 0x628   :  { %11141 = vmatpush1.bf16.msra.mxu0 %v15671_v23  ;;  %v1667_v23 = vld [vmem:[#allocation5 + $0x25b8] sm:$0xff] }
 0x629   :  { %11142 = vmatprep.subr.bf16.mxu0 %v15680_v60  ;;  %11553 = vmatpush1.bf16.msra.mxu1 %v15425_v0  ;;  %v1922_v60 = vld [vmem:[#allocation5 + $0x2db0] sm:$0xff]  ;;  %v15482_v2 = vcombine.high %v1663_v45, %v1667_v23  ;;  %v1671_v0 = vld [vmem:[#allocation5 + $0x25d8] sm:$0xff]  ;;  %v15481_v26 = vcombine.low %v1663_v45, %v1667_v23 }
 0x62a   :  { %11563 = vmatprep.subr.bf16.mxu1 %v15434_v10  ;;  %v15736_v3 = vcombine.high %v1918_v50, %v1922_v60  ;;  %v1926_v10 = vld [vmem:[#allocation5 + $0x2dd0] sm:$0xff]  ;;  %v15735_v19 = vcombine.low %v1918_v50, %v1922_v60 }
 0x62c   :  { %11143 = vmatpush1.bf16.msra.mxu0 %v15679_v63  ;;  %11555 = vmatmul.mubr.bf16.vlgmr.msra.gmra.mrb[8].mxu1 %v17526_v32  ;;  %v15449_v32 = vcombine.low %v1631_v30, %v1635_v31  ;;  %v1675_v63 = vld [vmem:[#allocation5 + $0x25f8] sm:$0xff] }
 0x62d   :  { %11153 = vmatprep.subr.bf16.mxu0 %v15688_v44  ;;  %11564 = vmatpush1.bf16.msra.mxu1 %v15433_v43  ;;  %v1930_v44 = vld [vmem:[#allocation5 + $0x2df0] sm:$0xff]  ;;  %v15490_v20 = vcombine.high %v1671_v0, %v1675_v63  ;;  %v1679_v43 = vld [vmem:[#allocation5 + $0x2618] sm:$0xff]  ;;  %v15489_v30 = vcombine.low %v1671_v0, %v1675_v63 }
 0x62e   :  { %11565 = vmatprep.subr.bf16.mxu1 %v15442_v25  ;;  %11595 = vmatprep.mubr.bf16.mxu1 %v17528_v36  ;;  %v15720_v36 = vcombine.high %v1902_v7, %v1906_v56  ;;  %v15744_v18 = vcombine.high %v1926_v10, %v1930_v44  ;;  %v1934_v25 = vld [vmem:[#allocation5 + $0x2e10] sm:$0xff]  ;;  %v15743_v31 = vcombine.low %v1926_v10, %v1930_v44 }
 0x62f   :  { %11145 = vmatmul.mubr.bf16.vlgmr.msra.gmra.mrb[4].mxu0 %v17562_v33 }
 0x630   :  { %11154 = vmatpush1.bf16.msra.mxu0 %v15687_v24  ;;  %11185 = vmatprep.mubr.bf16.mxu0 %v17564_v38  ;;  %v1683_v24 = vld [vmem:[#allocation5 + $0x2638] sm:$0xff] }
 0x631   :  { %11155 = vmatprep.subr.bf16.mxu0 %v15696_v58  ;;  %11566 = vmatpush1.bf16.msra.mxu1 %v15441_v54  ;;  %v1938_v58 = vld [vmem:[#allocation5 + $0x2e30] sm:$0xff]  ;;  %v15498_v4 = vcombine.high %v1679_v43, %v1683_v24  ;;  %v1687_v54 = vld [vmem:[#allocation5 + $0x2658] sm:$0xff]  ;;  %v15497_v37 = vcombine.low %v1679_v43, %v1683_v24 }
 0x632   :  { %11567 = vmatprep.subr.bf16.mxu1 %v15450_v34  ;;  %v15752_v53 = vcombine.high %v1934_v25, %v1938_v58  ;;  %v1942_v34 = vld [vmem:[#allocation5 + $0x2e50] sm:$0xff]  ;;  %v15751_v48 = vcombine.low %v1934_v25, %v1938_v58 }
 0x634   :  { %11156 = vmatpush1.bf16.msra.mxu0 %v15695_v5  ;;  %v1691_v5 = vld [vmem:[#allocation5 + $0x2678] sm:$0xff] }
 0x635   :  { %11157 = vmatprep.subr.bf16.mxu0 %v15704_v35  ;;  %11568 = vmatpush1.bf16.msra.mxu1 %v15449_v32  ;;  %v1946_v35 = vld [vmem:[#allocation5 + $0x2e70] sm:$0xff]  ;;  %v15506_v39 = vcombine.high %v1687_v54, %v1691_v5  ;;  %v1695_v32 = vld [vmem:[#allocation5 + $0x2698] sm:$0xff]  ;;  %v15505_v8 = vcombine.low %v1687_v54, %v1691_v5 }
 0x636   :  { %11569 = vmatprep.subr.bf16.mxu1 %v15458_v11  ;;  %v15760_v40 = vcombine.high %v1942_v34, %v1946_v35  ;;  %v1950_v11 = vld [vmem:[#allocation5 + $0x2e90] sm:$0xff]  ;;  %v15759_v55 = vcombine.low %v1942_v34, %v1946_v35 }
 0x638   :  { %11158 = vmatpush1.bf16.msra.mxu0 %v15703_v21  ;;  %v1699_v21 = vld [vmem:[#allocation5 + $0x26b8] sm:$0xff] }
 0x639   :  { %11159 = vmatprep.subr.bf16.mxu0 %v15712_v28  ;;  %11570 = vmatpush1.bf16.msra.mxu1 %v15457_v16  ;;  %v1954_v28 = vld [vmem:[#allocation5 + $0x2eb0] sm:$0xff]  ;;  %v15514_v7 = vcombine.high %v1695_v32, %v1699_v21  ;;  %v1703_v16 = vld [vmem:[#allocation5 + $0x26d8] sm:$0xff]  ;;  %v15513_v46 = vcombine.low %v1695_v32, %v1699_v21 }
 0x63a   :  { %11571 = vmatprep.subr.bf16.mxu1 %v15466_v42  ;;  %v15768_v56 = vcombine.high %v1950_v11, %v1954_v28  ;;  %v1958_v42 = vld [vmem:[#allocation5 + $0x2ed0] sm:$0xff]  ;;  %v15767_v51 = vcombine.low %v1950_v11, %v1954_v28  ;;  %v16446_v21 = vld [vmem:[#allocation8 + $0x4] ss:$16 sps:$4 sm:$0xff]   ;;  %v11687_v11 = vmax.f32 %v17602_v9, 0.0 }
 0x63b   :  { %v1751_v28 = vld [vmem:[#allocation5 + $0x2858] sm:$0xff] }
 0x63c   :  { %11160 = vmatpush1.bf16.msra.mxu0 %v15711_v15  ;;  %v1707_v15 = vld [vmem:[#allocation5 + $0x26f8] sm:$0xff] }
 0x63d   :  { %11161 = vmatprep.subr.bf16.mxu0 %v15720_v36  ;;  %11572 = vmatpush1.bf16.msra.mxu1 %v15465_v52  ;;  %v1962_v36 = vld [vmem:[#allocation5 + $0x2ef0] sm:$0xff]  ;;  %v15522_v6 = vcombine.high %v1703_v16, %v1707_v15  ;;  %v1711_v52 = vld [vmem:[#allocation5 + $0x2718] sm:$0xff]  ;;  %v15521_v45 = vcombine.low %v1703_v16, %v1707_v15 }
 0x63e   :  { %11573 = vmatprep.subr.bf16.mxu1 %v15474_v49  ;;  %v15776_v14 = vcombine.high %v1958_v42, %v1962_v36  ;;  %v1966_v49 = vld [vmem:[#allocation5 + $0x2f10] sm:$0xff]  ;;  %v15775_v23 = vcombine.low %v1958_v42, %v1962_v36  ;;  %v16449_v16 = vld [vmem:[#allocation8 + $0x24] ss:$16 sps:$4 sm:$0xff]   ;;  %v17641_v36 = vpack.c.bf16 %v11687_v11, %v11687_v11 }
 0x63f   :  { %v1759_v15 = vld [vmem:[#allocation5 + $0x2898] sm:$0xff] }
 0x640   :  { %11162 = vmatpush1.bf16.msra.mxu0 %v15719_v59  ;;  %v1715_v59 = vld [vmem:[#allocation5 + $0x2738] sm:$0xff] }
 0x641   :  { %11163 = vmatprep.subr.bf16.mxu0 %v15728_v12  ;;  %11574 = vmatpush1.bf16.msra.mxu1 %v15473_v13  ;;  %v1970_v12 = vld [vmem:[#allocation5 + $0x2f30] sm:$0xff]  ;;  %v15530_v50 = vcombine.high %v1711_v52, %v1715_v59  ;;  %v1719_v13 = vld [vmem:[#allocation5 + $0x2758] sm:$0xff]  ;;  %v15529_v0 = vcombine.low %v1711_v52, %v1715_v59 }
 0x642   :  { %11575 = vmatprep.subr.bf16.mxu1 %v15482_v2  ;;  %v15784_v60 = vcombine.high %v1966_v49, %v1970_v12  ;;  %v1974_v2 = vld [vmem:[#allocation5 + $0x2f50] sm:$0xff]  ;;  %v15783_v63 = vcombine.low %v1966_v49, %v1970_v12  ;;  %v1763_v42 = vld [vmem:[#allocation5 + $0x28b8] sm:$0xff] }
 0x643   :  { %v1771_v52 = vld [vmem:[#allocation5 + $0x28f8] sm:$0xff]  ;;  %v15577_v59 = vcombine.low %v1759_v15, %v1763_v42 }
 0x644   :  { %11164 = vmatpush1.bf16.msra.mxu0 %v15727_v61  ;;  %v1723_v61 = vld [vmem:[#allocation5 + $0x2778] sm:$0xff] }
 0x645   :  { %11165 = vmatprep.subr.bf16.mxu0 %v15736_v3  ;;  %11576 = vmatpush1.bf16.msra.mxu1 %v15481_v26  ;;  %v1978_v3 = vld [vmem:[#allocation5 + $0x2f70] sm:$0xff]  ;;  %v15538_v10 = vcombine.high %v1719_v13, %v1723_v61  ;;  %v1727_v26 = vld [vmem:[#allocation5 + $0x2798] sm:$0xff]  ;;  %v15537_v43 = vcombine.low %v1719_v13, %v1723_v61 }
 0x646   :  { %11577 = vmatprep.subr.bf16.mxu1 %v15490_v20  ;;  %v15792_v44 = vcombine.high %v1974_v2, %v1978_v3  ;;  %v1982_v20 = vld [vmem:[#allocation5 + $0x2f90] sm:$0xff]  ;;  %v15791_v24 = vcombine.low %v1974_v2, %v1978_v3  ;;  %v16455_v12 = vld [vmem:[#allocation8 + $0x64] ss:$16 sps:$4 sm:$0xff]  }
 0x647   :  { %v16458_v61 = vld [vmem:[#allocation8 + $0x84] ss:$16 sps:$4 sm:$0xff]  }
 0x648   :  { %11166 = vmatpush1.bf16.msra.mxu0 %v15735_v19  ;;  %v1731_v19 = vld [vmem:[#allocation5 + $0x27b8] sm:$0xff] }
 0x649   :  { %11167 = vmatprep.subr.bf16.mxu0 %v15744_v18  ;;  %11578 = vmatpush1.bf16.msra.mxu1 %v15489_v30  ;;  %v1986_v18 = vld [vmem:[#allocation5 + $0x2fb0] sm:$0xff]  ;;  %v15546_v25 = vcombine.high %v1727_v26, %v1731_v19  ;;  %v1735_v30 = vld [vmem:[#allocation5 + $0x27d8] sm:$0xff]  ;;  %v15545_v54 = vcombine.low %v1727_v26, %v1731_v19 }
 0x64a   :  { %11579 = vmatprep.subr.bf16.mxu1 %v15498_v4  ;;  %v15800_v58 = vcombine.high %v1982_v20, %v1986_v18  ;;  %v1990_v4 = vld [vmem:[#allocation5 + $0x2fd0] sm:$0xff]  ;;  %v15799_v5 = vcombine.low %v1982_v20, %v1986_v18  ;;  %v1783_v2 = vld [vmem:[#allocation5 + $0x2958] sm:$0xff] }
 0x64b   :  { %v1795_v26 = vld [vmem:[#allocation5 + $0x29b8] sm:$0xff] }
 0x64c   :  { %11168 = vmatpush1.bf16.msra.mxu0 %v15743_v31  ;;  %v1739_v31 = vld [vmem:[#allocation5 + $0x27f8] sm:$0xff] }
 0x64d   :  { %11169 = vmatprep.subr.bf16.mxu0 %v15752_v53  ;;  %11580 = vmatpush1.bf16.msra.mxu1 %v15497_v37  ;;  %v1994_v53 = vld [vmem:[#allocation5 + $0x2ff0] sm:$0xff]  ;;  %v15554_v34 = vcombine.high %v1735_v30, %v1739_v31  ;;  %v1743_v37 = vld [vmem:[#allocation5 + $0x2818] sm:$0xff] }
 0x64e   :  { %11581 = vmatprep.subr.bf16.mxu1 %v15506_v39  ;;  %v15808_v35 = vcombine.high %v1990_v4, %v1994_v53  ;;  %v15553_v39 = vcombine.low %v1735_v30, %v1739_v31  ;;  %v16459_v20 = vld [vmem:[#allocation8 + $0xa0] ss:$16 sps:$4 sm:$0xff]   ;;  %v16473_v11 = vld [vmem:[#allocation8 + $0x124] ss:$16 sps:$4 sm:$0xff]  }
 0x64f   :  { %v16462_v30 = vld [vmem:[#allocation8 + $0xc0] ss:$16 sps:$4 sm:$0xff]  }
 0x650   :  { %11170 = vmatpush1.bf16.msra.mxu0 %v15751_v48  ;;  %v1747_v48 = vld [vmem:[#allocation5 + $0x2838] sm:$0xff] }
 0x651   :  { %11171 = vmatprep.subr.bf16.mxu0 %v15760_v40  ;;  %11582 = vmatpush1.bf16.msra.mxu1 %v15505_v8  ;;  %v15807_v40 = vcombine.low %v1990_v4, %v1994_v53  ;;  %v15562_v32 = vcombine.high %v1743_v37, %v1747_v48  ;;  %v1755_v8 = vld [vmem:[#allocation5 + $0x2878] sm:$0xff] }
 0x652   :  { %11583 = vmatprep.subr.bf16.mxu1 %v15514_v7  ;;  %v16444_v7 = vld [vmem:[#allocation8] ss:$16 sps:$4 sm:$0xff]   ;;  %v15569_v9 = vcombine.low %v1751_v28, %v1755_v8  ;;  %v16467_v4 = vld [vmem:[#allocation8 + $0xe4] ss:$16 sps:$4 sm:$0xff]  }
 0x653   :  { %v1807_v53 = vld [vmem:[#allocation5 + $0x2a18] sm:$0xff] }
 0x654   :  { %11172 = vmatpush1.bf16.msra.mxu0 %v15759_v55  ;;  %v15561_v55 = vcombine.low %v1743_v37, %v1747_v48  ;;  %v16470_v37 = vld [vmem:[#allocation8 + $0x104] ss:$16 sps:$4 sm:$0xff]  }
 0x655   :  { %11173 = vmatprep.subr.bf16.mxu0 %v15768_v56  ;;  %11584 = vmatpush1.bf16.msra.mxu1 %v15513_v46  ;;  %v15570_v56 = vcombine.high %v1751_v28, %v1755_v8  ;;  %v16447_v46 = vld [vmem:[#allocation8 + $0x20] ss:$16 sps:$4 sm:$0xff]  }
 0x656   :  { %11585 = vmatprep.subr.bf16.mxu1 %v15522_v6  ;;  %v16452_v6 = vld [vmem:[#allocation8 + $0x44] ss:$16 sps:$4 sm:$0xff]  }
 0x657   :  { %v1815_v48 = vld [vmem:[#allocation5 + $0x2a58] sm:$0xff] }
 0x658   :  { %11174 = vmatpush1.bf16.msra.mxu0 %v15767_v51  ;;  %v15578_v51 = vcombine.high %v1759_v15, %v1763_v42  ;;  %v1823_v28 = vld [vmem:[#allocation5 + $0x2a98] sm:$0xff] }
 0x659   :  { %11175 = vmatprep.subr.bf16.mxu0 %v15776_v14  ;;  %11586 = vmatpush1.bf16.msra.mxu1 %v15521_v45  ;;  %v1767_v14 = vld [vmem:[#allocation5 + $0x28d8] sm:$0xff] }
 0x65a   :  { %11587 = vmatprep.subr.bf16.mxu1 %v15530_v50  ;;  %v15586_v49 = vcombine.high %v1767_v14, %v1771_v52  ;;  %v1775_v45 = vld [vmem:[#allocation5 + $0x2918] sm:$0xff]  ;;  %v15585_v50 = vcombine.low %v1767_v14, %v1771_v52 }
 0x65b   :  { %v1827_v8 = vld [vmem:[#allocation5 + $0x2ab8] sm:$0xff] }
 0x65c   :  { %11176 = vmatpush1.bf16.msra.mxu0 %v15775_v23  ;;  %v1779_v23 = vld [vmem:[#allocation5 + $0x2938] sm:$0xff] }
 0x65d   :  { %11177 = vmatprep.subr.bf16.mxu0 %v15784_v60  ;;  %11588 = vmatpush1.bf16.msra.mxu1 %v15529_v0  ;;  %v16453_v60 = vld [vmem:[#allocation8 + $0x60] ss:$16 sps:$4 sm:$0xff]   ;;  %v15594_v13 = vcombine.high %v1775_v45, %v1779_v23  ;;  %v15593_v3 = vcombine.low %v1775_v45, %v1779_v23 }
 0x65e   :  { %11589 = vmatprep.subr.bf16.mxu1 %v15538_v10  ;;  %v16456_v0 = vld [vmem:[#allocation8 + $0x80] ss:$16 sps:$4 sm:$0xff]   ;;  %v16461_v10 = vld [vmem:[#allocation8 + $0xa4] ss:$16 sps:$4 sm:$0xff]  }
 0x65f   :  { %v1831_v15 = vld [vmem:[#allocation5 + $0x2ad8] sm:$0xff] }
 0x660   :  { %11178 = vmatpush1.bf16.msra.mxu0 %v15783_v63  ;;  %v1835_v42 = vld [vmem:[#allocation5 + $0x2af8] sm:$0xff] }
 0x661   :  { %11179 = vmatprep.subr.bf16.mxu0 %v15792_v44  ;;  %11590 = vmatpush1.bf16.msra.mxu1 %v15537_v43  ;;  %v1791_v44 = vld [vmem:[#allocation5 + $0x2998] sm:$0xff] }
 0x662   :  { %11591 = vmatprep.subr.bf16.mxu1 %v15546_v25  ;;  %v15610_v18 = vcombine.high %v1791_v44, %v1795_v26  ;;  %v16464_v43 = vld [vmem:[#allocation8 + $0xc4] ss:$16 sps:$4 sm:$0xff]  }
 0x663   :  { %v1803_v25 = vld [vmem:[#allocation5 + $0x29f8] sm:$0xff] }
 0x664   :  { %11180 = vmatpush1.bf16.msra.mxu0 %v15791_v24  ;;  %v1799_v24 = vld [vmem:[#allocation5 + $0x29d8] sm:$0xff] }
 0x665   :  { %11181 = vmatprep.subr.bf16.mxu0 %v15800_v58  ;;  %11592 = vmatpush1.bf16.msra.mxu1 %v15545_v54  ;;  %v15609_v58 = vcombine.low %v1791_v44, %v1795_v26  ;;  %v15618_v31 = vcombine.high %v1799_v24, %v1803_v25  ;;  %v1811_v54 = vld [vmem:[#allocation5 + $0x2a38] sm:$0xff] }
 0x666   :  { %11593 = vmatprep.subr.bf16.mxu1 %v15554_v34  ;;  %v16465_v34 = vld [vmem:[#allocation8 + $0xe0] ss:$16 sps:$4 sm:$0xff]   ;;  %v16488_v44 = vld [vmem:[#allocation8 + $0x1c4] ss:$16 sps:$4 sm:$0xff]  }
 0x667   :  { %v1839_v14 = vld [vmem:[#allocation5 + $0x2b18] sm:$0xff] }
 0x668   :  { %11182 = vmatpush1.bf16.msra.mxu0 %v15799_v5  ;;  %v15617_v5 = vcombine.low %v1799_v24, %v1803_v25  ;;  %v1843_v52 = vld [vmem:[#allocation5 + $0x2b38] sm:$0xff] }
 0x669   :  { %11183 = vmatprep.subr.bf16.mxu0 %v15808_v35  ;;  %11594 = vmatpush1.bf16.msra.mxu1 %v15553_v39  ;;  %v15626_v35 = vcombine.high %v1807_v53, %v1811_v54  ;;  %v1819_v39 = vld [vmem:[#allocation5 + $0x2a78] sm:$0xff] }
 0x66a   :  { %11604 = vmatprep.subr.bf16.mxu1 %v15562_v32  ;;  %v16468_v32 = vld [vmem:[#allocation8 + $0x100] ss:$16 sps:$4 sm:$0xff]  }
 0x66b   :  { %v1847_v45 = vld [vmem:[#allocation5 + $0x2b58] sm:$0xff] }
 0x66c   :  { %11184 = vmatpush1.bf16.msra.mxu0 %v15807_v40  ;;  %11596 = vmatmul.mubr.bf16.vlgmr.msra.gmra.mrb[8].mxu1 %v17544_v57  ;;  %v16450_v57 = vld [vmem:[#allocation8 + $0x40] ss:$16 sps:$4 sm:$0xff]   ;;  %v15625_v40 = vcombine.low %v1807_v53, %v1811_v54 }
 0x66d   :  { %13260 = vmatprep.subr.bf16.mxu0 %v16446_v21  ;;  %11605 = vmatpush1.bf16.msra.mxu1 %v15561_v55  ;;  %v15634_v21 = vcombine.high %v1815_v48, %v1819_v39  ;;  %v15633_v55 = vcombine.low %v1815_v48, %v1819_v39  ;;  %v1851_v23 = vld [vmem:[#allocation5 + $0x2b78] sm:$0xff] }
 0x66e   :  { %11606 = vmatprep.subr.bf16.mxu1 %v15570_v56  ;;  %11636 = vmatprep.mubr.bf16.mxu1 %v17546_v62  ;;  %v1787_v62 = vld [vmem:[#allocation5 + $0x2978] sm:$0xff]  ;;  %v15642_v56 = vcombine.high %v1823_v28, %v1827_v8 }
 0x66f   :  { %11186 = vmatmul.mubr.bf16.vlgmr.msra.gmra.mrb[4].mxu0 %v17572_v1  ;;  %v15602_v63 = vcombine.high %v1783_v2, %v1787_v62  ;;  %v15601_v19 = vcombine.low %v1783_v2, %v1787_v62  ;;  %v1855_v2 = vld [vmem:[#allocation5 + $0x2b98] sm:$0xff] }
 0x670   :  { %13261 = vmatpush1.bf16.msra.mxu0 %v16444_v7  ;;  %13292 = vmatprep.mubr.bf16.mxu0 %v17641_v36  ;;  %v16471_v7 = vld [vmem:[#allocation8 + $0x120] ss:$16 sps:$4 sm:$0xff]  }
 0x671   :  { %13262 = vmatprep.subr.bf16.mxu0 %v16449_v16  ;;  %11607 = vmatpush1.bf16.msra.mxu1 %v15569_v9  ;;  %v16476_v16 = vld [vmem:[#allocation8 + $0x144] ss:$16 sps:$4 sm:$0xff]   ;;  %v15641_v9 = vcombine.low %v1823_v28, %v1827_v8  ;;  %v16486_v24 = vld [vmem:[#allocation8 + $0x1c0] ss:$16 sps:$4 sm:$0xff]  }
 0x672   :  { %11608 = vmatprep.subr.bf16.mxu1 %v15578_v51  ;;  %v15650_v51 = vcombine.high %v1831_v15, %v1835_v42  ;;  %v1859_v62 = vld [vmem:[#allocation5 + $0x2bb8] sm:$0xff] }
 0x673   :  { %v1863_v26 = vld [vmem:[#allocation5 + $0x2bd8] sm:$0xff] }
 0x674   :  { %13263 = vmatpush1.bf16.msra.mxu0 %v16447_v46  ;;  %v16474_v46 = vld [vmem:[#allocation8 + $0x140] ss:$16 sps:$4 sm:$0xff]  }
 0x675   :  { %13264 = vmatprep.subr.bf16.mxu0 %v16452_v6  ;;  %11609 = vmatpush1.bf16.msra.mxu1 %v15577_v59  ;;  %v16479_v6 = vld [vmem:[#allocation8 + $0x164] ss:$16 sps:$4 sm:$0xff]   ;;  %v15649_v59 = vcombine.low %v1831_v15, %v1835_v42  ;;  %v16489_v54 = vld [vmem:[#allocation8 + $0x1e0] ss:$16 sps:$4 sm:$0xff]  }
 0x676   :  { %11610 = vmatprep.subr.bf16.mxu1 %v15586_v49  ;;  %v15658_v49 = vcombine.high %v1839_v14, %v1843_v52  ;;  %v1879_v48 = vld [vmem:[#allocation5 + $0x2c58] sm:$0xff] }
 0x677   :  { %v1883_v39 = vld [vmem:[#allocation5 + $0x2c78] sm:$0xff] }
 0x678   :  { %13265 = vmatpush1.bf16.msra.mxu0 %v16450_v57  ;;  %v16477_v57 = vld [vmem:[#allocation8 + $0x160] ss:$16 sps:$4 sm:$0xff]  }
 0x679   :  { %13266 = vmatprep.subr.bf16.mxu0 %v16455_v12  ;;  %11611 = vmatpush1.bf16.msra.mxu1 %v15585_v50  ;;  %v16482_v12 = vld [vmem:[#allocation8 + $0x184] ss:$16 sps:$4 sm:$0xff]   ;;  %v15657_v50 = vcombine.low %v1839_v14, %v1843_v52 }
 0x67a   :  { %11612 = vmatprep.subr.bf16.mxu1 %v15594_v13  ;;  %v15666_v13 = vcombine.high %v1847_v45, %v1851_v23  ;;  %v1887_v28 = vld [vmem:[#allocation5 + $0x2c98] sm:$0xff] }
 0x67b   :  { %v1891_v8 = vld [vmem:[#allocation5 + $0x2cb8] sm:$0xff] }
 0x67c   :  { %13267 = vmatpush1.bf16.msra.mxu0 %v16453_v60  ;;  %v16480_v60 = vld [vmem:[#allocation8 + $0x180] ss:$16 sps:$4 sm:$0xff]  }
 0x67d   :  { %13268 = vmatprep.subr.bf16.mxu0 %v16458_v61  ;;  %11613 = vmatpush1.bf16.msra.mxu1 %v15593_v3  ;;  %v16485_v61 = vld [vmem:[#allocation8 + $0x1a4] ss:$16 sps:$4 sm:$0xff]   ;;  %v2012_v3 = vsub.s32 3, %v17355_v47 }
 0x67e   :  { %11614 = vmatprep.subr.bf16.mxu1 %v15602_v63  ;;  %v16483_v63 = vld [vmem:[#allocation8 + $0x1a0] ss:$16 sps:$4 sm:$0xff]  }
 0x67f   :  { %v1895_v15 = vld [vmem:[#allocation5 + $0x2cd8] sm:$0xff] }
 0x680   :  { %13269 = vmatpush1.bf16.msra.mxu0 %v16456_v0  ;;  %v15665_v0 = vcombine.low %v1847_v45, %v1851_v23  ;;  %v1899_v42 = vld [vmem:[#allocation5 + $0x2cf8] sm:$0xff] }
 0x681   :  { %13270 = vmatprep.subr.bf16.mxu0 %v16461_v10  ;;  %11615 = vmatpush1.bf16.msra.mxu1 %v15601_v19  ;;  %v15674_v10 = vcombine.high %v1855_v2, %v1859_v62  ;;  %v1867_v19 = vld [vmem:[#allocation5 + $0x2bf8] sm:$0xff]  ;;  %v15713_v52 = vcombine.low %v1895_v15, %v1899_v42 }
 0x682   :  { %11616 = vmatprep.subr.bf16.mxu1 %v15610_v18  ;;  %v15682_v25 = vcombine.high %v1863_v26, %v1867_v19  ;;  %v15681_v53 = vcombine.low %v1863_v26, %v1867_v19  ;;  %v1907_v14 = vld [vmem:[#allocation5 + $0x2d38] sm:$0xff] }
 0x683   :  { %v16504_v23 = vld [vmem:[#allocation8 + $0x280] ss:$16 sps:$4 sm:$0xff]  }
 0x684   :  { %13271 = vmatpush1.bf16.msra.mxu0 %v16459_v20  ;;  %v17648_v20 = vld [vmem:[#allocation7] sm:$0xff]  ;;  %v16510_v19 = vld [vmem:[#allocation8 + $0x2c0] ss:$16 sps:$4 sm:$0xff]  }
 0x685   :  { %13272 = vmatprep.subr.bf16.mxu0 %v16464_v43  ;;  %11617 = vmatpush1.bf16.msra.mxu1 %v15609_v58  ;;  %v2013_v18 = vrot.slane %v17648_v20, %v2012_v3  ;;  %v15673_v43 = vcombine.low %v1855_v2, %v1859_v62  ;;  %v16491_v58 = vld [vmem:[#allocation8 + $0x1e4] ss:$16 sps:$4 sm:$0xff]   ;;  %v16507_v62 = vld [vmem:[#allocation8 + $0x2a0] ss:$16 sps:$4 sm:$0xff]  }
 0x686   :  { %11618 = vmatprep.subr.bf16.mxu1 %v15618_v31  ;;  %v1875_v31 = vld [vmem:[#allocation5 + $0x2c38] sm:$0xff] }
 0x688   :  { %13273 = vmatpush1.bf16.msra.mxu0 %v16462_v30  ;;  %v1871_v30 = vld [vmem:[#allocation5 + $0x2c18] sm:$0xff] }
 0x689   :  { %13274 = vmatprep.subr.bf16.mxu0 %v16467_v4  ;;  %11619 = vmatpush1.bf16.msra.mxu1 %v15617_v5  ;;  %v16175_v4 = vadd.f32 %v17614_v27, %v2013_v18  ;;  %v15690_v5 = vcombine.high %v1871_v30, %v1875_v31  ;;  %v15698_v27 = vcombine.high %v1879_v48, %v1883_v39 }
 0x68a   :  { %11620 = vmatprep.subr.bf16.mxu1 %v15626_v35  ;;  %v16494_v35 = vld [vmem:[#allocation8 + $0x204] ss:$16 sps:$4 sm:$0xff]  }
 0x68c   :  { %13275 = vmatpush1.bf16.msra.mxu0 %v16465_v34  ;;  %v11686_v34 = vmax.f32 %v17600_v41, 0.0  ;;  %v15697_v41 = vcombine.low %v1879_v48, %v1883_v39  ;;  %v1951_v48 = vld [vmem:[#allocation5 + $0x2e98] sm:$0xff] }
 0x68d   :  { %13276 = vmatprep.subr.bf16.mxu0 %v16470_v37  ;;  %11621 = vmatpush1.bf16.msra.mxu1 %v15625_v40  ;;  %v11689_v37 = vmax.f32 %v16175_v4, 0.0  ;;  %v15689_v40 = vcombine.low %v1871_v30, %v1875_v31  ;;  %v16513_v30 = vld [vmem:[#allocation8 + $0x2e0] ss:$16 sps:$4 sm:$0xff]   ;;  %v16518_v4 = vld [vmem:[#allocation8 + $0x304] ss:$16 sps:$4 sm:$0xff]  }
 0x68e   :  { %11622 = vmatprep.subr.bf16.mxu1 %v15634_v21  ;;  %v17655_v21 = vpack.c.bf16 %v11686_v34, %v11686_v34  ;;  %v16516_v34 = vld [vmem:[#allocation8 + $0x300] ss:$16 sps:$4 sm:$0xff]  }
 0x68f   :  { %v1955_v39 = vld [vmem:[#allocation5 + $0x2eb8] sm:$0xff] }
 0x690   :  { %13277 = vmatpush1.bf16.msra.mxu0 %v16468_v32  ;;  %v16492_v32 = vld [vmem:[#allocation8 + $0x200] ss:$16 sps:$4 sm:$0xff]  }
 0x691   :  { %13278 = vmatprep.subr.bf16.mxu0 %v16473_v11  ;;  %11623 = vmatpush1.bf16.msra.mxu1 %v15633_v55  ;;  %v16497_v11 = vld [vmem:[#allocation8 + $0x224] ss:$16 sps:$4 sm:$0xff]   ;;  %v17657_v55 = vpack.c.bf16 %v11689_v37, %v11689_v37 }
 0x692   :  { %11624 = vmatprep.subr.bf16.mxu1 %v15642_v56  ;;  %v15706_v56 = vcombine.high %v1887_v28, %v1891_v8  ;;  %v16521_v37 = vld [vmem:[#allocation8 + $0x324] ss:$16 sps:$4 sm:$0xff]  }
 0x694   :  { %13279 = vmatpush1.bf16.msra.mxu0 %v16471_v7  ;;  %v16495_v7 = vld [vmem:[#allocation8 + $0x220] ss:$16 sps:$4 sm:$0xff]  }
 0x695   :  { %13280 = vmatprep.subr.bf16.mxu0 %v16476_v16  ;;  %11625 = vmatpush1.bf16.msra.mxu1 %v15641_v9  ;;  %v16500_v16 = vld [vmem:[#allocation8 + $0x244] ss:$16 sps:$4 sm:$0xff]   ;;  %v15705_v9 = vcombine.low %v1887_v28, %v1891_v8 }
 0x696   :  { %11626 = vmatprep.subr.bf16.mxu1 %v15650_v51  ;;  %v16503_v51 = vld [vmem:[#allocation8 + $0x264] ss:$16 sps:$4 sm:$0xff]  }
 0x697   :  { %v1959_v28 = vld [vmem:[#allocation5 + $0x2ed8] sm:$0xff] }
 0x698   :  { %13281 = vmatpush1.bf16.msra.mxu0 %v16474_v46  ;;  %v15714_v46 = vcombine.high %v1895_v15, %v1899_v42  ;;  %v1963_v8 = vld [vmem:[#allocation5 + $0x2ef8] sm:$0xff] }
 0x699   :  { %13282 = vmatprep.subr.bf16.mxu0 %v16479_v6  ;;  %11627 = vmatpush1.bf16.msra.mxu1 %v15649_v59  ;;  %v1903_v6 = vld [vmem:[#allocation5 + $0x2d18] sm:$0xff] }
 0x69a   :  { %11628 = vmatprep.subr.bf16.mxu1 %v15658_v49  ;;  %v16501_v59 = vld [vmem:[#allocation8 + $0x260] ss:$16 sps:$4 sm:$0xff]   ;;  %v16506_v49 = vld [vmem:[#allocation8 + $0x284] ss:$16 sps:$4 sm:$0xff]   ;;  %v15721_v45 = vcombine.low %v1903_v6, %v1907_v14 }
 0x69b   :  { %v1967_v15 = vld [vmem:[#allocation5 + $0x2f18] sm:$0xff] }
 0x69c   :  { %13283 = vmatpush1.bf16.msra.mxu0 %v16477_v57  ;;  %v15722_v57 = vcombine.high %v1903_v6, %v1907_v14  ;;  %v1971_v42 = vld [vmem:[#allocation5 + $0x2f38] sm:$0xff] }
 0x69d   :  { %13284 = vmatprep.subr.bf16.mxu0 %v16482_v12  ;;  %11629 = vmatpush1.bf16.msra.mxu1 %v15657_v50  ;;  %v1911_v12 = vld [vmem:[#allocation5 + $0x2d58] sm:$0xff] }
 0x69e   :  { %11630 = vmatprep.subr.bf16.mxu1 %v15666_v13  ;;  %v1919_v13 = vld [vmem:[#allocation5 + $0x2d98] sm:$0xff] }
 0x69f   :  { %v1975_v6 = vld [vmem:[#allocation5 + $0x2f58] sm:$0xff] }
 0x6a0   :  { %13285 = vmatpush1.bf16.msra.mxu0 %v16480_v60  ;;  %v16509_v60 = vld [vmem:[#allocation8 + $0x2a4] ss:$16 sps:$4 sm:$0xff]  }
 0x6a1   :  { %13286 = vmatprep.subr.bf16.mxu0 %v16485_v61  ;;  %11631 = vmatpush1.bf16.msra.mxu1 %v15665_v0  ;;  %v1923_v61 = vld [vmem:[#allocation5 + $0x2db8] sm:$0xff] }
 0x6a2   :  { %11632 = vmatprep.subr.bf16.mxu1 %v15674_v10  ;;  %v15738_v0 = vcombine.high %v1919_v13, %v1923_v61  ;;  %v1927_v10 = vld [vmem:[#allocation5 + $0x2dd8] sm:$0xff]  ;;  %v15737_v26 = vcombine.low %v1919_v13, %v1923_v61 }
 0x6a3   :  { %v1979_v14 = vld [vmem:[#allocation5 + $0x2f78] sm:$0xff] }
 0x6a4   :  { %13287 = vmatpush1.bf16.msra.mxu0 %v16483_v63  ;;  %v16512_v63 = vld [vmem:[#allocation8 + $0x2c4] ss:$16 sps:$4 sm:$0xff]  }
 0x6a5   :  { %13288 = vmatprep.subr.bf16.mxu0 %v16488_v44  ;;  %11633 = vmatpush1.bf16.msra.mxu1 %v15673_v43  ;;  %v1931_v44 = vld [vmem:[#allocation5 + $0x2df8] sm:$0xff] }
 0x6a6   :  { %11634 = vmatprep.subr.bf16.mxu1 %v15682_v25  ;;  %v15746_v18 = vcombine.high %v1927_v10, %v1931_v44  ;;  %v16515_v43 = vld [vmem:[#allocation8 + $0x2e4] ss:$16 sps:$4 sm:$0xff]  }
 0x6a7   :  { %v1939_v25 = vld [vmem:[#allocation5 + $0x2e38] sm:$0xff] }
 0x6a8   :  { %13289 = vmatpush1.bf16.msra.mxu0 %v16486_v24  ;;  %v1935_v24 = vld [vmem:[#allocation5 + $0x2e18] sm:$0xff] }
 0x6a9   :  { %13290 = vmatprep.subr.bf16.mxu0 %v16491_v58  ;;  %11635 = vmatpush1.bf16.msra.mxu1 %v15681_v53  ;;  %v15745_v58 = vcombine.low %v1927_v10, %v1931_v44  ;;  %v15754_v31 = vcombine.high %v1935_v24, %v1939_v25  ;;  %v1943_v53 = vld [vmem:[#allocation5 + $0x2e58] sm:$0xff] }
 0x6aa   :  { %11645 = vmatprep.subr.bf16.mxu1 %v15690_v5  ;;  %v15753_v5 = vcombine.low %v1935_v24, %v1939_v25  ;;  %v16536_v61 = vld [vmem:[#allocation8 + $0x3c4] ss:$16 sps:$4 sm:$0xff]  }
 0x6ab   :  { %v16563_v25 = vld [vmem:[#allocation8 + $0x404] ss:$16 sps:$4 sm:$0xff]  }
 0x6ac   :  { %13291 = vmatpush1.bf16.msra.mxu0 %v16489_v54  ;;  %11637 = vmatmul.mubr.bf16.vlgmr.msra.gmra.mrb[8].mxu1 %v17562_v33  ;;  %v16498_v33 = vld [vmem:[#allocation8 + $0x240] ss:$16 sps:$4 sm:$0xff]  }
 0x6ad   :  { %13301 = vmatprep.subr.bf16.mxu0 %v16494_v35  ;;  %11646 = vmatpush1.bf16.msra.mxu1 %v15689_v40  ;;  %v1947_v54 = vld [vmem:[#allocation5 + $0x2e78] sm:$0xff] }
 0x6ae   :  { %11647 = vmatprep.subr.bf16.mxu1 %v15698_v27  ;;  %11677 = vmatprep.mubr.bf16.mxu1 %v17564_v38  ;;  %v1915_v38 = vld [vmem:[#allocation5 + $0x2d78] sm:$0xff]  ;;  %v15762_v35 = vcombine.high %v1943_v53, %v1947_v54  ;;  %v15761_v40 = vcombine.low %v1943_v53, %v1947_v54  ;;  %v15770_v27 = vcombine.high %v1951_v48, %v1955_v39  ;;  %v16543_v53 = vld [vmem:[#allocation8 + $0x28] ss:$16 sps:$4 sm:$0xff]   ;;  %v16548_v54 = vld [vmem:[#allocation8 + $0x4c] ss:$16 sps:$4 sm:$0xff]  }
 0x6af   :  { %13293 = vmatmul.mubr.bf16.vlgmr.msra.gmra.mrb[8].mxu0 %v17655_v21  ;;  %v15730_v50 = vcombine.high %v1911_v12, %v1915_v38  ;;  %v15729_v2 = vcombine.low %v1911_v12, %v1915_v38  ;;  %v16533_v12 = vld [vmem:[#allocation8 + $0x3a4] ss:$16 sps:$4 sm:$0xff]  }
 0x6b0   :  { %13302 = vmatpush1.bf16.msra.mxu0 %v16492_v32  ;;  %13333 = vmatprep.mubr.bf16.mxu0 %v17657_v55  ;;  %v16519_v32 = vld [vmem:[#allocation8 + $0x320] ss:$16 sps:$4 sm:$0xff]  }
 0x6b1   :  { %13303 = vmatprep.subr.bf16.mxu0 %v16497_v11  ;;  %11648 = vmatpush1.bf16.msra.mxu1 %v15697_v41  ;;  %v16524_v11 = vld [vmem:[#allocation8 + $0x344] ss:$16 sps:$4 sm:$0xff]   ;;  %v15769_v41 = vcombine.low %v1951_v48, %v1955_v39  ;;  %v16573_v48 = vld [vmem:[#allocation8 + $0x440] ss:$16 sps:$4 sm:$0xff]   ;;  %v16549_v39 = vld [vmem:[#allocation8 + $0x68] ss:$16 sps:$4 sm:$0xff]  }
 0x6b2   :  { %11649 = vmatprep.subr.bf16.mxu1 %v15706_v56  ;;  %v15778_v56 = vcombine.high %v1959_v28, %v1963_v8  ;;  %v1983_v38 = vld [vmem:[#allocation5 + $0x2f98] sm:$0xff] }
 0x6b4   :  { %13304 = vmatpush1.bf16.msra.mxu0 %v16495_v7  ;;  %v16522_v7 = vld [vmem:[#allocation8 + $0x340] ss:$16 sps:$4 sm:$0xff]  }
 0x6b5   :  { %13305 = vmatprep.subr.bf16.mxu0 %v16500_v16  ;;  %11650 = vmatpush1.bf16.msra.mxu1 %v15705_v9  ;;  %v16527_v16 = vld [vmem:[#allocation8 + $0x364] ss:$16 sps:$4 sm:$0xff]   ;;  %v15777_v9 = vcombine.low %v1959_v28, %v1963_v8  ;;  %v16585_v28 = vld [vmem:[#allocation8 + $0x480] ss:$16 sps:$4 sm:$0xff]  }
 0x6b6   :  { %11651 = vmatprep.subr.bf16.mxu1 %v15714_v46  ;;  %v15786_v46 = vcombine.high %v1967_v15, %v1971_v42  ;;  %v16593_v8 = vld [vmem:[#allocation8 + $0x4a4] ss:$16 sps:$4 sm:$0xff]  }
 0x6b8   :  { %13306 = vmatpush1.bf16.msra.mxu0 %v16498_v33  ;;  %v16525_v33 = vld [vmem:[#allocation8 + $0x360] ss:$16 sps:$4 sm:$0xff]  }
 0x6b9   :  { %13307 = vmatprep.subr.bf16.mxu0 %v16503_v51  ;;  %11652 = vmatpush1.bf16.msra.mxu1 %v15713_v52  ;;  %v16530_v51 = vld [vmem:[#allocation8 + $0x384] ss:$16 sps:$4 sm:$0xff]   ;;  %v15785_v52 = vcombine.low %v1967_v15, %v1971_v42  ;;  %v16558_v15 = vld [vmem:[#allocation8 + $0xc8] ss:$16 sps:$4 sm:$0xff]   ;;  %v16566_v42 = vld [vmem:[#allocation8 + $0xec] ss:$16 sps:$4 sm:$0xff]  }
 0x6ba   :  { %11653 = vmatprep.subr.bf16.mxu1 %v15722_v57  ;;  %v15794_v57 = vcombine.high %v1975_v6, %v1979_v14 }
 0x6bc   :  { %13308 = vmatpush1.bf16.msra.mxu0 %v16501_v59  ;;  %v16528_v59 = vld [vmem:[#allocation8 + $0x380] ss:$16 sps:$4 sm:$0xff]  }
 0x6bd   :  { %13309 = vmatprep.subr.bf16.mxu0 %v16506_v49  ;;  %11654 = vmatpush1.bf16.msra.mxu1 %v15721_v45  ;;  %v2008_v49 = vsub.s32 2, %v17355_v47  ;;  %v1987_v45 = vld [vmem:[#allocation5 + $0x2fb8] sm:$0xff] }
 0x6be   :  { %11655 = vmatprep.subr.bf16.mxu1 %v15730_v50  ;;  %v16531_v50 = vld [vmem:[#allocation8 + $0x3a0] ss:$16 sps:$4 sm:$0xff]  }
 0x6bf   :  { %v2009_v13 = vrot.slane %v17648_v20, %v2008_v49 }
 0x6c0   :  { %13310 = vmatpush1.bf16.msra.mxu0 %v16504_v23  ;;  %v15793_v23 = vcombine.low %v1975_v6, %v1979_v14  ;;  %v16603_v6 = vld [vmem:[#allocation8 + $0x4e0] ss:$16 sps:$4 sm:$0xff]   ;;  %v16611_v14 = vld [vmem:[#allocation8 + $0x504] ss:$16 sps:$4 sm:$0xff]  }
 0x6c1   :  { %13311 = vmatprep.subr.bf16.mxu0 %v16509_v60  ;;  %11656 = vmatpush1.bf16.msra.mxu1 %v15729_v2  ;;  %v15802_v60 = vcombine.high %v1983_v38, %v1987_v45  ;;  %v1991_v2 = vld [vmem:[#allocation5 + $0x2fd8] sm:$0xff]  ;;  %v16174_v44 = vadd.f32 %v17612_v17, %v2009_v13  ;;  %v16590_v13 = vld [vmem:[#allocation8 + $0x16c] ss:$16 sps:$4 sm:$0xff]  }
 0x6c2   :  { %11657 = vmatprep.subr.bf16.mxu1 %v15738_v0  ;;  %v15801_v0 = vcombine.low %v1983_v38, %v1987_v45  ;;  %v16569_v17 = vld [vmem:[#allocation8 + $0x424] ss:$16 sps:$4 sm:$0xff]   ;;  %v16576_v38 = vld [vmem:[#allocation8 + $0x128] ss:$16 sps:$4 sm:$0xff]   ;;  %v16584_v45 = vld [vmem:[#allocation8 + $0x14c] ss:$16 sps:$4 sm:$0xff]  }
 0x6c3   :  { %v11688_v24 = vmax.f32 %v16174_v44, 0.0  ;;  %v16594_v44 = vld [vmem:[#allocation8 + $0x188] ss:$16 sps:$4 sm:$0xff]  }
 0x6c4   :  { %13312 = vmatpush1.bf16.msra.mxu0 %v16507_v62  ;;  %v1995_v62 = vld [vmem:[#allocation5 + $0x2ff8] sm:$0xff] }
 0x6c5   :  { %13313 = vmatprep.subr.bf16.mxu0 %v16512_v63  ;;  %11658 = vmatpush1.bf16.msra.mxu1 %v15737_v26  ;;  %v16534_v63 = vld [vmem:[#allocation8 + $0x3c0] ss:$16 sps:$4 sm:$0xff]   ;;  %v15810_v10 = vcombine.high %v1991_v2, %v1995_v62  ;;  %v16539_v26 = vld [vmem:[#allocation8 + $0x3e4] ss:$16 sps:$4 sm:$0xff]  }
 0x6c6   :  { %11659 = vmatprep.subr.bf16.mxu1 %v15746_v18  ;;  %v16537_v18 = vld [vmem:[#allocation8 + $0x3e0] ss:$16 sps:$4 sm:$0xff]  }
 0x6c8   :  { %13314 = vmatpush1.bf16.msra.mxu0 %v16510_v19  ;;  %v15809_v19 = vcombine.low %v1991_v2, %v1995_v62  ;;  %v16629_v2 = vld [vmem:[#allocation8 + $0x564] ss:$16 sps:$4 sm:$0xff]   ;;  %v16588_v62 = vld [vmem:[#allocation8 + $0x168] ss:$16 sps:$4 sm:$0xff]  }
 0x6c9   :  { %13315 = vmatprep.subr.bf16.mxu0 %v16515_v43  ;;  %11660 = vmatpush1.bf16.msra.mxu1 %v15745_v58  ;;  %v16542_v43 = vld [vmem:[#allocation8 + $0xc] ss:$16 sps:$4 sm:$0xff]   ;;  %v16540_v58 = vld [vmem:[#allocation8 + $0x8] ss:$16 sps:$4 sm:$0xff]  }
 0x6ca   :  { %11661 = vmatprep.subr.bf16.mxu1 %v15754_v31  ;;  %v17668_v31 = vpack.c.bf16 %v11688_v24, %v11688_v24  ;;  %v16608_v24 = vld [vmem:[#allocation8 + $0x1cc] ss:$16 sps:$4 sm:$0xff]  }
 0x6cc   :  { %13316 = vmatpush1.bf16.msra.mxu0 %v16513_v30  ;;  %v16545_v30 = vld [vmem:[#allocation8 + $0x2c] ss:$16 sps:$4 sm:$0xff]  }
 0x6cd   :  { %13317 = vmatprep.subr.bf16.mxu0 %v16518_v4  ;;  %11662 = vmatpush1.bf16.msra.mxu1 %v15753_v5  ;;  %v16561_v4 = vld [vmem:[#allocation8 + $0x400] ss:$16 sps:$4 sm:$0xff]  }
 0x6ce   :  { %11663 = vmatprep.subr.bf16.mxu1 %v15762_v35  ;;  %v16567_v5 = vld [vmem:[#allocation8 + $0x420] ss:$16 sps:$4 sm:$0xff]   ;;  %v16546_v35 = vld [vmem:[#allocation8 + $0x48] ss:$16 sps:$4 sm:$0xff]  }
 0x6d0   :  { %13318 = vmatpush1.bf16.msra.mxu0 %v16516_v34  ;;  %v16575_v34 = vld [vmem:[#allocation8 + $0x444] ss:$16 sps:$4 sm:$0xff]  }
 0x6d1   :  { %13319 = vmatprep.subr.bf16.mxu0 %v16521_v37  ;;  %11664 = vmatpush1.bf16.msra.mxu1 %v15761_v40  ;;  %v16551_v37 = vld [vmem:[#allocation8 + $0x6c] ss:$16 sps:$4 sm:$0xff]  }
 0x6d2   :  { %11665 = vmatprep.subr.bf16.mxu1 %v15770_v27  ;;  %v16554_v40 = vld [vmem:[#allocation8 + $0x8c] ss:$16 sps:$4 sm:$0xff]   ;;  %v16552_v27 = vld [vmem:[#allocation8 + $0x88] ss:$16 sps:$4 sm:$0xff]  }
 0x6d4   :  { %13320 = vmatpush1.bf16.msra.mxu0 %v16519_v32  ;;  %v16587_v32 = vld [vmem:[#allocation8 + $0x484] ss:$16 sps:$4 sm:$0xff]  }
 0x6d5   :  { %13321 = vmatprep.subr.bf16.mxu0 %v16524_v11  ;;  %11666 = vmatpush1.bf16.msra.mxu1 %v15769_v41  ;;  %v16557_v11 = vld [vmem:[#allocation8 + $0xac] ss:$16 sps:$4 sm:$0xff]   ;;  %v16555_v41 = vld [vmem:[#allocation8 + $0xa8] ss:$16 sps:$4 sm:$0xff]  }
 0x6d6   :  { %11667 = vmatprep.subr.bf16.mxu1 %v15778_v56  ;;  %v16591_v56 = vld [vmem:[#allocation8 + $0x4a0] ss:$16 sps:$4 sm:$0xff]  }
 0x6d8   :  { %13322 = vmatpush1.bf16.msra.mxu0 %v16522_v7  ;;  %v16560_v7 = vld [vmem:[#allocation8 + $0xcc] ss:$16 sps:$4 sm:$0xff]  }
 0x6d9   :  { %13323 = vmatprep.subr.bf16.mxu0 %v16527_v16  ;;  %11668 = vmatpush1.bf16.msra.mxu1 %v15777_v9  ;;  %v16599_v16 = vld [vmem:[#allocation8 + $0x4c4] ss:$16 sps:$4 sm:$0xff]   ;;  %v16597_v9 = vld [vmem:[#allocation8 + $0x4c0] ss:$16 sps:$4 sm:$0xff]  }
 0x6da   :  { %11669 = vmatprep.subr.bf16.mxu1 %v15786_v46  ;;  %v16564_v46 = vld [vmem:[#allocation8 + $0xe8] ss:$16 sps:$4 sm:$0xff]  }
 0x6dc   :  { %13324 = vmatpush1.bf16.msra.mxu0 %v16525_v33  ;;  %v16605_v33 = vld [vmem:[#allocation8 + $0x4e4] ss:$16 sps:$4 sm:$0xff]  }
 0x6dd   :  { %13325 = vmatprep.subr.bf16.mxu0 %v16530_v51  ;;  %11670 = vmatpush1.bf16.msra.mxu1 %v15785_v52  ;;  %v16572_v51 = vld [vmem:[#allocation8 + $0x10c] ss:$16 sps:$4 sm:$0xff]   ;;  %v16570_v52 = vld [vmem:[#allocation8 + $0x108] ss:$16 sps:$4 sm:$0xff]  }
 0x6de   :  { %11671 = vmatprep.subr.bf16.mxu1 %v15794_v57  ;;  %v16609_v57 = vld [vmem:[#allocation8 + $0x500] ss:$16 sps:$4 sm:$0xff]  }
 0x6e0   :  { %13326 = vmatpush1.bf16.msra.mxu0 %v16528_v59  ;;  %v16578_v59 = vld [vmem:[#allocation8 + $0x12c] ss:$16 sps:$4 sm:$0xff]  }
 0x6e1   :  { %13327 = vmatprep.subr.bf16.mxu0 %v16533_v12  ;;  %11672 = vmatpush1.bf16.msra.mxu1 %v15793_v23  ;;  %v16617_v12 = vld [vmem:[#allocation8 + $0x524] ss:$16 sps:$4 sm:$0xff]   ;;  %v16615_v23 = vld [vmem:[#allocation8 + $0x520] ss:$16 sps:$4 sm:$0xff]  }
 0x6e2   :  { %11673 = vmatprep.subr.bf16.mxu1 %v15802_v60  ;;  %v16582_v60 = vld [vmem:[#allocation8 + $0x148] ss:$16 sps:$4 sm:$0xff]  }
 0x6e4   :  { %13328 = vmatpush1.bf16.msra.mxu0 %v16531_v50  ;;  %v16623_v50 = vld [vmem:[#allocation8 + $0x544] ss:$16 sps:$4 sm:$0xff]  }
 0x6e5   :  { %13329 = vmatprep.subr.bf16.mxu0 %v16536_v61  ;;  %11674 = vmatpush1.bf16.msra.mxu1 %v15801_v0  ;;  %v16621_v61 = vld [vmem:[#allocation8 + $0x540] ss:$16 sps:$4 sm:$0xff]   ;;  %v16596_v0 = vld [vmem:[#allocation8 + $0x18c] ss:$16 sps:$4 sm:$0xff]  }
 0x6e6   :  { %11675 = vmatprep.subr.bf16.mxu1 %v15810_v10  ;;  %v16635_v10 = vld [vmem:[#allocation8 + $0x584] ss:$16 sps:$4 sm:$0xff]  }
 0x6e8   :  { %13330 = vmatpush1.bf16.msra.mxu0 %v16534_v63  ;;  %v16627_v63 = vld [vmem:[#allocation8 + $0x560] ss:$16 sps:$4 sm:$0xff]  }
 0x6e9   :  { %13331 = vmatprep.subr.bf16.mxu0 %v16539_v26  ;;  %11676 = vmatpush1.bf16.msra.mxu1 %v15809_v19  ;;  %v16602_v26 = vld [vmem:[#allocation8 + $0x1ac] ss:$16 sps:$4 sm:$0xff]   ;;  %v16633_v19 = vld [vmem:[#allocation8 + $0x580] ss:$16 sps:$4 sm:$0xff]  }
 0x6ea   :  { %13424 = vmatprep.subr.bf16.mxu1 %v16542_v43  ;;  %v16600_v43 = vld [vmem:[#allocation8 + $0x1a8] ss:$16 sps:$4 sm:$0xff]  }
 0x6ec   :  { %13332 = vmatpush1.bf16.msra.mxu0 %v16537_v18  ;;  %11678 = vmatmul.mubr.bf16.vlgmr.msra.gmra.mrb[8].mxu1 %v17572_v1  ;;  %v16581_v1 = vld [vmem:[#allocation8 + $0x464] ss:$16 sps:$4 sm:$0xff]  }
 0x6ed   :  { %13342 = vmatprep.subr.bf16.mxu0 %v16563_v25  ;;  %13425 = vmatpush1.bf16.msra.mxu1 %v16540_v58  ;;  %v16641_v18 = vld [vmem:[#allocation8 + $0x5a4] ss:$16 sps:$4 sm:$0xff]   ;;  %v16639_v25 = vld [vmem:[#allocation8 + $0x5a0] ss:$16 sps:$4 sm:$0xff]  }
 0x6ee   :  { %13456 = vmatprep.mubr.bf16.mxu1 %v17641_v36  ;;  %13426 = vmatprep.subr.bf16.mxu1 %v16545_v30  ;;  %v16579_v36 = vld [vmem:[#allocation8 + $0x460] ss:$16 sps:$4 sm:$0xff]   ;;  %v16647_v58 = vld [vmem:[#allocation8 + $0x5c4] ss:$16 sps:$4 sm:$0xff]   ;;  %v16606_v30 = vld [vmem:[#allocation8 + $0x1c8] ss:$16 sps:$4 sm:$0xff]  }
 0x6ef   :  { %13334 = vmatmul.mubr.bf16.vlgmr.msra.gmra.mrb[8].mxu0 %v17668_v31 }
 0x6f0   :  { %13343 = vmatpush1.bf16.msra.mxu0 %v16561_v4  ;;  %v16614_v4 = vld [vmem:[#allocation8 + $0x1ec] ss:$16 sps:$4 sm:$0xff]  }
 0x6f1   :  { %13344 = vmatprep.subr.bf16.mxu0 %v16569_v17  ;;  %13427 = vmatpush1.bf16.msra.mxu1 %v16543_v53  ;;  %v16645_v17 = vld [vmem:[#allocation8 + $0x5c0] ss:$16 sps:$4 sm:$0xff]   ;;  %v16653_v53 = vld [vmem:[#allocation8 + $0x5e4] ss:$16 sps:$4 sm:$0xff]  }
 0x6f2   :  { %13428 = vmatprep.subr.bf16.mxu1 %v16548_v54  ;;  %v16612_v54 = vld [vmem:[#allocation8 + $0x1e8] ss:$16 sps:$4 sm:$0xff]  }
 0x6f4   :  { %13345 = vmatpush1.bf16.msra.mxu0 %v16567_v5  ;;  %v16620_v5 = vld [vmem:[#allocation8 + $0x20c] ss:$16 sps:$4 sm:$0xff]  }
 0x6f5   :  { %13346 = vmatprep.subr.bf16.mxu0 %v16575_v34  ;;  %13429 = vmatpush1.bf16.msra.mxu1 %v16546_v35  ;;  %v16651_v34 = vld [vmem:[#allocation8 + $0x5e0] ss:$16 sps:$4 sm:$0xff]   ;;  %v16707_v35 = vld [vmem:[#allocation8 + $0x604] ss:$16 sps:$4 sm:$0xff]  }
 0x6f6   :  { %13430 = vmatprep.subr.bf16.mxu1 %v16551_v37  ;;  %v16618_v37 = vld [vmem:[#allocation8 + $0x208] ss:$16 sps:$4 sm:$0xff]  }
 0x6f8   :  { %13347 = vmatpush1.bf16.msra.mxu0 %v16573_v48  ;;  %v16626_v48 = vld [vmem:[#allocation8 + $0x22c] ss:$16 sps:$4 sm:$0xff]  }
 0x6f9   :  { %13348 = vmatprep.subr.bf16.mxu0 %v16581_v1  ;;  %13431 = vmatpush1.bf16.msra.mxu1 %v16549_v39  ;;  %v16624_v1 = vld [vmem:[#allocation8 + $0x228] ss:$16 sps:$4 sm:$0xff]   ;;  %v16632_v39 = vld [vmem:[#allocation8 + $0x24c] ss:$16 sps:$4 sm:$0xff]  }
 0x6fa   :  { %13432 = vmatprep.subr.bf16.mxu1 %v16554_v40  ;;  %v16630_v40 = vld [vmem:[#allocation8 + $0x248] ss:$16 sps:$4 sm:$0xff]  }
 0x6fc   :  { %13349 = vmatpush1.bf16.msra.mxu0 %v16579_v36  ;;  %v16638_v36 = vld [vmem:[#allocation8 + $0x26c] ss:$16 sps:$4 sm:$0xff]  }
 0x6fd   :  { %13350 = vmatprep.subr.bf16.mxu0 %v16587_v32  ;;  %13433 = vmatpush1.bf16.msra.mxu1 %v16552_v27  ;;  %v16636_v32 = vld [vmem:[#allocation8 + $0x268] ss:$16 sps:$4 sm:$0xff]   ;;  %v16644_v27 = vld [vmem:[#allocation8 + $0x28c] ss:$16 sps:$4 sm:$0xff]  }
 0x6fe   :  { %13434 = vmatprep.subr.bf16.mxu1 %v16557_v11  ;;  %v16642_v11 = vld [vmem:[#allocation8 + $0x288] ss:$16 sps:$4 sm:$0xff]  }
 0x700   :  { %13351 = vmatpush1.bf16.msra.mxu0 %v16585_v28  ;;  %v2016_v28 = vsub.s32 4, %v17355_v47 }
 0x701   :  { %13352 = vmatprep.subr.bf16.mxu0 %v16593_v8  ;;  %13435 = vmatpush1.bf16.msra.mxu1 %v16555_v41  ;;  %v16650_v8 = vld [vmem:[#allocation8 + $0x2ac] ss:$16 sps:$4 sm:$0xff]   ;;  %v16648_v41 = vld [vmem:[#allocation8 + $0x2a8] ss:$16 sps:$4 sm:$0xff]  }
 0x702   :  { %13436 = vmatprep.subr.bf16.mxu1 %v16560_v7 }
 0x704   :  { %13353 = vmatpush1.bf16.msra.mxu0 %v16591_v56  ;;  %v16656_v56 = vld [vmem:[#allocation8 + $0x2cc] ss:$16 sps:$4 sm:$0xff]  }
 0x705   :  { %13354 = vmatprep.subr.bf16.mxu0 %v16599_v16  ;;  %13437 = vmatpush1.bf16.msra.mxu1 %v16558_v15 }
 0x706   :  { %13438 = vmatprep.subr.bf16.mxu1 %v16566_v42 }
 0x708   :  { %13355 = vmatpush1.bf16.msra.mxu0 %v16597_v9  ;;  %v16654_v9 = vld [vmem:[#allocation8 + $0x2c8] ss:$16 sps:$4 sm:$0xff]  }
 0x709   :  { %13356 = vmatprep.subr.bf16.mxu0 %v16605_v33  ;;  %13439 = vmatpush1.bf16.msra.mxu1 %v16564_v46 }
 0x70a   :  { %13440 = vmatprep.subr.bf16.mxu1 %v16572_v51  ;;  %v16659_v51 = vld [vmem:[#allocation8 + $0x2ec] ss:$16 sps:$4 sm:$0xff]  }
 0x70c   :  { %13357 = vmatpush1.bf16.msra.mxu0 %v16603_v6 }
 0x70d   :  { %13358 = vmatprep.subr.bf16.mxu0 %v16611_v14  ;;  %13441 = vmatpush1.bf16.msra.mxu1 %v16570_v52 }
 0x70e   :  { %13442 = vmatprep.subr.bf16.mxu1 %v16578_v59  ;;  %v16657_v59 = vld [vmem:[#allocation8 + $0x2e8] ss:$16 sps:$4 sm:$0xff]  }
 0x710   :  { %13359 = vmatpush1.bf16.msra.mxu0 %v16609_v57 }
 0x711   :  { %13360 = vmatprep.subr.bf16.mxu0 %v16617_v12  ;;  %13443 = vmatpush1.bf16.msra.mxu1 %v16576_v38  ;;  %v16705_v12 = vld [vmem:[#allocation8 + $0x600] ss:$16 sps:$4 sm:$0xff]  }
 0x712   :  { %13444 = vmatprep.subr.bf16.mxu1 %v16584_v45  ;;  %v16713_v45 = vld [vmem:[#allocation8 + $0x624] ss:$16 sps:$4 sm:$0xff]  }
 0x714   :  { %13361 = vmatpush1.bf16.msra.mxu0 %v16615_v23  ;;  %v16660_v23 = vld [vmem:[#allocation8 + $0x308] ss:$16 sps:$4 sm:$0xff]  }
 0x715   :  { %13362 = vmatprep.subr.bf16.mxu0 %v16623_v50  ;;  %13445 = vmatpush1.bf16.msra.mxu1 %v16582_v60  ;;  %v16665_v50 = vld [vmem:[#allocation8 + $0x32c] ss:$16 sps:$4 sm:$0xff]   ;;  %v16711_v60 = vld [vmem:[#allocation8 + $0x620] ss:$16 sps:$4 sm:$0xff]  }
 0x716   :  { %13446 = vmatprep.subr.bf16.mxu1 %v16590_v13  ;;  %v16719_v13 = vld [vmem:[#allocation8 + $0x644] ss:$16 sps:$4 sm:$0xff]  }
 0x718   :  { %13363 = vmatpush1.bf16.msra.mxu0 %v16621_v61  ;;  %v16663_v61 = vld [vmem:[#allocation8 + $0x328] ss:$16 sps:$4 sm:$0xff]  }
 0x719   :  { %13364 = vmatprep.subr.bf16.mxu0 %v16629_v2  ;;  %13447 = vmatpush1.bf16.msra.mxu1 %v16588_v62  ;;  %v16668_v2 = vld [vmem:[#allocation8 + $0x34c] ss:$16 sps:$4 sm:$0xff]   ;;  %v16717_v62 = vld [vmem:[#allocation8 + $0x640] ss:$16 sps:$4 sm:$0xff]  }
 0x71a   :  { %13448 = vmatprep.subr.bf16.mxu1 %v16596_v0  ;;  %v16725_v0 = vld [vmem:[#allocation8 + $0x664] ss:$16 sps:$4 sm:$0xff]  }
 0x71c   :  { %13365 = vmatpush1.bf16.msra.mxu0 %v16627_v63  ;;  %v16666_v63 = vld [vmem:[#allocation8 + $0x348] ss:$16 sps:$4 sm:$0xff]  }
 0x71d   :  { %13366 = vmatprep.subr.bf16.mxu0 %v16635_v10  ;;  %13449 = vmatpush1.bf16.msra.mxu1 %v16594_v44  ;;  %v16671_v10 = vld [vmem:[#allocation8 + $0x36c] ss:$16 sps:$4 sm:$0xff]   ;;  %v16723_v44 = vld [vmem:[#allocation8 + $0x660] ss:$16 sps:$4 sm:$0xff]  }
 0x71e   :  { %13450 = vmatprep.subr.bf16.mxu1 %v16602_v26  ;;  %v16731_v26 = vld [vmem:[#allocation8 + $0x684] ss:$16 sps:$4 sm:$0xff]  }
 0x720   :  { %13367 = vmatpush1.bf16.msra.mxu0 %v16633_v19  ;;  %v16669_v19 = vld [vmem:[#allocation8 + $0x368] ss:$16 sps:$4 sm:$0xff]  }
 0x721   :  { %13368 = vmatprep.subr.bf16.mxu0 %v16641_v18  ;;  %13451 = vmatpush1.bf16.msra.mxu1 %v16600_v43  ;;  %v16674_v18 = vld [vmem:[#allocation8 + $0x38c] ss:$16 sps:$4 sm:$0xff]   ;;  %v16729_v43 = vld [vmem:[#allocation8 + $0x680] ss:$16 sps:$4 sm:$0xff]  }
 0x722   :  { %13452 = vmatprep.subr.bf16.mxu1 %v16608_v24  ;;  %v16737_v24 = vld [vmem:[#allocation8 + $0x6a4] ss:$16 sps:$4 sm:$0xff]  }
 0x724   :  { %13369 = vmatpush1.bf16.msra.mxu0 %v16639_v25  ;;  %v16672_v25 = vld [vmem:[#allocation8 + $0x388] ss:$16 sps:$4 sm:$0xff]  }
 0x725   :  { %13370 = vmatprep.subr.bf16.mxu0 %v16647_v58  ;;  %13453 = vmatpush1.bf16.msra.mxu1 %v16606_v30  ;;  %v16677_v58 = vld [vmem:[#allocation8 + $0x3ac] ss:$16 sps:$4 sm:$0xff]   ;;  %v16735_v30 = vld [vmem:[#allocation8 + $0x6a0] ss:$16 sps:$4 sm:$0xff]  }
 0x726   :  { %13454 = vmatprep.subr.bf16.mxu1 %v16614_v4  ;;  %v16743_v4 = vld [vmem:[#allocation8 + $0x6c4] ss:$16 sps:$4 sm:$0xff]  }
 0x728   :  { %13371 = vmatpush1.bf16.msra.mxu0 %v16645_v17  ;;  %v16675_v17 = vld [vmem:[#allocation8 + $0x3a8] ss:$16 sps:$4 sm:$0xff]  }
 0x729   :  { %13372 = vmatprep.subr.bf16.mxu0 %v16653_v53  ;;  %13455 = vmatpush1.bf16.msra.mxu1 %v16612_v54  ;;  %v16680_v53 = vld [vmem:[#allocation8 + $0x3cc] ss:$16 sps:$4 sm:$0xff]   ;;  %v16741_v54 = vld [vmem:[#allocation8 + $0x6c0] ss:$16 sps:$4 sm:$0xff]  }
 0x72a   :  { %13465 = vmatprep.subr.bf16.mxu1 %v16620_v5  ;;  %v16749_v5 = vld [vmem:[#allocation8 + $0x6e4] ss:$16 sps:$4 sm:$0xff]  }
 0x72c   :  { %13373 = vmatpush1.bf16.msra.mxu0 %v16651_v34  ;;  %13457 = vmatmul.mubr.bf16.vlgmr.msra.gmra.mrb[12].mxu1 %v17655_v21  ;;  %v2020_v21 = vsub.s32 5, %v17355_v47  ;;  %v16678_v34 = vld [vmem:[#allocation8 + $0x3c8] ss:$16 sps:$4 sm:$0xff]  }
 0x72d   :  { %13383 = vmatprep.subr.bf16.mxu0 %v16707_v35  ;;  %13466 = vmatpush1.bf16.msra.mxu1 %v16618_v37  ;;  %v16683_v35 = vld [vmem:[#allocation8 + $0x3ec] ss:$16 sps:$4 sm:$0xff]   ;;  %v16747_v37 = vld [vmem:[#allocation8 + $0x6e0] ss:$16 sps:$4 sm:$0xff]  }
 0x72e   :  { %13497 = vmatprep.mubr.bf16.mxu1 %v17657_v55  ;;  %13467 = vmatprep.subr.bf16.mxu1 %v16626_v48  ;;  %v2017_v55 = vrot.slane %v17648_v20, %v2016_v28  ;;  %v2021_v7 = vrot.slane %v17648_v20, %v2020_v21  ;;  %v16662_v20 = vld [vmem:[#allocation8 + $0x30c] ss:$16 sps:$4 sm:$0xff]   ;;  %v16755_v48 = vld [vmem:[#allocation8 + $0x704] ss:$16 sps:$4 sm:$0xff]   ;;  %v16687_v21 = vld [vmem:[#allocation8 + $0x428] ss:$16 sps:$4 sm:$0xff]  }
 0x72f   :  { %v16767_v28 = vld [vmem:[#allocation8 + $0x744] ss:$16 sps:$4 sm:$0xff]  }
 0x731   :  { %13468 = vmatpush1.bf16.msra.mxu1 %v16624_v1  ;;  %v16681_v1 = vld [vmem:[#allocation8 + $0x3e8] ss:$16 sps:$4 sm:$0xff]  }
 0x732   :  { %13469 = vmatprep.subr.bf16.mxu1 %v16632_v39  ;;  %v16686_v39 = vld [vmem:[#allocation8 + $0x40c] ss:$16 sps:$4 sm:$0xff]  }
 0x735   :  { %13470 = vmatpush1.bf16.msra.mxu1 %v16630_v40  ;;  %v16753_v40 = vld [vmem:[#allocation8 + $0x700] ss:$16 sps:$4 sm:$0xff]  }
 0x736   :  { %13471 = vmatprep.subr.bf16.mxu1 %v16638_v36  ;;  %v16761_v36 = vld [vmem:[#allocation8 + $0x724] ss:$16 sps:$4 sm:$0xff]  }
 0x739   :  { %13472 = vmatpush1.bf16.msra.mxu1 %v16636_v32  ;;  %v16684_v32 = vld [vmem:[#allocation8 + $0x408] ss:$16 sps:$4 sm:$0xff]  }
 0x73a   :  { %13473 = vmatprep.subr.bf16.mxu1 %v16644_v27  ;;  %v16689_v27 = vld [vmem:[#allocation8 + $0x42c] ss:$16 sps:$4 sm:$0xff]  }
 0x73d   :  { %13474 = vmatpush1.bf16.msra.mxu1 %v16642_v11  ;;  %v16759_v11 = vld [vmem:[#allocation8 + $0x720] ss:$16 sps:$4 sm:$0xff]  }
 0x73e   :  { %13475 = vmatprep.subr.bf16.mxu1 %v16650_v8  ;;  %v16692_v8 = vld [vmem:[#allocation8 + $0x44c] ss:$16 sps:$4 sm:$0xff]  }
 0x741   :  { %13476 = vmatpush1.bf16.msra.mxu1 %v16648_v41  ;;  %v16773_v41 = vld [vmem:[#allocation8 + $0x764] ss:$16 sps:$4 sm:$0xff]  }
 0x742   :  { %v11187_v16 = vpop.f32.mrb[4].mxu0  ;;  %13477 = vmatprep.subr.bf16.mxu1 %v16656_v56  ;;  %v16695_v56 = vld [vmem:[#allocation8 + $0x46c] ss:$16 sps:$4 sm:$0xff]  }
 0x743   :  { %v16176_v15 = vadd.f32 %v11187_v16, %v2017_v55  ;;  %v11189_v42 = vpop.f32.mrb[5].mxu0  ;;  %v16765_v55 = vld [vmem:[#allocation8 + $0x740] ss:$16 sps:$4 sm:$0xff]  }
 0x744   :  { %v16177_v33 = vadd.f32 %v11189_v42, %v2021_v7  ;;  %v11191_v46 = vpop.f32.mrb[6].mxu0  ;;  %v16690_v7 = vld [vmem:[#allocation8 + $0x448] ss:$16 sps:$4 sm:$0xff]   ;;  %v16771_v16 = vld [vmem:[#allocation8 + $0x760] ss:$16 sps:$4 sm:$0xff]  }
 0x745   :  { %v11690_v6 = vmax.f32 %v16176_v15, 0.0  ;;  %v11192_v14 = vpop.f32.mrb[7].mxu0  ;;  %13478 = vmatpush1.bf16.msra.mxu1 %v16654_v9  ;;  %v16779_v15 = vld [vmem:[#allocation8 + $0x784] ss:$16 sps:$4 sm:$0xff]   ;;  %v16698_v42 = vld [vmem:[#allocation8 + $0x48c] ss:$16 sps:$4 sm:$0xff]  }
 0x746   :  { %v11691_v52 = vmax.f32 %v16177_v33, 0.0  ;;  %13479 = vmatprep.subr.bf16.mxu1 %v16659_v51  ;;  %v16777_v9 = vld [vmem:[#allocation8 + $0x780] ss:$16 sps:$4 sm:$0xff]   ;;  %v16785_v33 = vld [vmem:[#allocation8 + $0x7a4] ss:$16 sps:$4 sm:$0xff]  }
 0x747   :  { %v17681_v38 = vpack.c.bf16 %v11690_v6, %v11690_v6  ;;  %v16696_v46 = vld [vmem:[#allocation8 + $0x488] ss:$16 sps:$4 sm:$0xff]   ;;  %v16701_v51 = vld [vmem:[#allocation8 + $0x4ac] ss:$16 sps:$4 sm:$0xff]   ;;  %v16783_v6 = vld [vmem:[#allocation8 + $0x7a0] ss:$16 sps:$4 sm:$0xff]  }
 0x748   :  { %v17679_v57 = vpack.c.bf16 %v11691_v52, %v11691_v52  ;;  %v16791_v14 = vld [vmem:[#allocation8 + $0x7c4] ss:$16 sps:$4 sm:$0xff]   ;;  %v16699_v52 = vld [vmem:[#allocation8 + $0x4a8] ss:$16 sps:$4 sm:$0xff]  }
 0x749   :  { %13480 = vmatpush1.bf16.msra.mxu1 %v16657_v59  ;;  %v16704_v59 = vld [vmem:[#allocation8 + $0x4cc] ss:$16 sps:$4 sm:$0xff]  }
 0x74a   :  { %13374 = vmatprep.mubr.bf16.mxu0 %v17679_v57  ;;  %13481 = vmatprep.subr.bf16.mxu1 %v16662_v20  ;;  %v16797_v20 = vld [vmem:[#allocation8 + $0x7e4] ss:$16 sps:$4 sm:$0xff]  }
 0x74b   :  { %13375 = vmatmul.mubr.bf16.vlgmr.msra.gmra.mrb[8].mxu0 %v17681_v38 }
 0x74c   :  { %13384 = vmatpush1.bf16.msra.mxu0 %v16705_v12  ;;  %v16702_v12 = vld [vmem:[#allocation8 + $0x4c8] ss:$16 sps:$4 sm:$0xff]  }
 0x74d   :  { %13385 = vmatprep.subr.bf16.mxu0 %v16713_v45  ;;  %13482 = vmatpush1.bf16.msra.mxu1 %v16660_v23  ;;  %v16710_v45 = vld [vmem:[#allocation8 + $0x4ec] ss:$16 sps:$4 sm:$0xff]   ;;  %v16795_v23 = vld [vmem:[#allocation8 + $0x7e0] ss:$16 sps:$4 sm:$0xff]  }
 0x74e   :  { %13483 = vmatprep.subr.bf16.mxu1 %v16665_v50  ;;  %v16830_v50 = vld [vmem:[#allocation11 + $0x4] ss:$8 sps:$4 sm:$0xff]  }
 0x750   :  { %13386 = vmatpush1.bf16.msra.mxu0 %v16711_v60  ;;  %v16708_v60 = vld [vmem:[#allocation8 + $0x4e8] ss:$16 sps:$4 sm:$0xff]  }
 0x751   :  { %13387 = vmatprep.subr.bf16.mxu0 %v16719_v13  ;;  %13484 = vmatpush1.bf16.msra.mxu1 %v16663_v61  ;;  %v16716_v13 = vld [vmem:[#allocation8 + $0x50c] ss:$16 sps:$4 sm:$0xff]   ;;  %v16714_v61 = vld [vmem:[#allocation8 + $0x508] ss:$16 sps:$4 sm:$0xff]  }
 0x752   :  { %13485 = vmatprep.subr.bf16.mxu1 %v16668_v2  ;;  %v16722_v2 = vld [vmem:[#allocation8 + $0x52c] ss:$16 sps:$4 sm:$0xff]  }
 0x754   :  { %13388 = vmatpush1.bf16.msra.mxu0 %v16717_v62  ;;  %v16720_v62 = vld [vmem:[#allocation8 + $0x528] ss:$16 sps:$4 sm:$0xff]  }
 0x755   :  { %13389 = vmatprep.subr.bf16.mxu0 %v16725_v0  ;;  %13486 = vmatpush1.bf16.msra.mxu1 %v16666_v63  ;;  %v16728_v0 = vld [vmem:[#allocation8 + $0x54c] ss:$16 sps:$4 sm:$0xff]   ;;  %v16726_v63 = vld [vmem:[#allocation8 + $0x548] ss:$16 sps:$4 sm:$0xff]  }
 0x756   :  { %13487 = vmatprep.subr.bf16.mxu1 %v16671_v10  ;;  %v16734_v10 = vld [vmem:[#allocation8 + $0x56c] ss:$16 sps:$4 sm:$0xff]  }
 0x758   :  { %13390 = vmatpush1.bf16.msra.mxu0 %v16723_v44  ;;  %v16732_v44 = vld [vmem:[#allocation8 + $0x568] ss:$16 sps:$4 sm:$0xff]  }
 0x759   :  { %13391 = vmatprep.subr.bf16.mxu0 %v16731_v26  ;;  %13488 = vmatpush1.bf16.msra.mxu1 %v16669_v19  ;;  %v16740_v26 = vld [vmem:[#allocation8 + $0x58c] ss:$16 sps:$4 sm:$0xff]   ;;  %v16738_v19 = vld [vmem:[#allocation8 + $0x588] ss:$16 sps:$4 sm:$0xff]  }
 0x75a   :  { %13489 = vmatprep.subr.bf16.mxu1 %v16674_v18  ;;  %v16746_v18 = vld [vmem:[#allocation8 + $0x5ac] ss:$16 sps:$4 sm:$0xff]  }
 0x75c   :  { %13392 = vmatpush1.bf16.msra.mxu0 %v16729_v43  ;;  %v16744_v43 = vld [vmem:[#allocation8 + $0x5a8] ss:$16 sps:$4 sm:$0xff]  }
 0x75d   :  { %13393 = vmatprep.subr.bf16.mxu0 %v16737_v24  ;;  %13490 = vmatpush1.bf16.msra.mxu1 %v16672_v25  ;;  %v16752_v24 = vld [vmem:[#allocation8 + $0x5cc] ss:$16 sps:$4 sm:$0xff]   ;;  %v16750_v25 = vld [vmem:[#allocation8 + $0x5c8] ss:$16 sps:$4 sm:$0xff]  }
 0x75e   :  { %13491 = vmatprep.subr.bf16.mxu1 %v16677_v58  ;;  %v16758_v58 = vld [vmem:[#allocation8 + $0x5ec] ss:$16 sps:$4 sm:$0xff]  }
 0x760   :  { %13394 = vmatpush1.bf16.msra.mxu0 %v16735_v30  ;;  %v16756_v30 = vld [vmem:[#allocation8 + $0x5e8] ss:$16 sps:$4 sm:$0xff]  }
 0x761   :  { %13395 = vmatprep.subr.bf16.mxu0 %v16743_v4  ;;  %13492 = vmatpush1.bf16.msra.mxu1 %v16675_v17  ;;  %v16764_v4 = vld [vmem:[#allocation8 + $0x60c] ss:$16 sps:$4 sm:$0xff]   ;;  %v16762_v17 = vld [vmem:[#allocation8 + $0x608] ss:$16 sps:$4 sm:$0xff]  }
 0x762   :  { %13493 = vmatprep.subr.bf16.mxu1 %v16680_v53  ;;  %v16770_v53 = vld [vmem:[#allocation8 + $0x62c] ss:$16 sps:$4 sm:$0xff]  }
 0x764   :  { %13396 = vmatpush1.bf16.msra.mxu0 %v16741_v54  ;;  %v16768_v54 = vld [vmem:[#allocation8 + $0x628] ss:$16 sps:$4 sm:$0xff]  }
 0x765   :  { %13397 = vmatprep.subr.bf16.mxu0 %v16749_v5  ;;  %13494 = vmatpush1.bf16.msra.mxu1 %v16678_v34  ;;  %v16776_v5 = vld [vmem:[#allocation8 + $0x64c] ss:$16 sps:$4 sm:$0xff]   ;;  %v16774_v34 = vld [vmem:[#allocation8 + $0x648] ss:$16 sps:$4 sm:$0xff]  }
 0x766   :  { %13495 = vmatprep.subr.bf16.mxu1 %v16683_v35  ;;  %v16782_v35 = vld [vmem:[#allocation8 + $0x66c] ss:$16 sps:$4 sm:$0xff]  }
 0x768   :  { %13398 = vmatpush1.bf16.msra.mxu0 %v16747_v37  ;;  %v16780_v37 = vld [vmem:[#allocation8 + $0x668] ss:$16 sps:$4 sm:$0xff]  }
 0x769   :  { %13399 = vmatprep.subr.bf16.mxu0 %v16755_v48  ;;  %13496 = vmatpush1.bf16.msra.mxu1 %v16681_v1  ;;  %v16788_v48 = vld [vmem:[#allocation8 + $0x68c] ss:$16 sps:$4 sm:$0xff]   ;;  %v2024_v1 = vsub.s32 6, %v17355_v47 }
 0x76a   :  { %13506 = vmatprep.subr.bf16.mxu1 %v16686_v39  ;;  %v16786_v39 = vld [vmem:[#allocation8 + $0x688] ss:$16 sps:$4 sm:$0xff]  }
 0x76c   :  { %13400 = vmatpush1.bf16.msra.mxu0 %v16753_v40  ;;  %13498 = vmatmul.mubr.bf16.vlgmr.msra.gmra.mrb[12].mxu1 %v17668_v31  ;;  %v16693_v31 = vld [vmem:[#allocation8 + $0x468] ss:$16 sps:$4 sm:$0xff]   ;;  %v2028_v40 = vsub.s32 7, %v17355_v47  ;;  %v16938_v47 = vld [vmem:[#allocation14 + $0x78] sm:$0xff]  }
 0x76d   :  { %13401 = vmatprep.subr.bf16.mxu0 %v16761_v36  ;;  %13507 = vmatpush1.bf16.msra.mxu1 %v16684_v32  ;;  %v16941_v36 = vld [vmem:[#allocation7] sm:$0xff] }
 0x76e   :  { %13538 = vmatprep.mubr.bf16.mxu1 %v17679_v57  ;;  %13508 = vmatprep.subr.bf16.mxu1 %v16689_v27  ;;  %v16789_v57 = vld [vmem:[#allocation8 + $0x7c0] ss:$16 sps:$4 sm:$0xff]   ;;  %v2025_v32 = vrot.slane %v16941_v36, %v2024_v1  ;;  %v2029_v27 = vrot.slane %v16941_v36, %v2028_v40 }
 0x76f   :  { %v16863_v1 = vld [vmem:[#allocation11 + $0xb4] ss:$8 sps:$4 sm:$0xff]   ;;  %v16866_v40 = vld [vmem:[#allocation11 + $0xc4] ss:$8 sps:$4 sm:$0xff]  }
 0x770   :  { %13402 = vmatpush1.bf16.msra.mxu0 %v16759_v11  ;;  %v16792_v11 = vld [vmem:[#allocation8 + $0x6a8] ss:$16 sps:$4 sm:$0xff]  }
 0x771   :  { %13403 = vmatprep.subr.bf16.mxu0 %v16767_v28  ;;  %13509 = vmatpush1.bf16.msra.mxu1 %v16687_v21  ;;  %v16800_v28 = vld [vmem:[#allocation8 + $0x6cc] ss:$16 sps:$4 sm:$0xff]   ;;  %v16869_v36 = vld [vmem:[#allocation11 + $0xd4] ss:$8 sps:$4 sm:$0xff]  }
 0x772   :  { %13510 = vmatprep.subr.bf16.mxu1 %v16692_v8 }
 0x774   :  { %13404 = vmatpush1.bf16.msra.mxu0 %v16765_v55 }
 0x775   :  { %13405 = vmatprep.subr.bf16.mxu0 %v16773_v41  ;;  %13511 = vmatpush1.bf16.msra.mxu1 %v16690_v7 }
 0x776   :  { %13512 = vmatprep.subr.bf16.mxu1 %v16695_v56  ;;  %v16798_v56 = vld [vmem:[#allocation8 + $0x6c8] ss:$16 sps:$4 sm:$0xff]  }
 0x778   :  { %13406 = vmatpush1.bf16.msra.mxu0 %v16771_v16 }
 0x779   :  { %13407 = vmatprep.subr.bf16.mxu0 %v16779_v15  ;;  %13513 = vmatpush1.bf16.msra.mxu1 %v16693_v31  ;;  %v16803_v31 = vld [vmem:[#allocation8 + $0x6ec] ss:$16 sps:$4 sm:$0xff]  }
 0x77a   :  { %13514 = vmatprep.subr.bf16.mxu1 %v16698_v42 }
 0x77c   :  { %13408 = vmatpush1.bf16.msra.mxu0 %v16777_v9 }
 0x77d   :  { %13409 = vmatprep.subr.bf16.mxu0 %v16785_v33  ;;  %13515 = vmatpush1.bf16.msra.mxu1 %v16696_v46  ;;  %v16801_v33 = vld [vmem:[#allocation8 + $0x6e8] ss:$16 sps:$4 sm:$0xff]   ;;  %v16828_v46 = vld [vmem:[#allocation11] ss:$8 sps:$4 sm:$0xff]  }
 0x77e   :  { %13516 = vmatprep.subr.bf16.mxu1 %v16701_v51 }
 0x780   :  { %13410 = vmatpush1.bf16.msra.mxu0 %v16783_v6  ;;  %v16806_v6 = vld [vmem:[#allocation8 + $0x70c] ss:$16 sps:$4 sm:$0xff]  }
 0x781   :  { %13411 = vmatprep.subr.bf16.mxu0 %v16791_v14  ;;  %13517 = vmatpush1.bf16.msra.mxu1 %v16699_v52  ;;  %v16833_v14 = vld [vmem:[#allocation11 + $0x14] ss:$8 sps:$4 sm:$0xff]  }
 0x782   :  { %13518 = vmatprep.subr.bf16.mxu1 %v16704_v59  ;;  %v16804_v52 = vld [vmem:[#allocation8 + $0x708] ss:$16 sps:$4 sm:$0xff]   ;;  %v16831_v59 = vld [vmem:[#allocation11 + $0x10] ss:$8 sps:$4 sm:$0xff]  }
 0x784   :  { %13412 = vmatpush1.bf16.msra.mxu0 %v16789_v57  ;;  %v16809_v57 = vld [vmem:[#allocation8 + $0x72c] ss:$16 sps:$4 sm:$0xff]  }
 0x785   :  { %13413 = vmatprep.subr.bf16.mxu0 %v16797_v20  ;;  %13519 = vmatpush1.bf16.msra.mxu1 %v16702_v12  ;;  %v16836_v20 = vld [vmem:[#allocation11 + $0x24] ss:$8 sps:$4 sm:$0xff]  }
 0x786   :  { %13520 = vmatprep.subr.bf16.mxu1 %v16710_v45  ;;  %v16807_v12 = vld [vmem:[#allocation8 + $0x728] ss:$16 sps:$4 sm:$0xff]   ;;  %v16834_v45 = vld [vmem:[#allocation11 + $0x20] ss:$8 sps:$4 sm:$0xff]  }
 0x788   :  { %13414 = vmatpush1.bf16.msra.mxu0 %v16795_v23  ;;  %v16812_v23 = vld [vmem:[#allocation8 + $0x74c] ss:$16 sps:$4 sm:$0xff]  }
 0x789   :  { %13992 = vmatprep.subr.bf16.mxu0 %v16830_v50  ;;  %13521 = vmatpush1.bf16.msra.mxu1 %v16708_v60  ;;  %v16839_v50 = vld [vmem:[#allocation11 + $0x34] ss:$8 sps:$4 sm:$0xff]  }
 0x78a   :  { %13522 = vmatprep.subr.bf16.mxu1 %v16716_v13  ;;  %v16810_v60 = vld [vmem:[#allocation8 + $0x748] ss:$16 sps:$4 sm:$0xff]   ;;  %v16837_v13 = vld [vmem:[#allocation11 + $0x30] ss:$8 sps:$4 sm:$0xff]  }
 0x78d   :  { %13523 = vmatpush1.bf16.msra.mxu1 %v16714_v61  ;;  %v16815_v61 = vld [vmem:[#allocation8 + $0x76c] ss:$16 sps:$4 sm:$0xff]  }
 0x78e   :  { %13524 = vmatprep.subr.bf16.mxu1 %v16722_v2  ;;  %v16842_v2 = vld [vmem:[#allocation11 + $0x44] ss:$8 sps:$4 sm:$0xff]  }
 0x791   :  { %13525 = vmatpush1.bf16.msra.mxu1 %v16720_v62  ;;  %v16813_v62 = vld [vmem:[#allocation8 + $0x768] ss:$16 sps:$4 sm:$0xff]  }
 0x792   :  { %13526 = vmatprep.subr.bf16.mxu1 %v16728_v0  ;;  %v16840_v0 = vld [vmem:[#allocation11 + $0x40] ss:$8 sps:$4 sm:$0xff]  }
 0x795   :  { %13527 = vmatpush1.bf16.msra.mxu1 %v16726_v63  ;;  %v16818_v63 = vld [vmem:[#allocation8 + $0x78c] ss:$16 sps:$4 sm:$0xff]  }
 0x796   :  { %13528 = vmatprep.subr.bf16.mxu1 %v16734_v10  ;;  %v16845_v10 = vld [vmem:[#allocation11 + $0x54] ss:$8 sps:$4 sm:$0xff]  }
 0x799   :  { %13529 = vmatpush1.bf16.msra.mxu1 %v16732_v44  ;;  %v16816_v44 = vld [vmem:[#allocation8 + $0x788] ss:$16 sps:$4 sm:$0xff]  }
 0x79a   :  { %13530 = vmatprep.subr.bf16.mxu1 %v16740_v26  ;;  %v16843_v26 = vld [vmem:[#allocation11 + $0x50] ss:$8 sps:$4 sm:$0xff]  }
 0x79d   :  { %13531 = vmatpush1.bf16.msra.mxu1 %v16738_v19  ;;  %v16821_v19 = vld [vmem:[#allocation8 + $0x7ac] ss:$16 sps:$4 sm:$0xff]  }
 0x79e   :  { %13532 = vmatprep.subr.bf16.mxu1 %v16746_v18  ;;  %v16848_v18 = vld [vmem:[#allocation11 + $0x64] ss:$8 sps:$4 sm:$0xff]  }
 0x7a1   :  { %13533 = vmatpush1.bf16.msra.mxu1 %v16744_v43  ;;  %v16819_v43 = vld [vmem:[#allocation8 + $0x7a8] ss:$16 sps:$4 sm:$0xff]  }
 0x7a2   :  { %13534 = vmatprep.subr.bf16.mxu1 %v16752_v24  ;;  %v16846_v24 = vld [vmem:[#allocation11 + $0x60] ss:$8 sps:$4 sm:$0xff]  }
 0x7a5   :  { %13535 = vmatpush1.bf16.msra.mxu1 %v16750_v25  ;;  %v16824_v25 = vld [vmem:[#allocation8 + $0x7cc] ss:$16 sps:$4 sm:$0xff]  }
 0x7a6   :  { %13536 = vmatprep.subr.bf16.mxu1 %v16758_v58  ;;  %v16851_v58 = vld [vmem:[#allocation11 + $0x74] ss:$8 sps:$4 sm:$0xff]  }
 0x7a9   :  { %13537 = vmatpush1.bf16.msra.mxu1 %v16756_v30  ;;  %v16822_v30 = vld [vmem:[#allocation8 + $0x7c8] ss:$16 sps:$4 sm:$0xff]  }
 0x7aa   :  { %13547 = vmatprep.subr.bf16.mxu1 %v16764_v4  ;;  %v16849_v4 = vld [vmem:[#allocation11 + $0x70] ss:$8 sps:$4 sm:$0xff]  }
 0x7ac   :  { %13539 = vmatmul.mubr.bf16.vlgmr.msra.gmra.mrb[12].mxu1 %v17681_v38  ;;  %v16794_v38 = vld [vmem:[#allocation8 + $0x6ac] ss:$16 sps:$4 sm:$0xff]  }
 0x7ad   :  { %13548 = vmatpush1.bf16.msra.mxu1 %v16762_v17  ;;  %v16827_v17 = vld [vmem:[#allocation8 + $0x7ec] ss:$16 sps:$4 sm:$0xff]  }
 0x7ae   :  { %13549 = vmatprep.subr.bf16.mxu1 %v16770_v53  ;;  %v16854_v53 = vld [vmem:[#allocation11 + $0x84] ss:$8 sps:$4 sm:$0xff]  }
 0x7b1   :  { %13550 = vmatpush1.bf16.msra.mxu1 %v16768_v54  ;;  %v16825_v54 = vld [vmem:[#allocation8 + $0x7e8] ss:$16 sps:$4 sm:$0xff]  }
 0x7b2   :  { %13551 = vmatprep.subr.bf16.mxu1 %v16776_v5  ;;  %v16852_v5 = vld [vmem:[#allocation11 + $0x80] ss:$8 sps:$4 sm:$0xff]  }
 0x7b5   :  { %13552 = vmatpush1.bf16.msra.mxu1 %v16774_v34  ;;  %v16857_v34 = vld [vmem:[#allocation11 + $0x94] ss:$8 sps:$4 sm:$0xff]  }
 0x7b6   :  { %13553 = vmatprep.subr.bf16.mxu1 %v16782_v35  ;;  %v16855_v35 = vld [vmem:[#allocation11 + $0x90] ss:$8 sps:$4 sm:$0xff]  }
 0x7b9   :  { %13554 = vmatpush1.bf16.msra.mxu1 %v16780_v37  ;;  %v16860_v37 = vld [vmem:[#allocation11 + $0xa4] ss:$8 sps:$4 sm:$0xff]  }
 0x7ba   :  { %13555 = vmatprep.subr.bf16.mxu1 %v16788_v48  ;;  %v16858_v48 = vld [vmem:[#allocation11 + $0xa0] ss:$8 sps:$4 sm:$0xff]  }
 0x7bd   :  { %13556 = vmatpush1.bf16.msra.mxu1 %v16786_v39  ;;  %v16861_v39 = vld [vmem:[#allocation11 + $0xb0] ss:$8 sps:$4 sm:$0xff]  }
 0x7be   :  { %13557 = vmatprep.subr.bf16.mxu1 %v16794_v38  ;;  %v16864_v38 = vld [vmem:[#allocation11 + $0xc0] ss:$8 sps:$4 sm:$0xff]  }
 0x7bf   :  { %v11679_v21 = vpop.f32.mrb[8].mxu1 }
 0x7c0   :  { %v16178_v8 = vadd.f32 %v11679_v21, %v2025_v32  ;;  %v11681_v55 = vpop.f32.mrb[9].mxu1  ;;  %v16867_v32 = vld [vmem:[#allocation11 + $0xd0] ss:$8 sps:$4 sm:$0xff]  }
 0x7c1   :  { %v16179_v41 = vadd.f32 %v11681_v55, %v2029_v27  ;;  %v11683_v7 = vpop.f32.mrb[10].mxu1  ;;  %13558 = vmatpush1.bf16.msra.mxu1 %v16792_v11  ;;  %v16872_v27 = vld [vmem:[#allocation11 + $0xe4] ss:$8 sps:$4 sm:$0xff]   ;;  %v16870_v11 = vld [vmem:[#allocation11 + $0xe0] ss:$8 sps:$4 sm:$0xff]  }
 0x7c2   :  { %v11692_v16 = vmax.f32 %v16178_v8, 0.0  ;;  %v11684_v15 = vpop.f32.mrb[11].mxu1  ;;  %13559 = vmatprep.subr.bf16.mxu1 %v16800_v28  ;;  %v16875_v28 = vld [vmem:[#allocation11 + $0xf4] ss:$8 sps:$4 sm:$0xff]   ;;  %v16873_v21 = vld [vmem:[#allocation11 + $0xf0] ss:$8 sps:$4 sm:$0xff]  }
 0x7c3   :  { %v11693_v42 = vmax.f32 %v16179_v41, 0.0  ;;  %v16878_v8 = vld [vmem:[#allocation11 + $0x104] ss:$8 sps:$4 sm:$0xff]   ;;  %v16929_v15 = vld [vmem:[#allocation14 + $0x10] sm:$0xff]  }
 0x7c4   :  { %v17690_v51 = vpack.c.bf16 %v11692_v16, %v11692_v16  ;;  %v16924_v55 = vld [vmem:[#allocation14 + $0x40] sm:$0xff]   ;;  %v16926_v7 = vld [vmem:[#allocation14 + $0x48] sm:$0xff]   ;;  %v16928_v16 = vld [vmem:[#allocation14 + $0x50] sm:$0xff]  }
 0x7c5   :  { %v11701_v9 = vpack.c.bf16 %v11693_v42, %v11693_v42  ;;  %13560 = vmatpush1.bf16.msra.mxu1 %v16798_v56  ;;  %v16925_v41 = vld [vmem:[#allocation14] sm:$0xff]   ;;  %v16927_v56 = vld [vmem:[#allocation14 + $0x8] sm:$0xff]   ;;  %v16931_v42 = vld [vmem:[#allocation14 + $0x18] sm:$0xff]  }
 0x7c6   :  { %13561 = vmatprep.subr.bf16.mxu1 %v16803_v31  ;;  %v16930_v31 = vld [vmem:[#allocation14 + $0x58] sm:$0xff]  }
 0x7c7   :  { %13415 = vmatprep.mubr.bf16.mxu0 %v11701_v9  ;;  %13579 = vmatprep.mubr.bf16.mxu1 %v11701_v9  ;;  %v16932_v9 = vld [vmem:[#allocation14 + $0x60] sm:$0xff]  }
 0x7c8   :  { %13416 = vmatmul.mubr.bf16.vlgmr.msra.gmra.mrb[8].mxu0 %v17690_v51 }
 0x7c9   :  { %13562 = vmatpush1.bf16.msra.mxu1 %v16801_v33  ;;  %13993 = vmatpush1.bf16.msra.mxu0 %v16828_v46  ;;  %v16933_v33 = vld [vmem:[#allocation14 + $0x20] sm:$0xff]   ;;  %v16934_v46 = vld [vmem:[#allocation14 + $0x68] sm:$0xff]  }
 0x7ca   :  { %13563 = vmatprep.subr.bf16.mxu1 %v16806_v6  ;;  %13994 = vmatprep.subr.bf16.mxu0 %v16833_v14  ;;  %v17694_v6 = vld [vmem:[#allocation10] sm:$0xf] }
 0x7cb   :  { %v11963_v14 = vrot.slane %v17694_v6, %v17591_v22 }
 0x7cd   :  { %13564 = vmatpush1.bf16.msra.mxu1 %v16804_v52  ;;  %13995 = vmatpush1.bf16.msra.mxu0 %v16831_v59  ;;  %v11967_v52 = vrot.slane %v17694_v6, %v17594_v29 }
 0x7ce   :  { %13565 = vmatprep.subr.bf16.mxu1 %v16809_v57  ;;  %13996 = vmatprep.subr.bf16.mxu0 %v16836_v20 }
 0x7d1   :  { %13566 = vmatpush1.bf16.msra.mxu1 %v16807_v12  ;;  %13997 = vmatpush1.bf16.msra.mxu0 %v16834_v45 }
 0x7d2   :  { %13567 = vmatprep.subr.bf16.mxu1 %v16812_v23  ;;  %13998 = vmatprep.subr.bf16.mxu0 %v16839_v50 }
 0x7d5   :  { %13568 = vmatpush1.bf16.msra.mxu1 %v16810_v60  ;;  %13999 = vmatpush1.bf16.msra.mxu0 %v16837_v13 }
 0x7d6   :  { %13569 = vmatprep.subr.bf16.mxu1 %v16815_v61  ;;  %14000 = vmatprep.subr.bf16.mxu0 %v16842_v2  ;;  %v16876_v61 = vld [vmem:[#allocation11 + $0x100] ss:$8 sps:$4 sm:$0xff]  }
 0x7d9   :  { %13570 = vmatpush1.bf16.msra.mxu1 %v16813_v62  ;;  %14001 = vmatpush1.bf16.msra.mxu0 %v16840_v0  ;;  %v16881_v62 = vld [vmem:[#allocation11 + $0x114] ss:$8 sps:$4 sm:$0xff]   ;;  %v16879_v0 = vld [vmem:[#allocation11 + $0x110] ss:$8 sps:$4 sm:$0xff]  }
 0x7da   :  { %13571 = vmatprep.subr.bf16.mxu1 %v16818_v63  ;;  %14002 = vmatprep.subr.bf16.mxu0 %v16845_v10  ;;  %v16884_v63 = vld [vmem:[#allocation11 + $0x124] ss:$8 sps:$4 sm:$0xff]   ;;  %v16882_v10 = vld [vmem:[#allocation11 + $0x120] ss:$8 sps:$4 sm:$0xff]  }
 0x7dd   :  { %13572 = vmatpush1.bf16.msra.mxu1 %v16816_v44  ;;  %14003 = vmatpush1.bf16.msra.mxu0 %v16843_v26  ;;  %v16887_v44 = vld [vmem:[#allocation11 + $0x134] ss:$8 sps:$4 sm:$0xff]   ;;  %v16885_v26 = vld [vmem:[#allocation11 + $0x130] ss:$8 sps:$4 sm:$0xff]  }
 0x7de   :  { %13573 = vmatprep.subr.bf16.mxu1 %v16821_v19  ;;  %14004 = vmatprep.subr.bf16.mxu0 %v16848_v18  ;;  %v16890_v19 = vld [vmem:[#allocation11 + $0x144] ss:$8 sps:$4 sm:$0xff]   ;;  %v16888_v18 = vld [vmem:[#allocation11 + $0x140] ss:$8 sps:$4 sm:$0xff]  }
 0x7e1   :  { %13574 = vmatpush1.bf16.msra.mxu1 %v16819_v43  ;;  %14005 = vmatpush1.bf16.msra.mxu0 %v16846_v24  ;;  %v16893_v43 = vld [vmem:[#allocation11 + $0x154] ss:$8 sps:$4 sm:$0xff]   ;;  %v16891_v24 = vld [vmem:[#allocation11 + $0x150] ss:$8 sps:$4 sm:$0xff]  }
 0x7e2   :  { %13575 = vmatprep.subr.bf16.mxu1 %v16824_v25  ;;  %14006 = vmatprep.subr.bf16.mxu0 %v16851_v58  ;;  %v16896_v25 = vld [vmem:[#allocation11 + $0x164] ss:$8 sps:$4 sm:$0xff]   ;;  %v16894_v58 = vld [vmem:[#allocation11 + $0x160] ss:$8 sps:$4 sm:$0xff]  }
 0x7e5   :  { %13576 = vmatpush1.bf16.msra.mxu1 %v16822_v30  ;;  %14007 = vmatpush1.bf16.msra.mxu0 %v16849_v4  ;;  %v16899_v30 = vld [vmem:[#allocation11 + $0x174] ss:$8 sps:$4 sm:$0xff]   ;;  %v16897_v4 = vld [vmem:[#allocation11 + $0x170] ss:$8 sps:$4 sm:$0xff]  }
 0x7e6   :  { %13577 = vmatprep.subr.bf16.mxu1 %v16827_v17  ;;  %14008 = vmatprep.subr.bf16.mxu0 %v16854_v53  ;;  %v11975_v17 = vrot.slane %v17694_v6, %v2012_v3  ;;  %v16902_v53 = vld [vmem:[#allocation11 + $0x184] ss:$8 sps:$4 sm:$0xff]   ;;  %v16906_v3 = vld [vmem:[#allocation11 + $0x1a0] ss:$8 sps:$4 sm:$0xff]  }
 0x7e9   :  { %13578 = vmatpush1.bf16.msra.mxu1 %v16825_v54  ;;  %14009 = vmatpush1.bf16.msra.mxu0 %v16852_v5 }
 0x7ea   :  { %14010 = vmatprep.subr.bf16.mxu0 %v16857_v34  ;;  %16148 = vmatprep.subr.bf16.mxu1 %v16924_v55  ;;  %v11971_v55 = vrot.slane %v17694_v6, %v2008_v49  ;;  %v16939_v49 = vld [vmem:[#allocation14 + $0x38] sm:$0xff]  }
 0x7ec   :  { %13580 = vmatmul.mubr.bf16.vlgmr.msra.gmra.mrb[12].mxu1 %v17690_v51  ;;  %v16935_v51 = vld [vmem:[#allocation14 + $0x28] sm:$0xff]  }
 0x7ed   :  { %14011 = vmatpush1.bf16.msra.mxu0 %v16855_v35  ;;  %16149 = vmatpush3.bf16.msra.mxu1 %v16925_v41  ;;  %v16920_v41 = vld [vmem:[#allocation11 + $0x1e4] ss:$8 sps:$4 sm:$0xff]  }
 0x7ee   :  { %14012 = vmatprep.subr.bf16.mxu0 %v16860_v37  ;;  %16150 = vmatprep.subr.bf16.mxu1 %v16926_v7  ;;  %v16900_v37 = vld [vmem:[#allocation11 + $0x180] ss:$8 sps:$4 sm:$0xff]  }
 0x7ef   :  { %v16918_v7 = vld [vmem:[#allocation11 + $0x1e0] ss:$8 sps:$4 sm:$0xff]  }
 0x7f1   :  { %14013 = vmatpush1.bf16.msra.mxu0 %v16858_v48  ;;  %16151 = vmatpush3.bf16.msra.mxu1 %v16927_v56 }
 0x7f2   :  { %14014 = vmatprep.subr.bf16.mxu0 %v16863_v1  ;;  %16152 = vmatprep.subr.bf16.mxu1 %v16928_v16  ;;  %v16905_v1 = vld [vmem:[#allocation11 + $0x194] ss:$8 sps:$4 sm:$0xff]  }
 0x7f3   :  { %v16923_v16 = vld [vmem:[#allocation11 + $0x1f4] ss:$8 sps:$4 sm:$0xff]  }
 0x7f5   :  { %14015 = vmatpush1.bf16.msra.mxu0 %v16861_v39  ;;  %16153 = vmatpush3.bf16.msra.mxu1 %v16929_v15  ;;  %v16921_v15 = vld [vmem:[#allocation11 + $0x1f0] ss:$8 sps:$4 sm:$0xff]  }
 0x7f6   :  { %14016 = vmatprep.subr.bf16.mxu0 %v16866_v40  ;;  %16154 = vmatprep.subr.bf16.mxu1 %v16930_v31 }
 0x7f9   :  { %14017 = vmatpush1.bf16.msra.mxu0 %v16864_v38  ;;  %16155 = vmatpush3.bf16.msra.mxu1 %v16931_v42  ;;  %v16903_v38 = vld [vmem:[#allocation11 + $0x190] ss:$8 sps:$4 sm:$0xff]  }
 0x7fa   :  { %14018 = vmatprep.subr.bf16.mxu0 %v16869_v36  ;;  %16156 = vmatprep.subr.bf16.mxu1 %v16932_v9  ;;  %v16908_v36 = vld [vmem:[#allocation11 + $0x1a4] ss:$8 sps:$4 sm:$0xff]   ;;  %v16936_v9 = vld [vmem:[#allocation14 + $0x70] sm:$0xff]  }
 0x7fd   :  { %14019 = vmatpush1.bf16.msra.mxu0 %v16867_v32  ;;  %16157 = vmatpush3.bf16.msra.mxu1 %v16933_v33  ;;  %v16911_v32 = vld [vmem:[#allocation11 + $0x1b4] ss:$8 sps:$4 sm:$0xff]  }
 0x7fe   :  { %14020 = vmatprep.subr.bf16.mxu0 %v16872_v27  ;;  %16158 = vmatprep.subr.bf16.mxu1 %v16934_v46  ;;  %v16909_v27 = vld [vmem:[#allocation11 + $0x1b0] ss:$8 sps:$4 sm:$0xff]   ;;  %v13660_v46 = vld [vmem:[#allocation13] sm:$0x3] }
 0x7ff   :  { %v16937_v33 = vld [vmem:[#allocation14 + $0x30] sm:$0xff]   ;;  %v13669_v6 = vrot.slane %v13660_v46, %v17594_v29 }
 0x801   :  { %14021 = vmatpush1.bf16.msra.mxu0 %v16870_v11  ;;  %16159 = vmatpush3.bf16.msra.mxu1 %v16935_v51  ;;  %v16914_v11 = vld [vmem:[#allocation11 + $0x1c4] ss:$8 sps:$4 sm:$0xff]   ;;  %v13665_v51 = vrot.slane %v13660_v46, %v17591_v22 }
 0x802   :  { %14022 = vmatprep.subr.bf16.mxu0 %v16875_v28  ;;  %v16912_v28 = vld [vmem:[#allocation11 + $0x1c0] ss:$8 sps:$4 sm:$0xff]   ;;  %16160 = vmatprep.subr.bf16.mxu1 %v16936_v9 }
 0x805   :  { %14023 = vmatpush1.bf16.msra.mxu0 %v16873_v21  ;;  %v16917_v21 = vld [vmem:[#allocation11 + $0x1d4] ss:$8 sps:$4 sm:$0xff]   ;;  %16161 = vmatpush3.bf16.msra.mxu1 %v16937_v33 }
 0x806   :  { %14033 = vmatprep.subr.bf16.mxu0 %v16878_v8  ;;  %v16915_v8 = vld [vmem:[#allocation11 + $0x1d0] ss:$8 sps:$4 sm:$0xff]   ;;  %16162 = vmatprep.subr.bf16.mxu1 %v16938_v47 }
 0x809   :  { %16163 = vmatpush3.bf16.msra.mxu1 %v16939_v49 }
 0x89b   :  { %v13417_v59 = vpop.f32.mrb[8].mxu0 }
 0x89c   :  { %v16180_v57 = vadd.f32 %v13417_v59, %v11963_v14  ;;  %v13419_v20 = vpop.f32.mrb[9].mxu0 }
 0x89d   :  { %v16181_v12 = vadd.f32 %v13419_v20, %v11967_v52  ;;  %v13421_v45 = vpop.f32.mrb[10].mxu0 }
 0x89e   :  { %v13588_v23 = vmax.f32 %v16180_v57, 0.0  ;;  %v13422_v50 = vpop.f32.mrb[11].mxu0 }
 0x89f   :  { %v13589_v60 = vmax.f32 %v16181_v12, 0.0 }
 0x8a0   :  { %v13592_v2 = vpack.c.bf16 %v13588_v23, %v13588_v23 }
 0x8a1   :  { %v13593_v13 = vpack.c.bf16 %v13589_v60, %v13589_v60 }
 0x8a3   :  { %14024 = vmatprep.mubr.bf16.mxu0 %v13593_v13 }
 0x8a4   :  { %14025 = vmatmul.mubr.bf16.vlgmr.msra.gmra.mrb[12].mxu0 %v13592_v2 }
 0x8a5   :  { %14034 = vmatpush1.bf16.msra.mxu0 %v16876_v61  ;;  %v16131_v61 = vld [vmem:[#allocation16] ss:$0 sm:$0xff] }
 0x8a6   :  { %14035 = vmatprep.subr.bf16.mxu0 %v16881_v62 }
 0x8a9   :  { %14036 = vmatpush1.bf16.msra.mxu0 %v16879_v0 }
 0x8aa   :  { %14037 = vmatprep.subr.bf16.mxu0 %v16884_v63 }
 0x8ad   :  { %14038 = vmatpush1.bf16.msra.mxu0 %v16882_v10 }
 0x8ae   :  { %14039 = vmatprep.subr.bf16.mxu0 %v16887_v44 }
 0x8b1   :  { %14040 = vmatpush1.bf16.msra.mxu0 %v16885_v26 }
 0x8b2   :  { %14041 = vmatprep.subr.bf16.mxu0 %v16890_v19 }
 0x8b5   :  { %14042 = vmatpush1.bf16.msra.mxu0 %v16888_v18 }
 0x8b6   :  { %14043 = vmatprep.subr.bf16.mxu0 %v16893_v43 }
 0x8b9   :  { %14044 = vmatpush1.bf16.msra.mxu0 %v16891_v24 }
 0x8ba   :  { %14045 = vmatprep.subr.bf16.mxu0 %v16896_v25 }
 0x8bd   :  { %14046 = vmatpush1.bf16.msra.mxu0 %v16894_v58 }
 0x8be   :  { %14047 = vmatprep.subr.bf16.mxu0 %v16899_v30 }
 0x8bf   :  { %v13581_v54 = vpop.f32.mrb[12].mxu1 }
 0x8c0   :  { %v13583_v5 = vpop.f32.mrb[13].mxu1  ;;  %v16182_v56 = vadd.f32 %v13581_v54, %v11971_v55 }
 0x8c1   :  { %v16183_v34 = vadd.f32 %v13583_v5, %v11975_v17  ;;  %14048 = vmatpush1.bf16.msra.mxu0 %v16897_v4  ;;  %v13585_v35 = vpop.f32.mrb[14].mxu1 }
 0x8c2   :  { %v13586_v48 = vpop.f32.mrb[15].mxu1  ;;  %14049 = vmatprep.subr.bf16.mxu0 %v16902_v53  ;;  %v13590_v31 = vmax.f32 %v16182_v56, 0.0 }
 0x8c3   :  { %v13591_v39 = vmax.f32 %v16183_v34, 0.0 }
 0x8c4   :  { %v13594_v42 = vpack.c.bf16 %v13590_v31, %v13590_v31 }
 0x8c5   :  { %v13595_v40 = vpack.c.bf16 %v13591_v39, %v13591_v39  ;;  %14050 = vmatpush1.bf16.msra.mxu0 %v16900_v37 }
 0x8c6   :  { %14051 = vmatprep.subr.bf16.mxu0 %v16905_v1 }
 0x8c7   :  { %14065 = vmatprep.mubr.bf16.mxu0 %v13595_v40 }
 0x8c9   :  { %14052 = vmatpush1.bf16.msra.mxu0 %v16903_v38 }
 0x8ca   :  { %14053 = vmatprep.subr.bf16.mxu0 %v16908_v36 }
 0x8cd   :  { %14054 = vmatpush1.bf16.msra.mxu0 %v16906_v3 }
 0x8ce   :  { %14055 = vmatprep.subr.bf16.mxu0 %v16911_v32 }
 0x8d1   :  { %14056 = vmatpush1.bf16.msra.mxu0 %v16909_v27 }
 0x8d2   :  { %14057 = vmatprep.subr.bf16.mxu0 %v16914_v11 }
 0x8d5   :  { %14058 = vmatpush1.bf16.msra.mxu0 %v16912_v28 }
 0x8d6   :  { %14059 = vmatprep.subr.bf16.mxu0 %v16917_v21 }
 0x8d9   :  { %14060 = vmatpush1.bf16.msra.mxu0 %v16915_v8 }
 0x8da   :  { %14061 = vmatprep.subr.bf16.mxu0 %v16920_v41 }
 0x8dd   :  { %14062 = vmatpush1.bf16.msra.mxu0 %v16918_v7 }
 0x8de   :  { %14063 = vmatprep.subr.bf16.mxu0 %v16923_v16 }
 0x8e1   :  { %14064 = vmatpush1.bf16.msra.mxu0 %v16921_v15 }
 0x8e4   :  { %14066 = vmatmul.mubr.bf16.vlgmr.msra.gmra.mrb[12].mxu0 %v13594_v42 }
 0x9b7   :  { %v14067_v14 = vpop.f32.mrb[12].mxu0 }
 0x9b8   :  { %v16184_v52 = vadd.f32 %v14067_v14, %v13665_v51  ;;  %v14069_v59 = vpop.f32.mrb[13].mxu0 }
 0x9b9   :  { %v16185_v57 = vadd.f32 %v14069_v59, %v13669_v6  ;;  %v14071_v20 = vpop.f32.mrb[14].mxu0 }
 0x9ba   :  { %v14074_v12 = vmax.f32 %v16184_v52, 0.0  ;;  %v14072_v45 = vpop.f32.mrb[15].mxu0 }
 0x9bb   :  { %v14075_v23 = vmax.f32 %v16185_v57, 0.0 }
 0x9bc   :  { %v14076_v60 = vpack.c.bf16 %v14074_v12, %v14074_v12 }
 0x9bd   :  { %v14077_v50 = vpack.c.bf16 %v14075_v23, %v14075_v23 }
 0x9bf   :  { %14245 = vmatprep.mubr.bf16.mxu1 %v14077_v50 }
 0x9c0   :  { %14246 = vmatmul.mubr.bf16.vlgmr.msra.gmra.mrb[16].mxu1 %v14076_v60 }
 0xa93   :  { %v16164_v13 = vpop.f32.mrb[16].mxu1 }
 0xa94   :  { %v16165_v2 = vpop.f32.mrb[17].mxu1 }
 0xa95   :  { %v16166_v62 = vadd.f32 %v16165_v2, %v16164_v13  ;;  %v16167_v0 = vpop.f32.mrb[18].mxu1 }
 0xa96   :  { %v16168_v22 = vpop.f32.mrb[19].mxu1 }
 0xa97   :  { %v14248_v63 = vadd.f32 %v16166_v62, %v16131_v61 }
 0xa99   :  { %14253 = vst [vmem:[#allocation17] sm:$0xff] %v14248_v63 }
 0xa9a   :  { %14258 = vsyncadd [#allocation4], 96  ;;  %s17194_s8 = smov [#allocation17]  }
 0xa9b   :  { %s14259_s30 = sshll.u32 %s17194_s8, 4  ;;  %s14260_s30 = int_to_ptr.vmem [resolvable:$true] %s14259_s30 }
 0xa9c   :  { %s17140_s2 = scalar_lea.vmem %s14260_s30, 32  ;;  %s17144_s11 = scalar_lea.vmem %s14260_s30, 128 }
 0xa9d   :  { %p17141_p2 = scmp.ne.s32.totalorder %s14260_s30, %s17140_s2  ;;  %p17145_p3 = scmp.lt.s32.totalorder %s14260_s30, %s14260_s30 }
 0xa9e   :  { %p17146_p4 = scmp.lt.s32.totalorder %s17144_s11, %s17140_s2 }
 0xaa0   :  { %p17147_p5 = por %p17146_p4, %p17145_p3 }
 0xaa2   :  { %p17148_p6 = pnand %p17147_p5, %p17141_p2 }
 0xaa4   :  { %17151 = shalt.err (!%p17148_p6)
}
 0xaa5   :  { %s17152_s10 = scalar_lea.hbm %s17731_s9, 32 }
 0xaa6   :  { %p17153_p7 = scmp.ne.s32.totalorder %s17731_s9, %s17152_s10  ;;  %p17156_p8 = scmp.lt.u32.totalorder %s17152_s10, %s17731_s9 }
 0xaa8   :  { %p17158_p9 = pnand %p17156_p8, %p17153_p7 }
 0xaaa   :  { %17161 = shalt.err (!%p17158_p9)
}
 0xaab   :  { %s17195_s16 = smov 2  }
 0xaac   :  { %14265 = dma.vmem_to_hbm [thread:$0]  %s14260_s30, 32, %s17731_s9, [#allocation4], %s17176_s20, %s17176_s20, %s17195_s16  }
 0xaad   :  { %17172 = dma.done.wait [#allocation4], 128  }
 0xaae   :  { %17173 = vsyncadd [#allocation4], 4294967168 }
 0xaaf   :  { %14269 = vsyncpa [#allocation3], 1 }
 0xab0   :  { %14270 = vsyncpa [#allocation6], 1 }
 0xab1   :  { %14271 = vsyncpa [#allocation9], 1 }
 0xab2   :  { %14272 = vsyncpa [#allocation12], 1 }
 0xab3   :  { %14273 = vsyncpa [#allocation15], 1 }
 0xab4   :  { %14274 = vsyncpa [#allocation4], 1 }

</bundles_post_ra>
